<compile_context>
chip_gen: v5e
topology: v5e:2x2
jax: 0.10.0
libtpu: 0.0.40
codegen_flags: <defaults>
</compile_context>

<pallas_src>
import jax
import jax.numpy as jnp
from jax import lax
from jax.experimental import pallas as pl
from jax.experimental.pallas import tpu as pltpu


def basic_block_kernel(x_ref, w1_ref, s1_ref, b1_ref, w2_ref, s2_ref, b2_ref,
                       out_ref, pad_ref):
    """One grid step = one batch element.

    x_ref   : (1, H, W, C)       unpadded input (NHWC); also the residual
    w1_ref  : (3, 3*C, C)        conv1 weights, kw folded into the K dim
    w2_ref  : (3, 3*C, C)        conv2 weights, kw folded into the K dim
    s*_ref  : (1, C)             folded BN scale
    b*_ref  : (1, C)             folded BN bias
    out_ref : (1, H, W, C)
    pad_ref : (H+2, W+2, C)      VMEM scratch holding the zero-padded feature
                                 map feeding each conv (interior rewritten per
                                 conv; halo re-zeroed cheaply per step).
    """
    H = out_ref.shape[1]
    W = out_ref.shape[2]
    C = out_ref.shape[3]

    x = x_ref[0]                                   # (H, W, C); residual too

    # ---- zero only the 1-wide halo of the scratch (interior is fully ----
    # ---- overwritten below).  O(H+W) stores instead of an O(H*W) memset. ----
    zrow = jnp.zeros((1, W + 2, C), jnp.float32)
    pad_ref[0:1, :, :] = zrow
    pad_ref[H + 1:H + 2, :, :] = zrow
    zcol = jnp.zeros((H, 1, C), jnp.float32)
    pad_ref[1:1 + H, 0:1, :] = zcol
    pad_ref[1:1 + H, W + 1:W + 2, :] = zcol

    def conv3x3(w_ref):
        """3x3 conv over pad_ref; kw taps folded into the MXU contraction."""
        acc = None
        for kh in range(3):
            rows = pad_ref[kh:kh + H, :, :]                       # (H, W+2, C)
            patch = jnp.concatenate(
                [rows[:, 0:W, :], rows[:, 1:W + 1, :], rows[:, 2:W + 2, :]],
                axis=-1).reshape(H * W, 3 * C)                    # (H*W, 3C)
            t = jnp.dot(patch, w_ref[kh],
                        preferred_element_type=jnp.float32)       # (H*W, C)
            acc = t if acc is None else acc + t                   # 1st tap inits
        return acc

    # ---- conv1 -> bn1 -> relu ----
    pad_ref[1:1 + H, 1:1 + W, :] = x
    y1 = jnp.maximum(conv3x3(w1_ref) * s1_ref[0] + b1_ref[0], 0.0)

    # ---- conv2 -> bn2 ----
    pad_ref[1:1 + H, 1:1 + W, :] = y1.reshape(H, W, C)
    y2 = conv3x3(w2_ref) * s2_ref[0] + b2_ref[0]

    # ---- residual add + relu (residual comes straight from x_ref) ----
    out = jnp.maximum(y2 + x.reshape(H * W, C), 0.0)
    out_ref[...] = out.reshape(1, H, W, C)


def fold_bn(gamma, beta, running_mean, running_var, eps=1e-5):
    scale = gamma / jnp.sqrt(running_var + eps)
    bias = beta - running_mean * scale
    return scale.reshape(1, -1), bias.reshape(1, -1)


@jax.jit
def basic_block_forward(x_nchw, w1, bn1_params, w2, bn2_params):
    """x_nchw: (N, C, H, W) float32.  w1/w2: (Cout, Cin, 3, 3) PyTorch OIHW."""
    N, Cin, H, W = x_nchw.shape
    Cout = w1.shape[0]
    assert Cin == Cout, "identity residual requires inplanes == planes"

    # Layout plumbing stays in plain JAX:
    #   NCHW -> NHWC; OIHW -> HWIO, then fold kw into the contraction dim so
    #   each per-kh weight slab is (3*Cin, Cout).
    x = jnp.transpose(x_nchw, (0, 2, 3, 1))                       # (N, H, W, C)
    w1_p = jnp.transpose(w1, (2, 3, 1, 0)).reshape(3, 3 * Cin, Cout)
    w2_p = jnp.transpose(w2, (2, 3, 1, 0)).reshape(3, 3 * Cout, Cout)

    s1, b1 = fold_bn(*bn1_params)
    s2, b2 = fold_bn(*bn2_params)

    out_nhwc = pl.pallas_call(
        basic_block_kernel,
        out_shape=jax.ShapeDtypeStruct((N, H, W, Cout), jnp.float32),
        grid_spec=pltpu.PrefetchScalarGridSpec(
            num_scalar_prefetch=0,
            grid=(N,),
            in_specs=[
                pl.BlockSpec((1, H, W, Cin), lambda n: (n, 0, 0, 0)),
                # constant index_maps: weights / BN params are not re-DMA'd
                # across grid steps by the Pallas pipeline.
                pl.BlockSpec((3, 3 * Cin, Cout), lambda n: (0, 0, 0)),
                pl.BlockSpec((1, Cout), lambda n: (0, 0)),
                pl.BlockSpec((1, Cout), lambda n: (0, 0)),
                pl.BlockSpec((3, 3 * Cout, Cout), lambda n: (0, 0, 0)),
                pl.BlockSpec((1, Cout), lambda n: (0, 0)),
                pl.BlockSpec((1, Cout), lambda n: (0, 0)),
            ],
            out_specs=pl.BlockSpec((1, H, W, Cout), lambda n: (n, 0, 0, 0)),
            scratch_shapes=[pltpu.VMEM((H + 2, W + 2, Cout), jnp.float32)],
        ),
        compiler_params=pltpu.CompilerParams(
            dimension_semantics=("parallel",)),
    )(x, w1_p, s1, b1, w2_p, s2, b2)

    return jnp.transpose(out_nhwc, (0, 3, 1, 2))                  # back to NCHW


def reference_forward(x, w1, bn1_params, w2, bn2_params):
    """Pure-JAX NCHW reference (eval-mode BN) for verification."""
    def conv3x3_ref(inp, w):
        return lax.conv_general_dilated(
            inp, w, window_strides=(1, 1), padding=((1, 1), (1, 1)),
            dimension_numbers=("NCHW", "OIHW", "NCHW"),
            precision=lax.Precision.HIGHEST)

    def bn(inp, params, eps=1e-5):
        g, b, m, v = params
        g = g.reshape(1, -1, 1, 1); b = b.reshape(1, -1, 1, 1)
        m = m.reshape(1, -1, 1, 1); v = v.reshape(1, -1, 1, 1)
        return (inp - m) / jnp.sqrt(v + eps) * g + b

    out = jax.nn.relu(bn(conv3x3_ref(x, w1), bn1_params))
    out = bn(conv3x3_ref(out, w2), bn2_params)
    return jax.nn.relu(out + x)


if __name__ == "__main__":
    # Shapes consistent with BasicBlock(inplanes=128, planes=128, stride=1):
    # C=128 keeps the lane axis dense (unmasked stores, full MXU N/K) while
    # the overall problem stays small (2 x 128 x 16 x 16).
    N, C, H, W = 2, 128, 16, 16
    key = jax.random.PRNGKey(0)
    k = jax.random.split(key, 10)

    x = jax.random.normal(k[0], (N, C, H, W), jnp.float32)

    # conv weights (PyTorch OIHW, bias=False)
    w1 = jax.random.normal(k[1], (C, C, 3, 3), jnp.float32) * 0.1
    w2 = jax.random.normal(k[2], (C, C, 3, 3), jnp.float32) * 0.1

    # BatchNorm parameters (eval-mode running stats), deterministic.
    bn1_params = (jax.random.uniform(k[3], (C,), jnp.float32, 0.5, 1.5),  # gamma
                  jax.random.normal(k[4], (C,), jnp.float32) * 0.1,       # beta
                  jax.random.normal(k[5], (C,), jnp.float32) * 0.1,       # mean
                  jax.random.uniform(k[6], (C,), jnp.float32, 0.5, 1.5))  # var
    bn2_params = (jax.random.uniform(k[7], (C,), jnp.float32, 0.5, 1.5),
                  jax.random.normal(k[8], (C,), jnp.float32) * 0.1,
                  jax.random.normal(k[9], (C,), jnp.float32) * 0.1,
                  jnp.ones((C,), jnp.float32))

    out = basic_block_forward(x, w1, bn1_params, w2, bn2_params)
    out = jax.block_until_ready(out)

    ref = reference_forward(x, w1, bn1_params, w2, bn2_params)
    assert out.shape == (N, C, H, W)
    assert jnp.allclose(out, ref, atol=1e-3, rtol=1e-3), \
        f"max abs err {jnp.max(jnp.abs(out - ref))}"

    print("KERNEL_OK")
</pallas_src>

<mosaic_0001>
module attributes {stable_mosaic.version = 11 : i64} {
  func.func @basic_block_kernel(%arg0: i32, %arg1: memref<1x16x16x128xf32, #tpu.memory_space<vmem>>, %arg2: memref<3x384x128xf32, #tpu.memory_space<vmem>>, %arg3: memref<1x128xf32, #tpu.memory_space<vmem>>, %arg4: memref<1x128xf32, #tpu.memory_space<vmem>>, %arg5: memref<3x384x128xf32, #tpu.memory_space<vmem>>, %arg6: memref<1x128xf32, #tpu.memory_space<vmem>>, %arg7: memref<1x128xf32, #tpu.memory_space<vmem>>, %arg8: memref<1x16x16x128xf32, #tpu.memory_space<vmem>>, %arg9: memref<18x18x128xf32, #tpu.memory_space<vmem>>) attributes {dimension_semantics = [#tpu.dimension_semantics<parallel>], iteration_bounds = array<i64: 2>, scalar_prefetch = 0 : i64, scratch_operands = 1 : i64, tpu.core_type = #tpu.core_type<tc>, window_params = [{transform_indices = @transform_0, window_bounds = array<i64: 1, 16, 16, 128>}, {pipeline_mode = #tpu.pipeline_mode<synchronous>, transform_indices = @transform_1, window_bounds = array<i64: 3, 384, 128>}, {pipeline_mode = #tpu.pipeline_mode<synchronous>, transform_indices = @transform_2, window_bounds = array<i64: 1, 128>}, {pipeline_mode = #tpu.pipeline_mode<synchronous>, transform_indices = @transform_3, window_bounds = array<i64: 1, 128>}, {pipeline_mode = #tpu.pipeline_mode<synchronous>, transform_indices = @transform_4, window_bounds = array<i64: 3, 384, 128>}, {pipeline_mode = #tpu.pipeline_mode<synchronous>, transform_indices = @transform_5, window_bounds = array<i64: 1, 128>}, {pipeline_mode = #tpu.pipeline_mode<synchronous>, transform_indices = @transform_6, window_bounds = array<i64: 1, 128>}, {transform_indices = @transform_7, window_bounds = array<i64: 1, 16, 16, 128>}]} {
    %c0 = arith.constant 0 : index
    %c0_0 = arith.constant 0 : index
    %c0_1 = arith.constant 0 : index
    %c0_2 = arith.constant 0 : index
    %0 = vector.load %arg1[%c0, %c0_0, %c0_1, %c0_2] : memref<1x16x16x128xf32, #tpu.memory_space<vmem>>, vector<1x16x16x128xf32>
    %1 = vector.shape_cast %0 : vector<1x16x16x128xf32> to vector<16x16x128xf32>
    %cst = arith.constant 0.000000e+00 : f32
    %2 = vector.broadcast %cst : f32 to vector<1x18x128xf32>
    %c0_3 = arith.constant 0 : index
    %c0_4 = arith.constant 0 : index
    %c0_5 = arith.constant 0 : index
    %3 = vector.load %arg9[%c0_3, %c0_4, %c0_5] : memref<18x18x128xf32, #tpu.memory_space<vmem>>, vector<1x18x128xf32>
    tpu.vector_store %arg9[%c0_3, %c0_4, %c0_5], %2 {strides = array<i32>} : memref<18x18x128xf32, #tpu.memory_space<vmem>>, vector<1x18x128xf32>,
    %c17 = arith.constant 17 : index
    %c0_6 = arith.constant 0 : index
    %c0_7 = arith.constant 0 : index
    %4 = vector.load %arg9[%c17, %c0_6, %c0_7] : memref<18x18x128xf32, #tpu.memory_space<vmem>>, vector<1x18x128xf32>
    tpu.vector_store %arg9[%c17, %c0_6, %c0_7], %2 {strides = array<i32>} : memref<18x18x128xf32, #tpu.memory_space<vmem>>, vector<1x18x128xf32>,
    %cst_8 = arith.constant 0.000000e+00 : f32
    %5 = vector.broadcast %cst_8 : f32 to vector<16x1x128xf32>
    %c1 = arith.constant 1 : index
    %c0_9 = arith.constant 0 : index
    %c0_10 = arith.constant 0 : index
    %6 = vector.load %arg9[%c1, %c0_9, %c0_10] : memref<18x18x128xf32, #tpu.memory_space<vmem>>, vector<16x1x128xf32>
    tpu.vector_store %arg9[%c1, %c0_9, %c0_10], %5 {strides = array<i32>} : memref<18x18x128xf32, #tpu.memory_space<vmem>>, vector<16x1x128xf32>,
    %c1_11 = arith.constant 1 : index
    %c17_12 = arith.constant 17 : index
    %c0_13 = arith.constant 0 : index
    %7 = vector.load %arg9[%c1_11, %c17_12, %c0_13] : memref<18x18x128xf32, #tpu.memory_space<vmem>>, vector<16x1x128xf32>
    tpu.vector_store %arg9[%c1_11, %c17_12, %c0_13], %5 {strides = array<i32>} : memref<18x18x128xf32, #tpu.memory_space<vmem>>, vector<16x1x128xf32>,
    %c1_14 = arith.constant 1 : index
    %c1_15 = arith.constant 1 : index
    %c0_16 = arith.constant 0 : index
    %8 = vector.load %arg9[%c1_14, %c1_15, %c0_16] : memref<18x18x128xf32, #tpu.memory_space<vmem>>, vector<16x16x128xf32>
    tpu.vector_store %arg9[%c1_14, %c1_15, %c0_16], %1 {strides = array<i32>} : memref<18x18x128xf32, #tpu.memory_space<vmem>>, vector<16x16x128xf32>,
    %c0_17 = arith.constant 0 : index
    %c0_18 = arith.constant 0 : index
    %c0_19 = arith.constant 0 : index
    %9 = vector.load %arg9[%c0_17, %c0_18, %c0_19] : memref<18x18x128xf32, #tpu.memory_space<vmem>>, vector<16x18x128xf32>
    %10 = vector.extract_strided_slice %9 {offsets = [0, 0, 0], sizes = [16, 16, 128], strides = [1, 1, 1]} : vector<16x18x128xf32> to vector<16x16x128xf32>
    %11 = vector.extract_strided_slice %9 {offsets = [0, 1, 0], sizes = [16, 16, 128], strides = [1, 1, 1]} : vector<16x18x128xf32> to vector<16x16x128xf32>
    %12 = vector.extract_strided_slice %9 {offsets = [0, 2, 0], sizes = [16, 16, 128], strides = [1, 1, 1]} : vector<16x18x128xf32> to vector<16x16x128xf32>
    %13 = tpu.concatenate %10, %11, %12 in 2 : vector<16x16x128xf32>, vector<16x16x128xf32>, vector<16x16x128xf32> -> vector<16x16x384xf32>
    %14 = vector.shape_cast %13 : vector<16x16x384xf32> to vector<256x384xf32>
    %c0_20 = arith.constant 0 : index
    %c0_21 = arith.constant 0 : index
    %c0_22 = arith.constant 0 : index
    %15 = vector.load %arg2[%c0_20, %c0_21, %c0_22] : memref<3x384x128xf32, #tpu.memory_space<vmem>>, vector<1x384x128xf32>
    %16 = vector.shape_cast %15 : vector<1x384x128xf32> to vector<384x128xf32>
    %cst_23 = arith.constant dense<0.000000e+00> : vector<256x128xf32>
    %17 = tpu.matmul %14, %16, %cst_23 {dimension_numbers = #tpu.dot_dimension_numbers<[1], [0], [0], [1], [0, 0, 1, 1], [], []>} : vector<256x384xf32>, vector<384x128xf32>, vector<256x128xf32> -> vector<256x128xf32>
    %c1_24 = arith.constant 1 : index
    %c0_25 = arith.constant 0 : index
    %c0_26 = arith.constant 0 : index
    %18 = vector.load %arg9[%c1_24, %c0_25, %c0_26] : memref<18x18x128xf32, #tpu.memory_space<vmem>>, vector<16x18x128xf32>
    %19 = vector.extract_strided_slice %18 {offsets = [0, 0, 0], sizes = [16, 16, 128], strides = [1, 1, 1]} : vector<16x18x128xf32> to vector<16x16x128xf32>
    %20 = vector.extract_strided_slice %18 {offsets = [0, 1, 0], sizes = [16, 16, 128], strides = [1, 1, 1]} : vector<16x18x128xf32> to vector<16x16x128xf32>
    %21 = vector.extract_strided_slice %18 {offsets = [0, 2, 0], sizes = [16, 16, 128], strides = [1, 1, 1]} : vector<16x18x128xf32> to vector<16x16x128xf32>
    %22 = tpu.concatenate %19, %20, %21 in 2 : vector<16x16x128xf32>, vector<16x16x128xf32>, vector<16x16x128xf32> -> vector<16x16x384xf32>
    %23 = vector.shape_cast %22 : vector<16x16x384xf32> to vector<256x384xf32>
    %c1_27 = arith.constant 1 : index
    %c0_28 = arith.constant 0 : index
    %c0_29 = arith.constant 0 : index
    %24 = vector.load %arg2[%c1_27, %c0_28, %c0_29] : memref<3x384x128xf32, #tpu.memory_space<vmem>>, vector<1x384x128xf32>
    %25 = vector.shape_cast %24 : vector<1x384x128xf32> to vector<384x128xf32>
    %cst_30 = arith.constant dense<0.000000e+00> : vector<256x128xf32>
    %26 = tpu.matmul %23, %25, %cst_30 {dimension_numbers = #tpu.dot_dimension_numbers<[1], [0], [0], [1], [0, 0, 1, 1], [], []>} : vector<256x384xf32>, vector<384x128xf32>, vector<256x128xf32> -> vector<256x128xf32>
    %27 = arith.addf %17, %26 : vector<256x128xf32>
    %c2 = arith.constant 2 : index
    %c0_31 = arith.constant 0 : index
    %c0_32 = arith.constant 0 : index
    %28 = vector.load %arg9[%c2, %c0_31, %c0_32] : memref<18x18x128xf32, #tpu.memory_space<vmem>>, vector<16x18x128xf32>
    %29 = vector.extract_strided_slice %28 {offsets = [0, 0, 0], sizes = [16, 16, 128], strides = [1, 1, 1]} : vector<16x18x128xf32> to vector<16x16x128xf32>
    %30 = vector.extract_strided_slice %28 {offsets = [0, 1, 0], sizes = [16, 16, 128], strides = [1, 1, 1]} : vector<16x18x128xf32> to vector<16x16x128xf32>
    %31 = vector.extract_strided_slice %28 {offsets = [0, 2, 0], sizes = [16, 16, 128], strides = [1, 1, 1]} : vector<16x18x128xf32> to vector<16x16x128xf32>
    %32 = tpu.concatenate %29, %30, %31 in 2 : vector<16x16x128xf32>, vector<16x16x128xf32>, vector<16x16x128xf32> -> vector<16x16x384xf32>
    %33 = vector.shape_cast %32 : vector<16x16x384xf32> to vector<256x384xf32>
    %c2_33 = arith.constant 2 : index
    %c0_34 = arith.constant 0 : index
    %c0_35 = arith.constant 0 : index
    %34 = vector.load %arg2[%c2_33, %c0_34, %c0_35] : memref<3x384x128xf32, #tpu.memory_space<vmem>>, vector<1x384x128xf32>
    %35 = vector.shape_cast %34 : vector<1x384x128xf32> to vector<384x128xf32>
    %cst_36 = arith.constant dense<0.000000e+00> : vector<256x128xf32>
    %36 = tpu.matmul %33, %35, %cst_36 {dimension_numbers = #tpu.dot_dimension_numbers<[1], [0], [0], [1], [0, 0, 1, 1], [], []>} : vector<256x384xf32>, vector<384x128xf32>, vector<256x128xf32> -> vector<256x128xf32>
    %37 = arith.addf %27, %36 : vector<256x128xf32>
    %c0_37 = arith.constant 0 : index
    %c0_38 = arith.constant 0 : index
    %38 = vector.load %arg3[%c0_37, %c0_38] : memref<1x128xf32, #tpu.memory_space<vmem>>, vector<1x128xf32>
    %39 = vector.shape_cast %38 : vector<1x128xf32> to vector<128xf32>
    %40 = vector.shape_cast %39 : vector<128xf32> to vector<1x128xf32>
    %41 = vector.broadcast %40 : vector<1x128xf32> to vector<256x128xf32>
    %42 = arith.mulf %37, %41 : vector<256x128xf32>
    %c0_39 = arith.constant 0 : index
    %c0_40 = arith.constant 0 : index
    %43 = vector.load %arg4[%c0_39, %c0_40] : memref<1x128xf32, #tpu.memory_space<vmem>>, vector<1x128xf32>
    %44 = vector.shape_cast %43 : vector<1x128xf32> to vector<128xf32>
    %45 = vector.shape_cast %44 : vector<128xf32> to vector<1x128xf32>
    %46 = vector.broadcast %45 : vector<1x128xf32> to vector<256x128xf32>
    %47 = arith.addf %42, %46 : vector<256x128xf32>
    %cst_41 = arith.constant 0.000000e+00 : f32
    %48 = vector.broadcast %cst_41 : f32 to vector<256x128xf32>
    %49 = arith.maximumf %47, %48 : vector<256x128xf32>
    %50 = vector.shape_cast %49 : vector<256x128xf32> to vector<16x16x128xf32>
    %c1_42 = arith.constant 1 : index
    %c1_43 = arith.constant 1 : index
    %c0_44 = arith.constant 0 : index
    %51 = vector.load %arg9[%c1_42, %c1_43, %c0_44] : memref<18x18x128xf32, #tpu.memory_space<vmem>>, vector<16x16x128xf32>
    tpu.vector_store %arg9[%c1_42, %c1_43, %c0_44], %50 {strides = array<i32>} : memref<18x18x128xf32, #tpu.memory_space<vmem>>, vector<16x16x128xf32>,
    %c0_45 = arith.constant 0 : index
    %c0_46 = arith.constant 0 : index
    %c0_47 = arith.constant 0 : index
    %52 = vector.load %arg9[%c0_45, %c0_46, %c0_47] : memref<18x18x128xf32, #tpu.memory_space<vmem>>, vector<16x18x128xf32>
    %53 = vector.extract_strided_slice %52 {offsets = [0, 0, 0], sizes = [16, 16, 128], strides = [1, 1, 1]} : vector<16x18x128xf32> to vector<16x16x128xf32>
    %54 = vector.extract_strided_slice %52 {offsets = [0, 1, 0], sizes = [16, 16, 128], strides = [1, 1, 1]} : vector<16x18x128xf32> to vector<16x16x128xf32>
    %55 = vector.extract_strided_slice %52 {offsets = [0, 2, 0], sizes = [16, 16, 128], strides = [1, 1, 1]} : vector<16x18x128xf32> to vector<16x16x128xf32>
    %56 = tpu.concatenate %53, %54, %55 in 2 : vector<16x16x128xf32>, vector<16x16x128xf32>, vector<16x16x128xf32> -> vector<16x16x384xf32>
    %57 = vector.shape_cast %56 : vector<16x16x384xf32> to vector<256x384xf32>
    %c0_48 = arith.constant 0 : index
    %c0_49 = arith.constant 0 : index
    %c0_50 = arith.constant 0 : index
    %58 = vector.load %arg5[%c0_48, %c0_49, %c0_50] : memref<3x384x128xf32, #tpu.memory_space<vmem>>, vector<1x384x128xf32>
    %59 = vector.shape_cast %58 : vector<1x384x128xf32> to vector<384x128xf32>
    %cst_51 = arith.constant dense<0.000000e+00> : vector<256x128xf32>
    %60 = tpu.matmul %57, %59, %cst_51 {dimension_numbers = #tpu.dot_dimension_numbers<[1], [0], [0], [1], [0, 0, 1, 1], [], []>} : vector<256x384xf32>, vector<384x128xf32>, vector<256x128xf32> -> vector<256x128xf32>
    %c1_52 = arith.constant 1 : index
    %c0_53 = arith.constant 0 : index
    %c0_54 = arith.constant 0 : index
    %61 = vector.load %arg9[%c1_52, %c0_53, %c0_54] : memref<18x18x128xf32, #tpu.memory_space<vmem>>, vector<16x18x128xf32>
    %62 = vector.extract_strided_slice %61 {offsets = [0, 0, 0], sizes = [16, 16, 128], strides = [1, 1, 1]} : vector<16x18x128xf32> to vector<16x16x128xf32>
    %63 = vector.extract_strided_slice %61 {offsets = [0, 1, 0], sizes = [16, 16, 128], strides = [1, 1, 1]} : vector<16x18x128xf32> to vector<16x16x128xf32>
    %64 = vector.extract_strided_slice %61 {offsets = [0, 2, 0], sizes = [16, 16, 128], strides = [1, 1, 1]} : vector<16x18x128xf32> to vector<16x16x128xf32>
    %65 = tpu.concatenate %62, %63, %64 in 2 : vector<16x16x128xf32>, vector<16x16x128xf32>, vector<16x16x128xf32> -> vector<16x16x384xf32>
    %66 = vector.shape_cast %65 : vector<16x16x384xf32> to vector<256x384xf32>
    %c1_55 = arith.constant 1 : index
    %c0_56 = arith.constant 0 : index
    %c0_57 = arith.constant 0 : index
    %67 = vector.load %arg5[%c1_55, %c0_56, %c0_57] : memref<3x384x128xf32, #tpu.memory_space<vmem>>, vector<1x384x128xf32>
    %68 = vector.shape_cast %67 : vector<1x384x128xf32> to vector<384x128xf32>
    %cst_58 = arith.constant dense<0.000000e+00> : vector<256x128xf32>
    %69 = tpu.matmul %66, %68, %cst_58 {dimension_numbers = #tpu.dot_dimension_numbers<[1], [0], [0], [1], [0, 0, 1, 1], [], []>} : vector<256x384xf32>, vector<384x128xf32>, vector<256x128xf32> -> vector<256x128xf32>
    %70 = arith.addf %60, %69 : vector<256x128xf32>
    %c2_59 = arith.constant 2 : index
    %c0_60 = arith.constant 0 : index
    %c0_61 = arith.constant 0 : index
    %71 = vector.load %arg9[%c2_59, %c0_60, %c0_61] : memref<18x18x128xf32, #tpu.memory_space<vmem>>, vector<16x18x128xf32>
    %72 = vector.extract_strided_slice %71 {offsets = [0, 0, 0], sizes = [16, 16, 128], strides = [1, 1, 1]} : vector<16x18x128xf32> to vector<16x16x128xf32>
    %73 = vector.extract_strided_slice %71 {offsets = [0, 1, 0], sizes = [16, 16, 128], strides = [1, 1, 1]} : vector<16x18x128xf32> to vector<16x16x128xf32>
    %74 = vector.extract_strided_slice %71 {offsets = [0, 2, 0], sizes = [16, 16, 128], strides = [1, 1, 1]} : vector<16x18x128xf32> to vector<16x16x128xf32>
    %75 = tpu.concatenate %72, %73, %74 in 2 : vector<16x16x128xf32>, vector<16x16x128xf32>, vector<16x16x128xf32> -> vector<16x16x384xf32>
    %76 = vector.shape_cast %75 : vector<16x16x384xf32> to vector<256x384xf32>
    %c2_62 = arith.constant 2 : index
    %c0_63 = arith.constant 0 : index
    %c0_64 = arith.constant 0 : index
    %77 = vector.load %arg5[%c2_62, %c0_63, %c0_64] : memref<3x384x128xf32, #tpu.memory_space<vmem>>, vector<1x384x128xf32>
    %78 = vector.shape_cast %77 : vector<1x384x128xf32> to vector<384x128xf32>
    %cst_65 = arith.constant dense<0.000000e+00> : vector<256x128xf32>
    %79 = tpu.matmul %76, %78, %cst_65 {dimension_numbers = #tpu.dot_dimension_numbers<[1], [0], [0], [1], [0, 0, 1, 1], [], []>} : vector<256x384xf32>, vector<384x128xf32>, vector<256x128xf32> -> vector<256x128xf32>
    %80 = arith.addf %70, %79 : vector<256x128xf32>
    %c0_66 = arith.constant 0 : index
    %c0_67 = arith.constant 0 : index
    %81 = vector.load %arg6[%c0_66, %c0_67] : memref<1x128xf32, #tpu.memory_space<vmem>>, vector<1x128xf32>
    %82 = vector.shape_cast %81 : vector<1x128xf32> to vector<128xf32>
    %83 = vector.shape_cast %82 : vector<128xf32> to vector<1x128xf32>
    %84 = vector.broadcast %83 : vector<1x128xf32> to vector<256x128xf32>
    %85 = arith.mulf %80, %84 : vector<256x128xf32>
    %c0_68 = arith.constant 0 : index
    %c0_69 = arith.constant 0 : index
    %86 = vector.load %arg7[%c0_68, %c0_69] : memref<1x128xf32, #tpu.memory_space<vmem>>, vector<1x128xf32>
    %87 = vector.shape_cast %86 : vector<1x128xf32> to vector<128xf32>
    %88 = vector.shape_cast %87 : vector<128xf32> to vector<1x128xf32>
    %89 = vector.broadcast %88 : vector<1x128xf32> to vector<256x128xf32>
    %90 = arith.addf %85, %89 : vector<256x128xf32>
    %91 = vector.shape_cast %1 : vector<16x16x128xf32> to vector<256x128xf32>
    %92 = arith.addf %90, %91 : vector<256x128xf32>
    %cst_70 = arith.constant 0.000000e+00 : f32
    %93 = vector.broadcast %cst_70 : f32 to vector<256x128xf32>
    %94 = arith.maximumf %92, %93 : vector<256x128xf32>
    %95 = vector.shape_cast %94 : vector<256x128xf32> to vector<1x16x16x128xf32>
    %c0_71 = arith.constant 0 : index
    %c0_72 = arith.constant 0 : index
    %c0_73 = arith.constant 0 : index
    %c0_74 = arith.constant 0 : index
    %96 = vector.load %arg8[%c0_71, %c0_72, %c0_73, %c0_74] : memref<1x16x16x128xf32, #tpu.memory_space<vmem>>, vector<1x16x16x128xf32>
    tpu.vector_store %arg8[%c0_71, %c0_72, %c0_73, %c0_74], %95 {strides = array<i32>} : memref<1x16x16x128xf32, #tpu.memory_space<vmem>>, vector<1x16x16x128xf32>,
    return
  }
  func.func @transform_0(%arg0: i32) -> (i32, i32, i32, i32) {
    %c0_i32 = arith.constant 0 : i32
    %c0_i32_0 = arith.constant 0 : i32
    %c0_i32_1 = arith.constant 0 : i32
    %c0_i32_2 = arith.constant 0 : i32
    return %arg0, %c0_i32, %c0_i32_0, %c0_i32_1 : i32, i32, i32, i32
  }
  func.func @transform_1(%arg0: i32) -> (i32, i32, i32) {
    %c0_i32 = arith.constant 0 : i32
    %c0_i32_0 = arith.constant 0 : i32
    %c0_i32_1 = arith.constant 0 : i32
    %c0_i32_2 = arith.constant 0 : i32
    return %c0_i32, %c0_i32_0, %c0_i32_1 : i32, i32, i32
  }
  func.func @transform_2(%arg0: i32) -> (i32, i32) {
    %c0_i32 = arith.constant 0 : i32
    %c0_i32_0 = arith.constant 0 : i32
    %c0_i32_1 = arith.constant 0 : i32
    return %c0_i32, %c0_i32_0 : i32, i32
  }
  func.func @transform_3(%arg0: i32) -> (i32, i32) {
    %c0_i32 = arith.constant 0 : i32
    %c0_i32_0 = arith.constant 0 : i32
    %c0_i32_1 = arith.constant 0 : i32
    return %c0_i32, %c0_i32_0 : i32, i32
  }
  func.func @transform_4(%arg0: i32) -> (i32, i32, i32) {
    %c0_i32 = arith.constant 0 : i32
    %c0_i32_0 = arith.constant 0 : i32
    %c0_i32_1 = arith.constant 0 : i32
    %c0_i32_2 = arith.constant 0 : i32
    return %c0_i32, %c0_i32_0, %c0_i32_1 : i32, i32, i32
  }
  func.func @transform_5(%arg0: i32) -> (i32, i32) {
    %c0_i32 = arith.constant 0 : i32
    %c0_i32_0 = arith.constant 0 : i32
    %c0_i32_1 = arith.constant 0 : i32
    return %c0_i32, %c0_i32_0 : i32, i32
  }
  func.func @transform_6(%arg0: i32) -> (i32, i32) {
    %c0_i32 = arith.constant 0 : i32
    %c0_i32_0 = arith.constant 0 : i32
    %c0_i32_1 = arith.constant 0 : i32
    return %c0_i32, %c0_i32_0 : i32, i32
  }
  func.func @transform_7(%arg0: i32) -> (i32, i32, i32, i32) {
    %c0_i32 = arith.constant 0 : i32
    %c0_i32_0 = arith.constant 0 : i32
    %c0_i32_1 = arith.constant 0 : i32
    %c0_i32_2 = arith.constant 0 : i32
    return %arg0, %c0_i32, %c0_i32_0, %c0_i32_1 : i32, i32, i32, i32
  }
}

</mosaic_0001>

<bundles_post_ra>
// kernel: basic_block_forward.1
= control target key start
LH: loop header
LB: loop body
LE: loop exit
PB: predicated region body
PF: predicated region fallthrough
CT: control target
= control target key end

     0   :  { %12 = vsyncpa [#allocation4], 0  ;;  %s9147_s0 = inlined_call_operand.vmem [shape: f32[2,16,16,128], index: 0, kind: input, shape index: {}]   ;;  %s9148_s1 = inlined_call_operand.vmem [shape: f32[3,384,128], index: 1, kind: input, shape index: {}]   ;;  %s9149_s2 = inlined_call_operand.vmem [shape: f32[1,128], index: 2, kind: input, shape index: {}]   ;;  %s9150_s3 = inlined_call_operand.vmem [shape: f32[1,128], index: 3, kind: input, shape index: {}]   ;;  %s9151_s4 = inlined_call_operand.vmem [shape: f32[3,384,128], index: 4, kind: input, shape index: {}]   ;;  %s9152_s5 = inlined_call_operand.vmem [shape: f32[1,128], index: 5, kind: input, shape index: {}]   ;;  %s9153_s6 = inlined_call_operand.vmem [shape: f32[1,128], index: 6, kind: input, shape index: {}]   ;;  %s9154_s7 = inlined_call_operand.hbm [shape: f32[2,16,16,128], index: 7, kind: output, shape index: {}]  }
   0x1   :  { %14 = vsyncpa [#allocation4 + $0x1], 0  ;;  %s5511_s24 = smov 0   ;;  %s5513_s25 = smov 0  }
   0x2   :  { %s5515_s26 = smov 0   ;;  %s5517_s27 = smov 0  }
   0x3 LB: > { %s5532_s28 = sadd.s32 4294967295, %s5466_s27   ;;  %s5076_s29 = sadd.s32 4294967294, %s5466_s27   ;;  %s5466_s27 = sphi %s5517_s27, %s9519_s27   ;;  %s5462_s26 = sphi %s5515_s26, %s9518_s26   ;;  %s5458_s25 = sphi %s5513_s25, %s9517_s25   ;;  %s5454_s24 = sphi %s5511_s24, %s9516_s24  }
   0x4   : > { %s5536_s30 = sadd.s32 1, %s5466_s27   ;;  %s179_s8 = sadd.s32 1, %s5462_s26 }
   0x5   : > { %s176_s9 = ssub.s32 %s5466_s27, %s5536_s30  ;;  %p189_p0 = scmp.ne.s32.totalorder %s5462_s26, %s5458_s25 }
   0x6   : > { %p177_p1 = scmp.eq.s32.totalorder %s176_s9, 0  ;;  %p190_p2 = scmp.eq.s32.totalorder %s5532_s28, 1 }
   0x7   : > { %p195_p3 = scmp.ne.s32.totalorder %s5458_s25, %s5454_s24  ;;  %p196_p4 = scmp.eq.s32.totalorder %s5076_s29, 1 }
   0x8   : > { %s5547_s10 = scalar_select %p177_p1, %s5462_s26, %s179_s8  }
   0x9   : > { %p5549_p5 = por %p190_p2, %p189_p0  ;;  %p5553_p6 = por %p196_p4, %p195_p3 }
   0xa   : > { %p5079_p7 = scmp.ge.s32.totalorder %s5466_s27, 1  ;;  %p240_p8 = scmp.lt.s32.totalorder %s5466_s27, 3 }
   0xc   : > { %p241_p9 = pnand %p5079_p7, %p240_p8 }
   0xe   : > { %244 = sbr.rel (%p241_p9) target bundleno = 1512 (0x5e8), region = 48 }
  0x13   : > { %v5098_v0 = vld [vmem:[%s9148_s1 + $0x1f8] sm:$0xff]  ;;  %v5097_v2 = vld [vmem:[%s9148_s1 + $0x1f0] sm:$0xff]  ;;  %p272_p10 = scmp.lt.s32.totalorder %s5532_s28, 1  ;;  %v5468_v4 = vmov 0.0   ;;  %v5096_v5 = vld [vmem:[%s9148_s1 + $0x1e8] sm:$0xff]  ;;  %vm477_vm0 = vcmask 1046528  }
  0x14   : > { %v5114_v1 = vld [vmem:[%s9148_s1 + $0x278] sm:$0xff]  ;;  %1120 = vmatpush.msra.mxu0 %v5098_v0  ;;  %5282 = vmatpush.msra.mxu2 %v5098_v0  ;;  %v5113_v3 = vld [vmem:[%s9148_s1 + $0x270] sm:$0xff]  ;;  %317 = vst [vmem:[#allocation2 + $0x18] sm:$0x1] %v5468_v4  ;;  %v5112_v6 = vld [vmem:[%s9148_s1 + $0x268] sm:$0xff]  ;;  %vm590_vm1 = vcmask 1045504  }
  0x15   : > { %5298 = vmatpush.msra.mxu3 %v5114_v1  ;;  %1233 = vmatpush.msra.mxu1 %v5114_v1  ;;  %s273_s23 = scalar_select %p272_p10, %s5532_s28, 1  ;;  %309 = vst [vmem:[#allocation2] sm:$0xff] %v5468_v4  ;;  %v5095_v7 = vld [vmem:[%s9148_s1 + $0x1e0] sm:$0xff]  ;;  %v5094_v9 = vld [vmem:[%s9148_s1 + $0x1d8] sm:$0xff]  ;;  %v5093_v11 = vld [vmem:[%s9148_s1 + $0x1d0] sm:$0xff] }
  0x16   : > { %1121 = vmatpush.msra.mxu0 %v5097_v2  ;;  %5283 = vmatpush.msra.mxu2 %v5097_v2  ;;  %311 = vst [vmem:[#allocation2 + $0x10] sm:$0x3] %v5468_v4  ;;  %v5111_v8 = vld [vmem:[%s9148_s1 + $0x260] sm:$0xff]  ;;  %v5110_v10 = vld [vmem:[%s9148_s1 + $0x258] sm:$0xff]  ;;  %v5109_v12 = vld [vmem:[%s9148_s1 + $0x250] sm:$0xff]  ;;  %s269_s9 = sand.u32 1, %s5458_s25  }
  0x17   : > { %5299 = vmatpush.msra.mxu3 %v5113_v3  ;;  %1234 = vmatpush.msra.mxu1 %v5113_v3  ;;  %s5280_s18 = sshll.u32 %s273_s23, 8  ;;  %315 = vst [vmem:[#allocation2 + $0x1a8] sm:$0x3] %v5468_v4  ;;  %v5092_v13 = vld [vmem:[%s9148_s1 + $0x1c8] sm:$0xff]  ;;  %v5091_v16 = vld [vmem:[%s9148_s1 + $0x1c0] sm:$0xff]  ;;  %v5090_v18 = vld [vmem:[%s9148_s1 + $0x1b8] sm:$0xff] }
  0x18   : > { %1122 = vmatpush.msra.mxu0 %v5096_v5  ;;  %5284 = vmatpush.msra.mxu2 %v5096_v5  ;;  %318 = vst [vmem:[#allocation2 + $0x30] sm:$0x1] %v5468_v4  ;;  %s5605_s13 = scalar_lea.vmem %s9147_s0, %s5280_s18  ;;  %v5108_v15 = vld [vmem:[%s9148_s1 + $0x248] sm:$0xff]  ;;  %v5107_v17 = vld [vmem:[%s9148_s1 + $0x240] sm:$0xff]  ;;  %v5106_v19 = vld [vmem:[%s9148_s1 + $0x238] sm:$0xff]  ;;  %s5080_s14 = sshll.u32 %s269_s9, 8 }
  0x19   : > { %5300 = vmatpush.msra.mxu3 %v5112_v6  ;;  %1235 = vmatpush.msra.mxu1 %v5112_v6  ;;  %319 = vst [vmem:[#allocation2 + $0x48] sm:$0x1] %v5468_v4  ;;  %v5612_v14 = vld [vmem:[%s5605_s13] sm:$0xff]  ;;  %v5089_v20 = vld [vmem:[%s9148_s1 + $0x1b0] sm:$0xff]  ;;  %v5088_v22 = vld [vmem:[%s9148_s1 + $0x1a8] sm:$0xff]  ;;  %s8807_s15 = scalar_lea.vmem [#allocation3], %s5080_s14 }
  0x1a   : > { %1123 = vmatpush.msra.mxu0 %v5095_v7  ;;  %5285 = vmatpush.msra.mxu2 %v5095_v7  ;;  %9221 = vst [vmem:[#allocation6_spill] sm:$0xff] %v5612_v14  ;;  %v5105_v21 = vld [vmem:[%s9148_s1 + $0x230] sm:$0xff]  ;;  %v5104_v23 = vld [vmem:[%s9148_s1 + $0x228] sm:$0xff]  ;;  %v5087_v24 = vld [vmem:[%s9148_s1 + $0x1a0] sm:$0xff]  ;;  %s5281_s16 = sshll.u32 %s5532_s28, 8  ;;  %s5011_s20 = sshll.u32 %s8807_s15, 4  ;;  %s5012_s20 = int_to_ptr.vmem [resolvable:$true] %s5011_s20 }
  0x1b   : > { %5301 = vmatpush.msra.mxu3 %v5111_v8  ;;  %1236 = vmatpush.msra.mxu1 %v5111_v8  ;;  %320 = vst [vmem:[#allocation2 + $0x60] sm:$0x1] %v5468_v4  ;;  %v5103_v25 = vld [vmem:[%s9148_s1 + $0x220] sm:$0xff]  ;;  %v5086_v26 = vld [vmem:[%s9148_s1 + $0x198] sm:$0xff]  ;;  %v5085_v28 = vld [vmem:[%s9148_s1 + $0x190] sm:$0xff]  ;;  %s5010_s19 = scalar_lea.hbm %s9154_s7, %s5281_s16  ;;  %s4999_s28 = scalar_lea.sflag [#allocation4], %s269_s9 }
  0x1c   : > { %1124 = vmatpush.msra.mxu0 %v5094_v9  ;;  %5286 = vmatpush.msra.mxu2 %v5094_v9  ;;  %349 = vst [vmem:[#allocation2 + $0x19] sm:$0xff] %v5612_v14  ;;  %v5102_v27 = vld [vmem:[%s9148_s1 + $0x218] sm:$0xff]  ;;  %v5101_v29 = vld [vmem:[%s9148_s1 + $0x210] sm:$0xff]  ;;  %v5084_v30 = vld [vmem:[%s9148_s1 + $0x188] sm:$0xff]  ;;  %s5013_s21 = sshll.u32 %s5010_s19, 4  ;;  %s5424_s8 = scalar_lea.hbm %s9154_s7, 512  ;;  %s5014_s21 = int_to_ptr.hbm [resolvable:$true] %s5013_s21 }
  0x1d   : > { %5302 = vmatpush.msra.mxu3 %v5110_v10  ;;  %1237 = vmatpush.msra.mxu1 %v5110_v10  ;;  %321 = vst [vmem:[#allocation2 + $0x78] sm:$0x1] %v5468_v4  ;;  %v5100_v31 = vld [vmem:[%s9148_s1 + $0x208] sm:$0xff]  ;;  %v5083_v32 = vld [vmem:[%s9148_s1 + $0x180] sm:$0xff]  ;;  %v5130_v35 = vld [vmem:[%s9148_s1 + $0x2f8] sm:$0xff]  ;;  %s5418_s22 = sshra.s32 %s5014_s21, 4  ;;  %s5419_s22 = int_to_ptr.hbm [resolvable:$true] %s5418_s22 }
  0x1e   : > { %1125 = vmatpush.msra.mxu0 %v5093_v11  ;;  %5287 = vmatpush.msra.mxu2 %v5093_v11  ;;  %322 = vst [vmem:[#allocation2 + $0x90] sm:$0x1] %v5468_v4  ;;  %v5099_v33 = vld [vmem:[%s9148_s1 + $0x200] sm:$0xff]  ;;  %v718_v36 = vld [vmem:[%s9148_s1 + $0x78] sm:$0xff]  ;;  %v5129_v38 = vld [vmem:[%s9148_s1 + $0x2f0] sm:$0xff]  ;;  %s5420_s29 = scalar_lea.hbm %s5419_s22, 256  ;;  %p5425_p0 = scmp.lt.s32.totalorder %s5419_s22, %s9154_s7 }
  0x1f   : > { %5303 = vmatpush.msra.mxu3 %v5109_v12  ;;  %1238 = vmatpush.msra.mxu1 %v5109_v12  ;;  %323 = vst [vmem:[#allocation2 + $0xa8] sm:$0x1] %v5468_v4  ;;  %v734_v37 = vld [vmem:[%s9148_s1 + $0xf8] sm:$0xff]  ;;  %v717_v39 = vld [vmem:[%s9148_s1 + $0x70] sm:$0xff]  ;;  %v5128_v40 = vld [vmem:[%s9148_s1 + $0x2e8] sm:$0xff]  ;;  %p5421_p11 = scmp.ne.s32.totalorder %s5419_s22, %s5420_s29  ;;  %p5426_p1 = scmp.lt.s32.totalorder %s5424_s8, %s5420_s29 }
  0x20   : > { %1126 = vmatpush.msra.mxu0 %v5092_v13  ;;  %5288 = vmatpush.msra.mxu2 %v5092_v13  ;;  %324 = vst [vmem:[#allocation2 + $0xc0] sm:$0x1] %v5468_v4  ;;  %v716_v41 = vld [vmem:[%s9148_s1 + $0x68] sm:$0xff]  ;;  %v733_v42 = vld [vmem:[%s9148_s1 + $0xf0] sm:$0xff]  ;;  %v5727_v43 = vld [vmem:[%s5605_s13 + $0x80] sm:$0xff] }
  0x21   : > { %5304 = vmatpush.msra.mxu3 %v5108_v15  ;;  %1239 = vmatpush.msra.mxu1 %v5108_v15  ;;  %325 = vst [vmem:[#allocation2 + $0xd8] sm:$0x1] %v5468_v4  ;;  %v5731_v44 = vld [vmem:[%s5605_s13 + $0x88] sm:$0xff]  ;;  %v5739_v46 = vld [vmem:[%s5605_s13 + $0x10] sm:$0xff]  ;;  %v5747_v48 = vld [vmem:[%s5605_s13 + $0x98] sm:$0xff]  ;;  %p5422_p12 = pnand %p5421_p11, %p5549_p5  ;;  %p5427_p2 = por %p5426_p1, %p5425_p0 }
  0x22   : > { %1127 = vmatpush.msra.mxu0 %v5091_v16  ;;  %5289 = vmatpush.msra.mxu2 %v5091_v16  ;;  %326 = vst [vmem:[#allocation2 + $0xf0] sm:$0x1] %v5468_v4  ;;  %v5735_v45 = vld [vmem:[%s5605_s13 + $0x8] sm:$0xff]  ;;  %v5743_v47 = vld [vmem:[%s5605_s13 + $0x90] sm:$0xff]  ;;  %v5751_v49 = vld [vmem:[%s5605_s13 + $0x18] sm:$0xff] }
  0x23   : > { %5305 = vmatpush.msra.mxu3 %v5107_v17  ;;  %1240 = vmatpush.msra.mxu1 %v5107_v17  ;;  %327 = vst [vmem:[#allocation2 + $0x108] sm:$0x1] %v5468_v4  ;;  %v5690_v34 = vld [vmem:[#allocation2 + $0x18] sm:$0xff]  ;;  %v5754_v50 = vld [vmem:[%s5605_s13 + $0x20] sm:$0xff]  ;;  %v732_v53 = vld [vmem:[%s9148_s1 + $0xe8] sm:$0xff]  ;;  %p5423_p13 = pneg %p5422_p12 }
  0x24   : > { %1128 = vmatpush.msra.mxu0 %v5090_v18  ;;  %5290 = vmatpush.msra.mxu2 %v5090_v18  ;;  %328 = vst [vmem:[#allocation2 + $0x120] sm:$0x1] %v5468_v4  ;;  %v5127_v51 = vld [vmem:[%s9148_s1 + $0x2e0] sm:$0xff]  ;;  %v5772_v55 = vld [vmem:[%s5605_s13 + $0xa8] sm:$0xff]  ;;  %v847_v59 = vrot.slane %v5690_v34, 1  ;;  %v714_v6 = vld [vmem:[%s9148_s1 + $0x58] sm:$0xff] }
  0x25   : > { %5306 = vmatpush.msra.mxu3 %v5106_v19  ;;  %1241 = vmatpush.msra.mxu1 %v5106_v19  ;;  %329 = vst [vmem:[#allocation2 + $0x138] sm:$0x1] %v5468_v4  ;;  %v715_v52 = vld [vmem:[%s9148_s1 + $0x60] sm:$0xff]  ;;  %v5778_v60 = vld [vmem:[%s5605_s13 + $0x28] sm:$0xff]  ;;  %v5809_v10 = vld [vmem:[%s5605_s13 + $0xb0] sm:$0xff]  ;;  %p5428_p3 = pnand %p5427_p2, %p5423_p13 }
  0x26   : > { %1129 = vmatpush.msra.mxu0 %v5089_v20  ;;  %5291 = vmatpush.msra.mxu2 %v5089_v20  ;;  %330 = vst [vmem:[#allocation2 + $0x150] sm:$0x1] %v5468_v4  ;;  %v5768_v54 = vld [vmem:[%s5605_s13 + $0xa0] sm:$0xff]  ;;  %v5814_v12 = vld [vmem:[%s5605_s13 + $0xb8] sm:$0xff]  ;;  %v5823_v18 = vld [vmem:[%s5605_s13 + $0x30] sm:$0xff] }
  0x27   : > { %5307 = vmatpush.msra.mxu3 %v5105_v21  ;;  %1242 = vmatpush.msra.mxu1 %v5105_v21  ;;  %331 = vst [vmem:[#allocation2 + $0x168] sm:$0x1] %v5468_v4  ;;  %v731_v8 = vld [vmem:[%s9148_s1 + $0xe0] sm:$0xff]  ;;  %v5125_v19 = vld [vmem:[%s9148_s1 + $0x2d0] sm:$0xff]  ;;  %v730_v21 = vld [vmem:[%s9148_s1 + $0xd8] sm:$0xff] }
  0x28   : > { %1130 = vmatpush.msra.mxu0 %v5088_v22  ;;  %5292 = vmatpush.msra.mxu2 %v5088_v22  ;;  %332 = vst [vmem:[#allocation2 + $0x180] sm:$0x1] %v5468_v4  ;;  %v713_v20 = vld [vmem:[%s9148_s1 + $0x50] sm:$0xff] }
  0x29   : > { %5308 = vmatpush.msra.mxu3 %v5104_v23  ;;  %1243 = vmatpush.msra.mxu1 %v5104_v23  ;;  %333 = vst [vmem:[#allocation2 + $0x29] sm:$0x1] %v5468_v4 }
  0x2a   : > { %1131 = vmatpush.msra.mxu0 %v5087_v24  ;;  %5293 = vmatpush.msra.mxu2 %v5087_v24  ;;  %334 = vst [vmem:[#allocation2 + $0x41] sm:$0x1] %v5468_v4 }
  0x2b   : > { %5309 = vmatpush.msra.mxu3 %v5103_v25  ;;  %1244 = vmatpush.msra.mxu1 %v5103_v25  ;;  %335 = vst [vmem:[#allocation2 + $0x59] sm:$0x1] %v5468_v4 }
  0x2c   : > { %1132 = vmatpush.msra.mxu0 %v5086_v26  ;;  %5294 = vmatpush.msra.mxu2 %v5086_v26  ;;  %336 = vst [vmem:[#allocation2 + $0x71] sm:$0x1] %v5468_v4  ;;  %v5840_v26 = vld [vmem:[%s5605_s13 + $0x38] sm:$0xff] }
  0x2d   : > { %5310 = vmatpush.msra.mxu3 %v5102_v27  ;;  %1245 = vmatpush.msra.mxu1 %v5102_v27  ;;  %337 = vst [vmem:[#allocation2 + $0x89] sm:$0x1] %v5468_v4 }
  0x2e   : > { %1133 = vmatpush.msra.mxu0 %v5085_v28  ;;  %5295 = vmatpush.msra.mxu2 %v5085_v28  ;;  %338 = vst [vmem:[#allocation2 + $0xa1] sm:$0x1] %v5468_v4 }
  0x2f   : > { %5311 = vmatpush.msra.mxu3 %v5101_v29  ;;  %1246 = vmatpush.msra.mxu1 %v5101_v29  ;;  %339 = vst [vmem:[#allocation2 + $0xb9] sm:$0x1] %v5468_v4 }
  0x30   : > { %1134 = vmatpush.msra.mxu0 %v5084_v30  ;;  %5296 = vmatpush.msra.mxu2 %v5084_v30  ;;  %340 = vst [vmem:[#allocation2 + $0xd1] sm:$0x1] %v5468_v4 }
  0x31   : > { %5312 = vmatpush.msra.mxu3 %v5100_v31  ;;  %1247 = vmatpush.msra.mxu1 %v5100_v31  ;;  %341 = vst [vmem:[#allocation2 + $0xe9] sm:$0x1] %v5468_v4  ;;  %v5124_v31 = vld [vmem:[%s9148_s1 + $0x2c8] sm:$0xff] }
  0x32   : > { %1135 = vmatpush.msra.mxu0 %v5083_v32  ;;  %5297 = vmatpush.msra.mxu2 %v5083_v32  ;;  %342 = vst [vmem:[#allocation2 + $0x101] sm:$0x1] %v5468_v4  ;;  %v712_v32 = vld [vmem:[%s9148_s1 + $0x48] sm:$0xff] }
  0x33   : > { %5313 = vmatpush.msra.mxu3 %v5099_v33  ;;  %1136 = vmatmul.f32.vlgmr.msra.gmra.mxu0 %v5690_v34  ;;  %343 = vst [vmem:[#allocation2 + $0x119] sm:$0x1] %v5468_v4 }
  0x34   : > { %1346 = vmatpush.msrb.mxu2 %v5130_v35  ;;  %1248 = vmatpush.msra.mxu1 %v5099_v33  ;;  %344 = vst [vmem:[#allocation2 + $0x131] sm:$0x1] %v5468_v4  ;;  %v729_v33 = vld [vmem:[%s9148_s1 + $0xd0] sm:$0xff] }
  0x35   : > { %1459 = vmatpush.msrb.mxu3 %v718_v36  ;;  %1572 = vmatpush.msrb.mxu0 %v734_v37  ;;  %345 = vst [vmem:[#allocation2 + $0x149] sm:$0x1] %v5468_v4 }
  0x36   : > { %1347 = vmatpush.msrb.mxu2 %v5129_v38  ;;  %346 = vst [vmem:[#allocation2 + $0x161] sm:$0x1] %v5468_v4  ;;  %v5865_v38 = vld [vmem:[%s5605_s13 + $0xc0] sm:$0xff] }
  0x37   : > { %1460 = vmatpush.msrb.mxu3 %v717_v39  ;;  %9222 = vst [vmem:[#allocation7_spill] sm:$0xff] %v5727_v43  ;;  %1573 = vmatpush.msrb.mxu0 %v733_v42 }
  0x38   : > { %1348 = vmatpush.msrb.mxu2 %v5128_v40  ;;  %347 = vst [vmem:[#allocation2 + $0x179] sm:$0x1] %v5468_v4  ;;  %v5870_v40 = vld [vmem:[%s5605_s13 + $0xc8] sm:$0xff] }
  0x39   : > { %1461 = vmatpush.msrb.mxu3 %v716_v41  ;;  %9223 = vst [vmem:[#allocation8_spill] sm:$0xff] %v5731_v44  ;;  %1574 = vmatpush.msrb.mxu0 %v732_v53  ;;  %v5879_v53 = vld [vmem:[%s5605_s13 + $0x40] sm:$0xff] }
  0x3a   : > { %348 = vst [vmem:[#allocation2 + $0x191] sm:$0x1] %v5468_v4  ;;  %1349 = vmatpush.msrb.mxu2 %v5127_v51  ;;  %v5126_v4 = vld [vmem:[%s9148_s1 + $0x2d8] sm:$0xff] }
  0x3b   : > { %9224 = vst [vmem:[#allocation9_spill] sm:$0xff] %v5735_v45  ;;  %1462 = vmatpush.msrb.mxu3 %v715_v52  ;;  %1575 = vmatpush.msrb.mxu0 %v731_v8 }
  0x3c   : > { %365 = vst [vmem:[#allocation2 + $0xd9] sm:$0xff] %v5727_v43  ;;  %1350 = vmatpush.msrb.mxu2 %v5126_v4  ;;  %v5896_v4 = vld [vmem:[%s5605_s13 + $0x48] sm:$0xff] }
  0x3d   : > { %9225 = vst [vmem:[#allocation10_spill] sm:$0xff] %v5739_v46  ;;  %1463 = vmatpush.msrb.mxu3 %v714_v6  ;;  %1576 = vmatpush.msrb.mxu0 %v730_v21  ;;  %v5921_v21 = vld [vmem:[%s5605_s13 + $0xd0] sm:$0xff] }
  0x3e   : > { %366 = vst [vmem:[#allocation2 + $0xe1] sm:$0xff] %v5731_v44  ;;  %1351 = vmatpush.msrb.mxu2 %v5125_v19 }
  0x3f   : > { %9226 = vst [vmem:[#allocation11_spill] sm:$0xff] %v5743_v47  ;;  %1464 = vmatpush.msrb.mxu3 %v713_v20  ;;  %1577 = vmatpush.msrb.mxu0 %v729_v33  ;;  %v5121_v33 = vld [vmem:[%s9148_s1 + $0x2b0] sm:$0xff] }
  0x40   : > { %350 = vst [vmem:[#allocation2 + $0x21] sm:$0xff] %v5735_v45  ;;  %1352 = vmatpush.msrb.mxu2 %v5124_v31 }
  0x41   : > { %9227 = vst [vmem:[#allocation12_spill] sm:$0xff] %v5747_v48  ;;  %1465 = vmatpush.msrb.mxu3 %v712_v32  ;;  %v5935_v32 = vld [vmem:[%s5605_s13 + $0x50] sm:$0xff] }
  0x42   : > { %351 = vst [vmem:[#allocation2 + $0x31] sm:$0xff] %v5739_v46 }
  0x43   : > { %9228 = vst [vmem:[#allocation13_spill] sm:$0xff] %v5751_v49  ;;  %v775_v56 = vld [vmem:[#allocation2 + $0xd8] sm:$0xff] }
  0x44   : > { %9229 = vst [vmem:[#allocation14_spill] sm:$0xff] %v5754_v50  ;;  %1184 = vmatmul.f32.vlgmr.msra.gmra.mxu2 %v775_v56  ;;  %v887_v58 = vrot.slane %v775_v56, 1  ;;  %v5123_v56 = vld [vmem:[%s9148_s1 + $0x2c0] sm:$0xff] }
  0x45   : > { %367 = vst [vmem:[#allocation2 + $0xf1] sm:$0xff] %v5743_v47  ;;  %v776_v57 = vld [vmem:[#allocation2 + $0xe0] sm:$0xff]  ;;  %v777_v0 = vld [vmem:[#allocation2 + $0xe8] sm:$0x3]  ;;  %1353 = vmatpush.msrb.mxu2 %v5123_v56  ;;  %v5952_v56 = vld [vmem:[%s5605_s13 + $0x58] sm:$0xff] }
  0x46   : > { %368 = vst [vmem:[#allocation2 + $0xf9] sm:$0xff] %v5747_v48  ;;  %v888_v61 = vrot.slane %v776_v57, 1  ;;  %v890_v5 = vrot.slane %v777_v0, 1  ;;  %v719_v48 = vld [vmem:[%s9148_s1 + $0x80] sm:$0xff]  ;;  %v742_v47 = vld [vmem:[%s9148_s1 + $0x138] sm:$0xff] }
  0x47   : > { %9230 = vst [vmem:[#allocation15_spill] sm:$0xff] %v5768_v54  ;;  %v5780_v62 = vld [vmem:[#allocation2 + $0x20] sm:$0xff]  ;;  %v5789_v2 = vld [vmem:[#allocation2 + $0x28] sm:$0x3] }
  0x48   : > { %352 = vst [vmem:[#allocation2 + $0x39] sm:$0xff] %v5751_v49  ;;  %1139 = vmatmul.f32.gmra.mxu0 %v5780_v62  ;;  %v5785_v63 = vrot.slane %v5780_v62, 1  ;;  %v889_v1 = vsel %vm477_vm0, %v887_v58, %v888_v61  ;;  %v850_v7 = vrot.slane %v5789_v2, 1  ;;  %v891_v11 = vsel %vm477_vm0, %v888_v61, %v890_v5  ;;  %v728_v58 = vld [vmem:[%s9148_s1 + $0xc8] sm:$0xff] }
  0x49   : > { %9231 = vst [vmem:[#allocation16_spill] sm:$0xff] %v5772_v55  ;;  %1297 = vmatmul.f32.vlgmr.msra.gmra.mxu3 %v889_v1  ;;  %v5806_v9 = vld [vmem:[#allocation2 + $0x30] sm:$0xff]  ;;  %1578 = vmatpush.msrb.mxu0 %v728_v58 }
  0x4a   : > { %353 = vst [vmem:[#allocation2 + $0x49] sm:$0xff] %v5754_v50  ;;  %v5793_v3 = vsel %vm477_vm0, %v847_v59, %v5785_v63  ;;  %v851_v15 = vsel %vm477_vm0, %v5785_v63, %v850_v7  ;;  %v852_v24 = vrot.slane %v5806_v9, 1 }
  0x4b   : > { %369 = vst [vmem:[#allocation2 + $0x109] sm:$0xff] %v5768_v54  ;;  %1249 = vmatmul.f32.vlgmr.msra.gmra.mxu1 %v5793_v3 }
  0x4c   : > { %9232 = vst [vmem:[#allocation17_spill] sm:$0xff] %v5778_v60  ;;  %1187 = vmatmul.f32.gmra.mxu2 %v776_v57  ;;  %v778_v13 = vld [vmem:[#allocation2 + $0xf0] sm:$0xff]  ;;  %v711_v57 = vld [vmem:[%s9148_s1 + $0x40] sm:$0xff] }
  0x4d   : > { %370 = vst [vmem:[#allocation2 + $0x111] sm:$0xff] %v5772_v55  ;;  %v779_v16 = vld [vmem:[#allocation2 + $0xf8] sm:$0xff]  ;;  %v892_v22 = vrot.slane %v778_v13, 1  ;;  %v780_v29 = vld [vmem:[#allocation2 + $0x100] sm:$0x3]  ;;  %1466 = vmatpush.msrb.mxu3 %v711_v57 }
  0x4e   : > { %354 = vst [vmem:[#allocation2 + $0x51] sm:$0xff] %v5778_v60  ;;  %v893_v23 = vrot.slane %v779_v16, 1  ;;  %v895_v35 = vrot.slane %v780_v29, 1 }
  0x4f   : > { %9233 = vst [vmem:[#allocation18_spill] sm:$0xff] %v5809_v10  ;;  %v5820_v17 = vld [vmem:[#allocation2 + $0x38] sm:$0xff]  ;;  %v5849_v30 = vld [vmem:[#allocation2 + $0x40] sm:$0x3] }
  0x50   : > { %371 = vst [vmem:[#allocation2 + $0x121] sm:$0xff] %v5809_v10  ;;  %1142 = vmatmul.f32.gmra.mxu0 %v5806_v9  ;;  %v5837_v25 = vrot.slane %v5820_v17, 1  ;;  %v894_v27 = vsel %vm477_vm0, %v892_v22, %v893_v23  ;;  %v855_v36 = vrot.slane %v5849_v30, 1  ;;  %v896_v39 = vsel %vm477_vm0, %v893_v23, %v895_v35  ;;  %v5926_v23 = vld [vmem:[%s5605_s13 + $0xd8] sm:$0xff]  ;;  %v709_v35 = vld [vmem:[%s9148_s1 + $0x30] sm:$0xff] }
  0x51   : > { %9234 = vst [vmem:[#allocation19_spill] sm:$0xff] %v5814_v12  ;;  %1300 = vmatmul.f32.gmra.mxu3 %v891_v11  ;;  %v5862_v37 = vld [vmem:[#allocation2 + $0x48] sm:$0xff]  ;;  %v5122_v11 = vld [vmem:[%s9148_s1 + $0x2b8] sm:$0xff]  ;;  %v6239_v60 = vrot.slane %v5820_v17, 2 }
  0x52   : > { %372 = vst [vmem:[#allocation2 + $0x129] sm:$0xff] %v5814_v12  ;;  %v5847_v28 = vsel %vm477_vm0, %v852_v24, %v5837_v25  ;;  %v781_v41 = vld [vmem:[#allocation2 + $0x108] sm:$0xff]  ;;  %v856_v42 = vsel %vm477_vm0, %v5837_v25, %v855_v36  ;;  %v857_v0 = vrot.slane %v5862_v37, 1  ;;  %1354 = vmatpush.msrb.mxu2 %v5122_v11  ;;  %v726_v36 = vld [vmem:[%s9148_s1 + $0xb8] sm:$0xff] }
  0x53   : > { %9235 = vst [vmem:[#allocation20_spill] sm:$0xff] %v5823_v18  ;;  %1252 = vmatmul.f32.gmra.mxu1 %v851_v15  ;;  %v897_v59 = vrot.slane %v781_v41, 1  ;;  %v727_v15 = vld [vmem:[%s9148_s1 + $0xc0] sm:$0xff] }
  0x54   : > { %355 = vst [vmem:[#allocation2 + $0x61] sm:$0xff] %v5823_v18  ;;  %1190 = vmatmul.f32.gmra.mxu2 %v778_v13  ;;  %v782_v51 = vld [vmem:[#allocation2 + $0x110] sm:$0xff]  ;;  %v783_v7 = vld [vmem:[#allocation2 + $0x118] sm:$0x3]  ;;  %1579 = vmatpush.msrb.mxu0 %v727_v15  ;;  %v964_v18 = vrot.slane %v5806_v9, 2 }
  0x55   : > { %9236 = vst [vmem:[#allocation21_spill] sm:$0xff] %v5840_v26  ;;  %v5876_v52 = vld [vmem:[#allocation2 + $0x50] sm:$0xff]  ;;  %v898_v61 = vrot.slane %v782_v51, 1  ;;  %v5905_v8 = vld [vmem:[#allocation2 + $0x58] sm:$0x3]  ;;  %1355 = vmatpush.msrb.mxu2 %v5121_v33 }
  0x56   : > { %356 = vst [vmem:[#allocation2 + $0x69] sm:$0xff] %v5840_v26  ;;  %v5893_v1 = vrot.slane %v5876_v52, 1  ;;  %v710_v13 = vld [vmem:[%s9148_s1 + $0x38] sm:$0xff]  ;;  %v860_v19 = vrot.slane %v5905_v8, 1  ;;  %1580 = vmatpush.msrb.mxu0 %v726_v36  ;;  %v5119_v36 = vld [vmem:[%s9148_s1 + $0x2a0] sm:$0xff] }
  0x57   : > { %9237 = vst [vmem:[#allocation22_spill] sm:$0xff] %v5865_v38  ;;  %v899_v5 = vsel %vm477_vm0, %v897_v59, %v898_v61  ;;  %1467 = vmatpush.msrb.mxu3 %v710_v13  ;;  %v784_v24 = vld [vmem:[#allocation2 + $0x120] sm:$0xff]  ;;  %v386_v26 = vld [vmem:[#allocation2 + $0x28] sm:$0x3] }
  0x58   : > { %1145 = vmatmul.f32.gmra.mxu0 %v5820_v17  ;;  %373 = vst [vmem:[#allocation2 + $0x139] sm:$0xff] %v5865_v38  ;;  %v5903_v6 = vsel %vm477_vm0, %v857_v0, %v5893_v1  ;;  %v5120_v0 = vld [vmem:[%s9148_s1 + $0x2a8] sm:$0xff]  ;;  %v747_v38 = vld [vmem:[%s9148_s1 + $0x160] sm:$0xff] }
  0x59   : > { %1303 = vmatmul.f32.gmra.mxu3 %v894_v27  ;;  %9238 = vst [vmem:[#allocation23_spill] sm:$0xff] %v5870_v40  ;;  %v861_v27 = vsel %vm477_vm0, %v5893_v1, %v860_v19  ;;  %v785_v29 = vld [vmem:[#allocation2 + $0x128] sm:$0xff]  ;;  %v786_v59 = vld [vmem:[#allocation2 + $0x130] sm:$0x3]  ;;  %1356 = vmatpush.msrb.mxu2 %v5120_v0 }
  0x5a   : > { %374 = vst [vmem:[#allocation2 + $0x141] sm:$0xff] %v5870_v40  ;;  %1468 = vmatpush.msrb.mxu3 %v709_v35  ;;  %v905_v11 = vrot.slane %v786_v59, 1 }
  0x5b   : > { %1255 = vmatmul.f32.gmra.mxu1 %v5847_v28  ;;  %9239 = vst [vmem:[#allocation24_spill] sm:$0xff] %v5879_v53  ;;  %v5918_v20 = vld [vmem:[#allocation2 + $0x60] sm:$0xff]  ;;  %1357 = vmatpush.msrb.mxu2 %v5119_v36 }
  0x5c   : > { %1193 = vmatmul.f32.gmra.mxu2 %v779_v16  ;;  %357 = vst [vmem:[#allocation2 + $0x79] sm:$0xff] %v5879_v53  ;;  %v900_v16 = vrot.slane %v783_v7, 1  ;;  %v725_v7 = vld [vmem:[%s9148_s1 + $0xb0] sm:$0xff]  ;;  %v723_v36 = vld [vmem:[%s9148_s1 + $0xa0] sm:$0xff] }
  0x5d   : > { %9240 = vst [vmem:[#allocation25_spill] sm:$0xff] %v5896_v4  ;;  %v5932_v31 = vld [vmem:[#allocation2 + $0x68] sm:$0xff]  ;;  %1581 = vmatpush.msrb.mxu0 %v725_v7 }
  0x5e   : > { %358 = vst [vmem:[#allocation2 + $0x81] sm:$0xff] %v5896_v4  ;;  %v901_v22 = vsel %vm477_vm0, %v898_v61, %v900_v16  ;;  %v5961_v61 = vld [vmem:[#allocation2 + $0x70] sm:$0x3]  ;;  %v5977_v16 = vld [vmem:[%s5605_s13 + $0xe0] sm:$0xff] }
  0x5f   : > { %9241 = vst [vmem:[#allocation26_spill] sm:$0xff] %v5921_v21  ;;  %v865_v13 = vrot.slane %v5961_v61, 1 }
  0x60   : > { %1148 = vmatmul.f32.gmra.mxu0 %v5862_v37  ;;  %375 = vst [vmem:[#allocation2 + $0x151] sm:$0xff] %v5921_v21  ;;  %v749_v21 = vld [vmem:[%s9148_s1 + $0x170] sm:$0xff] }
  0x61   : > { %1306 = vmatmul.f32.gmra.mxu3 %v896_v39  ;;  %9242 = vst [vmem:[#allocation27_spill] sm:$0xff] %v5926_v23  ;;  %v902_v39 = vrot.slane %v784_v24, 1  ;;  %v788_v33 = vld [vmem:[#allocation2 + $0x140] sm:$0xff] }
  0x62   : > { %376 = vst [vmem:[#allocation2 + $0x159] sm:$0xff] %v5926_v23 }
  0x63   : > { %1258 = vmatmul.f32.gmra.mxu1 %v856_v42  ;;  %9243 = vst [vmem:[#allocation28_spill] sm:$0xff] %v5935_v32  ;;  %v862_v42 = vrot.slane %v5918_v20, 1  ;;  %v5974_v15 = vld [vmem:[#allocation2 + $0x78] sm:$0xff] }
  0x64   : > { %1196 = vmatmul.f32.gmra.mxu2 %v781_v41  ;;  %359 = vst [vmem:[#allocation2 + $0x91] sm:$0xff] %v5935_v32  ;;  %v903_v41 = vrot.slane %v785_v29, 1  ;;  %v867_v59 = vrot.slane %v5974_v15, 1  ;;  %v6210_v32 = vrot.slane %v5780_v62, 2 }
  0x65   : > { %9244 = vst [vmem:[#allocation29_spill] sm:$0xff] %v5952_v56  ;;  %v5988_v35 = vld [vmem:[#allocation2 + $0x80] sm:$0xff] }
  0x66   : > { %v904_v57 = vsel %vm477_vm0, %v902_v39, %v903_v41  ;;  %360 = vst [vmem:[#allocation2 + $0x99] sm:$0xff] %v5952_v56  ;;  %v906_v19 = vsel %vm477_vm0, %v903_v41, %v905_v11  ;;  %v707_v39 = vld [vmem:[%s9148_s1 + $0x20] sm:$0xff]  ;;  %v724_v41 = vld [vmem:[%s9148_s1 + $0xa8] sm:$0xff]  ;;  %v6005_v0 = vrot.slane %v5988_v35, 1  ;;  %v959_v56 = vrot.slane %v5690_v34, 2 }
  0x67   : > { %9245 = vst [vmem:[#allocation30_spill] sm:$0xff] %v5977_v16  ;;  %1582 = vmatpush.msrb.mxu0 %v724_v41 }
  0x68   : > { %1151 = vmatmul.f32.gmra.mxu0 %v5876_v52  ;;  %377 = vst [vmem:[#allocation2 + $0x169] sm:$0xff] %v5977_v16  ;;  %v6015_v11 = vsel %vm477_vm0, %v867_v59, %v6005_v0  ;;  %v6033_v59 = vld [vmem:[%s5605_s13 + $0xf0] sm:$0xff] }
  0x69   : > { %1309 = vmatmul.f32.gmra.mxu3 %v899_v5  ;;  %v708_v5 = vld [vmem:[%s9148_s1 + $0x28] sm:$0xff]  ;;  %1583 = vmatpush.msrb.mxu0 %v723_v36  ;;  %9249 = vst [vmem:[#allocation34_spill] sm:$0xff] %v6033_v59  ;;  %v791_v16 = vld [vmem:[#allocation2 + $0x158] sm:$0xff]  ;;  %v705_v36 = vld [vmem:[%s9148_s1 + $0x10] sm:$0xff] }
  0x6a   : > { %1469 = vmatpush.msrb.mxu3 %v708_v5  ;;  %v6008_v5 = vld [vmem:[%s5605_s13 + $0x68] sm:$0xff]  ;;  %379 = vst [vmem:[#allocation2 + $0x181] sm:$0xff] %v6033_v59 }
  0x6b   : > { %1261 = vmatmul.f32.gmra.mxu1 %v5903_v6  ;;  %9248 = vst [vmem:[#allocation33_spill] sm:$0xff] %v6008_v5 }
  0x6c   : > { %1199 = vmatmul.f32.gmra.mxu2 %v782_v51  ;;  %v5949_v51 = vrot.slane %v5932_v31, 1  ;;  %1470 = vmatpush.msrb.mxu3 %v707_v39  ;;  %362 = vst [vmem:[#allocation2 + $0xb1] sm:$0xff] %v6008_v5  ;;  %v5360_v5 = vld [vmem:[#allocation2] sm:$0xff] }
  0x6e   : > { %v5959_v58 = vsel %vm477_vm0, %v862_v42, %v5949_v51 }
  0x6f   : > { %v793_v10 = vld [vmem:[#allocation2 + $0x168] sm:$0xff] }
  0x70   : > { %1154 = vmatmul.f32.gmra.mxu0 %v5918_v20 }
  0x71   : > { %1312 = vmatmul.f32.gmra.mxu3 %v901_v22  ;;  %v5982_v22 = vld [vmem:[%s5605_s13 + $0xe8] sm:$0xff] }
  0x72   : > { %9246 = vst [vmem:[#allocation31_spill] sm:$0xff] %v5982_v22 }
  0x73   : > { %1264 = vmatmul.f32.gmra.mxu1 %v861_v27  ;;  %v866_v27 = vsel %vm477_vm0, %v5949_v51, %v865_v13  ;;  %378 = vst [vmem:[#allocation2 + $0x171] sm:$0xff] %v5982_v22  ;;  %v789_v13 = vld [vmem:[#allocation2 + $0x148] sm:$0x3]  ;;  %v6038_v22 = vld [vmem:[%s5605_s13 + $0xf8] sm:$0xff] }
  0x74   : > { %1202 = vmatmul.f32.gmra.mxu2 %v784_v24  ;;  %v787_v24 = vld [vmem:[#allocation2 + $0x138] sm:$0xff]  ;;  %v910_v39 = vrot.slane %v789_v13, 1  ;;  %9250 = vst [vmem:[#allocation35_spill] sm:$0xff] %v6038_v22  ;;  %v790_v13 = vld [vmem:[#allocation2 + $0x150] sm:$0xff] }
  0x75   : > { %v907_v42 = vrot.slane %v787_v24, 1  ;;  %380 = vst [vmem:[#allocation2 + $0x189] sm:$0xff] %v6038_v22  ;;  %v913_v22 = vrot.slane %v791_v16, 1 }
  0x78   : > { %1157 = vmatmul.f32.gmra.mxu0 %v5932_v31 }
  0x79   : > { %1315 = vmatmul.f32.gmra.mxu3 %v904_v57  ;;  %v908_v57 = vrot.slane %v788_v33, 1 }
  0x7b   : > { %1267 = vmatmul.f32.gmra.mxu1 %v5959_v58  ;;  %v909_v7 = vsel %vm477_vm0, %v907_v42, %v908_v57  ;;  %v6030_v42 = vld [vmem:[#allocation2 + $0x90] sm:$0xff] }
  0x7c   : > { %1205 = vmatmul.f32.gmra.mxu2 %v785_v29  ;;  %v5991_v29 = vld [vmem:[%s5605_s13 + $0x60] sm:$0xff]  ;;  %v872_v59 = vrot.slane %v6030_v42, 1 }
  0x7d   : > { %9247 = vst [vmem:[#allocation32_spill] sm:$0xff] %v5991_v29 }
  0x7e   : > { %361 = vst [vmem:[#allocation2 + $0xa9] sm:$0xff] %v5991_v29  ;;  %v383_v29 = vld [vmem:[#allocation2 + $0x10] sm:$0x3] }
  0x80   : > { %1160 = vmatmul.f32.gmra.mxu0 %v5974_v15 }
  0x81   : > { %1318 = vmatmul.f32.gmra.mxu3 %v906_v19  ;;  %v6017_v19 = vld [vmem:[#allocation2 + $0x88] sm:$0x3] }
  0x82   : > { %v870_v41 = vrot.slane %v6017_v19, 1 }
  0x83   : > { %1270 = vmatmul.f32.gmra.mxu1 %v866_v27  ;;  %v706_v27 = vld [vmem:[%s9148_s1 + $0x18] sm:$0xff] }
  0x84   : > { %1208 = vmatmul.f32.gmra.mxu2 %v787_v24  ;;  %v5118_v24 = vld [vmem:[%s9148_s1 + $0x298] sm:$0xff]  ;;  %1471 = vmatpush.msrb.mxu3 %v706_v27 }
  0x85   : > { %1358 = vmatpush.msrb.mxu2 %v5118_v24  ;;  %v871_v24 = vsel %vm477_vm0, %v6005_v0, %v870_v41  ;;  %v6044_v27 = vld [vmem:[#allocation2 + $0x98] sm:$0xff]  ;;  %v912_v41 = vrot.slane %v790_v13, 1  ;;  %v6098_v12 = vld [vmem:[#allocation2 + $0xa8] sm:$0xff]  ;;  %v6107_v55 = vld [vmem:[#allocation2 + $0xb0] sm:$0xff] }
  0x86   : > { %v6064_v23 = vrot.slane %v6044_v27, 1  ;;  %1472 = vmatpush.msrb.mxu3 %v705_v36  ;;  %v792_v36 = vld [vmem:[#allocation2 + $0x160] sm:$0x3]  ;;  %v6126_v54 = vrot.slane %v6107_v55, 1 }
  0x88   : > { %1163 = vmatmul.f32.gmra.mxu0 %v5988_v35  ;;  %v6077_v40 = vsel %vm477_vm0, %v872_v59, %v6064_v23  ;;  %v915_v59 = vrot.slane %v792_v36, 1  ;;  %v746_v36 = vld [vmem:[%s9148_s1 + $0x158] sm:$0xff] }
  0x89   : > { %1321 = vmatmul.f32.gmra.mxu3 %v909_v7  ;;  %v911_v7 = vsel %vm477_vm0, %v908_v57, %v910_v39  ;;  %v5117_v57 = vld [vmem:[%s9148_s1 + $0x290] sm:$0xff]  ;;  %v722_v39 = vld [vmem:[%s9148_s1 + $0x98] sm:$0xff] }
  0x8a   : > { %1359 = vmatpush.msrb.mxu2 %v5117_v57  ;;  %1584 = vmatpush.msrb.mxu0 %v722_v39  ;;  %v914_v57 = vsel %vm477_vm0, %v912_v41, %v913_v22  ;;  %v6079_v39 = vld [vmem:[#allocation2 + $0xa0] sm:$0x3]  ;;  %v721_v41 = vld [vmem:[%s9148_s1 + $0x90] sm:$0xff] }
  0x8b   : > { %1273 = vmatmul.f32.gmra.mxu1 %v6015_v11 }
  0x8c   : > { %1211 = vmatmul.f32.gmra.mxu2 %v788_v33  ;;  %v6047_v33 = vld [vmem:[%s5605_s13 + $0x70] sm:$0xff]  ;;  %1585 = vmatpush.msrb.mxu0 %v721_v41 }
  0x8d   : > { %9251 = vst [vmem:[#allocation36_spill] sm:$0xff] %v6047_v33  ;;  %v794_v41 = vld [vmem:[#allocation2 + $0x170] sm:$0xff] }
  0x8e   : > { %363 = vst [vmem:[#allocation2 + $0xc1] sm:$0xff] %v6047_v33 }
  0x90   : > { %1166 = vmatmul.f32.gmra.mxu0 %v6030_v42 }
  0x91   : > { %1324 = vmatmul.f32.gmra.mxu3 %v911_v7  ;;  %v750_v7 = vld [vmem:[%s9148_s1 + $0x178] sm:$0xff] }
  0x92   : > { %1685 = vmatpush.msrb.mxu1 %v750_v7  ;;  %v748_v7 = vld [vmem:[%s9148_s1 + $0x168] sm:$0xff] }
  0x93   : > { %1276 = vmatmul.f32.gmra.mxu1 %v871_v24  ;;  %v6070_v24 = vld [vmem:[%s5605_s13 + $0x78] sm:$0xff] }
  0x94   : > { %1214 = vmatmul.f32.gmra.mxu2 %v790_v13  ;;  %9252 = vst [vmem:[#allocation37_spill] sm:$0xff] %v6070_v24  ;;  %1686 = vmatpush.msrb.mxu1 %v749_v21  ;;  %v5116_v13 = vld [vmem:[%s9148_s1 + $0x288] sm:$0xff] }
  0x95   : > { %364 = vst [vmem:[#allocation2 + $0xc9] sm:$0xff] %v6070_v24  ;;  %v704_v21 = vld [vmem:[%s9148_s1 + $0x8] sm:$0xff]  ;;  %1360 = vmatpush.msrb.mxu2 %v5116_v13  ;;  %v916_v13 = vsel %vm477_vm0, %v913_v22, %v915_v59  ;;  %v5115_v22 = vld [vmem:[%s9148_s1 + $0x280] sm:$0xff] }
  0x96   : > { %1473 = vmatpush.msrb.mxu3 %v704_v21  ;;  %1687 = vmatpush.msrb.mxu1 %v748_v7  ;;  %v720_v59 = vld [vmem:[%s9148_s1 + $0x88] sm:$0xff]  ;;  %v917_v7 = vrot.slane %v793_v10, 1 }
  0x97   : > { %1361 = vmatpush.msrb.mxu2 %v5115_v22  ;;  %1586 = vmatpush.msrb.mxu0 %v720_v59  ;;  %v6143_v59 = vld [vmem:[#allocation2 + $0xb8] sm:$0x3] }
  0x98   : > { %1169 = vmatmul.f32.gmra.mxu0 %v6044_v27  ;;  %1688 = vmatpush.msrb.mxu1 %v747_v38  ;;  %v703_v38 = vld [vmem:[%s9148_s1] sm:$0xff] }
  0x99   : > { %1327 = vmatmul.f32.gmra.mxu3 %v914_v57  ;;  %v875_v57 = vrot.slane %v6079_v39, 1  ;;  %1587 = vmatpush.msrb.mxu0 %v719_v48  ;;  %v5146_v48 = vld [vmem:[%s9148_s1 + $0x378] sm:$0xff] }
  0x9a   : > { %1689 = vmatpush.msrb.mxu1 %v746_v36  ;;  %v744_v36 = vld [vmem:[%s9148_s1 + $0x148] sm:$0xff]  ;;  %1474 = vmatpush.msrb.mxu3 %v703_v38  ;;  %v795_v38 = vld [vmem:[#allocation2 + $0x178] sm:$0x3] }
  0x9b   : > { %1279 = vmatmul.f32.gmra.mxu1 %v6077_v40  ;;  %v876_v21 = vsel %vm477_vm0, %v6064_v23, %v875_v57  ;;  %v918_v57 = vrot.slane %v794_v41, 1  ;;  %2168 = vmatpush.msra.mxu2 %v5146_v48  ;;  %v796_v48 = vld [vmem:[#allocation2 + $0x180] sm:$0xff] }
  0x9c   : > { %1217 = vmatmul.f32.gmra.mxu2 %v791_v16  ;;  %v745_v16 = vld [vmem:[%s9148_s1 + $0x150] sm:$0xff]  ;;  %v6171_v43 = vld [vmem:[#allocation2 + $0xc8] sm:$0xff] }
  0x9d   : > { %1690 = vmatpush.msrb.mxu1 %v745_v16  ;;  %v919_v22 = vsel %vm477_vm0, %v917_v7, %v918_v57  ;;  %v5162_v7 = vld [vmem:[%s9148_s1 + $0x3f8] sm:$0xff]  ;;  %v6184_v24 = vrot.slane %v6171_v43, 1  ;;  %v6195_v33 = vld [vmem:[#allocation2 + $0xd0] sm:$0x3] }
  0x9e   : > { %2281 = vmatpush.msra.mxu3 %v5162_v7  ;;  %v797_v7 = vld [vmem:[#allocation2 + $0x188] sm:$0xff] }
  0x9f   : > { %1691 = vmatpush.msrb.mxu1 %v744_v36  ;;  %v920_v36 = vrot.slane %v795_v38, 1  ;;  %v738_v38 = vld [vmem:[%s9148_s1 + $0x118] sm:$0xff] }
  0xa0   : > { %1172 = vmatmul.f32.gmra.mxu0 %v6098_v12 }
  0xa1   : > { %1330 = vmatmul.f32.gmra.mxu3 %v916_v13  ;;  %v877_v13 = vrot.slane %v6098_v12, 1  ;;  %v921_v44 = vsel %vm477_vm0, %v918_v57, %v920_v36  ;;  %v5178_v57 = vld [vmem:[%s9148_s1 + $0x478] sm:$0xff]  ;;  %v922_v36 = vrot.slane %v796_v48, 1 }
  0xa2   : > { %2394 = vmatpush.msra.mxu0 %v5178_v57  ;;  %v798_v57 = vld [vmem:[#allocation2 + $0x190] sm:$0x3] }
  0xa3   : > { %1282 = vmatmul.f32.gmra.mxu1 %v876_v21  ;;  %v743_v21 = vld [vmem:[%s9148_s1 + $0x140] sm:$0xff]  ;;  %v6141_v16 = vsel %vm477_vm0, %v877_v13, %v6126_v54  ;;  %v740_v13 = vld [vmem:[%s9148_s1 + $0x128] sm:$0xff] }
  0xa4   : > { %1220 = vmatmul.f32.gmra.mxu2 %v793_v10  ;;  %1692 = vmatpush.msrb.mxu1 %v743_v21  ;;  %v741_v10 = vld [vmem:[%s9148_s1 + $0x130] sm:$0xff]  ;;  %v880_v21 = vrot.slane %v6143_v59, 1 }
  0xa6   : > { %1693 = vmatpush.msrb.mxu1 %v742_v47  ;;  %v6159_v47 = vld [vmem:[#allocation2 + $0xc0] sm:$0xff] }
  0xa8   : > { %1175 = vmatmul.f32.gmra.mxu0 %v6107_v55  ;;  %1694 = vmatpush.msrb.mxu1 %v741_v10  ;;  %v881_v10 = vsel %vm477_vm0, %v6126_v54, %v880_v21  ;;  %v736_v21 = vld [vmem:[%s9148_s1 + $0x108] sm:$0xff] }
  0xa9   : > { %1333 = vmatmul.f32.gmra.mxu3 %v919_v22  ;;  %v739_v22 = vld [vmem:[%s9148_s1 + $0x120] sm:$0xff] }
  0xaa   : > { %1695 = vmatpush.msrb.mxu1 %v740_v13  ;;  %v923_v13 = vrot.slane %v797_v7, 1 }
  0xab   : > { %1285 = vmatmul.f32.gmra.mxu1 %v6141_v16 }
  0xac   : > { %1223 = vmatmul.f32.gmra.mxu2 %v794_v41  ;;  %1696 = vmatpush.msrb.mxu1 %v739_v22  ;;  %v737_v41 = vld [vmem:[%s9148_s1 + $0x110] sm:$0xff]  ;;  %v882_v22 = vrot.slane %v6159_v47, 1 }
  0xae   : > { %1697 = vmatpush.msrb.mxu1 %v738_v38  ;;  %v924_v38 = vsel %vm477_vm0, %v922_v36, %v923_v13  ;;  %v5161_v36 = vld [vmem:[%s9148_s1 + $0x3f0] sm:$0xff] }
  0xaf   : > { %2282 = vmatpush.msra.mxu3 %v5161_v36 }
  0xb0   : > { %1178 = vmatmul.f32.gmra.mxu0 %v6159_v47  ;;  %1698 = vmatpush.msrb.mxu1 %v737_v41  ;;  %v478_v41 = vrot.slane %v5360_v5, 1 }
  0xb1   : > { %1336 = vmatmul.f32.gmra.mxu3 %v921_v44  ;;  %v735_v44 = vld [vmem:[%s9148_s1 + $0x100] sm:$0xff] }
  0xb2   : > { %1699 = vmatpush.msrb.mxu1 %v736_v21  ;;  %v925_v21 = vrot.slane %v798_v57, 1  ;;  %v481_v57 = vrot.slane %v383_v29, 1 }
  0xb3   : > { %1288 = vmatmul.f32.gmra.mxu1 %v881_v10  ;;  %v6193_v10 = vsel %vm477_vm0, %v882_v22, %v6184_v24  ;;  %v6204_v22 = vpop.f32.mrf.mxu0 }
  0xb4   : > { %1226 = vmatmul.f32.gmra.mxu2 %v796_v48  ;;  %1700 = vmatpush.msrb.mxu1 %v735_v44  ;;  %v5145_v48 = vld [vmem:[%s9148_s1 + $0x370] sm:$0xff]  ;;  %v885_v44 = vrot.slane %v6195_v33, 1 }
  0xb5   : > { %2169 = vmatpush.msra.mxu2 %v5145_v48  ;;  %v5177_v48 = vld [vmem:[%s9148_s1 + $0x470] sm:$0xff] }
  0xb6   : > { %v886_v4 = vsel %vm477_vm0, %v6184_v24, %v885_v44  ;;  %2395 = vmatpush.msra.mxu0 %v5177_v48  ;;  %v962_v44 = vrot.slane %v5789_v2, 2 }
  0xb8   : > { %1181 = vmatmul.f32.gmra.mxu0 %v6171_v43  ;;  %v963_v48 = vsel %vm590_vm1, %v6210_v32, %v962_v44 }
  0xb9   : > { %1339 = vmatmul.f32.gmra.mxu3 %v924_v38  ;;  %v926_v38 = vsel %vm477_vm0, %v923_v13, %v925_v21  ;;  %v591_v13 = vrot.slane %v5360_v5, 2  ;;  %v482_v21 = vsel %vm477_vm0, %v478_v41, %v481_v57 }
  0xbb   : > { %1291 = vmatmul.f32.gmra.mxu1 %v6193_v10 }
  0xbc   : > { %1229 = vmatmul.f32.gmra.mxu2 %v797_v7  ;;  %v961_v7 = vsel %vm590_vm1, %v959_v56, %v6210_v32  ;;  %v5160_v56 = vld [vmem:[%s9148_s1 + $0x3e8] sm:$0xff] }
  0xbd   : > { %2283 = vmatpush.msra.mxu3 %v5160_v56  ;;  %v966_v56 = vsel %vm590_vm1, %v964_v18, %v6239_v60  ;;  %v5143_v18 = vld [vmem:[%s9148_s1 + $0x360] sm:$0xff] }
  0xc0   : > { %1588 = vmatmul.f32.vlgmr.msrb.gmra.mxu0 %v478_v41  ;;  %v594_v41 = vrot.slane %v383_v29, 2 }
  0xc1   : > { %1342 = vmatmul.f32.gmra.mxu3 %v926_v38 }
  0xc2   : > { %v595_v44 = vsel %vm590_vm1, %v591_v13, %v594_v41 }
  0xc3   : > { %1294 = vmatmul.f32.gmra.mxu1 %v886_v4  ;;  %v5144_v4 = vld [vmem:[%s9148_s1 + $0x368] sm:$0xff] }
  0xc4   : > { %1362 = vmatmul.f32.vlgmr.msrb.gmra.mxu2 %v961_v7 }
  0xc5   : > { %v6219_v36 = vpop.f32.mrf.mxu0  ;;  %2170 = vmatpush.msra.mxu2 %v5144_v4  ;;  %v486_v4 = vrot.slane %v386_v26, 1 }
  0xc7   : > { %v1185_v38 = vpop.f32.mrf.mxu2  ;;  %2171 = vmatpush.msra.mxu2 %v5143_v18 }
  0xc8   : > { %v6223_v53 = vpop.f32.mrf.mxu1  ;;  %1591 = vmatmul.f32.gmra.mxu0 %v482_v21 }
  0xc9   : > { %1475 = vmatmul.f32.vlgmr.msrb.gmra.mxu3 %v5360_v5 }
  0xcb   : > { %1701 = vmatmul.f32.vlgmr.msrb.gmra.mxu1 %v591_v13 }
  0xcc   : > { %v1298_v2 = vpop.f32.mrf.mxu3  ;;  %1365 = vmatmul.f32.gmra.mxu2 %v963_v48 }
  0xcd   : > { %v6233_v57 = vpop.f32.mrf.mxu0  ;;  %v6235_v21 = vadd.f32 %v1298_v2, %v1185_v38  ;;  %v5176_v38 = vld [vmem:[%s9148_s1 + $0x468] sm:$0xff] }
  0xce   : > { %2396 = vmatpush.msra.mxu0 %v5176_v38 }
  0xcf   : > { %v1188_v29 = vpop.f32.mrf.mxu2 }
  0xd0   : > { %v6241_v50 = vpop.f32.mrf.mxu1  ;;  %1594 = vmatmul.f32.gmra.mxu0 %v5793_v3  ;;  %v487_v3 = vsel %vm477_vm0, %v5785_v63, %v486_v4 }
  0xd1   : > { %1478 = vmatmul.f32.gmra.mxu3 %v5360_v5  ;;  %v967_v5 = vrot.slane %v5849_v30, 2  ;;  %v599_v30 = vrot.slane %v386_v26, 2 }
  0xd3   : > { %1704 = vmatmul.f32.gmra.mxu1 %v595_v44  ;;  %v5159_v44 = vld [vmem:[%s9148_s1 + $0x3e0] sm:$0xff]  ;;  %v968_v63 = vsel %vm590_vm1, %v6239_v60, %v967_v5  ;;  %v600_v26 = vsel %vm590_vm1, %v6210_v32, %v599_v30 }
  0xd4   : > { %v1301_v48 = vpop.f32.mrf.mxu3  ;;  %1368 = vmatmul.f32.gmra.mxu2 %v966_v56  ;;  %2284 = vmatpush.msra.mxu3 %v5159_v44 }
  0xd5   : > { %v6250_v2 = vpop.f32.mrf.mxu0  ;;  %v6254_v49 = vadd.f32 %v1301_v48, %v1188_v29  ;;  %v969_v48 = vrot.slane %v5862_v37, 2 }
  0xd7   : > { %v1191_v41 = vpop.f32.mrf.mxu2 }
  0xd8   : > { %v6257_v13 = vpop.f32.mrf.mxu1  ;;  %1597 = vmatmul.f32.gmra.mxu0 %v487_v3  ;;  %v6274_v3 = vrot.slane %v5876_v52, 2 }
  0xd9   : > { %1481 = vmatmul.f32.gmra.mxu3 %v5690_v34  ;;  %v389_v34 = vld [vmem:[#allocation2 + $0x40] sm:$0x3] }
  0xda   : > { %v491_v5 = vrot.slane %v389_v34, 1  ;;  %v971_v18 = vsel %vm590_vm1, %v969_v48, %v6274_v3  ;;  %v5142_v48 = vld [vmem:[%s9148_s1 + $0x358] sm:$0xff] }
  0xdb   : > { %1707 = vmatmul.f32.gmra.mxu1 %v961_v7  ;;  %2172 = vmatpush.msra.mxu2 %v5142_v48 }
  0xdc   : > { %v1304_v29 = vpop.f32.mrf.mxu3  ;;  %1371 = vmatmul.f32.gmra.mxu2 %v968_v63 }
  0xdd   : > { %v6268_v4 = vpop.f32.mrf.mxu0  ;;  %v6270_v38 = vadd.f32 %v1304_v29, %v1191_v41  ;;  %v5175_v41 = vld [vmem:[%s9148_s1 + $0x460] sm:$0xff] }
  0xde   : > { %2397 = vmatpush.msra.mxu0 %v5175_v41 }
  0xdf   : > { %v1194_v7 = vpop.f32.mrf.mxu2 }
  0xe0   : > { %v6276_v46 = vpop.f32.mrf.mxu1  ;;  %1600 = vmatmul.f32.gmra.mxu0 %v5847_v28  ;;  %v492_v28 = vsel %vm477_vm0, %v5837_v25, %v491_v5 }
  0xe1   : > { %1484 = vmatmul.f32.gmra.mxu3 %v5780_v62  ;;  %v972_v62 = vrot.slane %v5905_v8, 2  ;;  %v604_v8 = vrot.slane %v389_v34, 2 }
  0xe3   : > { %1710 = vmatmul.f32.gmra.mxu1 %v600_v26  ;;  %v5158_v26 = vld [vmem:[%s9148_s1 + $0x3d8] sm:$0xff]  ;;  %v973_v25 = vsel %vm590_vm1, %v6274_v3, %v972_v62 }
  0xe4   : > { %v1307_v44 = vpop.f32.mrf.mxu3  ;;  %1374 = vmatmul.f32.gmra.mxu2 %v971_v18  ;;  %2285 = vmatpush.msra.mxu3 %v5158_v26 }
  0xe5   : > { %v6287_v63 = vpop.f32.mrf.mxu0  ;;  %v6291_v32 = vadd.f32 %v1307_v44, %v1194_v7  ;;  %v974_v44 = vrot.slane %v5918_v20, 2 }
  0xe7   : > { %v1197_v29 = vpop.f32.mrf.mxu2 }
  0xe8   : > { %v6294_v30 = vpop.f32.mrf.mxu1  ;;  %1603 = vmatmul.f32.gmra.mxu0 %v492_v28  ;;  %v6311_v28 = vrot.slane %v5932_v31, 2 }
  0xe9   : > { %1487 = vmatmul.f32.gmra.mxu3 %v5806_v9  ;;  %v392_v9 = vld [vmem:[#allocation2 + $0x58] sm:$0x3] }
  0xea   : > { %v496_v62 = vrot.slane %v392_v9, 1  ;;  %v976_v48 = vsel %vm590_vm1, %v974_v44, %v6311_v28  ;;  %v5141_v44 = vld [vmem:[%s9148_s1 + $0x350] sm:$0xff] }
  0xeb   : > { %1713 = vmatmul.f32.gmra.mxu1 %v966_v56  ;;  %v605_v56 = vsel %vm590_vm1, %v6239_v60, %v604_v8  ;;  %2173 = vmatpush.msra.mxu2 %v5141_v44 }
  0xec   : > { %v1310_v7 = vpop.f32.mrf.mxu3  ;;  %1377 = vmatmul.f32.gmra.mxu2 %v973_v25 }
  0xed   : > { %v6305_v5 = vpop.f32.mrf.mxu0  ;;  %v6307_v41 = vadd.f32 %v1310_v7, %v1197_v29  ;;  %v5174_v29 = vld [vmem:[%s9148_s1 + $0x458] sm:$0xff] }
  0xee   : > { %2398 = vmatpush.msra.mxu0 %v5174_v29 }
  0xef   : > { %v1200_v34 = vpop.f32.mrf.mxu2 }
  0xf0   : > { %v6313_v45 = vpop.f32.mrf.mxu1  ;;  %1606 = vmatmul.f32.gmra.mxu0 %v5903_v6  ;;  %v497_v6 = vsel %vm477_vm0, %v5893_v1, %v496_v62 }
  0xf1   : > { %1490 = vmatmul.f32.gmra.mxu3 %v5820_v17  ;;  %v977_v17 = vrot.slane %v5961_v61, 2  ;;  %v609_v61 = vrot.slane %v392_v9, 2 }
  0xf3   : > { %1716 = vmatmul.f32.gmra.mxu1 %v605_v56  ;;  %v5157_v56 = vld [vmem:[%s9148_s1 + $0x3d0] sm:$0xff]  ;;  %v978_v1 = vsel %vm590_vm1, %v6311_v28, %v977_v17 }
  0xf4   : > { %v1313_v26 = vpop.f32.mrf.mxu3  ;;  %1380 = vmatmul.f32.gmra.mxu2 %v976_v48  ;;  %2286 = vmatpush.msra.mxu3 %v5157_v56 }
  0xf5   : > { %v6324_v25 = vpop.f32.mrf.mxu0  ;;  %v6328_v60 = vadd.f32 %v1313_v26, %v1200_v34  ;;  %v979_v26 = vrot.slane %v5974_v15, 2 }
  0xf7   : > { %v1203_v7 = vpop.f32.mrf.mxu2 }
  0xf8   : > { %v6331_v8 = vpop.f32.mrf.mxu1  ;;  %1609 = vmatmul.f32.gmra.mxu0 %v497_v6  ;;  %v6348_v6 = vrot.slane %v5988_v35, 2 }
  0xf9   : > { %1493 = vmatmul.f32.gmra.mxu3 %v5862_v37  ;;  %v395_v37 = vld [vmem:[#allocation2 + $0x70] sm:$0x3] }
  0xfa   : > { %v501_v17 = vrot.slane %v395_v37, 1  ;;  %v981_v44 = vsel %vm590_vm1, %v979_v26, %v6348_v6  ;;  %v5140_v26 = vld [vmem:[%s9148_s1 + $0x348] sm:$0xff] }
  0xfb   : > { %1719 = vmatmul.f32.gmra.mxu1 %v971_v18  ;;  %v610_v18 = vsel %vm590_vm1, %v6274_v3, %v609_v61  ;;  %2174 = vmatpush.msra.mxu2 %v5140_v26 }
  0xfc   : > { %v1316_v34 = vpop.f32.mrf.mxu3  ;;  %1383 = vmatmul.f32.gmra.mxu2 %v978_v1 }
  0xfd   : > { %v6342_v62 = vpop.f32.mrf.mxu0  ;;  %v6344_v29 = vadd.f32 %v1316_v34, %v1203_v7  ;;  %v5173_v7 = vld [vmem:[%s9148_s1 + $0x450] sm:$0xff] }
  0xfe   : > { %2399 = vmatpush.msra.mxu0 %v5173_v7 }
  0xff   : > { %v1206_v9 = vpop.f32.mrf.mxu2 }
 0x100   : > { %v6350_v14 = vpop.f32.mrf.mxu1  ;;  %1612 = vmatmul.f32.gmra.mxu0 %v5959_v58  ;;  %v502_v58 = vsel %vm477_vm0, %v5949_v51, %v501_v17 }
 0x101   : > { %1496 = vmatmul.f32.gmra.mxu3 %v5876_v52  ;;  %v982_v52 = vrot.slane %v6017_v19, 2  ;;  %v614_v19 = vrot.slane %v395_v37, 2 }
 0x103   : > { %1722 = vmatmul.f32.gmra.mxu1 %v610_v18  ;;  %v5156_v18 = vld [vmem:[%s9148_s1 + $0x3c8] sm:$0xff]  ;;  %v983_v51 = vsel %vm590_vm1, %v6348_v6, %v982_v52 }
 0x104   : > { %v1319_v56 = vpop.f32.mrf.mxu3  ;;  %1386 = vmatmul.f32.gmra.mxu2 %v981_v44  ;;  %2287 = vmatpush.msra.mxu3 %v5156_v18 }
 0x105   : > { %v6361_v1 = vpop.f32.mrf.mxu0  ;;  %v6365_v3 = vadd.f32 %v1319_v56, %v1206_v9  ;;  %v984_v56 = vrot.slane %v6030_v42, 2 }
 0x107   : > { %9253 = vst [vmem:[#allocation38_spill] sm:$0xff] %v6365_v3  ;;  %v1209_v34 = vpop.f32.mrf.mxu2 }
 0x108   : > { %v6368_v61 = vpop.f32.mrf.mxu1  ;;  %1615 = vmatmul.f32.gmra.mxu0 %v502_v58  ;;  %v6385_v58 = vrot.slane %v6044_v27, 2 }
 0x109   : > { %1499 = vmatmul.f32.gmra.mxu3 %v5918_v20  ;;  %v398_v20 = vld [vmem:[#allocation2 + $0x88] sm:$0x3] }
 0x10a   : > { %v506_v52 = vrot.slane %v398_v20, 1  ;;  %v986_v26 = vsel %vm590_vm1, %v984_v56, %v6385_v58  ;;  %v5139_v56 = vld [vmem:[%s9148_s1 + $0x340] sm:$0xff] }
 0x10b   : > { %1725 = vmatmul.f32.gmra.mxu1 %v976_v48  ;;  %v615_v48 = vsel %vm590_vm1, %v6311_v28, %v614_v19  ;;  %2175 = vmatpush.msra.mxu2 %v5139_v56 }
 0x10c   : > { %v1322_v9 = vpop.f32.mrf.mxu3  ;;  %1389 = vmatmul.f32.gmra.mxu2 %v983_v51 }
 0x10d   : > { %v6379_v17 = vpop.f32.mrf.mxu0  ;;  %v6381_v7 = vadd.f32 %v1322_v9, %v1209_v34  ;;  %v5172_v34 = vld [vmem:[%s9148_s1 + $0x448] sm:$0xff] }
 0x10e   : > { %2400 = vmatpush.msra.mxu0 %v5172_v34 }
 0x10f   : > { %9254 = vst [vmem:[#allocation39_spill] sm:$0xff] %v6381_v7  ;;  %v1212_v37 = vpop.f32.mrf.mxu2 }
 0x110   : > { %v6387_v3 = vpop.f32.mrf.mxu1  ;;  %1618 = vmatmul.f32.gmra.mxu0 %v6015_v11  ;;  %v507_v11 = vsel %vm477_vm0, %v6005_v0, %v506_v52 }
 0x111   : > { %1502 = vmatmul.f32.gmra.mxu3 %v5932_v31  ;;  %v987_v31 = vrot.slane %v6079_v39, 2  ;;  %v619_v39 = vrot.slane %v398_v20, 2 }
 0x113   : > { %1728 = vmatmul.f32.gmra.mxu1 %v615_v48  ;;  %v5155_v48 = vld [vmem:[%s9148_s1 + $0x3c0] sm:$0xff]  ;;  %v988_v0 = vsel %vm590_vm1, %v6385_v58, %v987_v31 }
 0x114   : > { %v1325_v18 = vpop.f32.mrf.mxu3  ;;  %1392 = vmatmul.f32.gmra.mxu2 %v986_v26  ;;  %2288 = vmatpush.msra.mxu3 %v5155_v48 }
 0x115   : > { %v6398_v51 = vpop.f32.mrf.mxu0  ;;  %v6402_v28 = vadd.f32 %v1325_v18, %v1212_v37  ;;  %v989_v18 = vrot.slane %v6098_v12, 2 }
 0x117   : > { %9255 = vst [vmem:[#allocation40_spill] sm:$0xff] %v6402_v28  ;;  %v1215_v9 = vpop.f32.mrf.mxu2 }
 0x118   : > { %v6405_v19 = vpop.f32.mrf.mxu1  ;;  %1621 = vmatmul.f32.gmra.mxu0 %v507_v11  ;;  %v6422_v11 = vrot.slane %v6107_v55, 2 }
 0x119   : > { %1505 = vmatmul.f32.gmra.mxu3 %v5974_v15  ;;  %v401_v15 = vld [vmem:[#allocation2 + $0xa0] sm:$0x3] }
 0x11a   : > { %v511_v31 = vrot.slane %v401_v15, 1  ;;  %v991_v56 = vsel %vm590_vm1, %v989_v18, %v6422_v11  ;;  %v5138_v18 = vld [vmem:[%s9148_s1 + $0x338] sm:$0xff] }
 0x11b   : > { %1731 = vmatmul.f32.gmra.mxu1 %v981_v44  ;;  %v620_v44 = vsel %vm590_vm1, %v6348_v6, %v619_v39  ;;  %2176 = vmatpush.msra.mxu2 %v5138_v18 }
 0x11c   : > { %v1328_v37 = vpop.f32.mrf.mxu3  ;;  %1395 = vmatmul.f32.gmra.mxu2 %v988_v0 }
 0x11d   : > { %v6416_v52 = vpop.f32.mrf.mxu0  ;;  %v6418_v34 = vadd.f32 %v1328_v37, %v1215_v9  ;;  %v5171_v9 = vld [vmem:[%s9148_s1 + $0x440] sm:$0xff] }
 0x11e   : > { %2401 = vmatpush.msra.mxu0 %v5171_v9 }
 0x11f   : > { %9256 = vst [vmem:[#allocation41_spill] sm:$0xff] %v6418_v34  ;;  %v1218_v20 = vpop.f32.mrf.mxu2 }
 0x120   : > { %v6424_v28 = vpop.f32.mrf.mxu1  ;;  %1624 = vmatmul.f32.gmra.mxu0 %v6077_v40  ;;  %v512_v40 = vsel %vm477_vm0, %v6064_v23, %v511_v31 }
 0x121   : > { %1508 = vmatmul.f32.gmra.mxu3 %v5988_v35  ;;  %v992_v35 = vrot.slane %v6143_v59, 2  ;;  %v624_v59 = vrot.slane %v401_v15, 2 }
 0x123   : > { %1734 = vmatmul.f32.gmra.mxu1 %v620_v44  ;;  %v5154_v44 = vld [vmem:[%s9148_s1 + $0x3b8] sm:$0xff]  ;;  %v993_v23 = vsel %vm590_vm1, %v6422_v11, %v992_v35 }
 0x124   : > { %v1331_v48 = vpop.f32.mrf.mxu3  ;;  %1398 = vmatmul.f32.gmra.mxu2 %v991_v56  ;;  %2289 = vmatpush.msra.mxu3 %v5154_v44 }
 0x125   : > { %v6435_v0 = vpop.f32.mrf.mxu0  ;;  %v6439_v6 = vadd.f32 %v1331_v48, %v1218_v20  ;;  %v994_v48 = vrot.slane %v6159_v47, 2 }
 0x127   : > { %9257 = vst [vmem:[#allocation42_spill] sm:$0xff] %v6439_v6  ;;  %v1221_v37 = vpop.f32.mrf.mxu2 }
 0x128   : > { %v6442_v39 = vpop.f32.mrf.mxu1  ;;  %1627 = vmatmul.f32.gmra.mxu0 %v512_v40  ;;  %v6459_v40 = vrot.slane %v6171_v43, 2 }
 0x129   : > { %1511 = vmatmul.f32.gmra.mxu3 %v6030_v42  ;;  %v404_v42 = vld [vmem:[#allocation2 + $0xb8] sm:$0x3] }
 0x12a   : > { %v516_v35 = vrot.slane %v404_v42, 1  ;;  %v996_v18 = vsel %vm590_vm1, %v994_v48, %v6459_v40  ;;  %v5137_v48 = vld [vmem:[%s9148_s1 + $0x330] sm:$0xff] }
 0x12b   : > { %1737 = vmatmul.f32.gmra.mxu1 %v986_v26  ;;  %v625_v26 = vsel %vm590_vm1, %v6385_v58, %v624_v59  ;;  %2177 = vmatpush.msra.mxu2 %v5137_v48  ;;  %v5194_v48 = vld [vmem:[%s9151_s4 + $0x1f8] sm:$0xff] }
 0x12c   : > { %v1334_v20 = vpop.f32.mrf.mxu3  ;;  %1401 = vmatmul.f32.gmra.mxu2 %v993_v23  ;;  %3412 = vmatpush.msra.mxu1 %v5194_v48 }
 0x12d   : > { %v6453_v31 = vpop.f32.mrf.mxu0  ;;  %v6455_v9 = vadd.f32 %v1334_v20, %v1221_v37  ;;  %v5170_v37 = vld [vmem:[%s9148_s1 + $0x438] sm:$0xff] }
 0x12e   : > { %2402 = vmatpush.msra.mxu0 %v5170_v37 }
 0x12f   : > { %9258 = vst [vmem:[#allocation43_spill] sm:$0xff] %v6455_v9  ;;  %v1224_v15 = vpop.f32.mrf.mxu2 }
 0x130   : > { %v6461_v6 = vpop.f32.mrf.mxu1  ;;  %1630 = vmatmul.f32.gmra.mxu0 %v6141_v16  ;;  %v517_v16 = vsel %vm477_vm0, %v6126_v54, %v516_v35 }
 0x131   : > { %1514 = vmatmul.f32.gmra.mxu3 %v6044_v27  ;;  %v997_v27 = vrot.slane %v6195_v33, 2  ;;  %v629_v33 = vrot.slane %v404_v42, 2 }
 0x133   : > { %1740 = vmatmul.f32.gmra.mxu1 %v625_v26  ;;  %v5153_v26 = vld [vmem:[%s9148_s1 + $0x3b0] sm:$0xff]  ;;  %v998_v54 = vsel %vm590_vm1, %v6459_v40, %v997_v27 }
 0x134   : > { %v1337_v44 = vpop.f32.mrf.mxu3  ;;  %1404 = vmatmul.f32.gmra.mxu2 %v996_v18  ;;  %2290 = vmatpush.msra.mxu3 %v5153_v26 }
 0x135   : > { %v6472_v23 = vpop.f32.mrf.mxu0  ;;  %v6476_v58 = vadd.f32 %v1337_v44, %v1224_v15  ;;  %v5361_v44 = vld [vmem:[#allocation2 + $0xd8] sm:$0xff] }
 0x137   : > { %9259 = vst [vmem:[#allocation44_spill] sm:$0xff] %v6476_v58  ;;  %v1227_v20 = vpop.f32.mrf.mxu2  ;;  %v5362_v58 = vld [vmem:[#allocation2 + $0xe0] sm:$0xff] }
 0x138   : > { %v6479_v59 = vpop.f32.mrf.mxu1  ;;  %1633 = vmatmul.f32.gmra.mxu0 %v517_v16  ;;  %v999_v16 = vrot.slane %v5361_v44, 2  ;;  %v1000_v9 = vrot.slane %v5362_v58, 2 }
 0x139   : > { %1517 = vmatmul.f32.gmra.mxu3 %v6098_v12  ;;  %v407_v12 = vld [vmem:[#allocation2 + $0xd0] sm:$0x3] }
 0x13a   : > { %v521_v42 = vrot.slane %v407_v12, 1  ;;  %v1001_v58 = vsel %vm590_vm1, %v999_v16, %v1000_v9  ;;  %v1251_v16 = vadd.f32 %v6223_v53, %v6204_v22  ;;  %v634_v22 = vrot.slane %v407_v12, 2 }
 0x13b   : > { %1743 = vmatmul.f32.gmra.mxu1 %v991_v56  ;;  %v630_v56 = vsel %vm590_vm1, %v6422_v11, %v629_v33  ;;  %v6511_v33 = vld [vmem:[#allocation2 + $0xe0] sm:$0xff] }
 0x13c   : > { %v1340_v15 = vpop.f32.mrf.mxu3  ;;  %1407 = vmatmul.f32.gmra.mxu2 %v998_v54  ;;  %v522_v11 = vsel %vm477_vm0, %v6184_v24, %v521_v42  ;;  %v5152_v42 = vld [vmem:[%s9148_s1 + $0x3a8] sm:$0xff] }
 0x13d   : > { %v1589_v35 = vpop.f32.mrf.mxu0  ;;  %v6490_v37 = vadd.f32 %v1340_v15, %v1227_v20  ;;  %v5169_v20 = vld [vmem:[%s9148_s1 + $0x430] sm:$0xff]  ;;  %v5363_v15 = vld [vmem:[#allocation2 + $0xe8] sm:$0x3]  ;;  %2291 = vmatpush.msra.mxu3 %v5152_v42 }
 0x13e   : > { %2403 = vmatpush.msra.mxu0 %v5169_v20  ;;  %v1002_v44 = vrot.slane %v5363_v15, 2  ;;  %v6528_v15 = vld [vmem:[#allocation2 + $0xe8] sm:$0x3] }
 0x13f   : > { %9260 = vst [vmem:[#allocation45_spill] sm:$0xff] %v6490_v37  ;;  %v1230_v27 = vpop.f32.mrf.mxu2  ;;  %v524_v37 = vrot.slane %v6511_v33, 1 }
 0x140   : > { %v6492_v34 = vpop.f32.mrf.mxu1  ;;  %1636 = vmatmul.f32.gmra.mxu0 %v6193_v10  ;;  %v1003_v53 = vsel %vm590_vm1, %v1000_v9, %v1002_v44  ;;  %v1254_v9 = vadd.f32 %v6241_v50, %v6219_v36  ;;  %v635_v44 = vsel %vm590_vm1, %v6459_v40, %v634_v22  ;;  %v5193_v50 = vld [vmem:[%s9151_s4 + $0x1f0] sm:$0xff] }
 0x141   : > { %1520 = vmatmul.f32.gmra.mxu3 %v6107_v55  ;;  %v6509_v55 = vld [vmem:[#allocation2 + $0xd8] sm:$0xff]  ;;  %3413 = vmatpush.msra.mxu1 %v5193_v50  ;;  %v5135_v50 = vld [vmem:[%s9148_s1 + $0x320] sm:$0xff] }
 0x142   : > { %v523_v48 = vrot.slane %v6509_v55, 1  ;;  %v636_v40 = vrot.slane %v6509_v55, 2 }
 0x143   : > { %1746 = vmatmul.f32.gmra.mxu1 %v630_v56 }
 0x144   : > { %v1343_v10 = vpop.f32.mrf.mxu3  ;;  %1410 = vmatmul.f32.gmra.mxu2 %v1001_v58 }
 0x145   : > { %v1592_v26 = vpop.f32.mrf.mxu0  ;;  %v6507_v54 = vadd.f32 %v1343_v10, %v1230_v27  ;;  %v5136_v27 = vld [vmem:[%s9148_s1 + $0x328] sm:$0xff] }
 0x146   : > { %2178 = vmatpush.msra.mxu2 %v5136_v27 }
 0x147   : > { %9261 = vst [vmem:[#allocation46_spill] sm:$0xff] %v6507_v54  ;;  %v1363_v20 = vpop.f32.mrf.mxu2  ;;  %v5365_v54 = vld [vmem:[#allocation2 + $0xf8] sm:$0xff] }
 0x148   : > { %1639 = vmatmul.f32.gmra.mxu0 %v522_v11  ;;  %v1702_v56 = vpop.f32.mrf.mxu1  ;;  %v1364_v24 = vadd.f32 %v1363_v20, %v1251_v16  ;;  %v5364_v16 = vld [vmem:[#allocation2 + $0xf0] sm:$0xff]  ;;  %v1005_v7 = vrot.slane %v5365_v54, 2  ;;  %v5168_v54 = vld [vmem:[%s9148_s1 + $0x428] sm:$0xff]  ;;  %2179 = vmatpush.msra.mxu2 %v5135_v50  ;;  %v5167_v50 = vld [vmem:[%s9148_s1 + $0x420] sm:$0xff] }
 0x149   : > { %1523 = vmatmul.f32.gmra.mxu3 %v6159_v47  ;;  %v525_v47 = vsel %vm477_vm0, %v523_v48, %v524_v37  ;;  %v1004_v20 = vrot.slane %v5364_v16, 2  ;;  %v526_v48 = vrot.slane %v6528_v15, 1  ;;  %2404 = vmatpush.msra.mxu0 %v5168_v54 }
 0x14b   : > { %1749 = vmatmul.f32.gmra.mxu1 %v996_v18  ;;  %v1006_v36 = vsel %vm590_vm1, %v1004_v20, %v1005_v7  ;;  %v1257_v20 = vadd.f32 %v6257_v13, %v6233_v57  ;;  %v5151_v57 = vld [vmem:[%s9148_s1 + $0x3a0] sm:$0xff]  ;;  %2405 = vmatpush.msra.mxu0 %v5167_v50 }
 0x14c   : > { %v1476_v58 = vpop.f32.mrf.mxu3  ;;  %1413 = vmatmul.f32.gmra.mxu2 %v1003_v53  ;;  %v527_v53 = vsel %vm477_vm0, %v524_v37, %v526_v48  ;;  %2292 = vmatpush.msra.mxu3 %v5151_v57 }
 0x14d   : > { %v6525_v10 = vpop.f32.mrf.mxu0  ;;  %v1477_v11 = vadd.f32 %v1476_v58, %v1364_v24  ;;  %v6550_v58 = vld [vmem:[#allocation2 + $0xf0] sm:$0xff] }
 0x14e   : > { %v528_v54 = vrot.slane %v6550_v58, 1 }
 0x14f   : > { %v1590_v18 = vadd.f32 %v1589_v35, %v1477_v11  ;;  %v1366_v27 = vpop.f32.mrf.mxu2  ;;  %v637_v35 = vrot.slane %v6511_v33, 2  ;;  %v5366_v11 = vld [vmem:[#allocation2 + $0x100] sm:$0x3] }
 0x150   : > { %1642 = vmatmul.f32.gmra.mxu0 %v525_v47  ;;  %v1705_v12 = vpop.f32.mrf.mxu1  ;;  %v1367_v42 = vadd.f32 %v1366_v27, %v1254_v9  ;;  %v6552_v47 = vld [vmem:[#allocation2 + $0xf8] sm:$0xff]  ;;  %v1007_v16 = vrot.slane %v5366_v11, 2  ;;  %v5368_v11 = vld [vmem:[#allocation2 + $0x110] sm:$0xff] }
 0x151   : > { %1526 = vmatmul.f32.gmra.mxu3 %v6171_v43  ;;  %v6536_v24 = vadd.f32 %v1702_v56, %v1590_v18  ;;  %v529_v37 = vrot.slane %v6552_v47, 1 }
 0x152   : > { %v1008_v13 = vsel %vm590_vm1, %v1005_v7, %v1007_v16  ;;  %v1260_v7 = vadd.f32 %v6276_v46, %v6250_v2  ;;  %v5192_v46 = vld [vmem:[%s9151_s4 + $0x1e8] sm:$0xff] }
 0x153   : > { %1752 = vmatmul.f32.gmra.mxu1 %v635_v44  ;;  %v638_v44 = vsel %vm590_vm1, %v636_v40, %v637_v35 }
 0x154   : > { %v1479_v43 = vpop.f32.mrf.mxu3  ;;  %1416 = vmatmul.f32.gmra.mxu2 %v1006_v36  ;;  %3414 = vmatpush.msra.mxu1 %v5192_v46 }
 0x155   : > { %v6547_v56 = vpop.f32.mrf.mxu0  ;;  %v1480_v22 = vadd.f32 %v1479_v43, %v1367_v42  ;;  %v6573_v43 = vld [vmem:[#allocation2 + $0x100] sm:$0x3] }
 0x157   : > { %v1593_v9 = vadd.f32 %v1592_v26, %v1480_v22  ;;  %v1369_v27 = vpop.f32.mrf.mxu2  ;;  %v639_v26 = vrot.slane %v6528_v15, 2 }
 0x158   : > { %1645 = vmatmul.f32.gmra.mxu0 %v527_v53  ;;  %v1708_v18 = vpop.f32.mrf.mxu1  ;;  %v1370_v42 = vadd.f32 %v1369_v27, %v1257_v20  ;;  %v5367_v53 = vld [vmem:[#allocation2 + $0x108] sm:$0xff]  ;;  %v1010_v20 = vrot.slane %v5368_v11, 2  ;;  %v531_v27 = vrot.slane %v6573_v43, 1 }
 0x159   : > { %1529 = vmatmul.f32.gmra.mxu3 %v6509_v55  ;;  %v6560_v48 = vadd.f32 %v1705_v12, %v1593_v9  ;;  %v530_v12 = vsel %vm477_vm0, %v528_v54, %v529_v37  ;;  %v1009_v22 = vrot.slane %v5367_v53, 2  ;;  %v640_v9 = vsel %vm590_vm1, %v637_v35, %v639_v26  ;;  %v6595_v26 = vld [vmem:[#allocation2 + $0x108] sm:$0xff] }
 0x15a   : > { %v642_v35 = vrot.slane %v6552_v47, 2  ;;  %v532_v57 = vsel %vm477_vm0, %v529_v37, %v531_v27  ;;  %v1263_v53 = vadd.f32 %v6294_v30, %v6268_v4  ;;  %v533_v37 = vrot.slane %v6595_v26, 1  ;;  %v5134_v4 = vld [vmem:[%s9148_s1 + $0x318] sm:$0xff] }
 0x15b   : > { %1755 = vmatmul.f32.gmra.mxu1 %v638_v44  ;;  %v1011_v2 = vsel %vm590_vm1, %v1009_v22, %v1010_v20  ;;  %v5150_v30 = vld [vmem:[%s9148_s1 + $0x398] sm:$0xff]  ;;  %2180 = vmatpush.msra.mxu2 %v5134_v4 }
 0x15c   : > { %v1482_v36 = vpop.f32.mrf.mxu3  ;;  %1419 = vmatmul.f32.gmra.mxu2 %v1008_v13  ;;  %2293 = vmatpush.msra.mxu3 %v5150_v30  ;;  %v6641_v30 = vld [vmem:[#allocation2 + $0x120] sm:$0xff] }
 0x15d   : > { %v6570_v55 = vpop.f32.mrf.mxu0  ;;  %v1483_v40 = vadd.f32 %v1482_v36, %v1370_v42  ;;  %v6597_v36 = vld [vmem:[#allocation2 + $0x110] sm:$0xff] }
 0x15f   : > { %v1596_v16 = vadd.f32 %v6525_v10, %v1483_v40  ;;  %v1372_v44 = vpop.f32.mrf.mxu2  ;;  %v641_v10 = vrot.slane %v6550_v58, 2 }
 0x160   : > { %1648 = vmatmul.f32.gmra.mxu0 %v530_v12  ;;  %v1711_v15 = vpop.f32.mrf.mxu1  ;;  %v1373_v42 = vadd.f32 %v1372_v44, %v1260_v7  ;;  %v5369_v12 = vld [vmem:[#allocation2 + $0x118] sm:$0x3] }
 0x161   : > { %1532 = vmatmul.f32.gmra.mxu3 %v6511_v33  ;;  %v6581_v54 = vadd.f32 %v1708_v18, %v1596_v16  ;;  %v1012_v40 = vrot.slane %v5369_v12, 2  ;;  %v643_v7 = vsel %vm590_vm1, %v641_v10, %v642_v35  ;;  %v5370_v10 = vld [vmem:[#allocation2 + $0x120] sm:$0xff] }
 0x163   : > { %1758 = vmatmul.f32.gmra.mxu1 %v640_v9  ;;  %v534_v9 = vrot.slane %v6597_v36, 1 }
 0x164   : > { %v1485_v33 = vpop.f32.mrf.mxu3  ;;  %1422 = vmatmul.f32.gmra.mxu2 %v1011_v2  ;;  %v6619_v2 = vld [vmem:[#allocation2 + $0x118] sm:$0x3] }
 0x165   : > { %v6592_v18 = vpop.f32.mrf.mxu0  ;;  %v1486_v13 = vadd.f32 %v1485_v33, %v1373_v42  ;;  %v644_v42 = vrot.slane %v6573_v43, 2  ;;  %v1014_v33 = vrot.slane %v5370_v10, 2 }
 0x167   : > { %v1599_v22 = vadd.f32 %v6547_v56, %v1486_v13  ;;  %v1375_v16 = vpop.f32.mrf.mxu2  ;;  %v1013_v56 = vsel %vm590_vm1, %v1010_v20, %v1012_v40  ;;  %v1266_v20 = vadd.f32 %v6313_v45, %v6287_v63  ;;  %v645_v43 = vsel %vm590_vm1, %v642_v35, %v644_v42  ;;  %v5191_v45 = vld [vmem:[%s9151_s4 + $0x1e0] sm:$0xff]  ;;  %v5372_v42 = vld [vmem:[#allocation2 + $0x130] sm:$0x3] }
 0x168   : > { %1651 = vmatmul.f32.gmra.mxu0 %v532_v57  ;;  %v1714_v11 = vpop.f32.mrf.mxu1  ;;  %v1376_v27 = vadd.f32 %v1375_v16, %v1263_v53  ;;  %v5371_v57 = vld [vmem:[#allocation2 + $0x128] sm:$0xff]  ;;  %v536_v53 = vrot.slane %v6619_v2, 1  ;;  %3415 = vmatpush.msra.mxu1 %v5191_v45  ;;  %v5373_v45 = vld [vmem:[#allocation2 + $0x138] sm:$0xff] }
 0x169   : > { %1535 = vmatmul.f32.gmra.mxu3 %v6550_v58  ;;  %v6606_v44 = vadd.f32 %v1711_v15, %v1599_v22  ;;  %v535_v15 = vsel %vm477_vm0, %v533_v37, %v534_v9  ;;  %v1015_v13 = vrot.slane %v5371_v57, 2  ;;  %v5166_v37 = vld [vmem:[%s9148_s1 + $0x418] sm:$0xff]  ;;  %v538_v57 = vrot.slane %v6641_v30, 1 }
 0x16a   : > { %2406 = vmatpush.msra.mxu0 %v5166_v37  ;;  %v6665_v37 = vld [vmem:[#allocation2 + $0x130] sm:$0x3] }
 0x16b   : > { %1761 = vmatmul.f32.gmra.mxu1 %v643_v7  ;;  %v1016_v63 = vsel %vm590_vm1, %v1014_v33, %v1015_v13 }
 0x16c   : > { %v1488_v50 = vpop.f32.mrf.mxu3  ;;  %1425 = vmatmul.f32.gmra.mxu2 %v1013_v56  ;;  %v6643_v56 = vld [vmem:[#allocation2 + $0x128] sm:$0xff] }
 0x16d   : > { %v6616_v58 = vpop.f32.mrf.mxu0  ;;  %v1489_v46 = vadd.f32 %v1488_v50, %v1376_v27  ;;  %v537_v27 = vsel %vm477_vm0, %v534_v9, %v536_v53  ;;  %v1017_v50 = vrot.slane %v5372_v42, 2  ;;  %v539_v9 = vrot.slane %v6643_v56, 1 }
 0x16e   : > { %v541_v42 = vrot.slane %v6665_v37, 1 }
 0x16f   : > { %v1602_v12 = vadd.f32 %v6570_v55, %v1489_v46  ;;  %v1378_v40 = vpop.f32.mrf.mxu2  ;;  %v646_v55 = vrot.slane %v6595_v26, 2 }
 0x170   : > { %1654 = vmatmul.f32.gmra.mxu0 %v535_v15  ;;  %v1379_v7 = vadd.f32 %v1378_v40, %v1266_v20  ;;  %v1717_v16 = vpop.f32.mrf.mxu1  ;;  %v1269_v15 = vadd.f32 %v6331_v8, %v6305_v5  ;;  %v5149_v5 = vld [vmem:[%s9148_s1 + $0x390] sm:$0xff]  ;;  %v1018_v8 = vsel %vm590_vm1, %v1015_v13, %v1017_v50  ;;  %v649_v40 = vrot.slane %v6619_v2, 2 }
 0x171   : > { %1538 = vmatmul.f32.gmra.mxu3 %v6552_v47  ;;  %v6627_v22 = vadd.f32 %v1714_v11, %v1602_v12  ;;  %v647_v47 = vrot.slane %v6597_v36, 2  ;;  %v1272_v13 = vadd.f32 %v6350_v14, %v6324_v25  ;;  %v5190_v14 = vld [vmem:[%s9151_s4 + $0x1d8] sm:$0xff] }
 0x172   : > { %2294 = vmatpush.msra.mxu3 %v5149_v5  ;;  %3416 = vmatpush.msra.mxu1 %v5190_v14  ;;  %v5377_v14 = vld [vmem:[#allocation2 + $0x158] sm:$0xff] }
 0x173   : > { %1764 = vmatmul.f32.gmra.mxu1 %v645_v43  ;;  %v648_v10 = vsel %vm590_vm1, %v646_v55, %v647_v47  ;;  %v5133_v43 = vld [vmem:[%s9148_s1 + $0x310] sm:$0xff]  ;;  %v5374_v55 = vld [vmem:[#allocation2 + $0x140] sm:$0xff]  ;;  %v650_v2 = vsel %vm590_vm1, %v647_v47, %v649_v40  ;;  %v652_v47 = vrot.slane %v6643_v56, 2  ;;  %v1275_v40 = vadd.f32 %v6368_v61, %v6342_v62  ;;  %v5148_v62 = vld [vmem:[%s9148_s1 + $0x388] sm:$0xff] }
 0x174   : > { %v1491_v35 = vpop.f32.mrf.mxu3  ;;  %1428 = vmatmul.f32.gmra.mxu2 %v1016_v63  ;;  %v1019_v63 = vrot.slane %v5373_v45, 2  ;;  %2295 = vmatpush.msra.mxu3 %v5148_v62 }
 0x175   : > { %v6638_v11 = vpop.f32.mrf.mxu0  ;;  %v1492_v4 = vadd.f32 %v1491_v35, %v1379_v7  ;;  %2181 = vmatpush.msra.mxu2 %v5133_v43  ;;  %v540_v7 = vsel %vm477_vm0, %v538_v57, %v539_v9  ;;  %v1020_v35 = vrot.slane %v5374_v55, 2  ;;  %v6687_v43 = vld [vmem:[#allocation2 + $0x140] sm:$0xff] }
 0x176   : > { %v544_v45 = vrot.slane %v6687_v43, 1 }
 0x177   : > { %v1605_v46 = vadd.f32 %v6592_v18, %v1492_v4  ;;  %v1381_v33 = vpop.f32.mrf.mxu2  ;;  %v1021_v25 = vsel %vm590_vm1, %v1019_v63, %v1020_v35 }
 0x178   : > { %1657 = vmatmul.f32.gmra.mxu0 %v537_v27  ;;  %v1382_v12 = vadd.f32 %v1381_v33, %v1269_v15  ;;  %v1720_v18 = vpop.f32.mrf.mxu1  ;;  %v542_v33 = vsel %vm477_vm0, %v539_v9, %v541_v42  ;;  %v422_v42 = vld [vmem:[#allocation2 + $0x148] sm:$0x3] }
 0x179   : > { %1541 = vmatmul.f32.gmra.mxu3 %v6595_v26  ;;  %v6652_v20 = vadd.f32 %v1717_v16, %v1605_v46  ;;  %v5165_v46 = vld [vmem:[%s9148_s1 + $0x410] sm:$0xff] }
 0x17a   : > { %2407 = vmatpush.msra.mxu0 %v5165_v46 }
 0x17b   : > { %1767 = vmatmul.f32.gmra.mxu1 %v648_v10 }
 0x17c   : > { %v1494_v26 = vpop.f32.mrf.mxu3  ;;  %1431 = vmatmul.f32.gmra.mxu2 %v1018_v8  ;;  %v5375_v8 = vld [vmem:[#allocation2 + $0x148] sm:$0x3] }
 0x17d   : > { %v6662_v53 = vpop.f32.mrf.mxu0  ;;  %v1495_v16 = vadd.f32 %v1494_v26, %v1382_v12  ;;  %v6685_v12 = vld [vmem:[#allocation2 + $0x138] sm:$0xff] }
 0x17e   : > { %v543_v9 = vrot.slane %v6685_v12, 1 }
 0x17f   : > { %v1608_v27 = vadd.f32 %v6616_v58, %v1495_v16  ;;  %v1384_v4 = vpop.f32.mrf.mxu2  ;;  %v651_v58 = vrot.slane %v6641_v30, 2 }
 0x180   : > { %1660 = vmatmul.f32.gmra.mxu0 %v540_v7  ;;  %v1385_v15 = vadd.f32 %v1384_v4, %v1272_v13  ;;  %v1723_v5 = vpop.f32.mrf.mxu1  ;;  %v5132_v13 = vld [vmem:[%s9148_s1 + $0x308] sm:$0xff] }
 0x181   : > { %1544 = vmatmul.f32.gmra.mxu3 %v6597_v36  ;;  %v6673_v50 = vadd.f32 %v1720_v18, %v1608_v27  ;;  %v1022_v18 = vrot.slane %v5375_v8, 2  ;;  %v653_v7 = vsel %vm590_vm1, %v651_v58, %v652_v47  ;;  %2182 = vmatpush.msra.mxu2 %v5132_v13  ;;  %v1278_v58 = vadd.f32 %v6387_v3, %v6361_v1  ;;  %v5189_v8 = vld [vmem:[%s9151_s4 + $0x1d0] sm:$0xff] }
 0x182   : > { %v656_v3 = vrot.slane %v6685_v12, 2  ;;  %3417 = vmatpush.msra.mxu1 %v5189_v8 }
 0x183   : > { %1770 = vmatmul.f32.gmra.mxu1 %v650_v2  ;;  %v1023_v61 = vsel %vm590_vm1, %v1020_v35, %v1022_v18  ;;  %v545_v2 = vsel %vm477_vm0, %v543_v9, %v544_v45 }
 0x184   : > { %v1497_v36 = vpop.f32.mrf.mxu3  ;;  %1434 = vmatmul.f32.gmra.mxu2 %v1021_v25  ;;  %v1025_v25 = vrot.slane %v5377_v14, 2  ;;  %v425_v14 = vld [vmem:[#allocation2 + $0x160] sm:$0x3] }
 0x185   : > { %v1616_v10 = vpop.f32.mrf.mxu0  ;;  %v1498_v57 = vadd.f32 %v1497_v36, %v1385_v15  ;;  %v5376_v15 = vld [vmem:[#allocation2 + $0x150] sm:$0xff]  ;;  %v551_v8 = vrot.slane %v425_v14, 1 }
 0x186   : > { %v1024_v46 = vrot.slane %v5376_v15, 2 }
 0x187   : > { %v1611_v26 = vadd.f32 %v6638_v11, %v1498_v57  ;;  %v1387_v16 = vpop.f32.mrf.mxu2  ;;  %v654_v11 = vrot.slane %v6665_v37, 2 }
 0x188   : > { %1663 = vmatmul.f32.gmra.mxu0 %v542_v33  ;;  %v1388_v55 = vadd.f32 %v1387_v16, %v1275_v40  ;;  %v546_v33 = vrot.slane %v422_v42, 1  ;;  %v1026_v1 = vsel %vm590_vm1, %v1024_v46, %v1025_v25  ;;  %v5378_v16 = vld [vmem:[#allocation2 + $0x160] sm:$0x3] }
 0x189   : > { %1547 = vmatmul.f32.gmra.mxu3 %v6641_v30  ;;  %v6696_v63 = vadd.f32 %v1723_v5, %v1611_v26  ;;  %v655_v37 = vsel %vm590_vm1, %v652_v47, %v654_v11  ;;  %v5164_v5 = vld [vmem:[%s9148_s1 + $0x408] sm:$0xff]  ;;  %v423_v26 = vld [vmem:[#allocation2 + $0x150] sm:$0xff]  ;;  %v1027_v9 = vrot.slane %v5378_v16, 2 }
 0x18a   : > { %2408 = vmatpush.msra.mxu0 %v5164_v5  ;;  %v547_v18 = vsel %vm477_vm0, %v544_v45, %v546_v33  ;;  %v548_v11 = vrot.slane %v423_v26, 1  ;;  %v426_v16 = vld [vmem:[#allocation2 + $0x168] sm:$0xff] }
 0x18b   : > { %1773 = vmatmul.f32.gmra.mxu1 %v653_v7  ;;  %v6724_v7 = vld [vmem:[#allocation2 + $0x158] sm:$0xff] }
 0x18c   : > { %v1500_v27 = vpop.f32.mrf.mxu3  ;;  %1437 = vmatmul.f32.gmra.mxu2 %v1023_v61 }
 0x18d   : > { %v1619_v30 = vpop.f32.mrf.mxu0  ;;  %v1501_v4 = vadd.f32 %v1500_v27, %v1388_v55  ;;  %v1281_v55 = vadd.f32 %v6405_v19, %v6379_v17  ;;  %v549_v27 = vrot.slane %v6724_v7, 1  ;;  %v5147_v17 = vld [vmem:[%s9148_s1 + $0x380] sm:$0xff]  ;;  %v1028_v19 = vsel %vm590_vm1, %v1025_v25, %v1027_v9  ;;  %v6756_v9 = vld [vmem:[#allocation2 + $0x170] sm:$0xff] }
 0x18e   : > { %2296 = vmatpush.msra.mxu3 %v5147_v17  ;;  %v553_v17 = vrot.slane %v426_v16, 1 }
 0x18f   : > { %v6710_v35 = vadd.f32 %v6662_v53, %v1501_v4  ;;  %v1390_v36 = vpop.f32.mrf.mxu2  ;;  %v657_v53 = vrot.slane %v6687_v43, 2  ;;  %v550_v46 = vsel %vm477_vm0, %v548_v11, %v549_v27 }
 0x190   : > { %1666 = vmatmul.f32.gmra.mxu0 %v545_v2  ;;  %v1391_v57 = vadd.f32 %v1390_v36, %v1278_v58  ;;  %v5131_v2 = vld [vmem:[%s9148_s1 + $0x300] sm:$0xff]  ;;  %v5379_v58 = vld [vmem:[#allocation2 + $0x168] sm:$0xff]  ;;  %v5380_v36 = vld [vmem:[#allocation2 + $0x170] sm:$0xff] }
 0x191   : > { %1550 = vmatmul.f32.gmra.mxu3 %v6643_v56  ;;  %v658_v62 = vsel %vm590_vm1, %v656_v3, %v657_v53  ;;  %2183 = vmatpush.msra.mxu2 %v5131_v2  ;;  %v1030_v33 = vrot.slane %v5380_v36, 2  ;;  %v5163_v3 = vld [vmem:[%s9148_s1 + $0x400] sm:$0xff]  ;;  %v5383_v36 = vld [vmem:[#allocation2 + $0x188] sm:$0xff] }
 0x192   : > { %2409 = vmatpush.msra.mxu0 %v5163_v3 }
 0x193   : > { %1776 = vmatmul.f32.gmra.mxu1 %v655_v37  ;;  %v1029_v37 = vrot.slane %v5379_v58, 2 }
 0x194   : > { %v1503_v47 = vpop.f32.mrf.mxu3  ;;  %1440 = vmatmul.f32.gmra.mxu2 %v1026_v1 }
 0x195   : > { %v1622_v56 = vpop.f32.mrf.mxu0  ;;  %v1504_v40 = vadd.f32 %v1503_v47, %v1391_v57  ;;  %v1284_v57 = vadd.f32 %v6424_v28, %v6398_v51  ;;  %v5188_v47 = vld [vmem:[%s9151_s4 + $0x1c8] sm:$0xff]  ;;  %v1031_v51 = vsel %vm590_vm1, %v1029_v37, %v1030_v33  ;;  %v661_v28 = vrot.slane %v423_v26, 2 }
 0x196   : > { %3418 = vmatpush.msra.mxu1 %v5188_v47  ;;  %v666_v47 = vrot.slane %v426_v16, 2 }
 0x197   : > { %v6728_v13 = vadd.f32 %v1616_v10, %v1504_v40  ;;  %v1393_v61 = vpop.f32.mrf.mxu2  ;;  %v659_v10 = vrot.slane %v422_v42, 2 }
 0x198   : > { %1669 = vmatmul.f32.gmra.mxu0 %v547_v18  ;;  %v1394_v45 = vadd.f32 %v1393_v61, %v1281_v55  ;;  %v5381_v55 = vld [vmem:[#allocation2 + $0x178] sm:$0x3]  ;;  %v1287_v61 = vadd.f32 %v6442_v39, %v6416_v52 }
 0x199   : > { %1553 = vmatmul.f32.gmra.mxu3 %v6685_v12  ;;  %v660_v42 = vsel %vm590_vm1, %v657_v53, %v659_v10  ;;  %v428_v39 = vld [vmem:[#allocation2 + $0x178] sm:$0x3] }
 0x19b   : > { %1779 = vmatmul.f32.gmra.mxu1 %v658_v62  ;;  %v1032_v62 = vrot.slane %v5381_v55, 2 }
 0x19c   : > { %v1506_v4 = vpop.f32.mrf.mxu3  ;;  %1443 = vmatmul.f32.gmra.mxu2 %v1028_v19  ;;  %v554_v19 = vrot.slane %v6756_v9, 1 }
 0x19d   : > { %v1625_v15 = vpop.f32.mrf.mxu0  ;;  %v1507_v12 = vadd.f32 %v1506_v4, %v1394_v45  ;;  %v1033_v10 = vsel %vm590_vm1, %v1030_v33, %v1032_v62  ;;  %v664_v4 = vrot.slane %v425_v14, 2 }
 0x19e   : > { %v555_v58 = vsel %vm477_vm0, %v553_v17, %v554_v19 }
 0x19f   : > { %v6743_v5 = vadd.f32 %v1619_v30, %v1507_v12  ;;  %v1396_v25 = vpop.f32.mrf.mxu2  ;;  %v662_v30 = vrot.slane %v6724_v7, 2 }
 0x1a0   : > { %1672 = vmatmul.f32.gmra.mxu0 %v550_v46  ;;  %v1397_v1 = vadd.f32 %v1396_v25, %v1284_v57  ;;  %v1035_v57 = vrot.slane %v5383_v36, 2  ;;  %v556_v25 = vrot.slane %v428_v39, 1 }
 0x1a1   : > { %1556 = vmatmul.f32.gmra.mxu3 %v6687_v43  ;;  %v552_v43 = vsel %vm477_vm0, %v549_v27, %v551_v8  ;;  %v663_v45 = vsel %vm590_vm1, %v661_v28, %v662_v30  ;;  %v665_v33 = vsel %vm590_vm1, %v662_v30, %v664_v4  ;;  %v1799_v30 = vld [vmem:[#allocation2 + $0x30] sm:$0xff] }
 0x1a2   : > { %v1895_v36 = vrot.slane %v1799_v30, 1 }
 0x1a3   : > { %1782 = vmatmul.f32.gmra.mxu1 %v660_v42  ;;  %v1290_v42 = vadd.f32 %v6461_v6, %v6435_v0  ;;  %v667_v0 = vrot.slane %v6756_v9, 2 }
 0x1a4   : > { %v1509_v53 = vpop.f32.mrf.mxu3  ;;  %1446 = vmatmul.f32.gmra.mxu2 %v1031_v51  ;;  %v557_v51 = vsel %vm477_vm0, %v554_v19, %v556_v25 }
 0x1a5   : > { %v1628_v18 = vpop.f32.mrf.mxu0  ;;  %v1510_v40 = vadd.f32 %v1509_v53, %v1397_v1  ;;  %v5187_v1 = vld [vmem:[%s9151_s4 + $0x1c0] sm:$0xff]  ;;  %v5384_v53 = vld [vmem:[#allocation2 + $0x190] sm:$0x3]  ;;  %v668_v62 = vsel %vm590_vm1, %v666_v47, %v667_v0 }
 0x1a6   : > { %3419 = vmatpush.msra.mxu1 %v5187_v1 }
 0x1a7   : > { %v6760_v11 = vadd.f32 %v1622_v56, %v1510_v40  ;;  %v1399_v2 = vpop.f32.mrf.mxu2  ;;  %v5382_v56 = vld [vmem:[#allocation2 + $0x180] sm:$0xff]  ;;  %v1293_v40 = vadd.f32 %v6479_v59, %v6453_v31  ;;  %v1296_v59 = vadd.f32 %v6492_v34, %v6472_v23 }
 0x1a8   : > { %1675 = vmatmul.f32.gmra.mxu0 %v552_v43  ;;  %v1400_v27 = vadd.f32 %v1399_v2, %v1287_v61  ;;  %v1034_v37 = vrot.slane %v5382_v56, 2  ;;  %v1037_v43 = vrot.slane %v5384_v53, 2  ;;  %v1801_v31 = vld [vmem:[#allocation2 + $0x40] sm:$0x3] }
 0x1a9   : > { %1559 = vmatmul.f32.gmra.mxu3 %v423_v26  ;;  %v2010_v56 = vrot.slane %v1801_v31, 2 }
 0x1aa   : > { %v1036_v3 = vsel %vm590_vm1, %v1034_v37, %v1035_v57  ;;  %v1038_v19 = vsel %vm590_vm1, %v1035_v57, %v1037_v43  ;;  %v5186_v37 = vld [vmem:[%s9151_s4 + $0x1b8] sm:$0xff] }
 0x1ab   : > { %1785 = vmatmul.f32.gmra.mxu1 %v663_v45  ;;  %v2007_v45 = vrot.slane %v1799_v30, 2 }
 0x1ac   : > { %v1512_v46 = vpop.f32.mrf.mxu3  ;;  %1449 = vmatmul.f32.gmra.mxu2 %v1033_v10  ;;  %3420 = vmatpush.msra.mxu1 %v5186_v37 }
 0x1ad   : > { %v1631_v12 = vpop.f32.mrf.mxu0  ;;  %v1513_v52 = vadd.f32 %v1512_v46, %v1400_v27  ;;  %v669_v27 = vrot.slane %v428_v39, 2 }
 0x1af   : > { %v6768_v26 = vadd.f32 %v1625_v15, %v1513_v52  ;;  %v1402_v14 = vpop.f32.mrf.mxu2 }
 0x1b0   : > { %1678 = vmatmul.f32.gmra.mxu0 %v555_v58  ;;  %v1403_v8 = vadd.f32 %v1402_v14, %v1290_v42  ;;  %v1803_v14 = vld [vmem:[#allocation2 + $0x50] sm:$0xff] }
 0x1b1   : > { %1562 = vmatmul.f32.gmra.mxu3 %v6724_v7  ;;  %v1800_v7 = vld [vmem:[#allocation2 + $0x38] sm:$0xff] }
 0x1b2   : > { %v2008_v2 = vrot.slane %v1800_v7, 2  ;;  %v1896_v57 = vrot.slane %v1800_v7, 1 }
 0x1b3   : > { %1788 = vmatmul.f32.gmra.mxu1 %v665_v33  ;;  %v1802_v33 = vld [vmem:[#allocation2 + $0x48] sm:$0xff] }
 0x1b4   : > { %v1515_v6 = vpop.f32.mrf.mxu3  ;;  %1452 = vmatmul.f32.gmra.mxu2 %v1036_v3  ;;  %v2009_v46 = vsel %vm590_vm1, %v2007_v45, %v2008_v2  ;;  %v2011_v23 = vsel %vm590_vm1, %v2008_v2, %v2010_v56  ;;  %v1897_v25 = vsel %vm477_vm0, %v1895_v36, %v1896_v57  ;;  %v2012_v1 = vrot.slane %v1802_v33, 2 }
 0x1b5   : > { %v1634_v15 = vpop.f32.mrf.mxu0  ;;  %v1516_v28 = vadd.f32 %v1515_v6, %v1403_v8  ;;  %v2013_v3 = vrot.slane %v1803_v14, 2  ;;  %v1900_v45 = vrot.slane %v1802_v33, 1  ;;  %v1901_v2 = vrot.slane %v1803_v14, 1 }
 0x1b7   : > { %v6780_v55 = vadd.f32 %v1628_v18, %v1516_v28  ;;  %v1405_v61 = vpop.f32.mrf.mxu2  ;;  %v2014_v28 = vsel %vm590_vm1, %v2012_v1, %v2013_v3 }
 0x1b8   : > { %1681 = vmatmul.f32.gmra.mxu0 %v557_v51  ;;  %v1406_v17 = vadd.f32 %v1405_v61, %v1293_v40 }
 0x1b9   : > { %1565 = vmatmul.f32.gmra.mxu3 %v426_v16  ;;  %v670_v16 = vsel %vm590_vm1, %v667_v0, %v669_v27  ;;  %v1898_v0 = vrot.slane %v1801_v31, 1 }
 0x1bb   : > { %1791 = vmatmul.f32.gmra.mxu1 %v668_v62  ;;  %v1899_v43 = vsel %vm477_vm0, %v1896_v57, %v1898_v0  ;;  %v1807_v57 = vld [vmem:[#allocation2 + $0x70] sm:$0x3]  ;;  %v1808_v0 = vld [vmem:[#allocation2 + $0x78] sm:$0xff] }
 0x1bc   : > { %v1518_v10 = vpop.f32.mrf.mxu3  ;;  %1455 = vmatmul.f32.gmra.mxu2 %v1038_v19 }
 0x1bd   : > { %v1637_v4 = vpop.f32.mrf.mxu0  ;;  %v1519_v58 = vadd.f32 %v1518_v10, %v1406_v17  ;;  %v1805_v10 = vld [vmem:[#allocation2 + $0x60] sm:$0xff] }
 0x1be   : > { %v2017_v31 = vrot.slane %v1805_v10, 2 }
 0x1bf   : > { %v6787_v18 = vadd.f32 %v1631_v12, %v1519_v58  ;;  %v1408_v52 = vpop.f32.mrf.mxu2 }
 0x1c0   : > { %2410 = vmatmul.f32.vlgmr.msra.gmra.mxu0 %v2009_v46  ;;  %v1409_v39 = vadd.f32 %v1408_v52, %v1296_v59  ;;  %v1902_v46 = vsel %vm477_vm0, %v1900_v45, %v1901_v2 }
 0x1c1   : > { %1568 = vmatmul.f32.gmra.mxu3 %v6756_v9 }
 0x1c3   : > { %1794 = vmatmul.f32.gmra.mxu1 %v670_v16 }
 0x1c4   : > { %v1521_v42 = vpop.f32.mrf.mxu3  ;;  %2184 = vmatmul.f32.vlgmr.msra.gmra.mxu2 %v1799_v30  ;;  %v1804_v30 = vld [vmem:[#allocation2 + $0x58] sm:$0x3] }
 0x1c5   : > { %v1640_v34 = vpop.f32.mrf.mxu0  ;;  %v1522_v12 = vadd.f32 %v1521_v42, %v1409_v39  ;;  %v2015_v62 = vrot.slane %v1804_v30, 2  ;;  %v1903_v52 = vrot.slane %v1804_v30, 1 }
 0x1c7   : > { %v6796_v9 = vadd.f32 %v1634_v15, %v1522_v12  ;;  %v1411_v8 = vpop.f32.mrf.mxu2  ;;  %v2016_v19 = vsel %vm590_vm1, %v2013_v3, %v2015_v62  ;;  %v1904_v42 = vsel %vm477_vm0, %v1901_v2, %v1903_v52  ;;  %v2020_v12 = vrot.slane %v1807_v57, 2  ;;  %v1810_v2 = vld [vmem:[#allocation2 + $0x88] sm:$0x3] }
 0x1c8   : > { %2413 = vmatmul.f32.gmra.mxu0 %v2011_v23  ;;  %v1412_v47 = vadd.f32 %v1411_v8, %v6235_v21  ;;  %v5185_v21 = vld [vmem:[%s9151_s4 + $0x1b0] sm:$0xff] }
 0x1c9   : > { %2297 = vmatmul.f32.vlgmr.msra.gmra.mxu3 %v1897_v25  ;;  %3421 = vmatpush.msra.mxu1 %v5185_v21  ;;  %v1905_v25 = vrot.slane %v1805_v10, 1 }
 0x1cc   : > { %v1524_v6 = vpop.f32.mrf.mxu3  ;;  %2187 = vmatmul.f32.gmra.mxu2 %v1800_v7 }
 0x1cd   : > { %v1643_v51 = vpop.f32.mrf.mxu0  ;;  %v1525_v53 = vadd.f32 %v1524_v6, %v1412_v47  ;;  %v1809_v6 = vld [vmem:[#allocation2 + $0x80] sm:$0xff] }
 0x1ce   : > { %v2023_v30 = vrot.slane %v1809_v6, 2 }
 0x1cf   : > { %v6801_v40 = vadd.f32 %v1637_v4, %v1525_v53  ;;  %v1414_v15 = vpop.f32.mrf.mxu2  ;;  %v1806_v4 = vld [vmem:[#allocation2 + $0x68] sm:$0xff]  ;;  %v2022_v53 = vrot.slane %v1808_v0, 2 }
 0x1d0   : > { %2416 = vmatmul.f32.gmra.mxu0 %v2014_v28  ;;  %v1415_v61 = vadd.f32 %v1414_v15, %v6254_v49  ;;  %v2018_v59 = vrot.slane %v1806_v4, 2  ;;  %v1906_v8 = vrot.slane %v1806_v4, 1  ;;  %v1908_v15 = vrot.slane %v1807_v57, 1 }
 0x1d1   : > { %2300 = vmatmul.f32.gmra.mxu3 %v1899_v43  ;;  %v2024_v21 = vsel %vm590_vm1, %v2022_v53, %v2023_v30 }
 0x1d2   : > { %v2019_v37 = vsel %vm590_vm1, %v2017_v31, %v2018_v59  ;;  %v2021_v3 = vsel %vm590_vm1, %v2018_v59, %v2020_v12  ;;  %v1911_v31 = vrot.slane %v1809_v6, 1 }
 0x1d4   : > { %v1527_v17 = vpop.f32.mrf.mxu3  ;;  %2190 = vmatmul.f32.gmra.mxu2 %v1802_v33 }
 0x1d5   : > { %v1646_v7 = vpop.f32.mrf.mxu0  ;;  %v1528_v27 = vadd.f32 %v1527_v17, %v1415_v61  ;;  %v1909_v17 = vsel %vm477_vm0, %v1906_v8, %v1908_v15 }
 0x1d7   : > { %v6809_v58 = vadd.f32 %v1640_v34, %v1528_v27  ;;  %v1417_v49 = vpop.f32.mrf.mxu2 }
 0x1d8   : > { %2419 = vmatmul.f32.gmra.mxu0 %v2016_v19  ;;  %v1418_v16 = vadd.f32 %v1417_v49, %v6270_v38  ;;  %v5184_v38 = vld [vmem:[%s9151_s4 + $0x1a8] sm:$0xff]  ;;  %v6827_v19 = vpop.f32.mrf.mxu1  ;;  %v1910_v49 = vrot.slane %v1808_v0, 1 }
 0x1d9   : > { %2303 = vmatmul.f32.gmra.mxu3 %v1902_v46  ;;  %3422 = vmatpush.msra.mxu1 %v5184_v38  ;;  %v5183_v46 = vld [vmem:[%s9151_s4 + $0x1a0] sm:$0xff] }
 0x1db   : > { %3423 = vmatpush.msra.mxu1 %v5183_v46 }
 0x1dc   : > { %v1530_v56 = vpop.f32.mrf.mxu3  ;;  %2193 = vmatmul.f32.gmra.mxu2 %v1803_v14 }
 0x1dd   : > { %v1649_v39 = vpop.f32.mrf.mxu0  ;;  %v1531_v36 = vadd.f32 %v1530_v56, %v1418_v16  ;;  %v1811_v56 = vld [vmem:[#allocation2 + $0x90] sm:$0xff] }
 0x1de   : > { %v2027_v57 = vrot.slane %v1811_v56, 2 }
 0x1df   : > { %v6814_v23 = vadd.f32 %v1643_v51, %v1531_v36  ;;  %v1420_v34 = vpop.f32.mrf.mxu2  ;;  %v1907_v51 = vsel %vm477_vm0, %v1905_v25, %v1906_v8 }
 0x1e0   : > { %2422 = vmatmul.f32.gmra.mxu0 %v2019_v37  ;;  %v1421_v33 = vadd.f32 %v1420_v34, %v6291_v32  ;;  %v1912_v37 = vsel %vm477_vm0, %v1910_v49, %v1911_v31  ;;  %v6839_v34 = vpop.f32.mrf.mxu1  ;;  %v9267_v49 = vld [vmem:[#allocation39_spill] sm:$0xff] }
 0x1e1   : > { %2306 = vmatmul.f32.gmra.mxu3 %v1904_v42 }
 0x1e4   : > { %v1533_v1 = vpop.f32.mrf.mxu3  ;;  %2196 = vmatmul.f32.gmra.mxu2 %v1805_v10  ;;  %v2025_v10 = vrot.slane %v1810_v2, 2 }
 0x1e5   : > { %v1652_v14 = vpop.f32.mrf.mxu0  ;;  %v1534_v47 = vadd.f32 %v1533_v1, %v1421_v33  ;;  %v1913_v33 = vrot.slane %v1810_v2, 1  ;;  %v1815_v2 = vld [vmem:[#allocation2 + $0xb0] sm:$0xff] }
 0x1e6   : > { %v2026_v16 = vsel %vm590_vm1, %v2023_v30, %v2025_v10  ;;  %v1915_v30 = vrot.slane %v1811_v56, 1  ;;  %v2033_v46 = vrot.slane %v1815_v2, 2 }
 0x1e7   : > { %v6822_v28 = vadd.f32 %v1646_v7, %v1534_v47  ;;  %v1423_v32 = vpop.f32.mrf.mxu2 }
 0x1e8   : > { %2425 = vmatmul.f32.gmra.mxu0 %v2021_v3  ;;  %v1424_v43 = vadd.f32 %v1423_v32, %v6307_v41  ;;  %v1813_v3 = vld [vmem:[#allocation2 + $0xa0] sm:$0x3]  ;;  %v9265_v32 = vld [vmem:[#allocation38_spill] sm:$0xff]  ;;  %v6850_v15 = vpop.f32.mrf.mxu1 }
 0x1e9   : > { %2309 = vmatmul.f32.gmra.mxu3 %v1907_v51  ;;  %v2030_v51 = vrot.slane %v1813_v3, 2 }
 0x1ec   : > { %v1536_v62 = vpop.f32.mrf.mxu3  ;;  %2199 = vmatmul.f32.gmra.mxu2 %v1806_v4 }
 0x1ed   : > { %v1655_v61 = vpop.f32.mrf.mxu0  ;;  %v1537_v45 = vadd.f32 %v1536_v62, %v1424_v43 }
 0x1ef   : > { %v6829_v7 = vadd.f32 %v1649_v39, %v1537_v45  ;;  %v1426_v27 = vpop.f32.mrf.mxu2  ;;  %v1812_v39 = vld [vmem:[#allocation2 + $0x98] sm:$0xff]  ;;  %v1814_v45 = vld [vmem:[#allocation2 + $0xa8] sm:$0xff] }
 0x1f0   : > { %2428 = vmatmul.f32.gmra.mxu0 %v2024_v21  ;;  %v1427_v41 = vadd.f32 %v1426_v27, %v6328_v60  ;;  %v2028_v42 = vrot.slane %v1812_v39, 2  ;;  %v1916_v43 = vrot.slane %v1812_v39, 1 }
 0x1f1   : > { %9262 = vst [vmem:[#allocation47_spill] sm:$0xff] %v6829_v7  ;;  %2312 = vmatmul.f32.gmra.mxu3 %v1909_v17 }
 0x1f2   : > { %v2029_v8 = vsel %vm590_vm1, %v2027_v57, %v2028_v42  ;;  %v1917_v17 = vsel %vm477_vm0, %v1915_v30, %v1916_v43  ;;  %v1816_v57 = vld [vmem:[#allocation2 + $0xb8] sm:$0x3] }
 0x1f4   : > { %v1539_v4 = vpop.f32.mrf.mxu3  ;;  %2202 = vmatmul.f32.gmra.mxu2 %v1808_v0 }
 0x1f5   : > { %v1658_v59 = vpop.f32.mrf.mxu0  ;;  %v1540_v52 = vadd.f32 %v1539_v4, %v1427_v41  ;;  %v2032_v41 = vrot.slane %v1814_v45, 2  ;;  %v1918_v4 = vrot.slane %v1813_v3, 1  ;;  %v1920_v3 = vrot.slane %v1814_v45, 1 }
 0x1f7   : > { %v6837_v36 = vadd.f32 %v1652_v14, %v1540_v52  ;;  %v1429_v60 = vpop.f32.mrf.mxu2  ;;  %v1914_v14 = vsel %vm477_vm0, %v1911_v31, %v1913_v33  ;;  %v2035_v33 = vrot.slane %v1816_v57, 2 }
 0x1f8   : > { %2431 = vmatmul.f32.gmra.mxu0 %v2026_v16  ;;  %v1430_v12 = vadd.f32 %v1429_v60, %v6344_v29  ;;  %v5182_v29 = vld [vmem:[%s9151_s4 + $0x198] sm:$0xff]  ;;  %v6858_v60 = vpop.f32.mrf.mxu1 }
 0x1f9   : > { %9263 = vst [vmem:[#allocation48_spill] sm:$0xff] %v6837_v36  ;;  %2315 = vmatmul.f32.gmra.mxu3 %v1912_v37  ;;  %3424 = vmatpush.msra.mxu1 %v5182_v29  ;;  %v2034_v37 = vsel %vm590_vm1, %v2032_v41, %v2033_v46  ;;  %v1923_v41 = vrot.slane %v1816_v57, 1  ;;  %v5180_v57 = vld [vmem:[%s9151_s4 + $0x188] sm:$0xff] }
 0x1fc   : > { %v1542_v38 = vpop.f32.mrf.mxu3  ;;  %2205 = vmatmul.f32.gmra.mxu2 %v1809_v6 }
 0x1fd   : > { %v1661_v25 = vpop.f32.mrf.mxu0  ;;  %v1543_v1 = vadd.f32 %v1542_v38, %v1430_v12  ;;  %v9269_v38 = vld [vmem:[#allocation40_spill] sm:$0xff] }
 0x1ff   : > { %v6844_v47 = vadd.f32 %v1655_v61, %v1543_v1  ;;  %v1432_v0 = vpop.f32.mrf.mxu2  ;;  %v2031_v61 = vsel %vm590_vm1, %v2028_v42, %v2030_v51  ;;  %v5181_v1 = vld [vmem:[%s9151_s4 + $0x190] sm:$0xff]  ;;  %v2036_v51 = vsel %vm590_vm1, %v2033_v46, %v2035_v33 }
 0x200   : > { %2434 = vmatmul.f32.gmra.mxu0 %v2029_v8  ;;  %v1433_v53 = vadd.f32 %v1432_v0, %v9265_v32  ;;  %3425 = vmatpush.msra.mxu1 %v5181_v1  ;;  %v6869_v30 = vpop.f32.mrf.mxu1 }
 0x201   : > { %9264 = vst [vmem:[#allocation49_spill] sm:$0xff] %v6844_v47  ;;  %2318 = vmatmul.f32.gmra.mxu3 %v1914_v14  ;;  %v1921_v14 = vrot.slane %v1815_v2, 1 }
 0x202   : > { %3426 = vmatpush.msra.mxu1 %v5180_v57 }
 0x203   : > { %v1922_v29 = vsel %vm477_vm0, %v1920_v3, %v1921_v14 }
 0x204   : > { %v1545_v6 = vpop.f32.mrf.mxu3  ;;  %2208 = vmatmul.f32.gmra.mxu2 %v1811_v56 }
 0x205   : > { %v1664_v62 = vpop.f32.mrf.mxu0  ;;  %v1546_v21 = vadd.f32 %v1545_v6, %v1433_v53  ;;  %v1818_v53 = vld [vmem:[#allocation2 + $0xc8] sm:$0xff] }
 0x207   : > { %v6854_v27 = vadd.f32 %v1658_v59, %v1546_v21  ;;  %v1435_v10 = vpop.f32.mrf.mxu2  ;;  %v1919_v59 = vsel %vm477_vm0, %v1916_v43, %v1918_v4  ;;  %v2038_v21 = vrot.slane %v1818_v53, 2  ;;  %v1819_v4 = vld [vmem:[#allocation2 + $0xd0] sm:$0x3] }
 0x208   : > { %2437 = vmatmul.f32.gmra.mxu0 %v2031_v61  ;;  %v1436_v31 = vadd.f32 %v1435_v10, %v9267_v49 }
 0x209   : > { %9266 = vst [vmem:[#allocation38_spill] sm:$0xff] %v6854_v27  ;;  %2321 = vmatmul.f32.gmra.mxu3 %v1917_v17  ;;  %v9271_v17 = vld [vmem:[#allocation41_spill] sm:$0xff] }
 0x20c   : > { %v1548_v16 = vpop.f32.mrf.mxu3  ;;  %2211 = vmatmul.f32.gmra.mxu2 %v1812_v39 }
 0x20d   : > { %v1667_v52 = vpop.f32.mrf.mxu0  ;;  %v1549_v56 = vadd.f32 %v1548_v16, %v1436_v31  ;;  %v1924_v16 = vsel %vm477_vm0, %v1921_v14, %v1923_v41  ;;  %v1820_v14 = vld [vmem:[#allocation2 + $0xd8] sm:$0xff]  ;;  %v1928_v41 = vrot.slane %v1819_v4, 1 }
 0x20f   : > { %v6861_v42 = vadd.f32 %v1661_v25, %v1549_v56  ;;  %v1438_v12 = vpop.f32.mrf.mxu2  ;;  %v1817_v25 = vld [vmem:[#allocation2 + $0xc0] sm:$0xff]  ;;  %v2040_v56 = vrot.slane %v1819_v4, 2  ;;  %v1930_v4 = vrot.slane %v1820_v14, 1 }
 0x210   : > { %2440 = vmatmul.f32.gmra.mxu0 %v2034_v37  ;;  %v1439_v8 = vadd.f32 %v1438_v12, %v9269_v38  ;;  %v2037_v61 = vrot.slane %v1817_v25, 2  ;;  %v9273_v12 = vld [vmem:[#allocation42_spill] sm:$0xff]  ;;  %v1925_v38 = vrot.slane %v1817_v25, 1 }
 0x211   : > { %9268 = vst [vmem:[#allocation39_spill] sm:$0xff] %v6861_v42  ;;  %2324 = vmatmul.f32.gmra.mxu3 %v1919_v59  ;;  %v6878_v59 = vpop.f32.mrf.mxu1 }
 0x214   : > { %v1551_v0 = vpop.f32.mrf.mxu3  ;;  %2214 = vmatmul.f32.gmra.mxu2 %v1814_v45  ;;  %v2039_v45 = vsel %vm590_vm1, %v2037_v61, %v2038_v21 }
 0x215   : > { %v1670_v39 = vpop.f32.mrf.mxu0  ;;  %v1552_v32 = vadd.f32 %v1551_v0, %v1439_v8  ;;  %v1926_v8 = vrot.slane %v1818_v53, 1  ;;  %v1821_v0 = vld [vmem:[#allocation2 + $0xe0] sm:$0xff] }
 0x216   : > { %v2043_v61 = vrot.slane %v1821_v0, 2 }
 0x217   : > { %v6871_v43 = vadd.f32 %v1664_v62, %v1552_v32  ;;  %v1441_v6 = vpop.f32.mrf.mxu2 }
 0x218   : > { %2443 = vmatmul.f32.gmra.mxu0 %v2036_v51  ;;  %v1442_v10 = vadd.f32 %v1441_v6, %v9271_v17  ;;  %v1927_v51 = vsel %vm477_vm0, %v1925_v38, %v1926_v8  ;;  %v2042_v6 = vrot.slane %v1820_v14, 2  ;;  %v9275_v17 = vld [vmem:[#allocation43_spill] sm:$0xff]  ;;  %v1931_v38 = vrot.slane %v1821_v0, 1 }
 0x219   : > { %9270 = vst [vmem:[#allocation40_spill] sm:$0xff] %v6871_v43  ;;  %2327 = vmatmul.f32.gmra.mxu3 %v1922_v29 }
 0x21c   : > { %v1554_v49 = vpop.f32.mrf.mxu3  ;;  %2217 = vmatmul.f32.gmra.mxu2 %v1815_v2 }
 0x21d   : > { %v1673_v46 = vpop.f32.mrf.mxu0  ;;  %v1555_v31 = vadd.f32 %v1554_v49, %v1442_v10  ;;  %v6889_v49 = vpop.f32.mrf.mxu1 }
 0x21f   : > { %v6876_v37 = vadd.f32 %v1667_v52, %v1555_v31  ;;  %v1444_v62 = vpop.f32.mrf.mxu2  ;;  %v2041_v52 = vsel %vm590_vm1, %v2038_v21, %v2040_v56 }
 0x220   : > { %2446 = vmatmul.f32.gmra.mxu0 %v2039_v45  ;;  %v1445_v33 = vadd.f32 %v1444_v62, %v9273_v12 }
 0x221   : > { %9272 = vst [vmem:[#allocation41_spill] sm:$0xff] %v6876_v37  ;;  %2330 = vmatmul.f32.gmra.mxu3 %v1924_v16  ;;  %v1822_v16 = vld [vmem:[#allocation2 + $0xe8] sm:$0x3] }
 0x222   : > { %v2045_v12 = vrot.slane %v1822_v16, 2 }
 0x224   : > { %v1557_v2 = vpop.f32.mrf.mxu3  ;;  %2220 = vmatmul.f32.gmra.mxu2 %v1817_v25  ;;  %v2044_v25 = vsel %vm590_vm1, %v2042_v6, %v2043_v61 }
 0x225   : > { %v1676_v1 = vpop.f32.mrf.mxu0  ;;  %v1558_v3 = vadd.f32 %v1557_v2, %v1445_v33  ;;  %v9277_v33 = vld [vmem:[#allocation44_spill] sm:$0xff] }
 0x227   : > { %v6886_v32 = vadd.f32 %v1670_v39, %v1558_v3  ;;  %v1447_v29 = vpop.f32.mrf.mxu2  ;;  %v1929_v39 = vsel %vm477_vm0, %v1926_v8, %v1928_v41  ;;  %v2046_v3 = vsel %vm590_vm1, %v2043_v61, %v2045_v12  ;;  %v1824_v8 = vld [vmem:[#allocation2 + $0xf8] sm:$0xff]  ;;  %v5179_v61 = vld [vmem:[%s9151_s4 + $0x180] sm:$0xff] }
 0x228   : > { %2449 = vmatmul.f32.gmra.mxu0 %v2041_v52  ;;  %v1448_v10 = vadd.f32 %v1447_v29, %v9275_v17  ;;  %v1823_v29 = vld [vmem:[#allocation2 + $0xf0] sm:$0xff]  ;;  %v2048_v41 = vrot.slane %v1824_v8, 2  ;;  %3427 = vmatpush.msra.mxu1 %v5179_v61  ;;  %v1826_v61 = vld [vmem:[#allocation2 + $0x108] sm:$0xff] }
 0x229   : > { %9274 = vst [vmem:[#allocation42_spill] sm:$0xff] %v6886_v32  ;;  %2333 = vmatmul.f32.gmra.mxu3 %v1927_v51  ;;  %v6897_v51 = vpop.f32.mrf.mxu1 }
 0x22c   : > { %v1560_v45 = vpop.f32.mrf.mxu3  ;;  %2223 = vmatmul.f32.gmra.mxu2 %v1818_v53 }
 0x22d   : > { %v1679_v21 = vpop.f32.mrf.mxu0  ;;  %v1561_v31 = vadd.f32 %v1560_v45, %v1448_v10  ;;  %v2047_v10 = vrot.slane %v1823_v29, 2  ;;  %v9279_v45 = vld [vmem:[#allocation45_spill] sm:$0xff] }
 0x22f   : > { %v6893_v62 = vadd.f32 %v1673_v46, %v1561_v31  ;;  %v1450_v56 = vpop.f32.mrf.mxu2  ;;  %v1932_v46 = vsel %vm477_vm0, %v1930_v4, %v1931_v38  ;;  %v1933_v31 = vrot.slane %v1822_v16, 1 }
 0x230   : > { %2452 = vmatmul.f32.gmra.mxu0 %v2044_v25  ;;  %v1451_v57 = vadd.f32 %v1450_v56, %v9277_v33  ;;  %v2049_v56 = vsel %vm590_vm1, %v2047_v10, %v2048_v41 }
 0x231   : > { %9276 = vst [vmem:[#allocation43_spill] sm:$0xff] %v6893_v62  ;;  %2336 = vmatmul.f32.gmra.mxu3 %v1929_v39  ;;  %v1934_v33 = vsel %vm477_vm0, %v1931_v38, %v1933_v31  ;;  %v1936_v38 = vrot.slane %v1824_v8, 1  ;;  %v6920_v31 = vld [vmem:[#allocation2 + $0x110] sm:$0xff] }
 0x234   : > { %v1563_v2 = vpop.f32.mrf.mxu3  ;;  %2226 = vmatmul.f32.gmra.mxu2 %v1820_v14 }
 0x235   : > { %v1682_v52 = vpop.f32.mrf.mxu0  ;;  %v1564_v53 = vadd.f32 %v1563_v2, %v1451_v57  ;;  %v6908_v57 = vpop.f32.mrf.mxu1 }
 0x237   : > { %v6900_v6 = vadd.f32 %v1676_v1, %v1564_v53  ;;  %v1453_v17 = vpop.f32.mrf.mxu2  ;;  %v1825_v1 = vld [vmem:[#allocation2 + $0x100] sm:$0x3]  ;;  %v9281_v53 = vld [vmem:[#allocation46_spill] sm:$0xff] }
 0x238   : > { %2455 = vmatmul.f32.gmra.mxu0 %v2046_v3  ;;  %v1454_v25 = vadd.f32 %v1453_v17, %v9279_v45  ;;  %v2050_v3 = vrot.slane %v1825_v1, 2  ;;  %v1935_v17 = vrot.slane %v1823_v29, 1 }
 0x239   : > { %9278 = vst [vmem:[#allocation44_spill] sm:$0xff] %v6900_v6  ;;  %2339 = vmatmul.f32.gmra.mxu3 %v1932_v46  ;;  %v5226_v46 = vld [vmem:[%s9151_s4 + $0x2f8] sm:$0xff] }
 0x23a   : > { %3638 = vmatpush.msrb.mxu3 %v5226_v46  ;;  %v2051_v45 = vsel %vm590_vm1, %v2048_v41, %v2050_v3  ;;  %v3010_v41 = vld [vmem:[%s9151_s4 + $0x78] sm:$0xff]  ;;  %v1938_v3 = vrot.slane %v1825_v1, 1 }
 0x23b   : > { %3751 = vmatpush.msrb.mxu0 %v3010_v41 }
 0x23c   : > { %v1566_v14 = vpop.f32.mrf.mxu3  ;;  %2229 = vmatmul.f32.gmra.mxu2 %v1821_v0  ;;  %v5210_v0 = vld [vmem:[%s9151_s4 + $0x278] sm:$0xff] }
 0x23d   : > { %v2411_v39 = vpop.f32.mrf.mxu0  ;;  %v1567_v12 = vadd.f32 %v1566_v14, %v1454_v25  ;;  %3525 = vmatpush.msrb.mxu2 %v5210_v0  ;;  %v1937_v14 = vsel %vm477_vm0, %v1935_v17, %v1936_v38  ;;  %v1828_v17 = vld [vmem:[#allocation2 + $0x118] sm:$0x3] }
 0x23e   : > { %v2055_v1 = vrot.slane %v1828_v17, 2 }
 0x23f   : > { %v6910_v4 = vadd.f32 %v1679_v21, %v1567_v12  ;;  %v1456_v2 = vpop.f32.mrf.mxu2 }
 0x240   : > { %2458 = vmatmul.f32.gmra.mxu0 %v2049_v56  ;;  %v1457_v16 = vadd.f32 %v1456_v2, %v9281_v53  ;;  %v2053_v2 = vrot.slane %v6920_v31, 2  ;;  %v6926_v53 = vpop.f32.mrf.mxu1 }
 0x241   : > { %9280 = vst [vmem:[#allocation45_spill] sm:$0xff] %v6910_v4  ;;  %2342 = vmatmul.f32.gmra.mxu3 %v1934_v33  ;;  %v2052_v33 = vrot.slane %v1826_v61, 2 }
 0x243   : > { %v2054_v46 = vsel %vm590_vm1, %v2052_v33, %v2053_v2  ;;  %v6945_v33 = vld [vmem:[%s9150_s3] ss:$0 sm:$0xff] }
 0x244   : > { %v1569_v21 = vpop.f32.mrf.mxu3  ;;  %2232 = vmatmul.f32.gmra.mxu2 %v1823_v29  ;;  %v3026_v29 = vld [vmem:[%s9151_s4 + $0xf8] sm:$0xff] }
 0x245   : > { %v2414_v10 = vpop.f32.mrf.mxu0  ;;  %v1570_v25 = vadd.f32 %v1569_v21, %v1457_v16  ;;  %3864 = vmatpush.msrb.mxu1 %v3026_v29  ;;  %v1939_v21 = vsel %vm477_vm0, %v1936_v38, %v1938_v3  ;;  %v1940_v38 = vrot.slane %v1826_v61, 1 }
 0x247   : > { %v6923_v56 = vadd.f32 %v1682_v52, %v1570_v25  ;;  %v2185_v12 = vpop.f32.mrf.mxu2  ;;  %v6939_v25 = vld [vmem:[%s9149_s2] ss:$0 sm:$0xff] }
 0x248   : > { %2461 = vmatmul.f32.gmra.mxu0 %v2051_v45 }
 0x249   : > { %9282 = vst [vmem:[#allocation46_spill] sm:$0xff] %v6923_v56  ;;  %2345 = vmatmul.f32.gmra.mxu3 %v1937_v14  ;;  %v6959_v56 = vld [vmem:[#allocation2 + $0x128] sm:$0xff] }
 0x24c   : > { %v2298_v52 = vpop.f32.mrf.mxu3  ;;  %2235 = vmatmul.f32.gmra.mxu2 %v1824_v8  ;;  %v5225_v8 = vld [vmem:[%s9151_s4 + $0x2f0] sm:$0xff] }
 0x24d   : > { %v2417_v16 = vpop.f32.mrf.mxu0  ;;  %v2299_v0 = vadd.f32 %v2298_v52, %v2185_v12  ;;  %v1941_v12 = vrot.slane %v6920_v31, 1  ;;  %3639 = vmatpush.msrb.mxu3 %v5225_v8 }
 0x24f   : > { %v2412_v45 = vadd.f32 %v2411_v39, %v2299_v0  ;;  %v2188_v14 = vpop.f32.mrf.mxu2  ;;  %v5209_v39 = vld [vmem:[%s9151_s4 + $0x270] sm:$0xff]  ;;  %v1942_v4 = vsel %vm477_vm0, %v1940_v38, %v1941_v12 }
 0x250   : > { %2464 = vmatmul.f32.gmra.mxu0 %v2054_v46  ;;  %3526 = vmatpush.msrb.mxu2 %v5209_v39  ;;  %v2056_v46 = vsel %vm590_vm1, %v2053_v2, %v2055_v1  ;;  %v3025_v2 = vld [vmem:[%s9151_s4 + $0xf0] sm:$0xff] }
 0x251   : > { %v2507_v41 = vadd.f32 %v2412_v45, %v6536_v24  ;;  %2348 = vmatmul.f32.gmra.mxu3 %v1939_v21  ;;  %v6954_v24 = vpop.f32.mrf.mxu1  ;;  %v1829_v45 = vld [vmem:[#allocation2 + $0x120] sm:$0xff]  ;;  %3865 = vmatpush.msrb.mxu1 %v3025_v2 }
 0x252   : > { %v2057_v62 = vrot.slane %v1829_v45, 2 }
 0x253   : > { %v2543_v29 = vmul.f32 %v6939_v25, %v2507_v41  ;;  %v2058_v41 = vrot.slane %v6959_v56, 2 }
 0x254   : > { %v2301_v3 = vpop.f32.mrf.mxu3  ;;  %2238 = vmatmul.f32.gmra.mxu2 %v1826_v61  ;;  %v3009_v61 = vld [vmem:[%s9151_s4 + $0x70] sm:$0xff] }
 0x255   : > { %v2420_v52 = vpop.f32.mrf.mxu0  ;;  %v2579_v0 = vadd.f32 %v6945_v33, %v2543_v29  ;;  %v2302_v21 = vadd.f32 %v2301_v3, %v2188_v14  ;;  %v1943_v14 = vrot.slane %v1828_v17, 1  ;;  %3752 = vmatpush.msrb.mxu0 %v3009_v61  ;;  %v6978_v3 = vld [vmem:[#allocation2 + $0x130] sm:$0x3] }
 0x257   : > { %v2611_v6 = vmax.f32 %v2579_v0, 0.0  ;;  %v2415_v8 = vadd.f32 %v2414_v10, %v2302_v21  ;;  %v2191_v39 = vpop.f32.mrf.mxu2  ;;  %v1944_v17 = vsel %vm477_vm0, %v1941_v12, %v1943_v14  ;;  %v1945_v12 = vrot.slane %v1829_v45, 1 }
 0x258   : > { %2467 = vmatmul.f32.gmra.mxu0 %v2056_v46 }
 0x259   : > { %2643 = vst [vmem:[#allocation2 + $0x19] sm:$0xff] %v2611_v6  ;;  %v2508_v32 = vadd.f32 %v2415_v8, %v6560_v48  ;;  %2351 = vmatmul.f32.gmra.mxu3 %v1942_v4  ;;  %v2059_v6 = vsel %vm590_vm1, %v2057_v62, %v2058_v41  ;;  %v6974_v48 = vpop.f32.mrf.mxu1  ;;  %v2060_v8 = vrot.slane %v6978_v3, 2 }
 0x25a   : > { %9283 = vst [vmem:[#allocation50_spill] sm:$0xff] %v6974_v48 }
 0x25b   : > { %v2544_v10 = vmul.f32 %v6939_v25, %v2508_v32  ;;  %v2061_v14 = vsel %vm590_vm1, %v2058_v41, %v2060_v8 }
 0x25c   : > { %v2304_v1 = vpop.f32.mrf.mxu3  ;;  %2241 = vmatmul.f32.gmra.mxu2 %v6920_v31  ;;  %v5224_v31 = vld [vmem:[%s9151_s4 + $0x2e8] sm:$0xff] }
 0x25d   : > { %v6971_v38 = vpop.f32.mrf.mxu0  ;;  %v2580_v4 = vadd.f32 %v6945_v33, %v2544_v10  ;;  %v2305_v29 = vadd.f32 %v2304_v1, %v2191_v39  ;;  %v1946_v39 = vrot.slane %v6959_v56, 1  ;;  %3640 = vmatpush.msrb.mxu3 %v5224_v31 }
 0x25f   : > { %v2612_v46 = vmax.f32 %v2580_v4, 0.0  ;;  %v2418_v0 = vadd.f32 %v2417_v16, %v2305_v29  ;;  %v2194_v21 = vpop.f32.mrf.mxu2  ;;  %v5208_v16 = vld [vmem:[%s9151_s4 + $0x268] sm:$0xff]  ;;  %v7000_v4 = vld [vmem:[#allocation2 + $0x140] sm:$0xff]  ;;  %v1947_v29 = vsel %vm477_vm0, %v1945_v12, %v1946_v39 }
 0x260   : > { %2470 = vmatmul.f32.gmra.mxu0 %v2059_v6  ;;  %v6981_v32 = vld [vmem:[#allocation2 + $0x18] sm:$0xff]  ;;  %3527 = vmatpush.msrb.mxu2 %v5208_v16  ;;  %v2063_v8 = vrot.slane %v7000_v4, 2 }
 0x261   : > { %2644 = vst [vmem:[#allocation2 + $0x21] sm:$0xff] %v2612_v46  ;;  %v2509_v62 = vadd.f32 %v2418_v0, %v6581_v54  ;;  %2354 = vmatmul.f32.gmra.mxu3 %v1944_v17  ;;  %3428 = vmatmul.f32.vlgmr.msra.gmra.mxu1 %v6981_v32  ;;  %v6998_v6 = vld [vmem:[#allocation2 + $0x138] sm:$0xff]  ;;  %v7003_v17 = vpop.f32.mrf.mxu1 }
 0x262   : > { %9284 = vst [vmem:[#allocation51_spill] sm:$0xff] %v7003_v17  ;;  %v2062_v41 = vrot.slane %v6998_v6, 2 }
 0x263   : > { %v2545_v61 = vmul.f32 %v6939_v25, %v2509_v62 }
 0x264   : > { %v2307_v2 = vpop.f32.mrf.mxu3  ;;  %2244 = vmatmul.f32.gmra.mxu2 %v1829_v45 }
 0x265   : > { %v6994_v54 = vpop.f32.mrf.mxu0  ;;  %v2581_v10 = vadd.f32 %v6945_v33, %v2545_v61  ;;  %v2308_v1 = vadd.f32 %v2307_v2, %v2194_v21  ;;  %v3024_v61 = vld [vmem:[%s9151_s4 + $0xe8] sm:$0xff]  ;;  %v3139_v2 = vrot.slane %v6981_v32, 1 }
 0x266   : > { %3866 = vmatpush.msrb.mxu1 %v3024_v61 }
 0x267   : > { %v2613_v46 = vmax.f32 %v2581_v10, 0.0  ;;  %v2421_v0 = vadd.f32 %v2420_v52, %v2308_v1  ;;  %v2197_v31 = vpop.f32.mrf.mxu2  ;;  %v3008_v52 = vld [vmem:[%s9151_s4 + $0x68] sm:$0xff] }
 0x268   : > { %2473 = vmatmul.f32.gmra.mxu0 %v2061_v14  ;;  %v7005_v62 = vld [vmem:[#allocation2 + $0x20] sm:$0xff]  ;;  %v2680_v21 = vld [vmem:[#allocation2 + $0x28] sm:$0x3]  ;;  %v1948_v14 = vrot.slane %v6978_v3, 1 }
 0x269   : > { %2645 = vst [vmem:[#allocation2 + $0x31] sm:$0xff] %v2613_v46  ;;  %v2510_v45 = vadd.f32 %v2421_v0, %v6606_v44  ;;  %2357 = vmatmul.f32.gmra.mxu3 %v1947_v29  ;;  %v7011_v16 = vrot.slane %v7005_v62, 1  ;;  %v7014_v12 = vrot.slane %v7005_v62, 2  ;;  %3431 = vmatmul.f32.gmra.mxu1 %v7005_v62  ;;  %v3251_v44 = vrot.slane %v6981_v32, 2 }
 0x26a   : > { %3753 = vmatpush.msrb.mxu0 %v3008_v52  ;;  %v2891_v10 = vrot.slane %v2680_v21, 2  ;;  %v2064_v0 = vsel %vm590_vm1, %v2062_v41, %v2063_v8  ;;  %v7040_v21 = vld [vmem:[#allocation2 + $0x148] sm:$0x3]  ;;  %v1949_v41 = vsel %vm477_vm0, %v1946_v39, %v1948_v14  ;;  %v5223_v39 = vld [vmem:[%s9151_s4 + $0x2e0] sm:$0xff]  ;;  %v1950_v14 = vrot.slane %v6998_v6, 1 }
 0x26b   : > { %9285 = vst [vmem:[#allocation52_spill] sm:$0xff] %v7011_v16  ;;  %v2546_v1 = vmul.f32 %v6939_v25, %v2510_v45  ;;  %v7032_v37 = vsel %vm477_vm0, %v3139_v2, %v7011_v16  ;;  %v7036_v43 = vsel %vm590_vm1, %v3251_v44, %v7014_v12  ;;  %3641 = vmatpush.msrb.mxu3 %v5223_v39 }
 0x26c   : > { %v2310_v29 = vpop.f32.mrf.mxu3  ;;  %9286 = vst [vmem:[#allocation53_spill] sm:$0xff] %v7032_v37  ;;  %2247 = vmatmul.f32.gmra.mxu2 %v6959_v56  ;;  %v7044_v45 = vsel %vm590_vm1, %v7014_v12, %v2891_v10  ;;  %v1951_v10 = vrot.slane %v7000_v4, 1 }
 0x26d   : > { %v7027_v46 = vpop.f32.mrf.mxu0  ;;  %9287 = vst [vmem:[#allocation54_spill] sm:$0xff] %v7036_v43  ;;  %v2582_v3 = vadd.f32 %v6945_v33, %v2546_v1  ;;  %v2311_v52 = vadd.f32 %v2310_v29, %v2197_v31  ;;  %v2065_v1 = vrot.slane %v7040_v21, 2  ;;  %v7051_v31 = vpop.f32.mrf.mxu1 }
 0x26e   : > { %9288 = vst [vmem:[#allocation55_spill] sm:$0xff] %v7044_v45  ;;  %v1952_v45 = vsel %vm477_vm0, %v1950_v14, %v1951_v10 }
 0x26f   : > { %v2614_v61 = vmax.f32 %v2582_v3, 0.0  ;;  %v2424_v2 = vadd.f32 %v6971_v38, %v2311_v52  ;;  %v2200_v44 = vpop.f32.mrf.mxu2  ;;  %9289 = vst [vmem:[#allocation56_spill] sm:$0xff] %v7051_v31  ;;  %v5207_v38 = vld [vmem:[%s9151_s4 + $0x260] sm:$0xff]  ;;  %v2066_v3 = vsel %vm590_vm1, %v2063_v8, %v2065_v1 }
 0x270   : > { %2476 = vmatmul.f32.gmra.mxu0 %v2064_v0  ;;  %v7048_v42 = vld [vmem:[#allocation2 + $0x30] sm:$0xff]  ;;  %3528 = vmatpush.msrb.mxu2 %v5207_v38 }
 0x271   : > { %2646 = vst [vmem:[#allocation2 + $0x39] sm:$0xff] %v2614_v61  ;;  %v2511_v56 = vadd.f32 %v2424_v2, %v6627_v22  ;;  %2360 = vmatmul.f32.gmra.mxu3 %v1949_v41  ;;  %3434 = vmatmul.f32.gmra.mxu1 %v7048_v42  ;;  %v7069_v61 = vld [vmem:[#allocation2 + $0x150] sm:$0xff]  ;;  %v7071_v2 = vld [vmem:[#allocation2 + $0x158] sm:$0xff] }
 0x272   : > { %v2067_v8 = vrot.slane %v7069_v61, 2  ;;  %v2068_v1 = vrot.slane %v7071_v2, 2 }
 0x273   : > { %v2547_v29 = vmul.f32 %v6939_v25, %v2511_v56 }
 0x274   : > { %v2313_v22 = vpop.f32.mrf.mxu3  ;;  %2250 = vmatmul.f32.gmra.mxu2 %v6998_v6  ;;  %v2069_v31 = vsel %vm590_vm1, %v2067_v8, %v2068_v1 }
 0x275   : > { %v7064_v0 = vpop.f32.mrf.mxu0  ;;  %v2583_v52 = vadd.f32 %v6945_v33, %v2547_v29  ;;  %v2314_v41 = vadd.f32 %v2313_v22, %v2200_v44  ;;  %v3023_v22 = vld [vmem:[%s9151_s4 + $0xe0] sm:$0xff] }
 0x276   : > { %3867 = vmatpush.msrb.mxu1 %v3023_v22 }
 0x277   : > { %v2615_v39 = vmax.f32 %v2583_v52, 0.0  ;;  %v2427_v38 = vadd.f32 %v6994_v54, %v2314_v41  ;;  %v2203_v27 = vpop.f32.mrf.mxu2  ;;  %v3007_v54 = vld [vmem:[%s9151_s4 + $0x60] sm:$0xff]  ;;  %v7095_v52 = vpop.f32.mrf.mxu1  ;;  %v3256_v41 = vrot.slane %v7048_v42, 2 }
 0x278   : > { %2479 = vmatmul.f32.gmra.mxu0 %v2066_v3  ;;  %v7075_v56 = vld [vmem:[#allocation2 + $0x38] sm:$0xff]  ;;  %v2683_v44 = vld [vmem:[#allocation2 + $0x40] sm:$0x3]  ;;  %v3144_v3 = vrot.slane %v7048_v42, 1  ;;  %9292 = vst [vmem:[#allocation59_spill] sm:$0xff] %v7095_v52 }
 0x279   : > { %9290 = vst [vmem:[#allocation57_spill] sm:$0xff] %v7075_v56  ;;  %v2512_v6 = vadd.f32 %v2427_v38, %v6652_v20  ;;  %2363 = vmatmul.f32.gmra.mxu3 %v1952_v45  ;;  %v7081_v29 = vrot.slane %v7075_v56, 1  ;;  %v7084_v14 = vrot.slane %v7075_v56, 2  ;;  %3437 = vmatmul.f32.gmra.mxu1 %v7075_v56  ;;  %v1953_v20 = vrot.slane %v7040_v21, 1 }
 0x27a   : > { %2647 = vst [vmem:[#allocation2 + $0x49] sm:$0xff] %v2615_v39  ;;  %3754 = vmatpush.msrb.mxu0 %v3007_v54  ;;  %v2896_v45 = vrot.slane %v2683_v44, 2  ;;  %v7108_v44 = vld [vmem:[#allocation2 + $0x160] sm:$0x3] }
 0x27b   : > { %9291 = vst [vmem:[#allocation58_spill] sm:$0xff] %v7081_v29  ;;  %v2548_v39 = vmul.f32 %v6939_v25, %v2512_v6  ;;  %v7104_v36 = vsel %vm477_vm0, %v3144_v3, %v7081_v29  ;;  %v7112_v22 = vsel %vm590_vm1, %v3256_v41, %v7084_v14  ;;  %v1954_v6 = vsel %vm477_vm0, %v1951_v10, %v1953_v20  ;;  %v5222_v10 = vld [vmem:[%s9151_s4 + $0x2d8] sm:$0xff] }
 0x27c   : > { %v2316_v38 = vpop.f32.mrf.mxu3  ;;  %9293 = vst [vmem:[#allocation60_spill] sm:$0xff] %v7104_v36  ;;  %2253 = vmatmul.f32.gmra.mxu2 %v7000_v4  ;;  %v7117_v8 = vsel %vm590_vm1, %v7084_v14, %v2896_v45  ;;  %v2070_v4 = vrot.slane %v7108_v44, 2  ;;  %v1956_v20 = vrot.slane %v7071_v2, 1  ;;  %3642 = vmatpush.msrb.mxu3 %v5222_v10 }
 0x27d   : > { %v7099_v47 = vpop.f32.mrf.mxu0  ;;  %v2584_v21 = vadd.f32 %v6945_v33, %v2548_v39  ;;  %v2317_v54 = vadd.f32 %v2316_v38, %v2203_v27  ;;  %9294 = vst [vmem:[#allocation61_spill] sm:$0xff] %v7112_v22 }
 0x27e   : > { %9295 = vst [vmem:[#allocation62_spill] sm:$0xff] %v7117_v8  ;;  %v2071_v41 = vsel %vm590_vm1, %v2068_v1, %v2070_v4  ;;  %v7143_v8 = vld [vmem:[#allocation2 + $0x170] sm:$0xff] }
 0x27f   : > { %v2616_v52 = vmax.f32 %v2584_v21, 0.0  ;;  %v2430_v3 = vadd.f32 %v7027_v46, %v2317_v54  ;;  %v2206_v27 = vpop.f32.mrf.mxu2  ;;  %v5206_v46 = vld [vmem:[%s9151_s4 + $0x258] sm:$0xff]  ;;  %v7137_v21 = vpop.f32.mrf.mxu1 }
 0x280   : > { %2482 = vmatmul.f32.gmra.mxu0 %v2069_v31  ;;  %v1955_v31 = vrot.slane %v7069_v61, 1  ;;  %3529 = vmatpush.msrb.mxu2 %v5206_v46  ;;  %9296 = vst [vmem:[#allocation63_spill] sm:$0xff] %v7137_v21 }
 0x281   : > { %v7120_v39 = vld [vmem:[#allocation2 + $0x48] sm:$0xff]  ;;  %2648 = vst [vmem:[#allocation2 + $0x51] sm:$0xff] %v2616_v52  ;;  %v2513_v38 = vadd.f32 %v2430_v3, %v6673_v50  ;;  %2366 = vmatmul.f32.gmra.mxu3 %v1954_v6 }
 0x282   : > { %3440 = vmatmul.f32.gmra.mxu1 %v7120_v39  ;;  %v7141_v3 = vld [vmem:[#allocation2 + $0x168] sm:$0xff]  ;;  %v1957_v10 = vsel %vm477_vm0, %v1955_v31, %v1956_v20 }
 0x283   : > { %v2549_v45 = vmul.f32 %v6939_v25, %v2513_v38  ;;  %v2072_v4 = vrot.slane %v7141_v3, 2 }
 0x284   : > { %v2319_v50 = vpop.f32.mrf.mxu3  ;;  %2256 = vmatmul.f32.gmra.mxu2 %v7069_v61 }
 0x285   : > { %v7134_v52 = vpop.f32.mrf.mxu0  ;;  %v2585_v54 = vadd.f32 %v6945_v33, %v2549_v45  ;;  %v2320_v6 = vadd.f32 %v2319_v50, %v2206_v27  ;;  %v2073_v45 = vrot.slane %v7143_v8, 2 }
 0x287   : > { %v2617_v46 = vmax.f32 %v2585_v54, 0.0  ;;  %v2433_v38 = vadd.f32 %v7064_v0, %v2320_v6  ;;  %v2209_v1 = vpop.f32.mrf.mxu2  ;;  %v3006_v0 = vld [vmem:[%s9151_s4 + $0x58] sm:$0xff]  ;;  %v3149_v54 = vrot.slane %v7120_v39, 1 }
 0x288   : > { %2485 = vmatmul.f32.gmra.mxu0 %v2071_v41  ;;  %v7147_v17 = vld [vmem:[#allocation2 + $0x50] sm:$0xff]  ;;  %v2686_v27 = vld [vmem:[#allocation2 + $0x58] sm:$0x3] }
 0x289   : > { %9297 = vst [vmem:[#allocation64_spill] sm:$0xff] %v7147_v17  ;;  %v2514_v61 = vadd.f32 %v2433_v38, %v6696_v63  ;;  %2369 = vmatmul.f32.gmra.mxu3 %v1957_v10  ;;  %v7153_v50 = vrot.slane %v7147_v17, 1  ;;  %v7156_v31 = vrot.slane %v7147_v17, 2  ;;  %v3022_v41 = vld [vmem:[%s9151_s4 + $0xd8] sm:$0xff]  ;;  %v1958_v63 = vrot.slane %v7108_v44, 1  ;;  %3755 = vmatpush.msrb.mxu0 %v3006_v0 }
 0x28a   : > { %2649 = vst [vmem:[#allocation2 + $0x61] sm:$0xff] %v2617_v46  ;;  %3443 = vmatmul.f32.gmra.mxu1 %v7147_v17  ;;  %v2901_v6 = vrot.slane %v2686_v27, 2  ;;  %v3261_v10 = vrot.slane %v7120_v39, 2  ;;  %v2074_v17 = vsel %vm590_vm1, %v2072_v4, %v2073_v45  ;;  %v7178_v44 = vld [vmem:[#allocation2 + $0x178] sm:$0x3]  ;;  %v1727_v0 = vadd.f32 %v6827_v19, %v6710_v35  ;;  %v5221_v35 = vld [vmem:[%s9151_s4 + $0x2d0] sm:$0xff] }
 0x28b   : > { %9298 = vst [vmem:[#allocation65_spill] sm:$0xff] %v7153_v50  ;;  %3868 = vmatpush.msrb.mxu1 %v3022_v41  ;;  %v2550_v46 = vmul.f32 %v6939_v25, %v2514_v61  ;;  %v7174_v7 = vsel %vm477_vm0, %v3149_v54, %v7153_v50  ;;  %v1959_v61 = vsel %vm477_vm0, %v1956_v20, %v1958_v63  ;;  %v7191_v41 = vpop.f32.mrf.mxu1  ;;  %v5205_v19 = vld [vmem:[%s9151_s4 + $0x250] sm:$0xff] }
 0x28c   : > { %v2322_v38 = vpop.f32.mrf.mxu3  ;;  %9299 = vst [vmem:[#allocation66_spill] sm:$0xff] %v7174_v7  ;;  %2259 = vmatmul.f32.gmra.mxu2 %v7071_v2  ;;  %v7182_v27 = vsel %vm590_vm1, %v3261_v10, %v7156_v31  ;;  %v7187_v4 = vsel %vm590_vm1, %v7156_v31, %v2901_v6  ;;  %v2075_v10 = vrot.slane %v7178_v44, 2  ;;  %3643 = vmatpush.msrb.mxu3 %v5221_v35  ;;  %v5220_v35 = vld [vmem:[%s9151_s4 + $0x2c8] sm:$0xff] }
 0x28d   : > { %v7169_v21 = vpop.f32.mrf.mxu0  ;;  %v2586_v56 = vadd.f32 %v6945_v33, %v2550_v46  ;;  %v2323_v48 = vadd.f32 %v2322_v38, %v2209_v1  ;;  %9300 = vst [vmem:[#allocation67_spill] sm:$0xff] %v7182_v27  ;;  %3530 = vmatpush.msrb.mxu2 %v5205_v19 }
 0x28e   : > { %9301 = vst [vmem:[#allocation68_spill] sm:$0xff] %v7187_v4  ;;  %v2076_v38 = vsel %vm590_vm1, %v2073_v45, %v2075_v10  ;;  %v3004_v45 = vld [vmem:[%s9151_s4 + $0x48] sm:$0xff]  ;;  %3644 = vmatpush.msrb.mxu3 %v5220_v35  ;;  %v5201_v35 = vld [vmem:[%s9151_s4 + $0x230] sm:$0xff] }
 0x28f   : > { %9302 = vst [vmem:[#allocation69_spill] sm:$0xff] %v7191_v41  ;;  %v2618_v1 = vmax.f32 %v2586_v56, 0.0  ;;  %v2436_v2 = vadd.f32 %v7099_v47, %v2323_v48  ;;  %v2212_v46 = vpop.f32.mrf.mxu2  ;;  %v1960_v47 = vrot.slane %v7141_v3, 1  ;;  %v9189_v48 = vrot.slane %v7143_v8, 1  ;;  %v3005_v56 = vld [vmem:[%s9151_s4 + $0x50] sm:$0xff] }
 0x290   : > { %2488 = vmatmul.f32.gmra.mxu0 %v2074_v17  ;;  %v5217_v4 = vld [vmem:[%s9151_s4 + $0x2b0] sm:$0xff] }
 0x291   : > { %v7194_v54 = vld [vmem:[#allocation2 + $0x60] sm:$0xff]  ;;  %2650 = vst [vmem:[#allocation2 + $0x69] sm:$0xff] %v2618_v1  ;;  %v2515_v20 = vadd.f32 %v2436_v2, %v1727_v0  ;;  %2372 = vmatmul.f32.gmra.mxu3 %v1959_v61  ;;  %v7215_v0 = vld [vmem:[#allocation2 + $0x188] sm:$0xff]  ;;  %3756 = vmatpush.msrb.mxu0 %v3005_v56  ;;  %v1962_v10 = vsel %vm477_vm0, %v1960_v47, %v9189_v48  ;;  %v3001_v41 = vld [vmem:[%s9151_s4 + $0x30] sm:$0xff] }
 0x292   : > { %3446 = vmatmul.f32.gmra.mxu1 %v7194_v54  ;;  %v7213_v61 = vld [vmem:[#allocation2 + $0x180] sm:$0xff] }
 0x293   : > { %v2551_v17 = vmul.f32 %v6939_v25, %v2515_v20  ;;  %v5204_v20 = vld [vmem:[%s9151_s4 + $0x248] sm:$0xff]  ;;  %v5219_v56 = vld [vmem:[%s9151_s4 + $0x2c0] sm:$0xff]  ;;  %3757 = vmatpush.msrb.mxu0 %v3004_v45  ;;  %v5202_v45 = vld [vmem:[%s9151_s4 + $0x238] sm:$0xff] }
 0x294   : > { %v2325_v63 = vpop.f32.mrf.mxu3  ;;  %2262 = vmatmul.f32.gmra.mxu2 %v7141_v3  ;;  %v1730_v3 = vadd.f32 %v6839_v34, %v6728_v13  ;;  %v3003_v13 = vld [vmem:[%s9151_s4 + $0x40] sm:$0xff]  ;;  %3645 = vmatpush.msrb.mxu3 %v5219_v56  ;;  %v9304_v56 = vrot.slane %v7215_v0, 2 }
 0x295   : > { %v7210_v6 = vpop.f32.mrf.mxu0  ;;  %v2587_v1 = vadd.f32 %v6945_v33, %v2551_v17  ;;  %v2326_v2 = vadd.f32 %v2325_v63, %v2212_v46  ;;  %3531 = vmatpush.msrb.mxu2 %v5204_v20  ;;  %v5203_v17 = vld [vmem:[%s9151_s4 + $0x240] sm:$0xff]  ;;  %v2077_v20 = vrot.slane %v7213_v61, 2  ;;  %3758 = vmatpush.msrb.mxu0 %v3003_v13 }
 0x297   : > { %v2619_v46 = vmax.f32 %v2587_v1, 0.0  ;;  %v2439_v19 = vadd.f32 %v7134_v52, %v2326_v2  ;;  %v2215_v47 = vpop.f32.mrf.mxu2  ;;  %3532 = vmatpush.msrb.mxu2 %v5203_v17  ;;  %v7247_v52 = vpop.f32.mrf.mxu1  ;;  %v3021_v2 = vld [vmem:[%s9151_s4 + $0xd0] sm:$0xff]  ;;  %v5218_v17 = vld [vmem:[%s9151_s4 + $0x2b8] sm:$0xff] }
 0x298   : > { %2491 = vmatmul.f32.gmra.mxu0 %v2076_v38  ;;  %v7240_v63 = vld [vmem:[#allocation2 + $0x68] sm:$0xff]  ;;  %v2689_v34 = vld [vmem:[#allocation2 + $0x70] sm:$0x3]  ;;  %9303 = vst [vmem:[#allocation70_spill] sm:$0xff] %v7247_v52  ;;  %3869 = vmatpush.msrb.mxu1 %v3021_v2  ;;  %v2079_v52 = vsel %vm590_vm1, %v2077_v20, %v9304_v56 }
 0x299   : > { %2651 = vst [vmem:[#allocation2 + $0x79] sm:$0xff] %v2619_v46  ;;  %v2516_v38 = vadd.f32 %v2439_v19, %v1730_v3  ;;  %2375 = vmatmul.f32.gmra.mxu3 %v1962_v10  ;;  %v7250_v1 = vrot.slane %v7240_v63, 2  ;;  %v3266_v3 = vrot.slane %v7194_v54, 2  ;;  %v1963_v10 = vrot.slane %v7178_v44, 1  ;;  %v3002_v46 = vld [vmem:[%s9151_s4 + $0x38] sm:$0xff]  ;;  %3533 = vmatpush.msrb.mxu2 %v5202_v45  ;;  %v5200_v20 = vld [vmem:[%s9151_s4 + $0x228] sm:$0xff] }
 0x29a   : > { %3449 = vmatmul.f32.gmra.mxu1 %v7240_v63  ;;  %v2906_v19 = vrot.slane %v2689_v34, 2  ;;  %3646 = vmatpush.msrb.mxu3 %v5218_v17  ;;  %v7285_v45 = vld [vmem:[#allocation2 + $0x190] sm:$0x3]  ;;  %v9306_v17 = vrot.slane %v7143_v8, 1  ;;  %v5216_v56 = vld [vmem:[%s9151_s4 + $0x2a8] sm:$0xff] }
 0x29b   : > { %v2552_v48 = vmul.f32 %v6939_v25, %v2516_v38  ;;  %v7281_v13 = vsel %vm590_vm1, %v3266_v3, %v7250_v1  ;;  %3759 = vmatpush.msrb.mxu0 %v3002_v46  ;;  %3534 = vmatpush.msrb.mxu2 %v5201_v35 }
 0x29c   : > { %v2328_v44 = vpop.f32.mrf.mxu3  ;;  %9305 = vst [vmem:[#allocation71_spill] sm:$0xff] %v7281_v13  ;;  %2265 = vmatmul.f32.gmra.mxu2 %v7143_v8  ;;  %v1964_v3 = vsel %vm477_vm0, %v9306_v17, %v1963_v10  ;;  %3647 = vmatpush.msrb.mxu3 %v5217_v4  ;;  %v3000_v8 = vld [vmem:[%s9151_s4 + $0x28] sm:$0xff]  ;;  %v2080_v10 = vrot.slane %v7285_v45, 2  ;;  %v5214_v17 = vld [vmem:[%s9151_s4 + $0x298] sm:$0xff] }
 0x29d   : > { %v7274_v2 = vpop.f32.mrf.mxu0  ;;  %v2588_v34 = vadd.f32 %v6945_v33, %v2552_v48  ;;  %v2329_v38 = vadd.f32 %v2328_v44, %v2215_v47  ;;  %v7298_v48 = vsel %vm590_vm1, %v7250_v1, %v2906_v19  ;;  %v1733_v47 = vadd.f32 %v6850_v15, %v6743_v5  ;;  %3760 = vmatpush.msrb.mxu0 %v3001_v41  ;;  %v5199_v5 = vld [vmem:[%s9151_s4 + $0x220] sm:$0xff] }
 0x29e   : > { %9307 = vst [vmem:[#allocation72_spill] sm:$0xff] %v7298_v48  ;;  %3535 = vmatpush.msrb.mxu2 %v5200_v20  ;;  %v1965_v41 = vrot.slane %v7213_v61, 1  ;;  %v1966_v19 = vrot.slane %v7215_v0, 1  ;;  %3648 = vmatpush.msrb.mxu3 %v5216_v56  ;;  %v5198_v20 = vld [vmem:[%s9151_s4 + $0x218] sm:$0xff] }
 0x29f   : > { %v2620_v46 = vmax.f32 %v2588_v34, 0.0  ;;  %v2442_v44 = vadd.f32 %v7169_v21, %v2329_v38  ;;  %v2218_v35 = vpop.f32.mrf.mxu2  ;;  %v5215_v21 = vld [vmem:[%s9151_s4 + $0x2a0] sm:$0xff]  ;;  %3761 = vmatpush.msrb.mxu0 %v3000_v8  ;;  %v7324_v34 = vpop.f32.mrf.mxu1 }
 0x2a0   : > { %2494 = vmatmul.f32.gmra.mxu0 %v2079_v52  ;;  %v7309_v4 = vld [vmem:[#allocation2 + $0x78] sm:$0xff]  ;;  %v2999_v52 = vld [vmem:[%s9151_s4 + $0x20] sm:$0xff]  ;;  %3536 = vmatpush.msrb.mxu2 %v5199_v5  ;;  %v1967_v48 = vsel %vm477_vm0, %v1965_v41, %v1966_v19 }
 0x2a1   : > { %2652 = vst [vmem:[#allocation2 + $0x81] sm:$0xff] %v2620_v46  ;;  %v2517_v15 = vadd.f32 %v2442_v44, %v1733_v47  ;;  %2378 = vmatmul.f32.gmra.mxu3 %v1964_v3  ;;  %v9308_v46 = vrot.slane %v7215_v0, 2  ;;  %3762 = vmatpush.msrb.mxu0 %v2999_v52  ;;  %v2998_v5 = vld [vmem:[%s9151_s4 + $0x18] sm:$0xff]  ;;  %v2997_v52 = vld [vmem:[%s9151_s4 + $0x10] sm:$0xff] }
 0x2a2   : > { %3452 = vmatmul.f32.gmra.mxu1 %v7309_v4  ;;  %3649 = vmatpush.msrb.mxu3 %v5215_v21  ;;  %v5213_v21 = vld [vmem:[%s9151_s4 + $0x290] sm:$0xff] }
 0x2a3   : > { %v2553_v38 = vmul.f32 %v6939_v25, %v2517_v15  ;;  %v2081_v44 = vsel %vm590_vm1, %v9308_v46, %v2080_v10  ;;  %v5197_v15 = vld [vmem:[%s9151_s4 + $0x210] sm:$0xff]  ;;  %3537 = vmatpush.msrb.mxu2 %v5198_v20  ;;  %v1736_v10 = vadd.f32 %v6858_v60, %v6760_v11  ;;  %v7360_v20 = vld [vmem:[#allocation2] sm:$0xff]  ;;  %3763 = vmatpush.msrb.mxu0 %v2998_v5  ;;  %v5196_v11 = vld [vmem:[%s9151_s4 + $0x208] sm:$0xff] }
 0x2a4   : > { %v2331_v3 = vpop.f32.mrf.mxu3  ;;  %2268 = vmatmul.f32.gmra.mxu2 %v7213_v61  ;;  %3650 = vmatpush.msrb.mxu3 %v5214_v17  ;;  %v7363_v17 = vrot.slane %v7360_v20, 2  ;;  %v5212_v46 = vld [vmem:[%s9151_s4 + $0x288] sm:$0xff] }
 0x2a5   : > { %v7333_v47 = vpop.f32.mrf.mxu0  ;;  %v2589_v56 = vadd.f32 %v6945_v33, %v2553_v38  ;;  %v2332_v8 = vadd.f32 %v2331_v3, %v2218_v35  ;;  %3538 = vmatpush.msrb.mxu2 %v5197_v15  ;;  %v3020_v3 = vld [vmem:[%s9151_s4 + $0xc8] sm:$0xff]  ;;  %3764 = vmatpush.msrb.mxu0 %v2997_v52  ;;  %v5195_v15 = vld [vmem:[%s9151_s4 + $0x200] sm:$0xff] }
 0x2a6   : > { %9309 = vst [vmem:[#allocation73_spill] sm:$0xff] %v7363_v17  ;;  %3870 = vmatpush.msrb.mxu1 %v3020_v3  ;;  %3651 = vmatpush.msrb.mxu3 %v5213_v21 }
 0x2a7   : > { %v2621_v35 = vmax.f32 %v2589_v56, 0.0  ;;  %v2445_v61 = vadd.f32 %v7210_v6, %v2332_v8  ;;  %v2221_v41 = vpop.f32.mrf.mxu2  ;;  %v1968_v56 = vrot.slane %v7285_v45, 1  ;;  %3539 = vmatpush.msrb.mxu2 %v5196_v11  ;;  %v3271_v45 = vrot.slane %v7309_v4, 2  ;;  %v7392_v21 = vpop.f32.mrf.mxu1  ;;  %v1846_v11 = vld [vmem:[#allocation2 + $0x1a8] sm:$0x3] }
 0x2a8   : > { %2497 = vmatmul.f32.gmra.mxu0 %v2081_v44  ;;  %v7358_v38 = vld [vmem:[#allocation2 + $0x80] sm:$0xff]  ;;  %v2692_v60 = vld [vmem:[#allocation2 + $0x88] sm:$0x3]  ;;  %3652 = vmatpush.msrb.mxu3 %v5212_v46 }
 0x2a9   : > { %2653 = vst [vmem:[#allocation2 + $0x91] sm:$0xff] %v2621_v35  ;;  %v2518_v6 = vadd.f32 %v2445_v61, %v1736_v10  ;;  %2381 = vmatmul.f32.gmra.mxu3 %v1967_v48  ;;  %v7376_v44 = vrot.slane %v7358_v38, 2  ;;  %v2996_v48 = vld [vmem:[%s9151_s4 + $0x8] sm:$0xff]  ;;  %v2911_v8 = vrot.slane %v2692_v60, 2  ;;  %v5211_v10 = vld [vmem:[%s9151_s4 + $0x280] sm:$0xff]  ;;  %v1969_v3 = vsel %vm477_vm0, %v1966_v19, %v1968_v56  ;;  %3540 = vmatpush.msrb.mxu2 %v5195_v15 }
 0x2aa   : > { %3455 = vmatmul.f32.gmra.mxu1 %v7358_v38  ;;  %3765 = vmatpush.msrb.mxu0 %v2996_v48  ;;  %v1739_v48 = vadd.f32 %v6869_v30, %v6768_v26  ;;  %v2085_v56 = vrot.slane %v1846_v11, 2 }
 0x2ab   : > { %v2554_v5 = vmul.f32 %v6939_v25, %v2518_v6  ;;  %v2995_v6 = vld [vmem:[%s9151_s4] sm:$0xff]  ;;  %3653 = vmatpush.msrb.mxu3 %v5211_v10  ;;  %v7404_v46 = vsel %vm590_vm1, %v3271_v45, %v7376_v44 }
 0x2ac   : > { %v2334_v35 = vpop.f32.mrf.mxu3  ;;  %2271 = vmatmul.f32.gmra.mxu2 %v7215_v0  ;;  %9310 = vst [vmem:[#allocation74_spill] sm:$0xff] %v7404_v46  ;;  %3766 = vmatpush.msrb.mxu0 %v2995_v6 }
 0x2ad   : > { %v7390_v61 = vpop.f32.mrf.mxu0  ;;  %v2590_v60 = vadd.f32 %v6945_v33, %v2554_v5  ;;  %v2335_v52 = vadd.f32 %v2334_v35, %v2221_v41  ;;  %v7408_v41 = vsel %vm590_vm1, %v7376_v44, %v2911_v8  ;;  %v7418_v8 = vrot.slane %v7360_v20, 1 }
 0x2ae   : > { %9311 = vst [vmem:[#allocation75_spill] sm:$0xff] %v7408_v41 }
 0x2af   : > { %v2622_v5 = vmax.f32 %v2590_v60, 0.0  ;;  %v2448_v35 = vadd.f32 %v7274_v2, %v2335_v52  ;;  %v2224_v19 = vpop.f32.mrf.mxu2  ;;  %9312 = vst [vmem:[#allocation76_spill] sm:$0xff] %v7418_v8  ;;  %v2086_v2 = vsel %vm590_vm1, %v7363_v17, %v2085_v56  ;;  %v1742_v52 = vadd.f32 %v6878_v59, %v6780_v55  ;;  %v7427_v6 = vpop.f32.mrf.mxu1  ;;  %v3019_v55 = vld [vmem:[%s9151_s4 + $0xc0] sm:$0xff] }
 0x2b0   : > { %2500 = vmatmul.f32.gmra.mxu0 %v7363_v17  ;;  %v7414_v0 = vld [vmem:[#allocation2 + $0x90] sm:$0xff]  ;;  %3871 = vmatpush.msrb.mxu1 %v3019_v55  ;;  %v1745_v55 = vadd.f32 %v6889_v49, %v6787_v18 }
 0x2b1   : > { %2654 = vst [vmem:[#allocation2 + $0x99] sm:$0xff] %v2622_v5  ;;  %v2519_v15 = vadd.f32 %v2448_v35, %v1739_v48  ;;  %2384 = vmatmul.f32.gmra.mxu3 %v1969_v3  ;;  %v3164_v59 = vrot.slane %v7414_v0, 1 }
 0x2b2   : > { %3458 = vmatmul.f32.gmra.mxu1 %v7414_v0 }
 0x2b3   : > { %v2555_v26 = vmul.f32 %v6939_v25, %v2519_v15 }
 0x2b4   : > { %v2337_v30 = vpop.f32.mrf.mxu3  ;;  %2274 = vmatmul.f32.gmra.mxu2 %v7360_v20 }
 0x2b5   : > { %v2456_v10 = vpop.f32.mrf.mxu0  ;;  %v2591_v45 = vadd.f32 %v6945_v33, %v2555_v26  ;;  %v2338_v60 = vadd.f32 %v2337_v30, %v2224_v19 }
 0x2b7   : > { %v2623_v3 = vmax.f32 %v2591_v45, 0.0  ;;  %v2451_v48 = vadd.f32 %v7333_v47, %v2338_v60  ;;  %v2227_v35 = vpop.f32.mrf.mxu2  ;;  %v1973_v47 = vrot.slane %v1846_v11, 1 }
 0x2b8   : > { %2503 = vmatmul.f32.gmra.mxu0 %v2086_v2  ;;  %v7430_v5 = vld [vmem:[#allocation2 + $0x98] sm:$0xff]  ;;  %v2695_v15 = vld [vmem:[#allocation2 + $0xa0] sm:$0x3]  ;;  %v3276_v2 = vrot.slane %v7414_v0, 2 }
 0x2b9   : > { %2655 = vst [vmem:[#allocation2 + $0xa9] sm:$0xff] %v2623_v3  ;;  %v2520_v56 = vadd.f32 %v2451_v48, %v1742_v52  ;;  %2387 = vmatmul.f32.gmra.mxu3 %v7418_v8  ;;  %v7434_v19 = vrot.slane %v7430_v5, 1  ;;  %v7437_v26 = vrot.slane %v7430_v5, 2  ;;  %v2916_v30 = vrot.slane %v2695_v15, 2 }
 0x2ba   : > { %3461 = vmatmul.f32.gmra.mxu1 %v7430_v5  ;;  %v1974_v15 = vsel %vm477_vm0, %v7418_v8, %v1973_v47 }
 0x2bb   : > { %v2556_v45 = vmul.f32 %v6939_v25, %v2520_v56  ;;  %v7448_v3 = vsel %vm477_vm0, %v3164_v59, %v7434_v19  ;;  %v7454_v11 = vsel %vm590_vm1, %v3276_v2, %v7437_v26  ;;  %v7460_v56 = vsel %vm590_vm1, %v7437_v26, %v2916_v30  ;;  %v7468_v2 = vpop.f32.mrf.mxu1 }
 0x2bc   : > { %v2340_v60 = vpop.f32.mrf.mxu3  ;;  %9313 = vst [vmem:[#allocation77_spill] sm:$0xff] %v7448_v3  ;;  %2277 = vmatmul.f32.gmra.mxu2 %v7360_v20 }
 0x2bd   : > { %v2459_v52 = vpop.f32.mrf.mxu0  ;;  %v2592_v48 = vadd.f32 %v6945_v33, %v2556_v45  ;;  %v2341_v41 = vadd.f32 %v2340_v60, %v2227_v35  ;;  %9314 = vst [vmem:[#allocation78_spill] sm:$0xff] %v7454_v11 }
 0x2be   : > { %9315 = vst [vmem:[#allocation79_spill] sm:$0xff] %v7460_v56 }
 0x2bf   : > { %v2624_v59 = vmax.f32 %v2592_v48, 0.0  ;;  %v2454_v45 = vadd.f32 %v7390_v61, %v2341_v41  ;;  %v2230_v60 = vpop.f32.mrf.mxu2  ;;  %v3045_v61 = vld [vmem:[#allocation2 + $0x28] sm:$0x3]  ;;  %v1748_v41 = vadd.f32 %v6897_v51, %v6796_v9  ;;  %v3018_v9 = vld [vmem:[%s9151_s4 + $0xb8] sm:$0xff] }
 0x2c0   : > { %3767 = vmatmul.f32.vlgmr.msrb.gmra.mxu0 %v7360_v20  ;;  %v7466_v35 = vld [vmem:[#allocation2 + $0xa8] sm:$0xff]  ;;  %3872 = vmatpush.msrb.mxu1 %v3018_v9 }
 0x2c1   : > { %2656 = vst [vmem:[#allocation2 + $0xb1] sm:$0xff] %v2624_v59  ;;  %v2521_v17 = vadd.f32 %v2454_v45, %v1745_v55  ;;  %2390 = vmatmul.f32.gmra.mxu3 %v1974_v15  ;;  %v3142_v59 = vrot.slane %v3045_v61, 1  ;;  %v3169_v51 = vrot.slane %v7466_v35, 1 }
 0x2c2   : > { %3464 = vmatmul.f32.gmra.mxu1 %v7466_v35 }
 0x2c3   : > { %v2557_v47 = vmul.f32 %v6939_v25, %v2521_v17 }
 0x2c4   : > { %v2343_v30 = vpop.f32.mrf.mxu3  ;;  %3541 = vmatmul.f32.vlgmr.msrb.gmra.mxu2 %v7032_v37 }
 0x2c5   : > { %v2462_v56 = vpop.f32.mrf.mxu0  ;;  %v2593_v18 = vadd.f32 %v6945_v33, %v2557_v47  ;;  %v2344_v49 = vadd.f32 %v2343_v30, %v2230_v60 }
 0x2c7   : > { %v2625_v48 = vmax.f32 %v2593_v18, 0.0  ;;  %v2457_v8 = vadd.f32 %v2456_v10, %v2344_v49  ;;  %v2233_v55 = vpop.f32.mrf.mxu2  ;;  %v7491_v10 = vpop.f32.mrf.mxu1  ;;  %v3143_v49 = vsel %vm477_vm0, %v7011_v16, %v3142_v59 }
 0x2c8   : > { %3770 = vmatmul.f32.gmra.mxu0 %v7360_v20  ;;  %v7477_v15 = vld [vmem:[#allocation2 + $0xb0] sm:$0xff]  ;;  %v2698_v17 = vld [vmem:[#allocation2 + $0xb8] sm:$0x3] }
 0x2c9   : > { %2657 = vst [vmem:[#allocation2 + $0xc1] sm:$0xff] %v2625_v48  ;;  %v2522_v45 = vadd.f32 %v2457_v8, %v1748_v41  ;;  %v7480_v47 = vrot.slane %v7477_v15, 1  ;;  %v7483_v60 = vrot.slane %v7477_v15, 2  ;;  %3654 = vmatmul.f32.vlgmr.msrb.gmra.mxu3 %v7036_v43  ;;  %v2921_v20 = vrot.slane %v2698_v17, 2 }
 0x2ca   : > { %3467 = vmatmul.f32.gmra.mxu1 %v7477_v15  ;;  %v3281_v8 = vrot.slane %v7466_v35, 2  ;;  %v3254_v41 = vrot.slane %v3045_v61, 2  ;;  %v1751_v61 = vadd.f32 %v6908_v57, %v6801_v40 }
 0x2cb   : > { %v2558_v30 = vmul.f32 %v6939_v25, %v2522_v45  ;;  %v7499_v43 = vsel %vm477_vm0, %v3169_v51, %v7480_v47  ;;  %v7508_v25 = vsel %vm590_vm1, %v7483_v60, %v2921_v20  ;;  %v7521_v20 = vld [vmem:[%s9149_s2] ss:$0 sm:$0xff] }
 0x2cc   : > { %v2346_v18 = vpop.f32.mrf.mxu3  ;;  %3544 = vmatmul.f32.gmra.mxu2 %v3143_v49  ;;  %v7504_v17 = vsel %vm590_vm1, %v3281_v8, %v7483_v60  ;;  %9317 = vst [vmem:[#allocation81_spill] sm:$0xff] %v7508_v25  ;;  %v1754_v49 = vadd.f32 %v6926_v53, %v6809_v58  ;;  %v3017_v58 = vld [vmem:[%s9151_s4 + $0xb0] sm:$0xff] }
 0x2cd   : > { %v2465_v48 = vpop.f32.mrf.mxu0  ;;  %v2594_v37 = vadd.f32 %v6945_v33, %v2558_v30  ;;  %v2347_v9 = vadd.f32 %v2346_v18, %v2233_v55  ;;  %9316 = vst [vmem:[#allocation80_spill] sm:$0xff] %v7504_v17  ;;  %v3255_v33 = vsel %vm590_vm1, %v7014_v12, %v3254_v41  ;;  %v3048_v30 = vld [vmem:[#allocation2 + $0x40] sm:$0x3]  ;;  %3873 = vmatpush.msrb.mxu1 %v3017_v58 }
 0x2cf   : > { %v2626_v59 = vmax.f32 %v2594_v37, 0.0  ;;  %v2460_v45 = vadd.f32 %v2459_v52, %v2347_v9  ;;  %v2236_v55 = vpop.f32.mrf.mxu2  ;;  %v7531_v18 = vpop.f32.mrf.mxu1 }
 0x2d0   : > { %3773 = vmatmul.f32.gmra.mxu0 %v6981_v32  ;;  %v7513_v51 = vld [vmem:[#allocation2 + $0xc0] sm:$0xff] }
 0x2d1   : > { %2658 = vst [vmem:[#allocation2 + $0xc9] sm:$0xff] %v2626_v59  ;;  %v2523_v8 = vadd.f32 %v2460_v45, %v1751_v61  ;;  %3657 = vmatmul.f32.gmra.mxu3 %v3255_v33  ;;  %v7527_v32 = vld [vmem:[%s9150_s3] ss:$0 sm:$0xff]  ;;  %v3147_v45 = vrot.slane %v3048_v30, 1  ;;  %v3174_v53 = vrot.slane %v7513_v51, 1 }
 0x2d2   : > { %3470 = vmatmul.f32.gmra.mxu1 %v7513_v51 }
 0x2d3   : > { %v2559_v40 = vmul.f32 %v7521_v20, %v2523_v8 }
 0x2d4   : > { %v2349_v37 = vpop.f32.mrf.mxu3  ;;  %3547 = vmatmul.f32.gmra.mxu2 %v7104_v36 }
 0x2d5   : > { %v2468_v57 = vpop.f32.mrf.mxu0  ;;  %v2595_v12 = vadd.f32 %v7527_v32, %v2559_v40  ;;  %v2350_v52 = vadd.f32 %v2349_v37, %v2236_v55 }
 0x2d7   : > { %v2627_v41 = vmax.f32 %v2595_v12, 0.0  ;;  %v2463_v9 = vadd.f32 %v2462_v56, %v2350_v52  ;;  %v2239_v59 = vpop.f32.mrf.mxu2  ;;  %v3286_v56 = vrot.slane %v7513_v51, 2  ;;  %v3148_v52 = vsel %vm477_vm0, %v7081_v29, %v3147_v45 }
 0x2d8   : > { %3776 = vmatmul.f32.gmra.mxu0 %v7005_v62  ;;  %v7536_v61 = vld [vmem:[#allocation2 + $0xc8] sm:$0xff]  ;;  %v2701_v33 = vld [vmem:[#allocation2 + $0xd0] sm:$0x3] }
 0x2d9   : > { %2659 = vst [vmem:[#allocation2 + $0xd9] sm:$0xff] %v2627_v41  ;;  %v2524_v8 = vadd.f32 %v2463_v9, %v1754_v49  ;;  %v7539_v55 = vrot.slane %v7536_v61, 1  ;;  %v7542_v40 = vrot.slane %v7536_v61, 2  ;;  %3660 = vmatmul.f32.gmra.mxu3 %v7112_v22  ;;  %v2926_v62 = vrot.slane %v2701_v33, 2 }
 0x2da   : > { %3473 = vmatmul.f32.gmra.mxu1 %v7536_v61  ;;  %v3259_v49 = vrot.slane %v3048_v30, 2  ;;  %v1757_v30 = vadd.f32 %v6954_v24, %v6814_v23 }
 0x2db   : > { %v2560_v37 = vmul.f32 %v7521_v20, %v2524_v8  ;;  %v7556_v9 = vsel %vm477_vm0, %v3174_v53, %v7539_v55  ;;  %v7561_v33 = vsel %vm590_vm1, %v3286_v56, %v7542_v40  ;;  %v7567_v8 = vsel %vm590_vm1, %v7542_v40, %v2926_v62 }
 0x2dc   : > { %v2352_v12 = vpop.f32.mrf.mxu3  ;;  %3550 = vmatmul.f32.gmra.mxu2 %v3148_v52  ;;  %9318 = vst [vmem:[#allocation82_spill] sm:$0xff] %v7561_v33 }
 0x2dd   : > { %v2471_v41 = vpop.f32.mrf.mxu0  ;;  %v2596_v25 = vadd.f32 %v7527_v32, %v2560_v37  ;;  %v2353_v22 = vadd.f32 %v2352_v12, %v2239_v59  ;;  %9319 = vst [vmem:[#allocation83_spill] sm:$0xff] %v7567_v8  ;;  %v3260_v59 = vsel %vm590_vm1, %v7084_v14, %v3259_v49  ;;  %v9320_v14 = vld [vmem:[#allocation50_spill] sm:$0xff] }
 0x2de   : > { %v7563_v58 = vpop.f32.mrf.mxu1 }
 0x2df   : > { %v2628_v45 = vmax.f32 %v2596_v25, 0.0  ;;  %v2466_v53 = vadd.f32 %v2465_v48, %v2353_v22  ;;  %v2242_v56 = vpop.f32.mrf.mxu2  ;;  %v1760_v48 = vadd.f32 %v9320_v14, %v6822_v28  ;;  %v3016_v28 = vld [vmem:[%s9151_s4 + $0xa8] sm:$0xff] }
 0x2e0   : > { %3779 = vmatmul.f32.gmra.mxu0 %v7048_v42  ;;  %v7572_v37 = vld [vmem:[#allocation2 + $0xd8] sm:$0xff]  ;;  %3874 = vmatpush.msrb.mxu1 %v3016_v28 }
 0x2e1   : > { %2660 = vst [vmem:[#allocation2 + $0xe1] sm:$0xff] %v2628_v45  ;;  %v2525_v12 = vadd.f32 %v2466_v53, %v1757_v30  ;;  %3663 = vmatmul.f32.gmra.mxu3 %v3260_v59  ;;  %v3051_v42 = vld [vmem:[#allocation2 + $0x58] sm:$0x3]  ;;  %v9321_v30 = vld [vmem:[#allocation57_spill] sm:$0xff] }
 0x2e2   : > { %3476 = vmatmul.f32.gmra.mxu1 %v7572_v37  ;;  %v3152_v59 = vrot.slane %v3051_v42, 1 }
 0x2e3   : > { %v2561_v62 = vmul.f32 %v7521_v20, %v2525_v12 }
 0x2e4   : > { %v2355_v52 = vpop.f32.mrf.mxu3  ;;  %3553 = vmatmul.f32.gmra.mxu2 %v7174_v7  ;;  %v3153_v14 = vsel %vm477_vm0, %v7153_v50, %v3152_v59  ;;  %v9325_v7 = vld [vmem:[#allocation51_spill] sm:$0xff] }
 0x2e5   : > { %v2474_v8 = vpop.f32.mrf.mxu0  ;;  %v2597_v23 = vadd.f32 %v7527_v32, %v2561_v62  ;;  %v2356_v24 = vadd.f32 %v2355_v52, %v2242_v56  ;;  %v3291_v52 = vrot.slane %v7572_v37, 2 }
 0x2e6   : > { %v7580_v22 = vpop.f32.mrf.mxu1 }
 0x2e7   : > { %v2629_v25 = vmax.f32 %v2597_v23, 0.0  ;;  %v2469_v49 = vadd.f32 %v2468_v57, %v2356_v24  ;;  %v2245_v53 = vpop.f32.mrf.mxu2 }
 0x2e8   : > { %3782 = vmatmul.f32.gmra.mxu0 %v9321_v30  ;;  %v7585_v45 = vld [vmem:[#allocation2 + $0xe0] sm:$0xff]  ;;  %v2704_v12 = vld [vmem:[#allocation2 + $0xe8] sm:$0x3] }
 0x2e9   : > { %2661 = vst [vmem:[#allocation2 + $0xf1] sm:$0xff] %v2629_v25  ;;  %v2526_v62 = vadd.f32 %v2469_v49, %v1760_v48  ;;  %v7588_v56 = vrot.slane %v7585_v45, 2  ;;  %3666 = vmatmul.f32.gmra.mxu3 %v7182_v27  ;;  %v2931_v57 = vrot.slane %v2704_v12, 2  ;;  %v3264_v48 = vrot.slane %v3051_v42, 2 }
 0x2ea   : > { %3479 = vmatmul.f32.gmra.mxu1 %v7585_v45 }
 0x2eb   : > { %v2562_v23 = vmul.f32 %v7521_v20, %v2526_v62  ;;  %v7602_v27 = vsel %vm590_vm1, %v3291_v52, %v7588_v56  ;;  %v7606_v12 = vsel %vm590_vm1, %v7588_v56, %v2931_v57  ;;  %v9324_v62 = vld [vmem:[#allocation47_spill] sm:$0xff]  ;;  %v3265_v52 = vsel %vm590_vm1, %v7156_v31, %v3264_v48  ;;  %v3054_v31 = vld [vmem:[#allocation2 + $0x70] sm:$0x3]  ;;  %v9329_v48 = vld [vmem:[#allocation48_spill] sm:$0xff] }
 0x2ec   : > { %v2358_v24 = vpop.f32.mrf.mxu3  ;;  %3556 = vmatmul.f32.gmra.mxu2 %v3153_v14  ;;  %9322 = vst [vmem:[#allocation50_spill] sm:$0xff] %v7602_v27  ;;  %v1763_v29 = vadd.f32 %v9325_v7, %v9324_v62  ;;  %v3154_v7 = vrot.slane %v7194_v54, 1  ;;  %v3157_v36 = vrot.slane %v3054_v31, 1 }
 0x2ed   : > { %v2477_v25 = vpop.f32.mrf.mxu0  ;;  %v2598_v49 = vadd.f32 %v7527_v32, %v2562_v23  ;;  %v2359_v30 = vadd.f32 %v2358_v24, %v2245_v53  ;;  %9323 = vst [vmem:[#allocation57_spill] sm:$0xff] %v7606_v12  ;;  %v7614_v53 = vrot.slane %v7240_v63, 1 }
 0x2ee   : > { %v7608_v28 = vpop.f32.mrf.mxu1 }
 0x2ef   : > { %v2630_v59 = vmax.f32 %v2598_v49, 0.0  ;;  %v2472_v42 = vadd.f32 %v2471_v41, %v2359_v30  ;;  %9326 = vst [vmem:[#allocation47_spill] sm:$0xff] %v7614_v53  ;;  %v2248_v24 = vpop.f32.mrf.mxu2 }
 0x2f0   : > { %3785 = vmatmul.f32.gmra.mxu0 %v7120_v39  ;;  %v7616_v23 = vld [vmem:[#allocation2 + $0xf0] sm:$0xff]  ;;  %v7625_v39 = vsel %vm477_vm0, %v3154_v7, %v7614_v53 }
 0x2f1   : > { %2662 = vst [vmem:[#allocation2 + $0xf9] sm:$0xff] %v2630_v59  ;;  %v2527_v57 = vadd.f32 %v2472_v42, %v1763_v29  ;;  %3669 = vmatmul.f32.gmra.mxu3 %v3265_v52  ;;  %v9330_v59 = vld [vmem:[#allocation56_spill] sm:$0xff] }
 0x2f2   : > { %3482 = vmatmul.f32.gmra.mxu1 %v7616_v23  ;;  %9327 = vst [vmem:[#allocation51_spill] sm:$0xff] %v7625_v39  ;;  %v1766_v42 = vadd.f32 %v9330_v59, %v9329_v48  ;;  %v3269_v59 = vrot.slane %v3054_v31, 2 }
 0x2f3   : > { %v2563_v41 = vmul.f32 %v7521_v20, %v2527_v57  ;;  %v9331_v57 = vld [vmem:[#allocation64_spill] sm:$0xff] }
 0x2f4   : > { %v2361_v14 = vpop.f32.mrf.mxu3  ;;  %3559 = vmatmul.f32.gmra.mxu2 %v7625_v39  ;;  %v9336_v39 = vld [vmem:[#allocation59_spill] sm:$0xff] }
 0x2f5   : > { %v2480_v49 = vpop.f32.mrf.mxu0  ;;  %v2599_v30 = vadd.f32 %v7527_v32, %v2563_v41  ;;  %v2362_v62 = vadd.f32 %v2361_v14, %v2248_v24 }
 0x2f6   : > { %v7629_v29 = vpop.f32.mrf.mxu1 }
 0x2f7   : > { %9328 = vst [vmem:[#allocation84_spill] sm:$0xff] %v7629_v29  ;;  %v2631_v52 = vmax.f32 %v2599_v30, 0.0  ;;  %v2475_v12 = vadd.f32 %v2474_v8, %v2362_v62  ;;  %v2251_v7 = vpop.f32.mrf.mxu2  ;;  %v3015_v8 = vld [vmem:[%s9151_s4 + $0xa0] sm:$0xff]  ;;  %v3296_v30 = vrot.slane %v7616_v23, 2 }
 0x2f8   : > { %3788 = vmatmul.f32.gmra.mxu0 %v9331_v57  ;;  %v7634_v50 = vld [vmem:[#allocation2 + $0xf8] sm:$0xff]  ;;  %v2707_v16 = vld [vmem:[#allocation2 + $0x100] sm:$0x3]  ;;  %3875 = vmatpush.msrb.mxu1 %v3015_v8 }
 0x2f9   : > { %2663 = vst [vmem:[#allocation2 + $0x109] sm:$0xff] %v2631_v52  ;;  %v2528_v41 = vadd.f32 %v2475_v12, %v1766_v42  ;;  %v7637_v24 = vrot.slane %v7634_v50, 2  ;;  %3672 = vmatmul.f32.gmra.mxu3 %v7281_v13  ;;  %v2936_v14 = vrot.slane %v2707_v16, 2  ;;  %v3158_v12 = vsel %vm477_vm0, %v7614_v53, %v3157_v36 }
 0x2fa   : > { %3485 = vmatmul.f32.gmra.mxu1 %v7634_v50 }
 0x2fb   : > { %v2564_v62 = vmul.f32 %v7521_v20, %v2528_v41  ;;  %v7651_v13 = vsel %vm590_vm1, %v3296_v30, %v7637_v24  ;;  %v7655_v16 = vsel %vm590_vm1, %v7637_v24, %v2936_v14  ;;  %v9335_v41 = vld [vmem:[#allocation49_spill] sm:$0xff]  ;;  %v3270_v30 = vsel %vm590_vm1, %v7250_v1, %v3269_v59  ;;  %v9339_v59 = vld [vmem:[#allocation38_spill] sm:$0xff] }
 0x2fc   : > { %v2364_v48 = vpop.f32.mrf.mxu3  ;;  %3562 = vmatmul.f32.gmra.mxu2 %v3158_v12  ;;  %9332 = vst [vmem:[#allocation48_spill] sm:$0xff] %v7651_v13  ;;  %v1769_v29 = vadd.f32 %v9336_v39, %v9335_v41  ;;  %v3159_v39 = vrot.slane %v7309_v4, 1  ;;  %v3057_v1 = vld [vmem:[#allocation2 + $0x88] sm:$0x3] }
 0x2fd   : > { %v2483_v42 = vpop.f32.mrf.mxu0  ;;  %v2600_v52 = vadd.f32 %v7527_v32, %v2564_v62  ;;  %v2365_v57 = vadd.f32 %v2364_v48, %v2251_v7  ;;  %9333 = vst [vmem:[#allocation56_spill] sm:$0xff] %v7655_v16  ;;  %v7663_v7 = vrot.slane %v7358_v38, 1  ;;  %v3162_v53 = vrot.slane %v3057_v1, 1 }
 0x2ff   : > { %v7657_v8 = vpop.f32.mrf.mxu1  ;;  %v2632_v36 = vmax.f32 %v2600_v52, 0.0  ;;  %v2478_v31 = vadd.f32 %v2477_v25, %v2365_v57  ;;  %v2254_v48 = vpop.f32.mrf.mxu2 }
 0x300   : > { %9334 = vst [vmem:[#allocation64_spill] sm:$0xff] %v7657_v8  ;;  %3791 = vmatmul.f32.gmra.mxu0 %v7194_v54  ;;  %v7665_v62 = vld [vmem:[#allocation2 + $0x108] sm:$0xff]  ;;  %v7674_v54 = vsel %vm477_vm0, %v3159_v39, %v7663_v7 }
 0x301   : > { %2664 = vst [vmem:[#allocation2 + $0x111] sm:$0xff] %v2632_v36  ;;  %v2529_v14 = vadd.f32 %v2478_v31, %v1769_v29  ;;  %3675 = vmatmul.f32.gmra.mxu3 %v3270_v30  ;;  %v9340_v36 = vld [vmem:[#allocation63_spill] sm:$0xff] }
 0x302   : > { %3488 = vmatmul.f32.gmra.mxu1 %v7665_v62  ;;  %9337 = vst [vmem:[#allocation49_spill] sm:$0xff] %v7674_v54  ;;  %v1772_v31 = vadd.f32 %v9340_v36, %v9339_v59  ;;  %v3274_v59 = vrot.slane %v3057_v1, 2 }
 0x303   : > { %v2565_v25 = vmul.f32 %v7521_v20, %v2529_v14 }
 0x304   : > { %v2367_v12 = vpop.f32.mrf.mxu3  ;;  %3565 = vmatmul.f32.gmra.mxu2 %v7674_v54  ;;  %v9344_v54 = vld [vmem:[#allocation69_spill] sm:$0xff] }
 0x305   : > { %v2486_v52 = vpop.f32.mrf.mxu0  ;;  %v2601_v57 = vadd.f32 %v7527_v32, %v2565_v25  ;;  %v2368_v41 = vadd.f32 %v2367_v12, %v2254_v48  ;;  %v3301_v12 = vrot.slane %v7665_v62, 2 }
 0x307   : > { %v7678_v29 = vpop.f32.mrf.mxu1  ;;  %v2633_v30 = vmax.f32 %v2601_v57, 0.0  ;;  %v2481_v16 = vadd.f32 %v2480_v49, %v2368_v41  ;;  %v2257_v39 = vpop.f32.mrf.mxu2  ;;  %v3014_v49 = vld [vmem:[%s9151_s4 + $0x98] sm:$0xff] }
 0x308   : > { %9338 = vst [vmem:[#allocation59_spill] sm:$0xff] %v7678_v29  ;;  %3794 = vmatmul.f32.gmra.mxu0 %v7240_v63  ;;  %v7683_v14 = vld [vmem:[#allocation2 + $0x110] sm:$0xff]  ;;  %v2710_v8 = vld [vmem:[#allocation2 + $0x118] sm:$0x3]  ;;  %3876 = vmatpush.msrb.mxu1 %v3014_v49 }
 0x309   : > { %2665 = vst [vmem:[#allocation2 + $0x121] sm:$0xff] %v2633_v30  ;;  %v2530_v25 = vadd.f32 %v2481_v16, %v1772_v31  ;;  %v7686_v48 = vrot.slane %v7683_v14, 2  ;;  %3678 = vmatmul.f32.gmra.mxu3 %v7404_v46  ;;  %v2941_v63 = vrot.slane %v2710_v8, 2  ;;  %v3163_v16 = vsel %vm477_vm0, %v7663_v7, %v3162_v53 }
 0x30a   : > { %3491 = vmatmul.f32.gmra.mxu1 %v7683_v14 }
 0x30b   : > { %v2566_v57 = vmul.f32 %v7521_v20, %v2530_v25  ;;  %v7700_v46 = vsel %vm590_vm1, %v3301_v12, %v7686_v48  ;;  %v7704_v8 = vsel %vm590_vm1, %v7686_v48, %v2941_v63  ;;  %v9343_v25 = vld [vmem:[#allocation39_spill] sm:$0xff] }
 0x30c   : > { %v2370_v41 = vpop.f32.mrf.mxu3  ;;  %3568 = vmatmul.f32.gmra.mxu2 %v3163_v16  ;;  %9341 = vst [vmem:[#allocation38_spill] sm:$0xff] %v7700_v46  ;;  %v1775_v29 = vadd.f32 %v9344_v54, %v9343_v25 }
 0x30d   : > { %v2489_v36 = vpop.f32.mrf.mxu0  ;;  %v2602_v31 = vadd.f32 %v7527_v32, %v2566_v57  ;;  %v2371_v30 = vadd.f32 %v2370_v41, %v2257_v39  ;;  %9342 = vst [vmem:[#allocation63_spill] sm:$0xff] %v7704_v8  ;;  %v3275_v39 = vsel %vm590_vm1, %v7376_v44, %v3274_v59  ;;  %v9346_v44 = vld [vmem:[#allocation70_spill] sm:$0xff] }
 0x30f   : > { %v7706_v49 = vpop.f32.mrf.mxu1  ;;  %v2634_v53 = vmax.f32 %v2602_v31, 0.0  ;;  %v2484_v1 = vadd.f32 %v2483_v42, %v2371_v30  ;;  %v2260_v12 = vpop.f32.mrf.mxu2  ;;  %v9345_v30 = vld [vmem:[#allocation40_spill] sm:$0xff] }
 0x310   : > { %3797 = vmatmul.f32.gmra.mxu0 %v7309_v4  ;;  %v7711_v57 = vld [vmem:[#allocation2 + $0x120] sm:$0xff]  ;;  %v1778_v59 = vadd.f32 %v9346_v44, %v9345_v30 }
 0x311   : > { %2666 = vst [vmem:[#allocation2 + $0x129] sm:$0xff] %v2634_v53  ;;  %v2531_v41 = vadd.f32 %v2484_v1, %v1775_v29  ;;  %3681 = vmatmul.f32.gmra.mxu3 %v3275_v39  ;;  %v3060_v4 = vld [vmem:[#allocation2 + $0xa0] sm:$0x3] }
 0x312   : > { %3494 = vmatmul.f32.gmra.mxu1 %v7711_v57  ;;  %v3167_v39 = vrot.slane %v3060_v4, 1  ;;  %v3279_v44 = vrot.slane %v3060_v4, 2 }
 0x313   : > { %v2567_v63 = vmul.f32 %v7521_v20, %v2531_v41 }
 0x314   : > { %v2373_v16 = vpop.f32.mrf.mxu3  ;;  %3571 = vmatmul.f32.gmra.mxu2 %v7448_v3  ;;  %v3168_v30 = vsel %vm477_vm0, %v7434_v19, %v3167_v39 }
 0x315   : > { %v2492_v8 = vpop.f32.mrf.mxu0  ;;  %v2603_v54 = vadd.f32 %v7527_v32, %v2567_v63  ;;  %v2374_v42 = vadd.f32 %v2373_v16, %v2260_v12  ;;  %v3306_v16 = vrot.slane %v7711_v57, 2 }
 0x317   : > { %v7719_v31 = vpop.f32.mrf.mxu1  ;;  %v2635_v25 = vmax.f32 %v2603_v54, 0.0  ;;  %v2487_v29 = vadd.f32 %v2486_v52, %v2374_v42  ;;  %v2263_v1 = vpop.f32.mrf.mxu2  ;;  %v3013_v52 = vld [vmem:[%s9151_s4 + $0x90] sm:$0xff] }
 0x318   : > { %3800 = vmatmul.f32.gmra.mxu0 %v7358_v38  ;;  %v7724_v53 = vld [vmem:[#allocation2 + $0x128] sm:$0xff]  ;;  %v2713_v41 = vld [vmem:[#allocation2 + $0x130] sm:$0x3]  ;;  %3877 = vmatpush.msrb.mxu1 %v3013_v52 }
 0x319   : > { %2667 = vst [vmem:[#allocation2 + $0x139] sm:$0xff] %v2635_v25  ;;  %v2532_v63 = vadd.f32 %v2487_v29, %v1778_v59  ;;  %v7727_v12 = vrot.slane %v7724_v53, 2  ;;  %3684 = vmatmul.f32.gmra.mxu3 %v7454_v11  ;;  %v2946_v38 = vrot.slane %v2713_v41, 2 }
 0x31a   : > { %3497 = vmatmul.f32.gmra.mxu1 %v7724_v53 }
 0x31b   : > { %v2568_v54 = vmul.f32 %v7521_v20, %v2532_v63  ;;  %v7741_v11 = vsel %vm590_vm1, %v3306_v16, %v7727_v12  ;;  %v7745_v41 = vsel %vm590_vm1, %v7727_v12, %v2946_v38  ;;  %v9349_v63 = vld [vmem:[#allocation41_spill] sm:$0xff] }
 0x31c   : > { %v2376_v42 = vpop.f32.mrf.mxu3  ;;  %3574 = vmatmul.f32.gmra.mxu2 %v3168_v30  ;;  %9347 = vst [vmem:[#allocation39_spill] sm:$0xff] %v7741_v11  ;;  %v1781_v3 = vadd.f32 %v7324_v34, %v9349_v63 }
 0x31d   : > { %v2495_v59 = vpop.f32.mrf.mxu0  ;;  %v2604_v25 = vadd.f32 %v7527_v32, %v2568_v54  ;;  %v2377_v29 = vadd.f32 %v2376_v42, %v2263_v1  ;;  %9348 = vst [vmem:[#allocation69_spill] sm:$0xff] %v7745_v41  ;;  %v3280_v1 = vsel %vm590_vm1, %v7437_v26, %v3279_v44 }
 0x31f   : > { %v7747_v52 = vpop.f32.mrf.mxu1  ;;  %v2636_v39 = vmax.f32 %v2604_v25, 0.0  ;;  %v2490_v4 = vadd.f32 %v2489_v36, %v2377_v29  ;;  %v2266_v16 = vpop.f32.mrf.mxu2  ;;  %v9350_v29 = vld [vmem:[#allocation42_spill] sm:$0xff] }
 0x320   : > { %3803 = vmatmul.f32.gmra.mxu0 %v7414_v0  ;;  %v7752_v54 = vld [vmem:[#allocation2 + $0x138] sm:$0xff]  ;;  %v1784_v26 = vadd.f32 %v7392_v21, %v9350_v29  ;;  %v3012_v21 = vld [vmem:[%s9151_s4 + $0x88] sm:$0xff] }
 0x321   : > { %2668 = vst [vmem:[#allocation2 + $0x141] sm:$0xff] %v2636_v39  ;;  %v2533_v42 = vadd.f32 %v2490_v4, %v1781_v3  ;;  %3687 = vmatmul.f32.gmra.mxu3 %v3280_v1  ;;  %v3063_v0 = vld [vmem:[#allocation2 + $0xb8] sm:$0x3]  ;;  %3878 = vmatpush.msrb.mxu1 %v3012_v21 }
 0x322   : > { %3500 = vmatmul.f32.gmra.mxu1 %v7752_v54  ;;  %v3172_v4 = vrot.slane %v3063_v0, 1 }
 0x323   : > { %v2569_v38 = vmul.f32 %v7521_v20, %v2533_v42 }
 0x324   : > { %v2379_v30 = vpop.f32.mrf.mxu3  ;;  %3577 = vmatmul.f32.gmra.mxu2 %v7499_v43 }
 0x325   : > { %v2498_v41 = vpop.f32.mrf.mxu0  ;;  %v2605_v34 = vadd.f32 %v7527_v32, %v2569_v38  ;;  %v2380_v36 = vadd.f32 %v2379_v30, %v2266_v16 }
 0x327   : > { %v7760_v25 = vpop.f32.mrf.mxu1  ;;  %v2637_v44 = vmax.f32 %v2605_v34, 0.0  ;;  %v2493_v3 = vadd.f32 %v2492_v8, %v2380_v36  ;;  %v2269_v39 = vpop.f32.mrf.mxu2  ;;  %v3311_v8 = vrot.slane %v7752_v54, 2  ;;  %v3173_v34 = vsel %vm477_vm0, %v7480_v47, %v3172_v4 }
 0x328   : > { %3806 = vmatmul.f32.gmra.mxu0 %v7430_v5  ;;  %v7765_v63 = vld [vmem:[#allocation2 + $0x140] sm:$0xff]  ;;  %v2716_v1 = vld [vmem:[#allocation2 + $0x148] sm:$0x3]  ;;  %v3284_v36 = vrot.slane %v3063_v0, 2 }
 0x329   : > { %2669 = vst [vmem:[#allocation2 + $0x151] sm:$0xff] %v2637_v44  ;;  %v2534_v42 = vadd.f32 %v2493_v3, %v1784_v26  ;;  %v7768_v16 = vrot.slane %v7765_v63, 2  ;;  %3690 = vmatmul.f32.gmra.mxu3 %v7504_v17  ;;  %v2951_v5 = vrot.slane %v2716_v1, 2 }
 0x32a   : > { %3503 = vmatmul.f32.gmra.mxu1 %v7765_v63 }
 0x32b   : > { %v2570_v38 = vmul.f32 %v7521_v20, %v2534_v42  ;;  %v7782_v3 = vsel %vm590_vm1, %v3311_v8, %v7768_v16  ;;  %v7786_v1 = vsel %vm590_vm1, %v7768_v16, %v2951_v5  ;;  %v9353_v42 = vld [vmem:[#allocation43_spill] sm:$0xff]  ;;  %v3011_v5 = vld [vmem:[%s9151_s4 + $0x80] sm:$0xff] }
 0x32c   : > { %v2382_v30 = vpop.f32.mrf.mxu3  ;;  %3580 = vmatmul.f32.gmra.mxu2 %v3173_v34  ;;  %9351 = vst [vmem:[#allocation40_spill] sm:$0xff] %v7782_v3  ;;  %v1787_v17 = vadd.f32 %v7427_v6, %v9353_v42  ;;  %3879 = vmatpush.msrb.mxu1 %v3011_v5 }
 0x32d   : > { %v2501_v29 = vpop.f32.mrf.mxu0  ;;  %v2606_v26 = vadd.f32 %v7527_v32, %v2570_v38  ;;  %v2383_v44 = vadd.f32 %v2382_v30, %v2269_v39  ;;  %9352 = vst [vmem:[#allocation70_spill] sm:$0xff] %v7786_v1  ;;  %v3285_v39 = vsel %vm590_vm1, %v7483_v60, %v3284_v36  ;;  %v3066_v60 = vld [vmem:[#allocation2 + $0xd0] sm:$0x3]  ;;  %v9354_v36 = vld [vmem:[#allocation44_spill] sm:$0xff] }
 0x32f   : > { %v7788_v21 = vpop.f32.mrf.mxu1  ;;  %v2638_v4 = vmax.f32 %v2606_v26, 0.0  ;;  %v2496_v0 = vadd.f32 %v2495_v59, %v2383_v44  ;;  %v2272_v8 = vpop.f32.mrf.mxu2  ;;  %v1790_v44 = vadd.f32 %v7468_v2, %v9354_v36  ;;  %v5242_v2 = vld [vmem:[%s9151_s4 + $0x378] sm:$0xff] }
 0x330   : > { %3809 = vmatmul.f32.gmra.mxu0 %v7466_v35  ;;  %v7793_v38 = vld [vmem:[#allocation2 + $0x150] sm:$0xff]  ;;  %4459 = vmatpush.msra.mxu3 %v5242_v2 }
 0x331   : > { %2670 = vst [vmem:[#allocation2 + $0x159] sm:$0xff] %v2638_v4  ;;  %v2535_v30 = vadd.f32 %v2496_v0, %v1787_v17  ;;  %3693 = vmatmul.f32.gmra.mxu3 %v3285_v39 }
 0x332   : > { %3506 = vmatmul.f32.gmra.mxu1 %v7793_v38 }
 0x333   : > { %v2571_v6 = vmul.f32 %v7521_v20, %v2535_v30  ;;  %v3177_v30 = vrot.slane %v3066_v60, 1 }
 0x334   : > { %v2385_v59 = vpop.f32.mrf.mxu3  ;;  %3583 = vmatmul.f32.gmra.mxu2 %v7556_v9 }
 0x335   : > { %v7802_v35 = vpop.f32.mrf.mxu0  ;;  %v2607_v34 = vadd.f32 %v7527_v32, %v2571_v6  ;;  %v2386_v26 = vadd.f32 %v2385_v59, %v2272_v8  ;;  %v3316_v59 = vrot.slane %v7793_v38, 2  ;;  %v3178_v36 = vsel %vm477_vm0, %v7539_v55, %v3177_v30  ;;  %v9356_v30 = vld [vmem:[#allocation45_spill] sm:$0xff] }
 0x337   : > { %v7806_v17 = vpop.f32.mrf.mxu1  ;;  %v2639_v42 = vmax.f32 %v2607_v34, 0.0  ;;  %v2499_v4 = vadd.f32 %v2498_v41, %v2386_v26  ;;  %v2275_v39 = vpop.f32.mrf.mxu2 }
 0x338   : > { %3812 = vmatmul.f32.gmra.mxu0 %v7477_v15  ;;  %v7811_v0 = vld [vmem:[#allocation2 + $0x158] sm:$0xff]  ;;  %v2719_v5 = vld [vmem:[#allocation2 + $0x160] sm:$0x3] }
 0x339   : > { %2671 = vst [vmem:[#allocation2 + $0x169] sm:$0xff] %v2639_v42  ;;  %v2536_v6 = vadd.f32 %v2499_v4, %v1790_v44  ;;  %v7814_v8 = vrot.slane %v7811_v0, 2  ;;  %3696 = vmatmul.f32.gmra.mxu3 %v7561_v33  ;;  %v3042_v15 = vld [vmem:[%s9151_s4 + $0x178] sm:$0xff]  ;;  %v2956_v41 = vrot.slane %v2719_v5, 2  ;;  %v3289_v44 = vrot.slane %v3066_v60, 2 }
 0x33a   : > { %3509 = vmatmul.f32.gmra.mxu1 %v7811_v0  ;;  %3977 = vmatpush.msra.mxu2 %v3042_v15  ;;  %v5258_v60 = vld [vmem:[%s9151_s4 + $0x3f8] sm:$0xff]  ;;  %v1793_v15 = vadd.f32 %v7491_v10, %v9356_v30  ;;  %v3069_v30 = vld [vmem:[#allocation2 + $0xe8] sm:$0x3] }
 0x33b   : > { %v2572_v34 = vmul.f32 %v7521_v20, %v2536_v6  ;;  %v7833_v2 = vsel %vm590_vm1, %v3316_v59, %v7814_v8  ;;  %v7837_v5 = vsel %vm590_vm1, %v7814_v8, %v2956_v41  ;;  %v7848_v59 = vrot.slane %v7585_v45, 1  ;;  %4572 = vmatpush.msra.mxu0 %v5258_v60  ;;  %v5274_v10 = vld [vmem:[%s9151_s4 + $0x478] sm:$0xff] }
 0x33c   : > { %v2388_v26 = vpop.f32.mrf.mxu3  ;;  %3586 = vmatmul.f32.gmra.mxu2 %v3178_v36  ;;  %9355 = vst [vmem:[#allocation41_spill] sm:$0xff] %v7837_v5  ;;  %v3290_v41 = vsel %vm590_vm1, %v7542_v40, %v3289_v44  ;;  %4685 = vmatpush.msra.mxu1 %v5274_v10  ;;  %v3182_v33 = vrot.slane %v3069_v30, 1 }
 0x33d   : > { %v7828_v42 = vpop.f32.mrf.mxu0  ;;  %v2608_v4 = vadd.f32 %v7527_v32, %v2572_v34  ;;  %v2389_v1 = vadd.f32 %v2388_v26, %v2275_v39 }
 0x33f   : > { %v7839_v6 = vpop.f32.mrf.mxu1  ;;  %v2640_v34 = vmax.f32 %v2608_v4, 0.0  ;;  %v2502_v39 = vadd.f32 %v2501_v29, %v2389_v1  ;;  %v2278_v36 = vpop.f32.mrf.mxu2 }
 0x340   : > { %3815 = vmatmul.f32.gmra.mxu0 %v7513_v51  ;;  %v7850_v26 = vld [vmem:[#allocation2 + $0x168] sm:$0xff]  ;;  %v3179_v51 = vrot.slane %v7572_v37, 1 }
 0x341   : > { %2672 = vst [vmem:[#allocation2 + $0x171] sm:$0xff] %v2640_v34  ;;  %v2537_v5 = vadd.f32 %v2502_v39, %v1793_v15  ;;  %3699 = vmatmul.f32.gmra.mxu3 %v3290_v41  ;;  %v9357_v34 = vld [vmem:[#allocation46_spill] sm:$0xff] }
 0x342   : > { %3512 = vmatmul.f32.gmra.mxu1 %v7850_v26  ;;  %v7862_v40 = vsel %vm477_vm0, %v3179_v51, %v7848_v59  ;;  %v1796_v39 = vadd.f32 %v7531_v18, %v9357_v34 }
 0x343   : > { %v2573_v29 = vmul.f32 %v7521_v20, %v2537_v5 }
 0x344   : > { %v2391_v1 = vpop.f32.mrf.mxu3  ;;  %3589 = vmatmul.f32.gmra.mxu2 %v7862_v40 }
 0x345   : > { %v3771_v44 = vpop.f32.mrf.mxu0  ;;  %v2609_v4 = vadd.f32 %v7527_v32, %v2573_v29  ;;  %v2392_v60 = vadd.f32 %v2391_v1, %v2278_v36  ;;  %v3321_v1 = vrot.slane %v7850_v26, 2 }
 0x347   : > { %v7866_v15 = vpop.f32.mrf.mxu1  ;;  %v2641_v41 = vmax.f32 %v2609_v4, 0.0  ;;  %v2505_v5 = vadd.f32 %v7802_v35, %v2392_v60  ;;  %v3542_v51 = vpop.f32.mrf.mxu2  ;;  %v5241_v35 = vld [vmem:[%s9151_s4 + $0x370] sm:$0xff] }
 0x348   : > { %3818 = vmatmul.f32.gmra.mxu0 %v7536_v61  ;;  %v7872_v10 = vld [vmem:[#allocation2 + $0x170] sm:$0xff]  ;;  %v3543_v18 = vadd.f32 %v3542_v51, %v7563_v58  ;;  %4460 = vmatpush.msra.mxu3 %v5241_v35  ;;  %v2722_v60 = vld [vmem:[#allocation2 + $0x178] sm:$0x3]  ;;  %v3294_v58 = vrot.slane %v3069_v30, 2 }
 0x349   : > { %2673 = vst [vmem:[#allocation2 + $0x181] sm:$0xff] %v2641_v41  ;;  %v2538_v29 = vadd.f32 %v2505_v5, %v1796_v39  ;;  %v7875_v36 = vrot.slane %v7872_v10, 2  ;;  %3702 = vmatmul.f32.gmra.mxu3 %v7602_v27  ;;  %v3041_v61 = vld [vmem:[%s9151_s4 + $0x170] sm:$0xff]  ;;  %v3183_v39 = vsel %vm477_vm0, %v7848_v59, %v3182_v33 }
 0x34a   : > { %3515 = vmatmul.f32.gmra.mxu1 %v7872_v10  ;;  %3978 = vmatpush.msra.mxu2 %v3041_v61 }
 0x34b   : > { %v2574_v4 = vmul.f32 %v7521_v20, %v2538_v29  ;;  %v7893_v27 = vsel %vm590_vm1, %v3321_v1, %v7875_v36  ;;  %v5257_v20 = vld [vmem:[%s9151_s4 + $0x3f0] sm:$0xff]  ;;  %v2961_v29 = vrot.slane %v2722_v60, 2  ;;  %v3184_v60 = vrot.slane %v7616_v23, 1 }
 0x34c   : > { %v3655_v34 = vpop.f32.mrf.mxu3  ;;  %3592 = vmatmul.f32.gmra.mxu2 %v3183_v39  ;;  %4573 = vmatpush.msra.mxu0 %v5257_v20 }
 0x34d   : > { %v3774_v41 = vpop.f32.mrf.mxu0  ;;  %v2610_v5 = vadd.f32 %v7527_v32, %v2574_v4  ;;  %v3656_v51 = vadd.f32 %v3655_v34, %v3543_v18  ;;  %v7905_v32 = vrot.slane %v7634_v50, 1  ;;  %v3295_v18 = vsel %vm590_vm1, %v7588_v56, %v3294_v58 }
 0x34e   : > { %v7911_v4 = vsel %vm590_vm1, %v7875_v36, %v2961_v29 }
 0x34f   : > { %v7895_v35 = vpop.f32.mrf.mxu1  ;;  %v2642_v61 = vmax.f32 %v2610_v5, 0.0  ;;  %v7902_v33 = vadd.f32 %v7828_v42, %v3656_v51  ;;  %v3545_v1 = vpop.f32.mrf.mxu2  ;;  %9359 = vst [vmem:[#allocation43_spill] sm:$0xff] %v7911_v4  ;;  %v5273_v42 = vld [vmem:[%s9151_s4 + $0x470] sm:$0xff]  ;;  %v7920_v56 = vsel %vm477_vm0, %v3184_v60, %v7905_v32  ;;  %v3072_v5 = vld [vmem:[#allocation2 + $0x100] sm:$0x3] }
 0x350   : > { %3821 = vmatmul.f32.gmra.mxu0 %v7572_v37  ;;  %v3088_v30 = vld [vmem:[#allocation2 + $0x180] sm:$0xff]  ;;  %v3546_v37 = vadd.f32 %v3545_v1, %v7580_v22  ;;  %4686 = vmatpush.msra.mxu1 %v5273_v42 }
 0x351   : > { %9358 = vst [vmem:[#allocation42_spill] sm:$0xff] %v7902_v33  ;;  %3705 = vmatmul.f32.gmra.mxu3 %v3295_v18  ;;  %v3214_v20 = vrot.slane %v3088_v30, 1  ;;  %v3187_v18 = vrot.slane %v3072_v5, 1  ;;  %v3326_v1 = vrot.slane %v3088_v30, 2 }
 0x352   : > { %2674 = vst [vmem:[#allocation2 + $0x189] sm:$0xff] %v2642_v61  ;;  %3518 = vmatmul.f32.gmra.mxu1 %v3088_v30 }
 0x354   : > { %v3658_v34 = vpop.f32.mrf.mxu3  ;;  %3595 = vmatmul.f32.gmra.mxu2 %v7920_v56 }
 0x355   : > { %v3777_v39 = vpop.f32.mrf.mxu0  ;;  %v3659_v58 = vadd.f32 %v3658_v34, %v3546_v37 }
 0x357   : > { %v7923_v51 = vpop.f32.mrf.mxu1  ;;  %v7926_v22 = vadd.f32 %v3771_v44, %v3659_v58  ;;  %v3548_v61 = vpop.f32.mrf.mxu2  ;;  %v3040_v44 = vld [vmem:[%s9151_s4 + $0x168] sm:$0xff]  ;;  %v3188_v58 = vsel %vm477_vm0, %v7905_v32, %v3187_v18 }
 0x358   : > { %3824 = vmatmul.f32.gmra.mxu0 %v7585_v45  ;;  %v3549_v37 = vadd.f32 %v3548_v61, %v7608_v28  ;;  %v5240_v45 = vld [vmem:[%s9151_s4 + $0x368] sm:$0xff]  ;;  %3979 = vmatpush.msra.mxu2 %v3040_v44  ;;  %v3299_v61 = vrot.slane %v3072_v5, 2  ;;  %v7959_v44 = vld [vmem:[#allocation2 + $0x10] sm:$0x3] }
 0x359   : > { %9360 = vst [vmem:[#allocation44_spill] sm:$0xff] %v7926_v22  ;;  %v7928_v29 = vld [vmem:[#allocation2 + $0x188] sm:$0xff]  ;;  %3708 = vmatmul.f32.gmra.mxu3 %v7651_v13 }
 0x35a   : > { %v9215_v42 = vrot.slane %v7928_v29, 1  ;;  %v9214_v60 = vrot.slane %v7928_v29, 2  ;;  %3521 = vmatmul.f32.gmra.mxu1 %v7928_v29  ;;  %4461 = vmatpush.msra.mxu3 %v5240_v45  ;;  %v3300_v5 = vsel %vm590_vm1, %v7637_v24, %v3299_v61 }
 0x35c   : > { %v7944_v30 = vsel %vm477_vm0, %v3214_v20, %v9215_v42  ;;  %v7949_v34 = vsel %vm590_vm1, %v3326_v1, %v9214_v60  ;;  %v3661_v28 = vpop.f32.mrf.mxu3  ;;  %3598 = vmatmul.f32.gmra.mxu2 %v3188_v58  ;;  %v5256_v20 = vld [vmem:[%s9151_s4 + $0x3e8] sm:$0xff]  ;;  %v7964_v60 = vrot.slane %v7683_v14, 1 }
 0x35d   : > { %v3780_v4 = vpop.f32.mrf.mxu0  ;;  %v3662_v13 = vadd.f32 %v3661_v28, %v3549_v37  ;;  %4574 = vmatpush.msra.mxu0 %v5256_v20  ;;  %v9362_v37 = vld [vmem:[#allocation76_spill] sm:$0xff] }
 0x35e   : > { %v9363_v28 = vld [vmem:[#allocation84_spill] sm:$0xff] }
 0x35f   : > { %v7953_v45 = vpop.f32.mrf.mxu1  ;;  %v7961_v1 = vadd.f32 %v3774_v41, %v3662_v13  ;;  %v3551_v18 = vpop.f32.mrf.mxu2  ;;  %v3189_v13 = vrot.slane %v7665_v62, 1  ;;  %v2774_v41 = vrot.slane %v7959_v44, 1 }
 0x360   : > { %3827 = vmatmul.f32.gmra.mxu0 %v7616_v23  ;;  %v3552_v58 = vadd.f32 %v3551_v18, %v9363_v28  ;;  %v5272_v23 = vld [vmem:[%s9151_s4 + $0x468] sm:$0xff] }
 0x361   : > { %9361 = vst [vmem:[#allocation45_spill] sm:$0xff] %v7961_v1  ;;  %3711 = vmatmul.f32.gmra.mxu3 %v3300_v5  ;;  %4687 = vmatpush.msra.mxu1 %v5272_v23  ;;  %v7977_v24 = vsel %vm477_vm0, %v3189_v13, %v7964_v60  ;;  %v3075_v5 = vld [vmem:[#allocation2 + $0x118] sm:$0x3]  ;;  %v2775_v28 = vsel %vm477_vm0, %v9362_v37, %v2774_v41  ;;  %v9365_v13 = vld [vmem:[#allocation64_spill] sm:$0xff] }
 0x362   : > { %3880 = vmatmul.f32.vlgmr.msrb.gmra.mxu1 %v9362_v37  ;;  %v3192_v22 = vrot.slane %v3075_v5, 1  ;;  %v3304_v37 = vrot.slane %v3075_v5, 2 }
 0x364   : > { %v3664_v42 = vpop.f32.mrf.mxu3  ;;  %3601 = vmatmul.f32.gmra.mxu2 %v7977_v24 }
 0x365   : > { %v3783_v61 = vpop.f32.mrf.mxu0  ;;  %v3665_v20 = vadd.f32 %v3664_v42, %v3552_v58  ;;  %v5239_v42 = vld [vmem:[%s9151_s4 + $0x360] sm:$0xff] }
 0x366   : > { %v3039_v58 = vld [vmem:[%s9151_s4 + $0x160] sm:$0xff]  ;;  %4462 = vmatpush.msra.mxu3 %v5239_v42  ;;  %v8006_v42 = vrot.slane %v7724_v53, 1 }
 0x367   : > { %v7980_v18 = vpop.f32.mrf.mxu1  ;;  %v7985_v1 = vadd.f32 %v3777_v39, %v3665_v20  ;;  %v3554_v23 = vpop.f32.mrf.mxu2  ;;  %3980 = vmatpush.msra.mxu2 %v3039_v58  ;;  %v3193_v39 = vsel %vm477_vm0, %v7964_v60, %v3192_v22  ;;  %v3305_v22 = vsel %vm590_vm1, %v7686_v48, %v3304_v37  ;;  %v9368_v58 = vld [vmem:[#allocation59_spill] sm:$0xff]  ;;  %v5388_v48 = vld [vmem:[#allocation2 + $0x28] sm:$0x3] }
 0x368   : > { %3830 = vmatmul.f32.gmra.mxu0 %v7634_v50  ;;  %v3555_v33 = vadd.f32 %v3554_v23, %v9365_v13  ;;  %v5255_v23 = vld [vmem:[%s9151_s4 + $0x3e0] sm:$0xff]  ;;  %v2779_v37 = vrot.slane %v5388_v48, 1 }
 0x369   : > { %9364 = vst [vmem:[#allocation46_spill] sm:$0xff] %v7985_v1  ;;  %3714 = vmatmul.f32.gmra.mxu3 %v7700_v46  ;;  %4575 = vmatpush.msra.mxu0 %v5255_v23  ;;  %v9369_v46 = vld [vmem:[#allocation52_spill] sm:$0xff] }
 0x36a   : > { %3883 = vmatmul.f32.gmra.mxu1 %v2775_v28 }
 0x36c   : > { %v3667_v50 = vpop.f32.mrf.mxu3  ;;  %3604 = vmatmul.f32.gmra.mxu2 %v3193_v39  ;;  %v5271_v39 = vld [vmem:[%s9151_s4 + $0x460] sm:$0xff] }
 0x36d   : > { %v3786_v41 = vpop.f32.mrf.mxu0  ;;  %v3668_v20 = vadd.f32 %v3667_v50, %v3555_v33  ;;  %v9367_v33 = vld [vmem:[#allocation53_spill] sm:$0xff]  ;;  %4688 = vmatpush.msra.mxu1 %v5271_v39  ;;  %v2780_v39 = vsel %vm477_vm0, %v9369_v46, %v2779_v37 }
 0x36f   : > { %v7997_v28 = vpop.f32.mrf.mxu1  ;;  %v8003_v13 = vadd.f32 %v3780_v4, %v3668_v20  ;;  %v3557_v5 = vpop.f32.mrf.mxu2 }
 0x370   : > { %3833 = vmatmul.f32.gmra.mxu0 %v7665_v62  ;;  %v3558_v50 = vadd.f32 %v3557_v5, %v9368_v58  ;;  %v3194_v62 = vrot.slane %v7711_v57, 1 }
 0x371   : > { %9366 = vst [vmem:[#allocation76_spill] sm:$0xff] %v8003_v13  ;;  %3717 = vmatmul.f32.gmra.mxu3 %v3305_v22 }
 0x372   : > { %3886 = vmatmul.f32.gmra.mxu1 %v9367_v33  ;;  %v8018_v20 = vsel %vm477_vm0, %v3194_v62, %v8006_v42  ;;  %v3078_v33 = vld [vmem:[#allocation2 + $0x130] sm:$0x3] }
 0x373   : > { %v3197_v1 = vrot.slane %v3078_v33, 1 }
 0x374   : > { %v3670_v4 = vpop.f32.mrf.mxu3  ;;  %3607 = vmatmul.f32.gmra.mxu2 %v8018_v20 }
 0x375   : > { %v3789_v23 = vpop.f32.mrf.mxu0  ;;  %v3671_v22 = vadd.f32 %v3670_v4, %v3558_v50  ;;  %v5238_v50 = vld [vmem:[%s9151_s4 + $0x358] sm:$0xff]  ;;  %v3198_v46 = vsel %vm477_vm0, %v8006_v42, %v3197_v1  ;;  %v3309_v4 = vrot.slane %v3078_v33, 2 }
 0x376   : > { %4463 = vmatpush.msra.mxu3 %v5238_v50 }
 0x377   : > { %v8021_v5 = vpop.f32.mrf.mxu1  ;;  %v8024_v58 = vadd.f32 %v3783_v61, %v3671_v22  ;;  %v3560_v13 = vpop.f32.mrf.mxu2  ;;  %v3310_v1 = vsel %vm590_vm1, %v7727_v12, %v3309_v4  ;;  %v5389_v12 = vld [vmem:[#allocation2 + $0x40] sm:$0x3] }
 0x378   : > { %3836 = vmatmul.f32.gmra.mxu0 %v7683_v14  ;;  %v3561_v62 = vadd.f32 %v3560_v13, %v7706_v49  ;;  %v3038_v14 = vld [vmem:[%s9151_s4 + $0x158] sm:$0xff] }
 0x379   : > { %3720 = vmatmul.f32.gmra.mxu3 %v7741_v11  ;;  %3981 = vmatpush.msra.mxu2 %v3038_v14  ;;  %v5254_v49 = vld [vmem:[%s9151_s4 + $0x3d8] sm:$0xff] }
 0x37a   : > { %3889 = vmatmul.f32.gmra.mxu1 %v2780_v39  ;;  %v8047_v39 = vrot.slane %v7765_v63, 1  ;;  %4576 = vmatpush.msra.mxu0 %v5254_v49  ;;  %v5270_v14 = vld [vmem:[%s9151_s4 + $0x458] sm:$0xff]  ;;  %v3081_v49 = vld [vmem:[#allocation2 + $0x148] sm:$0x3] }
 0x37b   : > { %4689 = vmatpush.msra.mxu1 %v5270_v14  ;;  %v3202_v11 = vrot.slane %v3081_v49, 1 }
 0x37c   : > { %v3673_v61 = vpop.f32.mrf.mxu3  ;;  %3610 = vmatmul.f32.gmra.mxu2 %v3198_v46  ;;  %v2784_v46 = vrot.slane %v5389_v12, 1  ;;  %v3314_v12 = vrot.slane %v3081_v49, 2 }
 0x37d   : > { %v3792_v48 = vpop.f32.mrf.mxu0  ;;  %v3674_v37 = vadd.f32 %v3673_v61, %v3561_v62  ;;  %v9370_v62 = vld [vmem:[#allocation60_spill] sm:$0xff] }
 0x37f   : > { %v8038_v22 = vpop.f32.mrf.mxu1  ;;  %v8044_v13 = vadd.f32 %v3786_v41, %v3674_v37  ;;  %v3563_v33 = vpop.f32.mrf.mxu2 }
 0x380   : > { %3839 = vmatmul.f32.gmra.mxu0 %v7711_v57  ;;  %v3564_v50 = vadd.f32 %v3563_v33, %v7719_v31  ;;  %v3199_v57 = vrot.slane %v7752_v54, 1  ;;  %v9371_v33 = vld [vmem:[#allocation58_spill] sm:$0xff] }
 0x381   : > { %3723 = vmatmul.f32.gmra.mxu3 %v3310_v1 }
 0x382   : > { %3892 = vmatmul.f32.gmra.mxu1 %v9370_v62  ;;  %v8059_v61 = vsel %vm477_vm0, %v3199_v57, %v8047_v39  ;;  %v2785_v62 = vsel %vm477_vm0, %v9371_v33, %v2784_v46  ;;  %v5253_v33 = vld [vmem:[%s9151_s4 + $0x3d0] sm:$0xff] }
 0x383   : > { %4577 = vmatpush.msra.mxu0 %v5253_v33 }
 0x384   : > { %v3676_v41 = vpop.f32.mrf.mxu3  ;;  %3613 = vmatmul.f32.gmra.mxu2 %v8059_v61 }
 0x385   : > { %v3795_v4 = vpop.f32.mrf.mxu0  ;;  %v3677_v37 = vadd.f32 %v3676_v41, %v3564_v50  ;;  %v5237_v50 = vld [vmem:[%s9151_s4 + $0x350] sm:$0xff]  ;;  %v3203_v41 = vsel %vm477_vm0, %v8047_v39, %v3202_v11  ;;  %v3315_v11 = vsel %vm590_vm1, %v7768_v16, %v3314_v12  ;;  %v5390_v16 = vld [vmem:[#allocation2 + $0x58] sm:$0x3] }
 0x386   : > { %4464 = vmatpush.msra.mxu3 %v5237_v50 }
 0x387   : > { %v8062_v31 = vpop.f32.mrf.mxu1  ;;  %v8065_v1 = vadd.f32 %v3789_v23, %v3677_v37  ;;  %v3566_v14 = vpop.f32.mrf.mxu2 }
 0x388   : > { %3842 = vmatmul.f32.gmra.mxu0 %v7724_v53  ;;  %v3567_v57 = vadd.f32 %v3566_v14, %v7747_v52  ;;  %v3037_v53 = vld [vmem:[%s9151_s4 + $0x150] sm:$0xff]  ;;  %v8090_v14 = vrot.slane %v7811_v0, 1 }
 0x389   : > { %3726 = vmatmul.f32.gmra.mxu3 %v7782_v3  ;;  %3982 = vmatpush.msra.mxu2 %v3037_v53  ;;  %v5269_v53 = vld [vmem:[%s9151_s4 + $0x450] sm:$0xff] }
 0x38a   : > { %3895 = vmatmul.f32.gmra.mxu1 %v2785_v62 }
 0x38b   : > { %4690 = vmatpush.msra.mxu1 %v5269_v53  ;;  %v5235_v53 = vld [vmem:[%s9151_s4 + $0x340] sm:$0xff] }
 0x38c   : > { %v3679_v23 = vpop.f32.mrf.mxu3  ;;  %3616 = vmatmul.f32.gmra.mxu2 %v3203_v41  ;;  %v2789_v41 = vrot.slane %v5390_v16, 1 }
 0x38d   : > { %v8079_v46 = vpop.f32.mrf.mxu0  ;;  %v3680_v37 = vadd.f32 %v3679_v23, %v3567_v57  ;;  %v9373_v57 = vld [vmem:[#allocation66_spill] sm:$0xff] }
 0x38f   : > { %v8081_v52 = vpop.f32.mrf.mxu1  ;;  %v8087_v62 = vadd.f32 %v3792_v48, %v3680_v37  ;;  %v3569_v49 = vpop.f32.mrf.mxu2 }
 0x390   : > { %3845 = vmatmul.f32.gmra.mxu0 %v7752_v54  ;;  %v3570_v50 = vadd.f32 %v3569_v49, %v7760_v25  ;;  %v3204_v54 = vrot.slane %v7793_v38, 1  ;;  %v3084_v25 = vld [vmem:[#allocation2 + $0x160] sm:$0x3]  ;;  %v5236_v49 = vld [vmem:[%s9151_s4 + $0x348] sm:$0xff] }
 0x391   : > { %9372 = vst [vmem:[#allocation84_spill] sm:$0xff] %v8087_v62  ;;  %3729 = vmatmul.f32.gmra.mxu3 %v3315_v11  ;;  %v3036_v11 = vld [vmem:[%s9151_s4 + $0x148] sm:$0xff]  ;;  %v3207_v3 = vrot.slane %v3084_v25, 1 }
 0x392   : > { %3898 = vmatmul.f32.gmra.mxu1 %v9373_v57  ;;  %v8102_v23 = vsel %vm477_vm0, %v3204_v54, %v8090_v14  ;;  %v5252_v57 = vld [vmem:[%s9151_s4 + $0x3c8] sm:$0xff]  ;;  %3983 = vmatpush.msra.mxu2 %v3036_v11 }
 0x393   : > { %4465 = vmatpush.msra.mxu3 %v5236_v49  ;;  %4578 = vmatpush.msra.mxu0 %v5252_v57  ;;  %v3208_v57 = vsel %vm477_vm0, %v8090_v14, %v3207_v3  ;;  %v5249_v3 = vld [vmem:[%s9151_s4 + $0x3b0] sm:$0xff] }
 0x394   : > { %v3682_v48 = vpop.f32.mrf.mxu3  ;;  %3619 = vmatmul.f32.gmra.mxu2 %v8102_v23 }
 0x395   : > { %v8104_v12 = vpop.f32.mrf.mxu0  ;;  %v3683_v37 = vadd.f32 %v3682_v48, %v3570_v50  ;;  %v3035_v50 = vld [vmem:[%s9151_s4 + $0x140] sm:$0xff]  ;;  %v9375_v48 = vld [vmem:[#allocation65_spill] sm:$0xff]  ;;  %4466 = vmatpush.msra.mxu3 %v5235_v53 }
 0x396   : > { %v2790_v16 = vsel %vm477_vm0, %v9375_v48, %v2789_v41  ;;  %v5234_v41 = vld [vmem:[%s9151_s4 + $0x338] sm:$0xff]  ;;  %3984 = vmatpush.msra.mxu2 %v3035_v50  ;;  %v3033_v48 = vld [vmem:[%s9151_s4 + $0x130] sm:$0xff] }
 0x397   : > { %v8107_v33 = vpop.f32.mrf.mxu1  ;;  %v8125_v54 = vadd.f32 %v3795_v4, %v3683_v37  ;;  %v3572_v62 = vpop.f32.mrf.mxu2  ;;  %v3034_v4 = vld [vmem:[%s9151_s4 + $0x138] sm:$0xff]  ;;  %4467 = vmatpush.msra.mxu3 %v5234_v41  ;;  %v5233_v50 = vld [vmem:[%s9151_s4 + $0x330] sm:$0xff]  ;;  %v8172_v41 = vrot.slane %v7872_v10, 1 }
 0x398   : > { %3848 = vmatmul.f32.gmra.mxu0 %v7765_v63  ;;  %v5251_v63 = vld [vmem:[%s9151_s4 + $0x3c0] sm:$0xff]  ;;  %v3573_v11 = vadd.f32 %v3572_v62, %v7788_v21  ;;  %v5250_v37 = vld [vmem:[%s9151_s4 + $0x3b8] sm:$0xff]  ;;  %v3319_v21 = vrot.slane %v3084_v25, 2  ;;  %3985 = vmatpush.msra.mxu2 %v3034_v4 }
 0x399   : > { %9374 = vst [vmem:[#allocation64_spill] sm:$0xff] %v8125_v54  ;;  %3732 = vmatmul.f32.gmra.mxu3 %v7833_v2  ;;  %4579 = vmatpush.msra.mxu0 %v5251_v63  ;;  %v5232_v63 = vld [vmem:[%s9151_s4 + $0x328] sm:$0xff] }
 0x39a   : > { %3901 = vmatmul.f32.gmra.mxu1 %v2790_v16  ;;  %3986 = vmatpush.msra.mxu2 %v3033_v48  ;;  %v3032_v16 = vld [vmem:[%s9151_s4 + $0x128] sm:$0xff] }
 0x39b   : > { %4580 = vmatpush.msra.mxu0 %v5250_v37  ;;  %4468 = vmatpush.msra.mxu3 %v5233_v50  ;;  %v3320_v37 = vsel %vm590_vm1, %v7814_v8, %v3319_v21  ;;  %v5247_v8 = vld [vmem:[%s9151_s4 + $0x3a0] sm:$0xff]  ;;  %v5268_v21 = vld [vmem:[%s9151_s4 + $0x448] sm:$0xff]  ;;  %v3209_v50 = vrot.slane %v7850_v26, 1 }
 0x39c   : > { %v3685_v49 = vpop.f32.mrf.mxu3  ;;  %3622 = vmatmul.f32.gmra.mxu2 %v3208_v57  ;;  %v9377_v57 = vld [vmem:[#allocation51_spill] sm:$0xff]  ;;  %4691 = vmatpush.msra.mxu1 %v5268_v21  ;;  %v3029_v21 = vld [vmem:[%s9151_s4 + $0x110] sm:$0xff] }
 0x39d   : > { %v8145_v62 = vpop.f32.mrf.mxu0  ;;  %v3686_v53 = vadd.f32 %v3685_v49, %v3573_v11  ;;  %v5248_v11 = vld [vmem:[%s9151_s4 + $0x3a8] sm:$0xff]  ;;  %4581 = vmatpush.msra.mxu0 %v5249_v3  ;;  %3987 = vmatpush.msra.mxu2 %v3032_v16  ;;  %v8199_v16 = vsel %vm477_vm0, %v3209_v50, %v8172_v41 }
 0x39e   : > { %4469 = vmatpush.msra.mxu3 %v5232_v63 }
 0x39f   : > { %v8156_v25 = vpop.f32.mrf.mxu1  ;;  %v8169_v4 = vadd.f32 %v8079_v46, %v3686_v53  ;;  %v3575_v49 = vpop.f32.mrf.mxu2  ;;  %v5231_v46 = vld [vmem:[%s9151_s4 + $0x320] sm:$0xff]  ;;  %4582 = vmatpush.msra.mxu0 %v5248_v11  ;;  %v5230_v53 = vld [vmem:[%s9151_s4 + $0x318] sm:$0xff] }
 0x3a0   : > { %3851 = vmatmul.f32.gmra.mxu0 %v7793_v38  ;;  %v3031_v38 = vld [vmem:[%s9151_s4 + $0x120] sm:$0xff]  ;;  %v3576_v48 = vadd.f32 %v3575_v49, %v7806_v17  ;;  %v3030_v17 = vld [vmem:[%s9151_s4 + $0x118] sm:$0xff]  ;;  %4470 = vmatpush.msra.mxu3 %v5231_v46  ;;  %v5245_v46 = vld [vmem:[%s9151_s4 + $0x390] sm:$0xff] }
 0x3a1   : > { %9376 = vst [vmem:[#allocation53_spill] sm:$0xff] %v8169_v4  ;;  %3735 = vmatmul.f32.gmra.mxu3 %v3320_v37  ;;  %3988 = vmatpush.msra.mxu2 %v3031_v38  ;;  %v5391_v37 = vld [vmem:[#allocation2 + $0x70] sm:$0x3]  ;;  %v3087_v11 = vld [vmem:[#allocation2 + $0x178] sm:$0x3] }
 0x3a2   : > { %3904 = vmatmul.f32.gmra.mxu1 %v9377_v57  ;;  %v2794_v49 = vrot.slane %v5391_v37, 1  ;;  %4583 = vmatpush.msra.mxu0 %v5247_v8  ;;  %v5246_v38 = vld [vmem:[%s9151_s4 + $0x398] sm:$0xff]  ;;  %v3212_v54 = vrot.slane %v3087_v11, 1 }
 0x3a3   : > { %3989 = vmatpush.msra.mxu2 %v3030_v17  ;;  %4471 = vmatpush.msra.mxu3 %v5230_v53  ;;  %v5244_v53 = vld [vmem:[%s9151_s4 + $0x388] sm:$0xff] }
 0x3a4   : > { %v3688_v3 = vpop.f32.mrf.mxu3  ;;  %3625 = vmatmul.f32.gmra.mxu2 %v8199_v16  ;;  %4584 = vmatpush.msra.mxu0 %v5246_v38  ;;  %v3324_v38 = vrot.slane %v3087_v11, 2 }
 0x3a5   : > { %v8201_v57 = vpop.f32.mrf.mxu0  ;;  %v3689_v63 = vadd.f32 %v3688_v3, %v3576_v48  ;;  %v5229_v48 = vld [vmem:[%s9151_s4 + $0x310] sm:$0xff]  ;;  %v9379_v3 = vld [vmem:[#allocation47_spill] sm:$0xff]  ;;  %3990 = vmatpush.msra.mxu2 %v3029_v21 }
 0x3a6   : > { %v2795_v37 = vsel %vm477_vm0, %v9379_v3, %v2794_v49  ;;  %4472 = vmatpush.msra.mxu3 %v5229_v48  ;;  %4585 = vmatpush.msra.mxu0 %v5245_v46  ;;  %v3027_v49 = vld [vmem:[%s9151_s4 + $0x100] sm:$0xff] }
 0x3a7   : > { %v8210_v50 = vpop.f32.mrf.mxu1  ;;  %v8220_v8 = vadd.f32 %v8104_v12, %v3689_v63  ;;  %v3578_v4 = vpop.f32.mrf.mxu2  ;;  %v5228_v12 = vld [vmem:[%s9151_s4 + $0x308] sm:$0xff]  ;;  %v5227_v63 = vld [vmem:[%s9151_s4 + $0x300] sm:$0xff] }
 0x3a8   : > { %3854 = vmatmul.f32.gmra.mxu0 %v7811_v0  ;;  %v3028_v0 = vld [vmem:[%s9151_s4 + $0x108] sm:$0xff]  ;;  %v3579_v17 = vadd.f32 %v3578_v4, %v7839_v6  ;;  %v3213_v4 = vsel %vm477_vm0, %v8172_v41, %v3212_v54  ;;  %4473 = vmatpush.msra.mxu3 %v5228_v12  ;;  %v5243_v48 = vld [vmem:[%s9151_s4 + $0x380] sm:$0xff]  ;;  %v3325_v54 = vsel %vm590_vm1, %v7875_v36, %v3324_v38  ;;  %v3090_v36 = vld [vmem:[#allocation2 + $0x190] sm:$0x3] }
 0x3a9   : > { %9378 = vst [vmem:[#allocation59_spill] sm:$0xff] %v8220_v8  ;;  %3738 = vmatmul.f32.gmra.mxu3 %v7893_v27  ;;  %3991 = vmatpush.msra.mxu2 %v3028_v0  ;;  %v9381_v0 = vld [vmem:[#allocation49_spill] sm:$0xff]  ;;  %v5267_v12 = vld [vmem:[%s9151_s4 + $0x440] sm:$0xff] }
 0x3aa   : > { %3907 = vmatmul.f32.gmra.mxu1 %v2795_v37  ;;  %4586 = vmatpush.msra.mxu0 %v5244_v53 }
 0x3ab   : > { %3992 = vmatpush.msra.mxu2 %v3027_v49  ;;  %4474 = vmatpush.msra.mxu3 %v5227_v63 }
 0x3ac   : > { %v3691_v6 = vpop.f32.mrf.mxu3  ;;  %3628 = vmatmul.f32.gmra.mxu2 %v3213_v4  ;;  %4587 = vmatpush.msra.mxu0 %v5243_v48  ;;  %v8263_v4 = vld [vmem:[#allocation2 + $0x38] sm:$0xff]  ;;  %v3217_v48 = vrot.slane %v3090_v36, 1 }
 0x3ad   : > { %v3810_v21 = vpop.f32.mrf.mxu0  ;;  %v3692_v3 = vadd.f32 %v3691_v6, %v3579_v17  ;;  %4692 = vmatpush.msra.mxu1 %v5267_v12 }
 0x3af   : > { %v8246_v46 = vpop.f32.mrf.mxu1  ;;  %v8250_v37 = vadd.f32 %v8145_v62, %v3692_v3  ;;  %v3581_v11 = vpop.f32.mrf.mxu2 }
 0x3b0   : > { %3857 = vmatmul.f32.gmra.mxu0 %v7850_v26  ;;  %v3582_v17 = vadd.f32 %v3581_v11, %v7866_v15  ;;  %v5392_v26 = vld [vmem:[#allocation2 + $0x88] sm:$0x3]  ;;  %v4187_v11 = vrot.slane %v8263_v4, 1 }
 0x3b1   : > { %9380 = vst [vmem:[#allocation52_spill] sm:$0xff] %v8250_v37  ;;  %3741 = vmatmul.f32.gmra.mxu3 %v3325_v54  ;;  %v2799_v49 = vrot.slane %v5392_v26, 1  ;;  %v8272_v54 = vld [vmem:[#allocation2 + $0x30] sm:$0xff] }
 0x3b2   : > { %3910 = vmatmul.f32.gmra.mxu1 %v9381_v0  ;;  %v9383_v0 = vrot.slane %v7928_v29, 1 }
 0x3b3   : > { %v2800_v38 = vsel %vm477_vm0, %v7663_v7, %v2799_v49  ;;  %v4186_v7 = vrot.slane %v8272_v54, 1 }
 0x3b4   : > { %v3694_v53 = vpop.f32.mrf.mxu3  ;;  %3631 = vmatmul.f32.gmra.mxu2 %v7944_v30 }
 0x3b5   : > { %v3813_v62 = vpop.f32.mrf.mxu0  ;;  %v3695_v63 = vadd.f32 %v3694_v53, %v3582_v17  ;;  %v3329_v17 = vrot.slane %v3090_v36, 2  ;;  %v9386_v36 = vld [vmem:[#allocation77_spill] sm:$0xff] }
 0x3b7   : > { %v8260_v6 = vpop.f32.mrf.mxu1  ;;  %v8266_v15 = vadd.f32 %v8201_v57, %v3695_v63  ;;  %v3584_v3 = vpop.f32.mrf.mxu2  ;;  %v3218_v57 = vsel %vm477_vm0, %v9383_v0, %v3217_v48  ;;  %v9385_v63 = vrot.slane %v7928_v29, 2 }
 0x3b8   : > { %3860 = vmatmul.f32.gmra.mxu0 %v7872_v10  ;;  %v3585_v30 = vadd.f32 %v3584_v3, %v7895_v35  ;;  %v8282_v35 = vld [vmem:[#allocation2 + $0x40] sm:$0x3] }
 0x3b9   : > { %9382 = vst [vmem:[#allocation60_spill] sm:$0xff] %v8266_v15  ;;  %3744 = vmatmul.f32.gmra.mxu3 %v7949_v34  ;;  %v4188_v34 = vsel %vm477_vm0, %v4186_v7, %v4187_v11 }
 0x3ba   : > { %3913 = vmatmul.f32.gmra.mxu1 %v2800_v38  ;;  %v3330_v38 = vsel %vm590_vm1, %v9385_v63, %v3329_v17  ;;  %v8300_v63 = vld [vmem:[#allocation2 + $0x50] sm:$0xff] }
 0x3bc   : > { %v3697_v10 = vpop.f32.mrf.mxu3  ;;  %3634 = vmatmul.f32.gmra.mxu2 %v3218_v57 }
 0x3bd   : > { %v3816_v12 = vpop.f32.mrf.mxu0  ;;  %v3698_v53 = vadd.f32 %v3697_v10, %v3585_v30  ;;  %v5266_v30 = vld [vmem:[%s9151_s4 + $0x438] sm:$0xff]  ;;  %v4189_v10 = vrot.slane %v8282_v35, 1 }
 0x3be   : > { %4693 = vmatpush.msra.mxu1 %v5266_v30  ;;  %v8308_v30 = vld [vmem:[#allocation2 + $0x48] sm:$0xff] }
 0x3bf   : > { %v8279_v26 = vpop.f32.mrf.mxu1  ;;  %v8284_v49 = vadd.f32 %v3810_v21, %v3698_v53  ;;  %v3587_v3 = vpop.f32.mrf.mxu2  ;;  %v5393_v21 = vld [vmem:[#allocation2 + $0xa0] sm:$0x3]  ;;  %v9387_v53 = vld [vmem:[#allocation73_spill] sm:$0xff] }
 0x3c0   : > { %4588 = vmatmul.f32.vlgmr.msra.gmra.mxu0 %v4188_v34  ;;  %v3588_v48 = vadd.f32 %v3587_v3, %v7923_v51  ;;  %v2804_v57 = vrot.slane %v5393_v21, 1  ;;  %v2886_v34 = vrot.slane %v7959_v44, 2  ;;  %v4190_v51 = vsel %vm477_vm0, %v4187_v11, %v4189_v10 }
 0x3c1   : > { %9384 = vst [vmem:[#allocation58_spill] sm:$0xff] %v8284_v49  ;;  %3747 = vmatmul.f32.gmra.mxu3 %v3330_v38  ;;  %v4192_v11 = vrot.slane %v8300_v63, 1 }
 0x3c2   : > { %3916 = vmatmul.f32.gmra.mxu1 %v9386_v36  ;;  %v2805_v3 = vsel %vm477_vm0, %v7434_v19, %v2804_v57  ;;  %v2887_v44 = vsel %vm590_vm1, %v9387_v53, %v2886_v34  ;;  %v5265_v34 = vld [vmem:[%s9151_s4 + $0x430] sm:$0xff] }
 0x3c3   : > { %4694 = vmatpush.msra.mxu1 %v5265_v34 }
 0x3c4   : > { %v3700_v0 = vpop.f32.mrf.mxu3  ;;  %3993 = vmatmul.f32.vlgmr.msra.gmra.mxu2 %v9387_v53 }
 0x3c5   : > { %v3819_v7 = vpop.f32.mrf.mxu0  ;;  %v3701_v29 = vadd.f32 %v3700_v0, %v3588_v48 }
 0x3c7   : > { %v8296_v17 = vpop.f32.mrf.mxu1  ;;  %v8302_v38 = vadd.f32 %v3813_v62, %v3701_v29  ;;  %v3590_v36 = vpop.f32.mrf.mxu2  ;;  %v4191_v62 = vrot.slane %v8308_v30, 1  ;;  %v8317_v29 = vld [vmem:[#allocation2 + $0x58] sm:$0x3] }
 0x3c8   : > { %4591 = vmatmul.f32.gmra.mxu0 %v4190_v51  ;;  %v3591_v48 = vadd.f32 %v3590_v36, %v7953_v45 }
 0x3c9   : > { %9388 = vst [vmem:[#allocation66_spill] sm:$0xff] %v8302_v38  ;;  %4475 = vmatmul.f32.vlgmr.msra.gmra.mxu3 %v8272_v54  ;;  %v4193_v57 = vsel %vm477_vm0, %v4191_v62, %v4192_v11  ;;  %v9390_v62 = vld [vmem:[#allocation54_spill] sm:$0xff] }
 0x3ca   : > { %3919 = vmatmul.f32.gmra.mxu1 %v2805_v3  ;;  %v4194_v3 = vrot.slane %v8317_v29, 1 }
 0x3cc   : > { %v3703_v10 = vpop.f32.mrf.mxu3  ;;  %3996 = vmatmul.f32.gmra.mxu2 %v2887_v44 }
 0x3cd   : > { %v3822_v0 = vpop.f32.mrf.mxu0  ;;  %v3704_v21 = vadd.f32 %v3703_v10, %v3591_v48  ;;  %v5394_v48 = vld [vmem:[#allocation2 + $0xb8] sm:$0x3] }
 0x3ce   : > { %v2809_v44 = vrot.slane %v5394_v48, 1 }
 0x3cf   : > { %v8314_v19 = vpop.f32.mrf.mxu1  ;;  %v8319_v45 = vadd.f32 %v3816_v12, %v3704_v21  ;;  %v3593_v51 = vpop.f32.mrf.mxu2 }
 0x3d0   : > { %4594 = vmatmul.f32.gmra.mxu0 %v4193_v57  ;;  %v3594_v53 = vadd.f32 %v3593_v51, %v7980_v18  ;;  %v8332_v18 = vld [vmem:[#allocation2 + $0x68] sm:$0xff]  ;;  %v2810_v51 = vsel %vm477_vm0, %v7480_v47, %v2809_v44  ;;  %v8348_v44 = vld [vmem:[#allocation2 + $0x70] sm:$0x3] }
 0x3d1   : > { %9389 = vst [vmem:[#allocation65_spill] sm:$0xff] %v8319_v45  ;;  %4478 = vmatmul.f32.gmra.mxu3 %v8263_v4  ;;  %v4197_v48 = vrot.slane %v8332_v18, 1 }
 0x3d2   : > { %3922 = vmatmul.f32.gmra.mxu1 %v7499_v43  ;;  %v4195_v43 = vsel %vm477_vm0, %v4192_v11, %v4194_v3 }
 0x3d4   : > { %v3706_v36 = vpop.f32.mrf.mxu3  ;;  %3999 = vmatmul.f32.gmra.mxu2 %v9390_v62 }
 0x3d5   : > { %v3825_v10 = vpop.f32.mrf.mxu0  ;;  %v3707_v12 = vadd.f32 %v3706_v36, %v3594_v53  ;;  %v8340_v36 = vld [vmem:[#allocation2 + $0x60] sm:$0xff] }
 0x3d6   : > { %v4196_v3 = vrot.slane %v8340_v36, 1 }
 0x3d7   : > { %v8329_v21 = vpop.f32.mrf.mxu1  ;;  %v8334_v57 = vadd.f32 %v3819_v7, %v3707_v12  ;;  %v3596_v34 = vpop.f32.mrf.mxu2  ;;  %v9392_v7 = vld [vmem:[#allocation55_spill] sm:$0xff] }
 0x3d8   : > { %4597 = vmatmul.f32.gmra.mxu0 %v4195_v43  ;;  %v3597_v53 = vadd.f32 %v3596_v34, %v7997_v28  ;;  %v4198_v47 = vsel %vm477_vm0, %v4196_v3, %v4197_v48 }
 0x3d9   : > { %9391 = vst [vmem:[#allocation51_spill] sm:$0xff] %v8334_v57  ;;  %4481 = vmatmul.f32.gmra.mxu3 %v8308_v30 }
 0x3da   : > { %3925 = vmatmul.f32.gmra.mxu1 %v2810_v51 }
 0x3dc   : > { %v3709_v62 = vpop.f32.mrf.mxu3  ;;  %4002 = vmatmul.f32.gmra.mxu2 %v9392_v7  ;;  %v5395_v7 = vld [vmem:[#allocation2 + $0xd0] sm:$0x3] }
 0x3dd   : > { %v3828_v11 = vpop.f32.mrf.mxu0  ;;  %v3710_v43 = vadd.f32 %v3709_v62, %v3597_v53  ;;  %v5264_v53 = vld [vmem:[%s9151_s4 + $0x428] sm:$0xff]  ;;  %v4199_v62 = vrot.slane %v8348_v44, 1 }
 0x3de   : > { %4695 = vmatpush.msra.mxu1 %v5264_v53 }
 0x3df   : > { %v8345_v12 = vpop.f32.mrf.mxu1  ;;  %v8350_v51 = vadd.f32 %v3822_v0, %v3710_v43  ;;  %v3599_v28 = vpop.f32.mrf.mxu2  ;;  %v9394_v43 = vld [vmem:[#allocation61_spill] sm:$0xff] }
 0x3e0   : > { %4600 = vmatmul.f32.gmra.mxu0 %v4198_v47  ;;  %v3600_v34 = vadd.f32 %v3599_v28, %v8021_v5  ;;  %v2814_v47 = vrot.slane %v5395_v7, 1  ;;  %v8363_v5 = vld [vmem:[#allocation2 + $0x80] sm:$0xff] }
 0x3e1   : > { %9393 = vst [vmem:[#allocation47_spill] sm:$0xff] %v8350_v51  ;;  %4484 = vmatmul.f32.gmra.mxu3 %v8300_v63  ;;  %v4202_v7 = vrot.slane %v8363_v5, 1 }
 0x3e2   : > { %3928 = vmatmul.f32.gmra.mxu1 %v7556_v9  ;;  %v4200_v9 = vsel %vm477_vm0, %v4197_v48, %v4199_v62  ;;  %v2815_v45 = vsel %vm477_vm0, %v7539_v55, %v2814_v47 }
 0x3e4   : > { %v3712_v3 = vpop.f32.mrf.mxu3  ;;  %4005 = vmatmul.f32.gmra.mxu2 %v9394_v43 }
 0x3e5   : > { %v3831_v57 = vpop.f32.mrf.mxu0  ;;  %v3713_v0 = vadd.f32 %v3712_v3, %v3600_v34  ;;  %v8371_v3 = vld [vmem:[#allocation2 + $0x78] sm:$0xff] }
 0x3e6   : > { %v4201_v62 = vrot.slane %v8371_v3, 1 }
 0x3e7   : > { %v8360_v51 = vpop.f32.mrf.mxu1  ;;  %v8365_v28 = vadd.f32 %v3825_v10, %v3713_v0  ;;  %v3602_v53 = vpop.f32.mrf.mxu2  ;;  %v9396_v10 = vld [vmem:[#allocation62_spill] sm:$0xff] }
 0x3e8   : > { %4603 = vmatmul.f32.gmra.mxu0 %v4200_v9  ;;  %v3603_v34 = vadd.f32 %v3602_v53, %v8038_v22  ;;  %v4203_v55 = vsel %vm477_vm0, %v4201_v62, %v4202_v7 }
 0x3e9   : > { %9395 = vst [vmem:[#allocation49_spill] sm:$0xff] %v8365_v28  ;;  %4487 = vmatmul.f32.gmra.mxu3 %v8340_v36 }
 0x3ea   : > { %3931 = vmatmul.f32.gmra.mxu1 %v2815_v45  ;;  %v8379_v45 = vld [vmem:[#allocation2 + $0x88] sm:$0x3] }
 0x3ec   : > { %v3715_v43 = vpop.f32.mrf.mxu3  ;;  %4008 = vmatmul.f32.gmra.mxu2 %v9396_v10  ;;  %v5396_v10 = vld [vmem:[#allocation2 + $0xe8] sm:$0x3] }
 0x3ed   : > { %v3834_v48 = vpop.f32.mrf.mxu0  ;;  %v3716_v9 = vadd.f32 %v3715_v43, %v3603_v34  ;;  %v5263_v34 = vld [vmem:[%s9151_s4 + $0x420] sm:$0xff]  ;;  %v4204_v43 = vrot.slane %v8379_v45, 1 }
 0x3ee   : > { %4696 = vmatpush.msra.mxu1 %v5263_v34 }
 0x3ef   : > { %v8376_v0 = vpop.f32.mrf.mxu1  ;;  %v8381_v47 = vadd.f32 %v3828_v11, %v3716_v9  ;;  %v3605_v22 = vpop.f32.mrf.mxu2  ;;  %v9398_v9 = vld [vmem:[#allocation67_spill] sm:$0xff] }
 0x3f0   : > { %4606 = vmatmul.f32.gmra.mxu0 %v4203_v55  ;;  %v3606_v53 = vadd.f32 %v3605_v22, %v8062_v31  ;;  %v2819_v55 = vrot.slane %v5396_v10, 1  ;;  %v8394_v31 = vld [vmem:[#allocation2 + $0x98] sm:$0xff] }
 0x3f1   : > { %9397 = vst [vmem:[#allocation77_spill] sm:$0xff] %v8381_v47  ;;  %4490 = vmatmul.f32.gmra.mxu3 %v8332_v18  ;;  %v4207_v10 = vrot.slane %v8394_v31, 1 }
 0x3f2   : > { %3934 = vmatmul.f32.gmra.mxu1 %v7862_v40  ;;  %v4205_v40 = vsel %vm477_vm0, %v4202_v7, %v4204_v43  ;;  %v2820_v38 = vsel %vm477_vm0, %v7848_v59, %v2819_v55 }
 0x3f4   : > { %v3718_v62 = vpop.f32.mrf.mxu3  ;;  %4011 = vmatmul.f32.gmra.mxu2 %v9398_v9 }
 0x3f5   : > { %v3837_v28 = vpop.f32.mrf.mxu0  ;;  %v3719_v11 = vadd.f32 %v3718_v62, %v3606_v53  ;;  %v8402_v62 = vld [vmem:[#allocation2 + $0x90] sm:$0xff] }
 0x3f6   : > { %v4206_v43 = vrot.slane %v8402_v62, 1 }
 0x3f7   : > { %v8391_v47 = vpop.f32.mrf.mxu1  ;;  %v8396_v22 = vadd.f32 %v3831_v57, %v3719_v11  ;;  %v3608_v34 = vpop.f32.mrf.mxu2  ;;  %v9400_v57 = vld [vmem:[#allocation68_spill] sm:$0xff] }
 0x3f8   : > { %4609 = vmatmul.f32.gmra.mxu0 %v4205_v40  ;;  %v3609_v53 = vadd.f32 %v3608_v34, %v8081_v52  ;;  %v4208_v59 = vsel %vm477_vm0, %v4206_v43, %v4207_v10 }
 0x3f9   : > { %9399 = vst [vmem:[#allocation73_spill] sm:$0xff] %v8396_v22  ;;  %4493 = vmatmul.f32.gmra.mxu3 %v8371_v3 }
 0x3fa   : > { %3937 = vmatmul.f32.gmra.mxu1 %v2820_v38  ;;  %v8410_v38 = vld [vmem:[#allocation2 + $0xa0] sm:$0x3] }
 0x3fc   : > { %v3721_v9 = vpop.f32.mrf.mxu3  ;;  %4014 = vmatmul.f32.gmra.mxu2 %v9400_v57  ;;  %v5397_v57 = vld [vmem:[#allocation2 + $0x100] sm:$0x3] }
 0x3fd   : > { %v3840_v7 = vpop.f32.mrf.mxu0  ;;  %v3722_v40 = vadd.f32 %v3721_v9, %v3609_v53  ;;  %v5262_v53 = vld [vmem:[%s9151_s4 + $0x418] sm:$0xff]  ;;  %v4209_v9 = vrot.slane %v8410_v38, 1 }
 0x3fe   : > { %4697 = vmatpush.msra.mxu1 %v5262_v53 }
 0x3ff   : > { %v8407_v11 = vpop.f32.mrf.mxu1  ;;  %v8412_v55 = vadd.f32 %v3834_v48, %v3722_v40  ;;  %v3611_v52 = vpop.f32.mrf.mxu2  ;;  %v9402_v40 = vld [vmem:[#allocation71_spill] sm:$0xff] }
 0x400   : > { %4612 = vmatmul.f32.gmra.mxu0 %v4208_v59  ;;  %v3612_v34 = vadd.f32 %v3611_v52, %v8107_v33  ;;  %v2824_v59 = vrot.slane %v5397_v57, 1  ;;  %v8425_v33 = vld [vmem:[#allocation2 + $0xb0] sm:$0xff] }
 0x401   : > { %9401 = vst [vmem:[#allocation54_spill] sm:$0xff] %v8412_v55  ;;  %4496 = vmatmul.f32.gmra.mxu3 %v8363_v5  ;;  %v4212_v57 = vrot.slane %v8425_v33, 1 }
 0x402   : > { %3940 = vmatmul.f32.gmra.mxu1 %v7920_v56  ;;  %v4210_v56 = vsel %vm477_vm0, %v4207_v10, %v4209_v9  ;;  %v2825_v49 = vsel %vm477_vm0, %v7905_v32, %v2824_v59 }
 0x404   : > { %v3724_v43 = vpop.f32.mrf.mxu3  ;;  %4017 = vmatmul.f32.gmra.mxu2 %v9402_v40 }
 0x405   : > { %v3843_v22 = vpop.f32.mrf.mxu0  ;;  %v3725_v48 = vadd.f32 %v3724_v43, %v3612_v34  ;;  %v8433_v43 = vld [vmem:[#allocation2 + $0xa8] sm:$0xff] }
 0x406   : > { %v4211_v9 = vrot.slane %v8433_v43, 1 }
 0x407   : > { %v8422_v55 = vpop.f32.mrf.mxu1  ;;  %v8427_v52 = vadd.f32 %v3837_v28, %v3725_v48  ;;  %v3614_v53 = vpop.f32.mrf.mxu2  ;;  %v9404_v28 = vld [vmem:[#allocation72_spill] sm:$0xff] }
 0x408   : > { %4615 = vmatmul.f32.gmra.mxu0 %v4210_v56  ;;  %v3615_v34 = vadd.f32 %v3614_v53, %v8156_v25  ;;  %v4213_v32 = vsel %vm477_vm0, %v4211_v9, %v4212_v57 }
 0x409   : > { %9403 = vst [vmem:[#allocation55_spill] sm:$0xff] %v8427_v52  ;;  %4499 = vmatmul.f32.gmra.mxu3 %v8402_v62 }
 0x40a   : > { %3943 = vmatmul.f32.gmra.mxu1 %v2825_v49  ;;  %v8441_v49 = vld [vmem:[#allocation2 + $0xb8] sm:$0x3] }
 0x40c   : > { %v3727_v40 = vpop.f32.mrf.mxu3  ;;  %4020 = vmatmul.f32.gmra.mxu2 %v9404_v28  ;;  %v5398_v28 = vld [vmem:[#allocation2 + $0x118] sm:$0x3] }
 0x40d   : > { %v3846_v10 = vpop.f32.mrf.mxu0  ;;  %v3728_v56 = vadd.f32 %v3727_v40, %v3615_v34  ;;  %v5261_v34 = vld [vmem:[%s9151_s4 + $0x410] sm:$0xff]  ;;  %v4214_v40 = vrot.slane %v8441_v49, 1 }
 0x40e   : > { %4698 = vmatpush.msra.mxu1 %v5261_v34 }
 0x40f   : > { %v8438_v48 = vpop.f32.mrf.mxu1  ;;  %v8443_v59 = vadd.f32 %v3840_v7, %v3728_v56  ;;  %v3617_v25 = vpop.f32.mrf.mxu2  ;;  %v9406_v56 = vld [vmem:[#allocation74_spill] sm:$0xff] }
 0x410   : > { %4618 = vmatmul.f32.gmra.mxu0 %v4213_v32  ;;  %v3618_v53 = vadd.f32 %v3617_v25, %v8210_v50  ;;  %v2829_v32 = vrot.slane %v5398_v28, 1  ;;  %v8456_v50 = vld [vmem:[#allocation2 + $0xc8] sm:$0xff] }
 0x411   : > { %9405 = vst [vmem:[#allocation61_spill] sm:$0xff] %v8443_v59  ;;  %4502 = vmatmul.f32.gmra.mxu3 %v8394_v31  ;;  %v4217_v28 = vrot.slane %v8456_v50, 1 }
 0x412   : > { %3946 = vmatmul.f32.gmra.mxu1 %v7977_v24  ;;  %v4215_v24 = vsel %vm477_vm0, %v4212_v57, %v4214_v40  ;;  %v2830_v15 = vsel %vm477_vm0, %v7964_v60, %v2829_v32 }
 0x414   : > { %v3730_v9 = vpop.f32.mrf.mxu3  ;;  %4023 = vmatmul.f32.gmra.mxu2 %v9406_v56 }
 0x415   : > { %v3849_v52 = vpop.f32.mrf.mxu0  ;;  %v3731_v7 = vadd.f32 %v3730_v9, %v3618_v53  ;;  %v8464_v9 = vld [vmem:[#allocation2 + $0xc0] sm:$0xff] }
 0x416   : > { %v4216_v40 = vrot.slane %v8464_v9, 1 }
 0x417   : > { %v8453_v59 = vpop.f32.mrf.mxu1  ;;  %v8458_v25 = vadd.f32 %v3843_v22, %v3731_v7  ;;  %v3620_v34 = vpop.f32.mrf.mxu2  ;;  %v9408_v22 = vld [vmem:[#allocation75_spill] sm:$0xff] }
 0x418   : > { %4621 = vmatmul.f32.gmra.mxu0 %v4215_v24  ;;  %v3621_v53 = vadd.f32 %v3620_v34, %v8246_v46  ;;  %v4218_v60 = vsel %vm477_vm0, %v4216_v40, %v4217_v28 }
 0x419   : > { %9407 = vst [vmem:[#allocation62_spill] sm:$0xff] %v8458_v25  ;;  %4505 = vmatmul.f32.gmra.mxu3 %v8433_v43 }
 0x41a   : > { %3949 = vmatmul.f32.gmra.mxu1 %v2830_v15  ;;  %v8472_v15 = vld [vmem:[#allocation2 + $0xd0] sm:$0x3] }
 0x41c   : > { %v3733_v56 = vpop.f32.mrf.mxu3  ;;  %4026 = vmatmul.f32.gmra.mxu2 %v9408_v22  ;;  %v5399_v22 = vld [vmem:[#allocation2 + $0x130] sm:$0x3] }
 0x41d   : > { %v3852_v57 = vpop.f32.mrf.mxu0  ;;  %v3734_v24 = vadd.f32 %v3733_v56, %v3621_v53  ;;  %v5260_v53 = vld [vmem:[%s9151_s4 + $0x408] sm:$0xff]  ;;  %v4219_v56 = vrot.slane %v8472_v15, 1 }
 0x41e   : > { %4699 = vmatpush.msra.mxu1 %v5260_v53 }
 0x41f   : > { %v8469_v7 = vpop.f32.mrf.mxu1  ;;  %v8474_v32 = vadd.f32 %v3846_v10, %v3734_v24  ;;  %v3623_v46 = vpop.f32.mrf.mxu2  ;;  %v9410_v24 = vld [vmem:[#allocation78_spill] sm:$0xff] }
 0x420   : > { %4624 = vmatmul.f32.gmra.mxu0 %v4218_v60  ;;  %v3624_v34 = vadd.f32 %v3623_v46, %v8260_v6  ;;  %v2834_v60 = vrot.slane %v5399_v22, 1  ;;  %v8487_v6 = vld [vmem:[#allocation2 + $0xe0] sm:$0xff] }
 0x421   : > { %9409 = vst [vmem:[#allocation67_spill] sm:$0xff] %v8474_v32  ;;  %4508 = vmatmul.f32.gmra.mxu3 %v8425_v33  ;;  %v4222_v22 = vrot.slane %v8487_v6, 1 }
 0x422   : > { %3952 = vmatmul.f32.gmra.mxu1 %v8018_v20  ;;  %v4220_v20 = vsel %vm477_vm0, %v4217_v28, %v4219_v56  ;;  %v2835_v37 = vsel %vm477_vm0, %v8006_v42, %v2834_v60 }
 0x424   : > { %v3736_v40 = vpop.f32.mrf.mxu3  ;;  %4029 = vmatmul.f32.gmra.mxu2 %v9410_v24 }
 0x425   : > { %v3855_v25 = vpop.f32.mrf.mxu0  ;;  %v3737_v10 = vadd.f32 %v3736_v40, %v3624_v34  ;;  %v8495_v40 = vld [vmem:[#allocation2 + $0xd8] sm:$0xff] }
 0x426   : > { %v4221_v28 = vrot.slane %v8495_v40, 1 }
 0x427   : > { %v8484_v32 = vpop.f32.mrf.mxu1  ;;  %v8489_v46 = vadd.f32 %v3849_v52, %v3737_v10  ;;  %v3626_v53 = vpop.f32.mrf.mxu2 }
 0x428   : > { %4627 = vmatmul.f32.gmra.mxu0 %v4220_v20  ;;  %v3627_v34 = vadd.f32 %v3626_v53, %v8279_v26  ;;  %v9412_v20 = vld [vmem:[#allocation79_spill] sm:$0xff]  ;;  %v4223_v42 = vsel %vm477_vm0, %v4221_v28, %v4222_v22 }
 0x429   : > { %9411 = vst [vmem:[#allocation68_spill] sm:$0xff] %v8489_v46  ;;  %4511 = vmatmul.f32.gmra.mxu3 %v8464_v9 }
 0x42a   : > { %3955 = vmatmul.f32.gmra.mxu1 %v2835_v37  ;;  %v8503_v37 = vld [vmem:[#allocation2 + $0xe8] sm:$0x3] }
 0x42c   : > { %v3739_v24 = vpop.f32.mrf.mxu3  ;;  %4032 = vmatmul.f32.gmra.mxu2 %v9412_v20  ;;  %v5400_v20 = vld [vmem:[#allocation2 + $0x148] sm:$0x3] }
 0x42d   : > { %v3740_v56 = vadd.f32 %v3739_v24, %v3627_v34  ;;  %v3858_v10 = vpop.f32.mrf.mxu0  ;;  %v5259_v34 = vld [vmem:[%s9151_s4 + $0x400] sm:$0xff]  ;;  %v4224_v24 = vrot.slane %v8503_v37, 1 }
 0x42e   : > { %4700 = vmatpush.msra.mxu1 %v5259_v34 }
 0x42f   : > { %v8500_v52 = vpop.f32.mrf.mxu1  ;;  %v8505_v60 = vadd.f32 %v3852_v57, %v3740_v56  ;;  %v3629_v26 = vpop.f32.mrf.mxu2  ;;  %v9415_v57 = vld [vmem:[#allocation80_spill] sm:$0xff] }
 0x430   : > { %9413 = vst [vmem:[#allocation71_spill] sm:$0xff] %v8500_v52  ;;  %4630 = vmatmul.f32.gmra.mxu0 %v4223_v42  ;;  %v3630_v53 = vadd.f32 %v3629_v26, %v8296_v17  ;;  %v2839_v42 = vrot.slane %v5400_v20, 1 }
 0x431   : > { %9414 = vst [vmem:[#allocation72_spill] sm:$0xff] %v8505_v60  ;;  %4514 = vmatmul.f32.gmra.mxu3 %v8456_v50  ;;  %v8518_v60 = vld [vmem:[#allocation2 + $0xf8] sm:$0xff] }
 0x432   : > { %3958 = vmatmul.f32.gmra.mxu1 %v8059_v61  ;;  %v4225_v61 = vsel %vm477_vm0, %v4222_v22, %v4224_v24  ;;  %v2840_v26 = vsel %vm477_vm0, %v8047_v39, %v2839_v42  ;;  %v4227_v20 = vrot.slane %v8518_v60, 1  ;;  %v8534_v42 = vld [vmem:[#allocation2 + $0x100] sm:$0x3] }
 0x434   : > { %v3742_v28 = vpop.f32.mrf.mxu3  ;;  %4035 = vmatmul.f32.gmra.mxu2 %v9415_v57 }
 0x435   : > { %v3743_v46 = vadd.f32 %v3742_v28, %v3630_v53  ;;  %v3861_v34 = vpop.f32.mrf.mxu0  ;;  %v8526_v28 = vld [vmem:[#allocation2 + $0xf0] sm:$0xff] }
 0x436   : > { %v4226_v24 = vrot.slane %v8526_v28, 1 }
 0x437   : > { %v8515_v56 = vpop.f32.mrf.mxu1  ;;  %v8520_v17 = vadd.f32 %v3855_v25, %v3743_v46  ;;  %v3632_v8 = vpop.f32.mrf.mxu2  ;;  %v9418_v25 = vld [vmem:[#allocation81_spill] sm:$0xff] }
 0x438   : > { %9416 = vst [vmem:[#allocation74_spill] sm:$0xff] %v8515_v56  ;;  %4633 = vmatmul.f32.gmra.mxu0 %v4225_v61  ;;  %v3633_v53 = vadd.f32 %v3632_v8, %v8314_v19  ;;  %v4228_v39 = vsel %vm477_vm0, %v4226_v24, %v4227_v20  ;;  %v9421_v24 = vld [vmem:[#allocation82_spill] sm:$0xff] }
 0x439   : > { %9417 = vst [vmem:[#allocation75_spill] sm:$0xff] %v8520_v17  ;;  %4517 = vmatmul.f32.gmra.mxu3 %v8495_v40 }
 0x43a   : > { %3961 = vmatmul.f32.gmra.mxu1 %v2840_v26 }
 0x43c   : > { %v3745_v22 = vpop.f32.mrf.mxu3  ;;  %4038 = vmatmul.f32.gmra.mxu2 %v9418_v25  ;;  %v5401_v25 = vld [vmem:[#allocation2 + $0x160] sm:$0x3] }
 0x43d   : > { %v3746_v57 = vadd.f32 %v3745_v22, %v3633_v53  ;;  %v4589_v26 = vpop.f32.mrf.mxu0  ;;  %v4229_v53 = vrot.slane %v8534_v42, 1  ;;  %v2844_v17 = vrot.slane %v5401_v25, 1 }
 0x43f   : > { %v8531_v46 = vpop.f32.mrf.mxu1  ;;  %v8536_v61 = vadd.f32 %v3858_v10, %v3746_v57  ;;  %v3635_v8 = vpop.f32.mrf.mxu2  ;;  %v4230_v10 = vsel %vm477_vm0, %v4227_v20, %v4229_v53  ;;  %v9423_v57 = vld [vmem:[#allocation42_spill] sm:$0xff] }
 0x440   : > { %9419 = vst [vmem:[#allocation78_spill] sm:$0xff] %v8531_v46  ;;  %4636 = vmatmul.f32.gmra.mxu0 %v4228_v39  ;;  %v3636_v19 = vadd.f32 %v3635_v8, %v8329_v21  ;;  %v2845_v8 = vsel %vm477_vm0, %v8090_v14, %v2844_v17  ;;  %v9427_v17 = vld [vmem:[#allocation44_spill] sm:$0xff] }
 0x441   : > { %9420 = vst [vmem:[#allocation79_spill] sm:$0xff] %v8536_v61  ;;  %4520 = vmatmul.f32.gmra.mxu3 %v8487_v6  ;;  %v8548_v61 = vld [vmem:[#allocation2 + $0x110] sm:$0xff] }
 0x442   : > { %3964 = vmatmul.f32.gmra.mxu1 %v8102_v23  ;;  %v3882_v23 = vadd.f32 %v8345_v12, %v9423_v57  ;;  %v4232_v20 = vrot.slane %v8548_v61, 1 }
 0x444   : > { %v3748_v22 = vpop.f32.mrf.mxu3  ;;  %4041 = vmatmul.f32.gmra.mxu2 %v9421_v24 }
 0x445   : > { %v3749_v46 = vadd.f32 %v3748_v22, %v3636_v19  ;;  %v8557_v22 = vld [vmem:[#allocation2 + $0x108] sm:$0xff]  ;;  %v4592_v12 = vpop.f32.mrf.mxu0 }
 0x446   : > { %v4231_v25 = vrot.slane %v8557_v22, 1 }
 0x447   : > { %v8543_v39 = vpop.f32.mrf.mxu1  ;;  %v8550_v21 = vadd.f32 %v3861_v34, %v3749_v46  ;;  %v3994_v56 = vpop.f32.mrf.mxu2  ;;  %v9425_v34 = vld [vmem:[#allocation83_spill] sm:$0xff] }
 0x448   : > { %9422 = vst [vmem:[#allocation80_spill] sm:$0xff] %v8543_v39  ;;  %4639 = vmatmul.f32.gmra.mxu0 %v4230_v10  ;;  %v8555_v19 = vadd.f32 %v3994_v56, %v3882_v23  ;;  %v4233_v14 = vsel %vm477_vm0, %v4231_v25, %v4232_v20  ;;  %v3885_v56 = vadd.f32 %v8360_v51, %v9427_v17  ;;  %v8569_v10 = vld [vmem:[#allocation2 + $0x118] sm:$0x3]  ;;  %v9428_v25 = vld [vmem:[#allocation50_spill] sm:$0xff] }
 0x449   : > { %9424 = vst [vmem:[#allocation81_spill] sm:$0xff] %v8550_v21  ;;  %4523 = vmatmul.f32.gmra.mxu3 %v8526_v28 }
 0x44a   : > { %3967 = vmatmul.f32.gmra.mxu1 %v2845_v8 }
 0x44c   : > { %v4476_v53 = vpop.f32.mrf.mxu3  ;;  %4044 = vmatmul.f32.gmra.mxu2 %v9425_v34 }
 0x44d   : > { %v8561_v24 = vadd.f32 %v4589_v26, %v4476_v53  ;;  %v4234_v26 = vrot.slane %v8569_v10, 1  ;;  %v5402_v53 = vld [vmem:[#allocation2 + $0x178] sm:$0x3] }
 0x44e   : > { %v2849_v34 = vrot.slane %v5402_v53, 1 }
 0x44f   : > { %v8564_v46 = vpop.f32.mrf.mxu1  ;;  %v3997_v57 = vpop.f32.mrf.mxu2  ;;  %v4235_v17 = vsel %vm477_vm0, %v4232_v20, %v4234_v26  ;;  %v4299_v26 = vrot.slane %v8263_v4, 2 }
 0x450   : > { %9426 = vst [vmem:[#allocation82_spill] sm:$0xff] %v8564_v46  ;;  %4642 = vmatmul.f32.gmra.mxu0 %v4233_v14  ;;  %v8573_v23 = vadd.f32 %v3997_v57, %v3885_v56  ;;  %v4595_v14 = vpop.f32.mrf.mxu0  ;;  %v9430_v46 = vld [vmem:[#allocation45_spill] sm:$0xff]  ;;  %v2850_v57 = vsel %vm477_vm0, %v8172_v41, %v2849_v34  ;;  %v4298_v41 = vrot.slane %v8272_v54, 2 }
 0x451   : > { %4526 = vmatmul.f32.gmra.mxu3 %v8518_v60  ;;  %v8584_v56 = vld [vmem:[#allocation2 + $0x128] sm:$0xff] }
 0x452   : > { %3970 = vmatmul.f32.gmra.mxu1 %v8199_v16  ;;  %v3888_v16 = vadd.f32 %v8376_v0, %v9430_v46  ;;  %v4237_v53 = vrot.slane %v8584_v56, 1  ;;  %v4300_v4 = vsel %vm590_vm1, %v4298_v41, %v4299_v26  ;;  %v9436_v41 = vld [vmem:[#allocation76_spill] sm:$0xff] }
 0x454   : > { %v4479_v8 = vpop.f32.mrf.mxu3  ;;  %4047 = vmatmul.f32.gmra.mxu2 %v9428_v25  ;;  %v9431_v25 = vld [vmem:[#allocation57_spill] sm:$0xff] }
 0x455   : > { %v8576_v21 = vadd.f32 %v4592_v12, %v4479_v8  ;;  %v8591_v8 = vld [vmem:[#allocation2 + $0x120] sm:$0xff] }
 0x456   : > { %v4236_v0 = vrot.slane %v8591_v8, 1 }
 0x457   : > { %v8579_v51 = vpop.f32.mrf.mxu1  ;;  %v4000_v39 = vpop.f32.mrf.mxu2 }
 0x458   : > { %9429 = vst [vmem:[#allocation42_spill] sm:$0xff] %v8579_v51  ;;  %4645 = vmatmul.f32.gmra.mxu0 %v4235_v17  ;;  %v8589_v12 = vadd.f32 %v4000_v39, %v3888_v16  ;;  %v4238_v39 = vsel %vm477_vm0, %v4236_v0, %v4237_v53  ;;  %v9433_v17 = vld [vmem:[#allocation46_spill] sm:$0xff]  ;;  %v4598_v51 = vpop.f32.mrf.mxu0  ;;  %v4301_v0 = vrot.slane %v8282_v35, 2 }
 0x459   : > { %4529 = vmatmul.f32.gmra.mxu3 %v8557_v22  ;;  %v3891_v16 = vadd.f32 %v8391_v47, %v9433_v17  ;;  %v9434_v47 = vld [vmem:[#allocation48_spill] sm:$0xff] }
 0x45a   : > { %3973 = vmatmul.f32.gmra.mxu1 %v2850_v57  ;;  %v8605_v57 = vld [vmem:[#allocation2 + $0x130] sm:$0x3] }
 0x45b   : > { %v4239_v54 = vrot.slane %v8605_v57, 1 }
 0x45c   : > { %v4482_v20 = vpop.f32.mrf.mxu3  ;;  %4050 = vmatmul.f32.gmra.mxu2 %v9431_v25 }
 0x45d   : > { %v8596_v46 = vadd.f32 %v4595_v14, %v4482_v20  ;;  %v4240_v17 = vsel %vm477_vm0, %v4237_v53, %v4239_v54  ;;  %v4304_v54 = vrot.slane %v8300_v63, 2 }
 0x45f   : > { %v8600_v34 = vpop.f32.mrf.mxu1  ;;  %v4003_v52 = vpop.f32.mrf.mxu2 }
 0x460   : > { %9432 = vst [vmem:[#allocation83_spill] sm:$0xff] %v8600_v34  ;;  %4648 = vmatmul.f32.gmra.mxu0 %v4238_v39  ;;  %v8609_v14 = vadd.f32 %v4003_v52, %v3891_v16  ;;  %v3894_v34 = vadd.f32 %v8407_v11, %v9436_v41  ;;  %v4302_v52 = vsel %vm590_vm1, %v4299_v26, %v4301_v0  ;;  %v9437_v41 = vld [vmem:[#allocation56_spill] sm:$0xff]  ;;  %v4303_v26 = vrot.slane %v8308_v30, 2 }
 0x461   : > { %4532 = vmatmul.f32.gmra.mxu3 %v8548_v61 }
 0x462   : > { %4701 = vmatmul.f32.vlgmr.msra.gmra.mxu1 %v4300_v4  ;;  %v8621_v4 = vld [vmem:[#allocation2 + $0x140] sm:$0xff]  ;;  %v4305_v63 = vsel %vm590_vm1, %v4303_v26, %v4304_v54 }
 0x464   : > { %v4485_v20 = vpop.f32.mrf.mxu3  ;;  %4053 = vmatmul.f32.gmra.mxu2 %v9434_v47  ;;  %v4242_v47 = vrot.slane %v8621_v4, 1 }
 0x465   : > { %v8613_v25 = vadd.f32 %v4598_v51, %v4485_v20  ;;  %v8627_v51 = vld [vmem:[#allocation2 + $0x138] sm:$0xff]  ;;  %v4601_v20 = vpop.f32.mrf.mxu0 }
 0x466   : > { %v4241_v11 = vrot.slane %v8627_v51, 1 }
 0x467   : > { %v8616_v39 = vpop.f32.mrf.mxu1  ;;  %v4006_v16 = vpop.f32.mrf.mxu2 }
 0x468   : > { %9435 = vst [vmem:[#allocation44_spill] sm:$0xff] %v8616_v39  ;;  %4651 = vmatmul.f32.gmra.mxu0 %v4240_v17  ;;  %v8625_v35 = vadd.f32 %v4006_v16, %v3894_v34  ;;  %v4243_v34 = vsel %vm477_vm0, %v4241_v11, %v4242_v47  ;;  %v8641_v16 = vld [vmem:[#allocation2 + $0x148] sm:$0x3]  ;;  %v4306_v11 = vrot.slane %v8317_v29, 2 }
 0x469   : > { %4535 = vmatmul.f32.gmra.mxu3 %v8591_v8  ;;  %v4244_v30 = vrot.slane %v8641_v16, 1 }
 0x46a   : > { %4704 = vmatmul.f32.gmra.mxu1 %v4302_v52  ;;  %v3897_v52 = vadd.f32 %v8422_v55, %v8024_v58  ;;  %v9439_v58 = vld [vmem:[#allocation38_spill] sm:$0xff] }
 0x46b   : > { %v4245_v26 = vsel %vm477_vm0, %v4242_v47, %v4244_v30  ;;  %v4309_v47 = vrot.slane %v8332_v18, 2 }
 0x46c   : > { %v4488_v53 = vpop.f32.mrf.mxu3  ;;  %4056 = vmatmul.f32.gmra.mxu2 %v9437_v41 }
 0x46d   : > { %v8632_v17 = vadd.f32 %v4601_v20, %v4488_v53  ;;  %v4604_v53 = vpop.f32.mrf.mxu0 }
 0x46f   : > { %v8636_v0 = vpop.f32.mrf.mxu1  ;;  %v4009_v39 = vpop.f32.mrf.mxu2 }
 0x470   : > { %9438 = vst [vmem:[#allocation50_spill] sm:$0xff] %v8636_v0  ;;  %4654 = vmatmul.f32.gmra.mxu0 %v4243_v34  ;;  %v8645_v20 = vadd.f32 %v4009_v39, %v3897_v52  ;;  %v3900_v34 = vadd.f32 %v8438_v48, %v8044_v13  ;;  %v8657_v39 = vld [vmem:[#allocation2 + $0x158] sm:$0xff]  ;;  %v4307_v52 = vsel %vm590_vm1, %v4304_v54, %v4306_v11  ;;  %v4308_v48 = vrot.slane %v8340_v36, 2 }
 0x471   : > { %4538 = vmatmul.f32.gmra.mxu3 %v8584_v56  ;;  %v9440_v13 = vld [vmem:[#allocation63_spill] sm:$0xff]  ;;  %v3903_v11 = vadd.f32 %v8453_v59, %v8065_v1  ;;  %v8687_v59 = vld [vmem:[#allocation2 + $0x170] sm:$0xff] }
 0x472   : > { %4707 = vmatmul.f32.gmra.mxu1 %v4305_v63 }
 0x474   : > { %v4491_v41 = vpop.f32.mrf.mxu3  ;;  %4059 = vmatmul.f32.gmra.mxu2 %v9439_v58 }
 0x475   : > { %v8649_v0 = vadd.f32 %v4604_v53, %v4491_v41  ;;  %v8663_v53 = vld [vmem:[#allocation2 + $0x150] sm:$0xff]  ;;  %v4247_v41 = vrot.slane %v8657_v39, 1 }
 0x476   : > { %v4246_v30 = vrot.slane %v8663_v53, 1 }
 0x477   : > { %v8652_v55 = vpop.f32.mrf.mxu1  ;;  %v4012_v63 = vpop.f32.mrf.mxu2 }
 0x478   : > { %4657 = vmatmul.f32.gmra.mxu0 %v4245_v26  ;;  %v8661_v29 = vadd.f32 %v4012_v63, %v3900_v34  ;;  %v4248_v54 = vsel %vm477_vm0, %v4246_v30, %v4247_v41  ;;  %v8675_v26 = vld [vmem:[#allocation2 + $0x160] sm:$0x3]  ;;  %v4310_v34 = vsel %vm590_vm1, %v4308_v48, %v4309_v47  ;;  %v4311_v63 = vrot.slane %v8348_v44, 2 }
 0x479   : > { %4541 = vmatmul.f32.gmra.mxu3 %v8627_v51  ;;  %v4249_v36 = vrot.slane %v8675_v26, 1  ;;  %v4314_v44 = vrot.slane %v8363_v5, 2 }
 0x47a   : > { %4710 = vmatmul.f32.gmra.mxu1 %v4307_v52  ;;  %v4312_v48 = vsel %vm590_vm1, %v4309_v47, %v4311_v63  ;;  %v8701_v47 = vld [vmem:[#allocation2 + $0x178] sm:$0x3] }
 0x47b   : > { %v4250_v1 = vsel %vm477_vm0, %v4247_v41, %v4249_v36  ;;  %v4313_v41 = vrot.slane %v8371_v3, 2  ;;  %v4254_v5 = vrot.slane %v8701_v47, 1 }
 0x47c   : > { %4062 = vmatmul.f32.gmra.mxu2 %v9440_v13  ;;  %v9441_v13 = vld [vmem:[#allocation39_spill] sm:$0xff] }
 0x47d   : > { %v4315_v63 = vsel %vm590_vm1, %v4313_v41, %v4314_v44  ;;  %v8715_v41 = vld [vmem:[#allocation2 + $0x180] sm:$0xff] }
 0x47f   : > { %v8670_v58 = vpop.f32.mrf.mxu1  ;;  %v4015_v52 = vpop.f32.mrf.mxu2 }
 0x480   : > { %4660 = vmatmul.f32.gmra.mxu0 %v4248_v54  ;;  %v8679_v18 = vadd.f32 %v4015_v52, %v3903_v11  ;;  %v8691_v54 = vld [vmem:[#allocation2 + $0x168] sm:$0xff]  ;;  %v4252_v11 = vrot.slane %v8687_v59, 1 }
 0x481   : > { %4544 = vmatmul.f32.gmra.mxu3 %v8621_v4  ;;  %v9442_v52 = vld [vmem:[#allocation69_spill] sm:$0xff] }
 0x482   : > { %4713 = vmatmul.f32.gmra.mxu1 %v4310_v34  ;;  %v4251_v34 = vrot.slane %v8691_v54, 1  ;;  %v4255_v3 = vsel %vm477_vm0, %v4252_v11, %v4254_v5 }
 0x484   : > { %4065 = vmatmul.f32.gmra.mxu2 %v9441_v13  ;;  %v4253_v13 = vsel %vm477_vm0, %v4251_v34, %v4252_v11  ;;  %v8711_v34 = vld [vmem:[#allocation2 + $0x188] sm:$0xff]  ;;  %v4318_v11 = vrot.slane %v8402_v62, 2 }
 0x487   : > { %v8684_v30 = vpop.f32.mrf.mxu1 }
 0x488   : > { %4663 = vmatmul.f32.gmra.mxu0 %v4250_v1  ;;  %v4316_v1 = vrot.slane %v8379_v45, 2  ;;  %v4319_v45 = vrot.slane %v8394_v31, 2 }
 0x489   : > { %4547 = vmatmul.f32.gmra.mxu3 %v8663_v53 }
 0x48a   : > { %4716 = vmatmul.f32.gmra.mxu1 %v4312_v48  ;;  %v9444_v48 = vld [vmem:[#allocation40_spill] sm:$0xff] }
 0x48c   : > { %4068 = vmatmul.f32.gmra.mxu2 %v9442_v52 }
 0x48f   : > { %v8698_v36 = vpop.f32.mrf.mxu1 }
 0x490   : > { %9443 = vst [vmem:[#allocation45_spill] sm:$0xff] %v8698_v36  ;;  %4666 = vmatmul.f32.gmra.mxu0 %v4253_v13  ;;  %v4317_v13 = vsel %vm590_vm1, %v4314_v44, %v4316_v1  ;;  %v9445_v36 = vld [vmem:[#allocation70_spill] sm:$0xff]  ;;  %v4320_v1 = vsel %vm590_vm1, %v4318_v11, %v4319_v45  ;;  %v4324_v11 = vrot.slane %v8425_v33, 2 }
 0x491   : > { %4550 = vmatmul.f32.gmra.mxu3 %v8657_v39  ;;  %v8725_v44 = vld [vmem:[#allocation2 + $0x190] sm:$0x3] }
 0x492   : > { %4719 = vmatmul.f32.gmra.mxu1 %v4315_v63  ;;  %v4257_v63 = vrot.slane %v8711_v34, 1  ;;  %v4259_v31 = vrot.slane %v8725_v44, 1 }
 0x494   : > { %4071 = vmatmul.f32.gmra.mxu2 %v9444_v48  ;;  %v4256_v48 = vrot.slane %v8715_v41, 1  ;;  %v4260_v62 = vsel %vm477_vm0, %v4257_v63, %v4259_v31  ;;  %v8751_v31 = vld [vmem:[#allocation2] sm:$0xff] }
 0x497   : > { %v8708_v52 = vpop.f32.mrf.mxu1 }
 0x498   : > { %4669 = vmatmul.f32.gmra.mxu0 %v4255_v3  ;;  %v4258_v3 = vsel %vm477_vm0, %v4256_v48, %v4257_v63 }
 0x499   : > { %4553 = vmatmul.f32.gmra.mxu3 %v8691_v54 }
 0x49a   : > { %4722 = vmatmul.f32.gmra.mxu1 %v4317_v13  ;;  %v4321_v13 = vrot.slane %v8410_v38, 2  ;;  %v4326_v38 = vrot.slane %v8441_v49, 2 }
 0x49c   : > { %4074 = vmatmul.f32.gmra.mxu2 %v9445_v36  ;;  %v4322_v48 = vsel %vm590_vm1, %v4319_v45, %v4321_v13  ;;  %v8748_v45 = vpop.f32.mrf.mxu3  ;;  %v4327_v33 = vsel %vm590_vm1, %v4324_v11, %v4326_v38  ;;  %v9448_v13 = vld [vmem:[#allocation43_spill] sm:$0xff] }
 0x49f   : > { %v8722_v5 = vpop.f32.mrf.mxu1 }
 0x4a0   : > { %9446 = vst [vmem:[#allocation57_spill] sm:$0xff] %v8722_v5  ;;  %4672 = vmatmul.f32.gmra.mxu0 %v4258_v3  ;;  %v9447_v3 = vld [vmem:[#allocation41_spill] sm:$0xff] }
 0x4a1   : > { %4556 = vmatmul.f32.gmra.mxu3 %v8687_v59 }
 0x4a2   : > { %4725 = vmatmul.f32.gmra.mxu1 %v4320_v1  ;;  %v4323_v1 = vrot.slane %v8433_v43, 2  ;;  %v4329_v43 = vrot.slane %v8456_v50, 2  ;;  %v4334_v50 = vrot.slane %v8487_v6, 2  ;;  %v4339_v6 = vrot.slane %v8518_v60, 2 }
 0x4a4   : > { %4077 = vmatmul.f32.gmra.mxu2 %v7833_v2  ;;  %v4325_v2 = vsel %vm590_vm1, %v4323_v1, %v4324_v11  ;;  %v4331_v11 = vrot.slane %v8472_v15, 2  ;;  %v8775_v15 = vpop.f32.mrf.mxu0 }
 0x4a6   : > { %v4332_v1 = vsel %vm590_vm1, %v4329_v43, %v4331_v11  ;;  %v8784_v11 = vld [vmem:[%s9152_s5] ss:$0 sm:$0xff] }
 0x4a7   : > { %v8732_v36 = vpop.f32.mrf.mxu1 }
 0x4a8   : > { %4675 = vmatmul.f32.gmra.mxu0 %v4260_v62  ;;  %v4328_v62 = vrot.slane %v8464_v9, 2  ;;  %v4333_v9 = vrot.slane %v8495_v40, 2  ;;  %v4338_v40 = vrot.slane %v8526_v28, 2 }
 0x4a9   : > { %4559 = vmatmul.f32.gmra.mxu3 %v8715_v41 }
 0x4aa   : > { %4728 = vmatmul.f32.gmra.mxu1 %v4322_v48  ;;  %v8760_v48 = vpop.f32.mrf.mxu3  ;;  %v4335_v38 = vsel %vm590_vm1, %v4333_v9, %v4334_v50 }
 0x4ac   : > { %4080 = vmatmul.f32.gmra.mxu2 %v9447_v3  ;;  %v8793_v60 = vpop.f32.mrf.mxu0 }
 0x4af   : > { %v8740_v5 = vpop.f32.mrf.mxu1 }
 0x4b1   : > { %4562 = vmatmul.f32.gmra.mxu3 %v8711_v34 }
 0x4b2   : > { %4731 = vmatmul.f32.gmra.mxu1 %v4325_v2 }
 0x4b4   : > { %4083 = vmatmul.f32.gmra.mxu2 %v7893_v27  ;;  %v4330_v27 = vsel %vm590_vm1, %v4328_v62, %v4329_v43 }
 0x4b7   : > { %v8746_v63 = vpop.f32.mrf.mxu1 }
 0x4b9   : > { %4565 = vmatmul.f32.gmra.mxu3 %v8751_v31 }
 0x4ba   : > { %4734 = vmatmul.f32.gmra.mxu1 %v4327_v33  ;;  %v4336_v33 = vrot.slane %v8503_v37, 2  ;;  %v4340_v37 = vsel %vm590_vm1, %v4338_v40, %v4339_v6 }
 0x4bc   : > { %4086 = vmatmul.f32.gmra.mxu2 %v9448_v13  ;;  %v4337_v43 = vsel %vm590_vm1, %v4334_v50, %v4336_v33  ;;  %v8791_v50 = vld [vmem:[%s9153_s6] ss:$0 sm:$0xff]  ;;  %v9449_v33 = vld [vmem:[#allocation6_spill] sm:$0xff] }
 0x4bf   : > { %v8757_v49 = vpop.f32.mrf.mxu1 }
 0x4c1   : > { %4568 = vmatmul.f32.gmra.mxu3 %v8751_v31 }
 0x4c2   : > { %4737 = vmatmul.f32.gmra.mxu1 %v4330_v27 }
 0x4c7   : > { %v8764_v3 = vpop.f32.mrf.mxu1 }
 0x4ca   : > { %4740 = vmatmul.f32.gmra.mxu1 %v4332_v1 }
 0x4cf   : > { %v8769_v2 = vpop.f32.mrf.mxu1 }
 0x4d2   : > { %4743 = vmatmul.f32.gmra.mxu1 %v4335_v38 }
 0x4d7   : > { %v8773_v13 = vpop.f32.mrf.mxu1 }
 0x4da   : > { %4746 = vmatmul.f32.gmra.mxu1 %v4337_v43 }
 0x4df   : > { %v4702_v62 = vpop.f32.mrf.mxu1 }
 0x4e0   : > { %v4703_v27 = vadd.f32 %v4702_v62, %v8561_v24  ;;  %v4341_v24 = vrot.slane %v8534_v42, 2 }
 0x4e2   : > { %v4798_v1 = vadd.f32 %v4703_v27, %v8555_v19  ;;  %4749 = vmatmul.f32.gmra.mxu1 %v4340_v37  ;;  %v4342_v40 = vsel %vm590_vm1, %v4339_v6, %v4341_v24  ;;  %v8805_v37 = vpop.f32.mrf.mxu3  ;;  %v4343_v6 = vrot.slane %v8557_v22, 2  ;;  %v8816_v24 = vpop.f32.mrf.mxu2 }
 0x4e4   : > { %v4834_v28 = vmul.f32 %v8784_v11, %v4798_v1  ;;  %v8811_v1 = vpop.f32.mrf.mxu0 }
 0x4e6   : > { %v4870_v9 = vadd.f32 %v8791_v50, %v4834_v28  ;;  %v4344_v28 = vrot.slane %v8548_v61, 2 }
 0x4e7   : > { %v4705_v38 = vpop.f32.mrf.mxu1 }
 0x4e8   : > { %v4902_v19 = vadd.f32 %v4870_v9, %v9449_v33  ;;  %v4706_v43 = vadd.f32 %v4705_v38, %v8576_v21  ;;  %v9450_v9 = vld [vmem:[#allocation9_spill] sm:$0xff] }
 0x4ea   : > { %v4934_v62 = vmax.f32 %v4902_v19, 0.0  ;;  %v4799_v27 = vadd.f32 %v4706_v43, %v8573_v23  ;;  %4752 = vmatmul.f32.gmra.mxu1 %v4342_v40  ;;  %v4345_v19 = vsel %vm590_vm1, %v4343_v6, %v4344_v28  ;;  %v8825_v22 = vpop.f32.mrf.mxu3 }
 0x4ec   : > { %4966 = vst [vmem:[%s8807_s15] sm:$0xff] %v4934_v62  ;;  %v4835_v42 = vmul.f32 %v8784_v11, %v4799_v27  ;;  %v4346_v62 = vrot.slane %v8569_v10, 2 }
 0x4ee   : > { %v4871_v21 = vadd.f32 %v8791_v50, %v4835_v42  ;;  %v8828_v42 = vpop.f32.mrf.mxu0 }
 0x4ef   : > { %v4708_v23 = vpop.f32.mrf.mxu1 }
 0x4f0   : > { %v4903_v38 = vadd.f32 %v4871_v21, %v9450_v9  ;;  %v4709_v33 = vadd.f32 %v4708_v23, %v8596_v46  ;;  %v9451_v46 = vld [vmem:[#allocation10_spill] sm:$0xff]  ;;  %v8832_v9 = vpop.f32.mrf.mxu2 }
 0x4f2   : > { %v4935_v43 = vmax.f32 %v4903_v38, 0.0  ;;  %v4800_v40 = vadd.f32 %v4709_v33, %v8589_v12  ;;  %4755 = vmatmul.f32.gmra.mxu1 %v4345_v19  ;;  %v4347_v12 = vsel %vm590_vm1, %v4344_v28, %v4346_v62  ;;  %v4349_v19 = vrot.slane %v8584_v56, 2 }
 0x4f4   : > { %4967 = vst [vmem:[%s8807_s15 + $0x8] sm:$0xff] %v4935_v43  ;;  %v4836_v61 = vmul.f32 %v8784_v11, %v4800_v40  ;;  %v4348_v40 = vrot.slane %v8591_v8, 2 }
 0x4f6   : > { %v4872_v27 = vadd.f32 %v8791_v50, %v4836_v61  ;;  %v8845_v62 = vpop.f32.mrf.mxu0 }
 0x4f7   : > { %v4711_v21 = vpop.f32.mrf.mxu1 }
 0x4f8   : > { %v4904_v23 = vadd.f32 %v4872_v27, %v9451_v46  ;;  %v4712_v6 = vadd.f32 %v4711_v21, %v8613_v25  ;;  %v8841_v25 = vpop.f32.mrf.mxu3  ;;  %v9452_v27 = vld [vmem:[#allocation13_spill] sm:$0xff]  ;;  %v8849_v56 = vpop.f32.mrf.mxu2 }
 0x4fa   : > { %v4936_v38 = vmax.f32 %v4904_v23, 0.0  ;;  %v4801_v33 = vadd.f32 %v4712_v6, %v8609_v14  ;;  %4758 = vmatmul.f32.gmra.mxu1 %v4347_v12  ;;  %v4350_v14 = vsel %vm590_vm1, %v4348_v40, %v4349_v19  ;;  %v4351_v6 = vrot.slane %v8605_v57, 2 }
 0x4fc   : > { %4968 = vst [vmem:[%s8807_s15 + $0x10] sm:$0xff] %v4936_v38  ;;  %v4837_v10 = vmul.f32 %v8784_v11, %v4801_v33 }
 0x4fe   : > { %v4873_v43 = vadd.f32 %v8791_v50, %v4837_v10 }
 0x4ff   : > { %v4714_v61 = vpop.f32.mrf.mxu1 }
 0x500   : > { %v4905_v21 = vadd.f32 %v4873_v43, %v9452_v27  ;;  %v4715_v28 = vadd.f32 %v4714_v61, %v8632_v17  ;;  %v9453_v17 = vld [vmem:[#allocation14_spill] sm:$0xff]  ;;  %v4352_v43 = vsel %vm590_vm1, %v4349_v19, %v4351_v6  ;;  %v8858_v40 = vpop.f32.mrf.mxu3  ;;  %v8861_v27 = vpop.f32.mrf.mxu0 }
 0x502   : > { %v4937_v46 = vmax.f32 %v4905_v21, 0.0  ;;  %v4802_v23 = vadd.f32 %v4715_v28, %v8625_v35  ;;  %4761 = vmatmul.f32.gmra.mxu1 %v4350_v14  ;;  %v8865_v21 = vpop.f32.mrf.mxu2  ;;  %v4354_v28 = vrot.slane %v8621_v4, 2  ;;  %v4353_v14 = vrot.slane %v8627_v51, 2 }
 0x503   : > { %v4356_v51 = vrot.slane %v8641_v16, 2 }
 0x504   : > { %4969 = vst [vmem:[%s8807_s15 + $0x18] sm:$0xff] %v4937_v46  ;;  %v4838_v8 = vmul.f32 %v8784_v11, %v4802_v23  ;;  %v4355_v6 = vsel %vm590_vm1, %v4353_v14, %v4354_v28  ;;  %v4359_v14 = vrot.slane %v8657_v39, 2 }
 0x506   : > { %v4874_v12 = vadd.f32 %v8791_v50, %v4838_v8 }
 0x507   : > { %v4717_v38 = vpop.f32.mrf.mxu1 }
 0x508   : > { %v4906_v33 = vadd.f32 %v4874_v12, %v9453_v17  ;;  %v4718_v10 = vadd.f32 %v4717_v38, %v8649_v0  ;;  %v4608_v0 = vadd.f32 %v8775_v15, %v8748_v45  ;;  %v8875_v17 = vpop.f32.mrf.mxu3  ;;  %v8879_v45 = vpop.f32.mrf.mxu0  ;;  %v4611_v15 = vadd.f32 %v8793_v60, %v8760_v48  ;;  %v9456_v48 = vld [vmem:[#allocation84_spill] sm:$0xff] }
 0x509   : > { %v3906_v60 = vadd.f32 %v8469_v7, %v9456_v48 }
 0x50a   : > { %v4938_v35 = vmax.f32 %v4906_v33, 0.0  ;;  %v4803_v61 = vadd.f32 %v4718_v10, %v8645_v20  ;;  %4764 = vmatmul.f32.gmra.mxu1 %v4352_v43  ;;  %v9454_v20 = vld [vmem:[#allocation17_spill] sm:$0xff]  ;;  %v8885_v10 = vpop.f32.mrf.mxu2 }
 0x50c   : > { %4970 = vst [vmem:[%s8807_s15 + $0x20] sm:$0xff] %v4938_v35  ;;  %v4839_v57 = vmul.f32 %v8784_v11, %v4803_v61 }
 0x50e   : > { %v4875_v19 = vadd.f32 %v8791_v50, %v4839_v57  ;;  %v4357_v57 = vsel %vm590_vm1, %v4354_v28, %v4356_v51 }
 0x50f   : > { %v4720_v46 = vpop.f32.mrf.mxu1 }
 0x510   : > { %v4907_v23 = vadd.f32 %v4875_v19, %v9454_v20  ;;  %v4721_v8 = vadd.f32 %v4720_v46, %v4608_v0  ;;  %v4614_v46 = vadd.f32 %v8811_v1, %v8805_v37  ;;  %v8897_v20 = vpop.f32.mrf.mxu3 }
 0x512   : > { %v4939_v12 = vmax.f32 %v4907_v23, 0.0  ;;  %v4804_v38 = vadd.f32 %v4721_v8, %v8661_v29  ;;  %4767 = vmatmul.f32.gmra.mxu1 %v4355_v6  ;;  %v9455_v29 = vld [vmem:[#allocation20_spill] sm:$0xff]  ;;  %v4358_v23 = vrot.slane %v8663_v53, 2  ;;  %v4019_v6 = vadd.f32 %v8816_v24, %v3906_v60 }
 0x513   : > { %v4361_v53 = vrot.slane %v8675_v26, 2  ;;  %v4617_v24 = vadd.f32 %v8828_v42, %v8825_v22  ;;  %v4364_v42 = vrot.slane %v8687_v59, 2 }
 0x514   : > { %4971 = vst [vmem:[%s8807_s15 + $0x28] sm:$0xff] %v4939_v12  ;;  %v4840_v4 = vmul.f32 %v8784_v11, %v4804_v38  ;;  %v9457_v12 = vld [vmem:[#allocation21_spill] sm:$0xff]  ;;  %v4360_v7 = vsel %vm590_vm1, %v4358_v23, %v4359_v14  ;;  %v4620_v23 = vadd.f32 %v8845_v62, %v8841_v25 }
 0x515   : > { %v4362_v26 = vsel %vm590_vm1, %v4359_v14, %v4361_v53  ;;  %v4363_v14 = vrot.slane %v8691_v54, 2  ;;  %v4261_v54 = vrot.slane %v8751_v31, 1 }
 0x516   : > { %v4876_v33 = vadd.f32 %v8791_v50, %v4840_v4  ;;  %v8905_v4 = vpop.f32.mrf.mxu2 }
 0x517   : > { %v4723_v43 = vpop.f32.mrf.mxu1  ;;  %4678 = vmatmul.f32.gmra.mxu0 %v4261_v54 }
 0x518   : > { %v4908_v35 = vadd.f32 %v4876_v33, %v9455_v29  ;;  %v4724_v61 = vadd.f32 %v4723_v43, %v4611_v15  ;;  %v9458_v15 = vld [vmem:[#allocation64_spill] sm:$0xff] }
 0x519   : > { %v3909_v33 = vadd.f32 %v8484_v32, %v9458_v15  ;;  %v9463_v15 = vld [vmem:[#allocation59_spill] sm:$0xff] }
 0x51a   : > { %v4940_v0 = vmax.f32 %v4908_v35, 0.0  ;;  %v4805_v19 = vadd.f32 %v4724_v61, %v8679_v18  ;;  %4770 = vmatmul.f32.gmra.mxu1 %v4357_v57  ;;  %v8901_v18 = vpop.f32.mrf.mxu0  ;;  %v8917_v61 = vpop.f32.mrf.mxu3  ;;  %v9459_v57 = vld [vmem:[#allocation24_spill] sm:$0xff] }
 0x51b   : > { %v4022_v35 = vadd.f32 %v8832_v9, %v3909_v33  ;;  %v9460_v9 = vld [vmem:[#allocation53_spill] sm:$0xff]  ;;  %v9464_v33 = vld [vmem:[#allocation74_spill] sm:$0xff] }
 0x51c   : > { %4972 = vst [vmem:[%s8807_s15 + $0x30] sm:$0xff] %v4940_v0  ;;  %v4841_v16 = vmul.f32 %v8784_v11, %v4805_v19 }
 0x51e   : > { %v4877_v28 = vadd.f32 %v8791_v50, %v4841_v16  ;;  %v8923_v32 = vpop.f32.mrf.mxu2 }
 0x51f   : > { %v4726_v8 = vpop.f32.mrf.mxu1 }
 0x520   : > { %v4909_v39 = vadd.f32 %v4877_v28, %v9457_v12  ;;  %v4727_v38 = vadd.f32 %v4726_v8, %v4614_v46  ;;  %v9461_v46 = vld [vmem:[#allocation71_spill] sm:$0xff] }
 0x521   : > { %v3912_v28 = vadd.f32 %v9461_v46, %v9460_v9 }
 0x522   : > { %v4941_v51 = vmax.f32 %v4909_v39, 0.0  ;;  %v4806_v37 = vadd.f32 %v4727_v38, %v4019_v6  ;;  %4773 = vmatmul.f32.gmra.mxu1 %v4360_v7  ;;  %v8920_v16 = vpop.f32.mrf.mxu0  ;;  %v9462_v39 = vld [vmem:[#allocation25_spill] sm:$0xff] }
 0x523   : > { %v4025_v12 = vadd.f32 %v8849_v56, %v3912_v28  ;;  %v4366_v56 = vrot.slane %v8701_v47, 2  ;;  %v8955_v47 = vld [vmem:[#allocation2 + $0x1a8] sm:$0x3]  ;;  %v9466_v28 = vld [vmem:[#allocation52_spill] sm:$0xff] }
 0x524   : > { %4973 = vst [vmem:[%s8807_s15 + $0x38] sm:$0xff] %v4941_v51  ;;  %v4842_v1 = vmul.f32 %v8784_v11, %v4806_v37  ;;  %v4365_v51 = vsel %vm590_vm1, %v4363_v14, %v4364_v42  ;;  %v8937_v37 = vpop.f32.mrf.mxu3 }
 0x526   : > { %v4878_v43 = vadd.f32 %v8791_v50, %v4842_v1  ;;  %v8944_v62 = vpop.f32.mrf.mxu2 }
 0x527   : > { %v4729_v29 = vpop.f32.mrf.mxu1 }
 0x528   : > { %v4910_v0 = vadd.f32 %v4878_v43, %v9459_v57  ;;  %v4730_v19 = vadd.f32 %v4729_v29, %v4617_v24  ;;  %v3915_v24 = vadd.f32 %v9464_v33, %v9463_v15  ;;  %v4623_v43 = vadd.f32 %v8861_v27, %v8858_v40 }
 0x529   : > { %v4264_v27 = vrot.slane %v8955_v47, 1 }
 0x52a   : > { %v4942_v48 = vmax.f32 %v4910_v0, 0.0  ;;  %v4807_v60 = vadd.f32 %v4730_v19, %v4022_v35  ;;  %4776 = vmatmul.f32.gmra.mxu1 %v4362_v26  ;;  %v8939_v53 = vpop.f32.mrf.mxu0  ;;  %v4028_v57 = vadd.f32 %v8865_v21, %v3915_v24  ;;  %v9465_v0 = vld [vmem:[#allocation28_spill] sm:$0xff]  ;;  %v4369_v21 = vrot.slane %v8711_v34, 2  ;;  %v9468_v34 = vld [vmem:[#allocation29_spill] sm:$0xff] }
 0x52c   : > { %4974 = vst [vmem:[%s8807_s15 + $0x40] sm:$0xff] %v4942_v48  ;;  %v4843_v22 = vmul.f32 %v8784_v11, %v4807_v60  ;;  %v4367_v48 = vsel %vm590_vm1, %v4364_v42, %v4366_v56  ;;  %v8957_v9 = vpop.f32.mrf.mxu3 }
 0x52e   : > { %v4879_v8 = vadd.f32 %v8791_v50, %v4843_v22 }
 0x52f   : > { %v4732_v6 = vpop.f32.mrf.mxu1 }
 0x530   : > { %v4911_v38 = vadd.f32 %v4879_v8, %v9462_v39  ;;  %v4733_v7 = vadd.f32 %v4732_v6, %v4620_v23  ;;  %v9467_v23 = vld [vmem:[#allocation78_spill] sm:$0xff]  ;;  %v4626_v8 = vadd.f32 %v8879_v45, %v8875_v17  ;;  %v4265_v6 = vsel %vm477_vm0, %v4261_v54, %v4264_v27  ;;  %v8972_v39 = vpop.f32.mrf.mxu2  ;;  %v9470_v54 = vld [vmem:[#allocation80_spill] sm:$0xff] }
 0x531   : > { %v3918_v42 = vadd.f32 %v9467_v23, %v9466_v28  ;;  %4681 = vmatmul.f32.gmra.mxu0 %v4265_v6  ;;  %v4371_v45 = vrot.slane %v8725_v44, 2 }
 0x532   : > { %v4943_v59 = vmax.f32 %v4911_v38, 0.0  ;;  %v4808_v1 = vadd.f32 %v4733_v7, %v4025_v12  ;;  %4779 = vmatmul.f32.gmra.mxu1 %v4365_v51  ;;  %v8962_v46 = vpop.f32.mrf.mxu0  ;;  %v4368_v12 = vrot.slane %v8715_v41, 2  ;;  %v9469_v41 = vld [vmem:[#allocation60_spill] sm:$0xff] }
 0x533   : > { %v4031_v7 = vadd.f32 %v8885_v10, %v3918_v42  ;;  %v3921_v15 = vadd.f32 %v9470_v54, %v9469_v41  ;;  %v4629_v10 = vadd.f32 %v8901_v18, %v8897_v20  ;;  %v4372_v44 = vsel %vm590_vm1, %v4369_v21, %v4371_v45  ;;  %v9472_v18 = vld [vmem:[#allocation58_spill] sm:$0xff]  ;;  %v9477_v45 = vld [vmem:[#allocation36_spill] sm:$0xff] }
 0x534   : > { %4975 = vst [vmem:[%s8807_s15 + $0x48] sm:$0xff] %v4943_v59  ;;  %v4844_v25 = vmul.f32 %v8784_v11, %v4808_v1  ;;  %v4370_v1 = vsel %vm590_vm1, %v4368_v12, %v4369_v21  ;;  %v4527_v33 = vpop.f32.mrf.mxu3 }
 0x536   : > { %v4880_v29 = vadd.f32 %v8791_v50, %v4844_v25 }
 0x537   : > { %v4735_v35 = vpop.f32.mrf.mxu1 }
 0x538   : > { %v4912_v19 = vadd.f32 %v4880_v29, %v9465_v0  ;;  %v4736_v26 = vadd.f32 %v4735_v35, %v4623_v43  ;;  %v4034_v35 = vadd.f32 %v8905_v4, %v3921_v15  ;;  %v4632_v4 = vadd.f32 %v8920_v16, %v8917_v61  ;;  %v9475_v16 = vld [vmem:[#allocation66_spill] sm:$0xff] }
 0x53a   : > { %v4944_v60 = vmax.f32 %v4912_v19, 0.0  ;;  %v4809_v22 = vadd.f32 %v4736_v26, %v4028_v57  ;;  %4782 = vmatmul.f32.gmra.mxu1 %v4367_v48  ;;  %v4640_v43 = vpop.f32.mrf.mxu0  ;;  %v9471_v57 = vld [vmem:[#allocation32_spill] sm:$0xff]  ;;  %v4045_v26 = vpop.f32.mrf.mxu2 }
 0x53c   : > { %4976 = vst [vmem:[%s8807_s15 + $0x50] sm:$0xff] %v4944_v60  ;;  %v4845_v40 = vmul.f32 %v8784_v11, %v4809_v22  ;;  %v4373_v22 = vrot.slane %v8751_v31, 2  ;;  %v4530_v42 = vpop.f32.mrf.mxu3 }
 0x53e   : > { %v4881_v14 = vadd.f32 %v8791_v50, %v4845_v40  ;;  %v9473_v40 = vld [vmem:[#allocation82_spill] sm:$0xff] }
 0x53f   : > { %v4738_v38 = vpop.f32.mrf.mxu1  ;;  %v3924_v27 = vadd.f32 %v9473_v40, %v9472_v18 }
 0x540   : > { %v4913_v51 = vadd.f32 %v4881_v14, %v9468_v34  ;;  %v4739_v59 = vadd.f32 %v4738_v38, %v4626_v8  ;;  %v9474_v8 = vld [vmem:[#allocation33_spill] sm:$0xff]  ;;  %v4376_v34 = vrot.slane %v8955_v47, 2 }
 0x541   : > { %v4037_v21 = vadd.f32 %v8923_v32, %v3924_v27  ;;  %v4635_v32 = vadd.f32 %v8939_v53, %v8937_v37  ;;  %v9478_v53 = vld [vmem:[#allocation65_spill] sm:$0xff] }
 0x542   : > { %v4945_v25 = vmax.f32 %v4913_v51, 0.0  ;;  %v4810_v56 = vadd.f32 %v4739_v59, %v4031_v7  ;;  %4785 = vmatmul.f32.gmra.mxu1 %v4370_v1  ;;  %v4643_v31 = vpop.f32.mrf.mxu0  ;;  %v4048_v7 = vpop.f32.mrf.mxu2  ;;  %v9476_v51 = vld [vmem:[#allocation42_spill] sm:$0xff] }
 0x543   : > { %v3927_v59 = vadd.f32 %v9476_v51, %v9475_v16  ;;  %v9484_v51 = vld [vmem:[#allocation47_spill] sm:$0xff] }
 0x544   : > { %4977 = vst [vmem:[%s8807_s15 + $0x58] sm:$0xff] %v4945_v25  ;;  %v4846_v17 = vmul.f32 %v8784_v11, %v4810_v56  ;;  %v4377_v56 = vsel %vm590_vm1, %v4373_v22, %v4376_v34  ;;  %v4533_v54 = vpop.f32.mrf.mxu3 }
 0x546   : > { %v4882_v24 = vadd.f32 %v8791_v50, %v4846_v17  ;;  %v4040_v17 = vadd.f32 %v8944_v62, %v3927_v59  ;;  %v9485_v59 = vld [vmem:[#allocation50_spill] sm:$0xff] }
 0x547   : > { %v4741_v29 = vpop.f32.mrf.mxu1 }
 0x548   : > { %v4914_v0 = vadd.f32 %v4882_v24, %v9471_v57  ;;  %v4742_v19 = vadd.f32 %v4741_v29, %v4629_v10 }
 0x54a   : > { %v4946_v48 = vmax.f32 %v4914_v0, 0.0  ;;  %v4811_v60 = vadd.f32 %v4742_v19, %v4034_v35  ;;  %4788 = vmatmul.f32.gmra.mxu1 %v4372_v44  ;;  %v4646_v24 = vpop.f32.mrf.mxu0  ;;  %v4051_v37 = vpop.f32.mrf.mxu2  ;;  %v9479_v35 = vld [vmem:[#allocation83_spill] sm:$0xff]  ;;  %v4638_v0 = vadd.f32 %v8962_v46, %v8957_v9  ;;  %v4641_v9 = vadd.f32 %v4640_v43, %v4527_v33 }
 0x54b   : > { %v3930_v57 = vadd.f32 %v9479_v35, %v9478_v53  ;;  %v9487_v53 = vld [vmem:[#allocation49_spill] sm:$0xff] }
 0x54c   : > { %4978 = vst [vmem:[%s8807_s15 + $0x60] sm:$0xff] %v4946_v48  ;;  %v4847_v20 = vmul.f32 %v8784_v11, %v4811_v60  ;;  %v9480_v48 = vld [vmem:[#allocation37_spill] sm:$0xff]  ;;  %v4536_v40 = vpop.f32.mrf.mxu3  ;;  %v3939_v35 = vadd.f32 %v8652_v55, %v9487_v53 }
 0x54d   : > { %v4043_v44 = vadd.f32 %v8972_v39, %v3930_v57 }
 0x54e   : > { %v4883_v28 = vadd.f32 %v8791_v50, %v4847_v20 }
 0x54f   : > { %v4744_v23 = vpop.f32.mrf.mxu1 }
 0x550   : > { %v4915_v14 = vadd.f32 %v4883_v28, %v9474_v8  ;;  %v4745_v6 = vadd.f32 %v4744_v23, %v4632_v4  ;;  %v9481_v28 = vld [vmem:[#allocation51_spill] sm:$0xff]  ;;  %v9482_v23 = vld [vmem:[#allocation44_spill] sm:$0xff] }
 0x552   : > { %v4947_v12 = vmax.f32 %v4915_v14, 0.0  ;;  %v4812_v38 = vadd.f32 %v4745_v6, %v4037_v21  ;;  %4791 = vmatmul.f32.gmra.mxu1 %v4373_v22  ;;  %v4649_v4 = vpop.f32.mrf.mxu0  ;;  %v3933_v21 = vadd.f32 %v9482_v23, %v9481_v28  ;;  %v4054_v8 = vpop.f32.mrf.mxu2  ;;  %v9483_v6 = vld [vmem:[#allocation7_spill] sm:$0xff]  ;;  %v9490_v23 = vld [vmem:[#allocation12_spill] sm:$0xff] }
 0x554   : > { %4979 = vst [vmem:[%s8807_s15 + $0x68] sm:$0xff] %v4947_v12  ;;  %v4848_v61 = vmul.f32 %v8784_v11, %v4812_v38  ;;  %v4046_v39 = vadd.f32 %v4045_v26, %v3933_v21  ;;  %v9486_v26 = vld [vmem:[#allocation8_spill] sm:$0xff] }
 0x556   : > { %v4884_v1 = vadd.f32 %v8791_v50, %v4848_v61 }
 0x557   : > { %v4747_v25 = vpop.f32.mrf.mxu1 }
 0x558   : > { %v4916_v41 = vadd.f32 %v4884_v1, %v9477_v45  ;;  %v4748_v47 = vadd.f32 %v4747_v25, %v4635_v32  ;;  %v3936_v32 = vadd.f32 %v9485_v59, %v9484_v51  ;;  %v4644_v1 = vadd.f32 %v4643_v31, %v4530_v42  ;;  %v4539_v25 = vpop.f32.mrf.mxu3 }
 0x559   : > { %v4647_v42 = vadd.f32 %v4646_v24, %v4533_v54  ;;  %v4650_v54 = vadd.f32 %v4649_v4, %v4536_v40 }
 0x55a   : > { %v4948_v15 = vmax.f32 %v4916_v41, 0.0  ;;  %v4813_v10 = vadd.f32 %v4748_v47, %v4040_v17  ;;  %4794 = vmatmul.f32.gmra.mxu1 %v4377_v56  ;;  %v4652_v43 = vpop.f32.mrf.mxu0  ;;  %v4049_v17 = vadd.f32 %v4048_v7, %v3936_v32  ;;  %v4057_v47 = vpop.f32.mrf.mxu2  ;;  %v9488_v7 = vld [vmem:[#allocation11_spill] sm:$0xff] }
 0x55b   : > { %v4653_v40 = vadd.f32 %v4652_v43, %v4539_v25 }
 0x55c   : > { %4980 = vst [vmem:[%s8807_s15 + $0x70] sm:$0xff] %v4948_v15  ;;  %v4849_v29 = vmul.f32 %v8784_v11, %v4813_v10 }
 0x55e   : > { %v4885_v62 = vadd.f32 %v8791_v50, %v4849_v29 }
 0x55f   : > { %v4750_v19 = vpop.f32.mrf.mxu1 }
 0x560   : > { %v4917_v60 = vadd.f32 %v4885_v62, %v9480_v48  ;;  %v4751_v22 = vadd.f32 %v4750_v19, %v4638_v0  ;;  %v4052_v0 = vadd.f32 %v4051_v37, %v3939_v35  ;;  %v4542_v62 = vpop.f32.mrf.mxu3 }
 0x562   : > { %v4949_v20 = vmax.f32 %v4917_v60, 0.0  ;;  %v4814_v18 = vadd.f32 %v4751_v22, %v4043_v44  ;;  %v4655_v48 = vpop.f32.mrf.mxu0 }
 0x564   : > { %4981 = vst [vmem:[%s8807_s15 + $0x78] sm:$0xff] %v4949_v20  ;;  %v4850_v27 = vmul.f32 %v8784_v11, %v4814_v18  ;;  %v4060_v20 = vpop.f32.mrf.mxu2 }
 0x566   : > { %v4886_v46 = vadd.f32 %v8791_v50, %v4850_v27  ;;  %v9489_v27 = vld [vmem:[#allocation77_spill] sm:$0xff] }
 0x567   : > { %v4753_v14 = vpop.f32.mrf.mxu1  ;;  %v3942_v55 = vadd.f32 %v8670_v58, %v9489_v27 }
 0x568   : > { %v4918_v12 = vadd.f32 %v4886_v46, %v9483_v6  ;;  %v4754_v38 = vadd.f32 %v4753_v14, %v4641_v9  ;;  %v4545_v46 = vpop.f32.mrf.mxu3 }
 0x569   : > { %v4055_v37 = vadd.f32 %v4054_v8, %v3942_v55 }
 0x56a   : > { %v4950_v34 = vmax.f32 %v4918_v12, 0.0  ;;  %v4815_v61 = vadd.f32 %v4754_v38, %v4046_v39  ;;  %v4658_v6 = vpop.f32.mrf.mxu0 }
 0x56c   : > { %4982 = vst [vmem:[%s8807_s15 + $0x80] sm:$0xff] %v4950_v34  ;;  %v4851_v16 = vmul.f32 %v8784_v11, %v4815_v61  ;;  %v4063_v38 = vpop.f32.mrf.mxu2  ;;  %v9491_v34 = vld [vmem:[#allocation73_spill] sm:$0xff] }
 0x56d   : > { %v3945_v58 = vadd.f32 %v8684_v30, %v9491_v34  ;;  %v4656_v30 = vadd.f32 %v4655_v48, %v4542_v62 }
 0x56e   : > { %v4887_v33 = vadd.f32 %v8791_v50, %v4851_v16  ;;  %v9492_v16 = vld [vmem:[#allocation15_spill] sm:$0xff] }
 0x56f   : > { %v4756_v56 = vpop.f32.mrf.mxu1  ;;  %v4058_v8 = vadd.f32 %v4057_v47, %v3945_v58 }
 0x570   : > { %v4919_v45 = vadd.f32 %v4887_v33, %v9486_v26  ;;  %v4757_v41 = vadd.f32 %v4756_v56, %v4644_v1  ;;  %v4548_v33 = vpop.f32.mrf.mxu3  ;;  %v9493_v26 = vld [vmem:[#allocation54_spill] sm:$0xff] }
 0x572   : > { %v4951_v15 = vmax.f32 %v4919_v45, 0.0  ;;  %v4816_v10 = vadd.f32 %v4757_v41, %v4049_v17  ;;  %v4661_v17 = vpop.f32.mrf.mxu0  ;;  %v9494_v45 = vld [vmem:[#allocation45_spill] sm:$0xff] }
 0x573   : > { %v3948_v41 = vadd.f32 %v9494_v45, %v9493_v26 }
 0x574   : > { %4983 = vst [vmem:[%s8807_s15 + $0x88] sm:$0xff] %v4951_v15  ;;  %v4852_v29 = vmul.f32 %v8784_v11, %v4816_v10  ;;  %v4066_v43 = vpop.f32.mrf.mxu2  ;;  %v9495_v10 = vld [vmem:[#allocation16_spill] sm:$0xff] }
 0x575   : > { %v4061_v47 = vadd.f32 %v4060_v20, %v3948_v41 }
 0x576   : > { %v4888_v31 = vadd.f32 %v8791_v50, %v4852_v29 }
 0x577   : > { %v4759_v57 = vpop.f32.mrf.mxu1 }
 0x578   : > { %v4920_v19 = vadd.f32 %v4888_v31, %v9488_v7  ;;  %v4760_v44 = vadd.f32 %v4759_v57, %v4647_v42  ;;  %v9496_v57 = vld [vmem:[#allocation55_spill] sm:$0xff]  ;;  %v4659_v7 = vadd.f32 %v4658_v6, %v4545_v46 }
 0x57a   : > { %v4952_v60 = vmax.f32 %v4920_v19, 0.0  ;;  %v4817_v22 = vadd.f32 %v4760_v44, %v4052_v0  ;;  %v3951_v0 = vadd.f32 %v8708_v52, %v9496_v57  ;;  %v4551_v19 = vpop.f32.mrf.mxu3  ;;  %v4664_v44 = vpop.f32.mrf.mxu0 }
 0x57c   : > { %4984 = vst [vmem:[%s8807_s15 + $0x90] sm:$0xff] %v4952_v60  ;;  %v4853_v18 = vmul.f32 %v8784_v11, %v4817_v22  ;;  %v4064_v60 = vadd.f32 %v4063_v38, %v3951_v0  ;;  %v9497_v22 = vld [vmem:[#allocation18_spill] sm:$0xff]  ;;  %v4069_v27 = vpop.f32.mrf.mxu2 }
 0x57e   : > { %v4889_v24 = vadd.f32 %v8791_v50, %v4853_v18 }
 0x57f   : > { %v4762_v28 = vpop.f32.mrf.mxu1 }
 0x580   : > { %v4921_v21 = vadd.f32 %v4889_v24, %v9490_v23  ;;  %v4763_v9 = vadd.f32 %v4762_v28, %v4650_v54  ;;  %v9498_v28 = vld [vmem:[#allocation61_spill] sm:$0xff]  ;;  %v4662_v23 = vadd.f32 %v4661_v17, %v4548_v33 }
 0x582   : > { %v4953_v14 = vmax.f32 %v4921_v21, 0.0  ;;  %v4818_v39 = vadd.f32 %v4763_v9, %v4055_v37  ;;  %v9499_v37 = vld [vmem:[#allocation57_spill] sm:$0xff]  ;;  %v4667_v38 = vpop.f32.mrf.mxu0 }
 0x583   : > { %v3954_v52 = vadd.f32 %v9499_v37, %v9498_v28  ;;  %v9507_v37 = vld [vmem:[#allocation72_spill] sm:$0xff] }
 0x584   : > { %4985 = vst [vmem:[%s8807_s15 + $0x98] sm:$0xff] %v4953_v14  ;;  %v4854_v12 = vmul.f32 %v8784_v11, %v4818_v39  ;;  %v4554_v14 = vpop.f32.mrf.mxu3  ;;  %v9500_v39 = vld [vmem:[#allocation19_spill] sm:$0xff] }
 0x585   : > { %v4067_v46 = vadd.f32 %v4066_v43, %v3954_v52  ;;  %v9503_v43 = vld [vmem:[#allocation67_spill] sm:$0xff]  ;;  %v3966_v52 = vadd.f32 %v8757_v49, %v9507_v37 }
 0x586   : > { %v4890_v4 = vadd.f32 %v8791_v50, %v4854_v12 }
 0x587   : > { %v4765_v61 = vpop.f32.mrf.mxu1 }
 0x588   : > { %v4922_v51 = vadd.f32 %v4890_v4, %v9492_v16  ;;  %v4766_v59 = vadd.f32 %v4765_v61, %v4653_v40  ;;  %v4072_v40 = vpop.f32.mrf.mxu2  ;;  %v9501_v61 = vld [vmem:[#allocation62_spill] sm:$0xff]  ;;  %v4665_v16 = vadd.f32 %v4664_v44, %v4551_v19 }
 0x58a   : > { %v4954_v32 = vmax.f32 %v4922_v51, 0.0  ;;  %v4819_v1 = vadd.f32 %v4766_v59, %v4058_v8  ;;  %v3957_v8 = vadd.f32 %v8732_v36, %v9501_v61  ;;  %v4670_v41 = vpop.f32.mrf.mxu0  ;;  %v3960_v36 = vadd.f32 %v8740_v5, %v9503_v43 }
 0x58c   : > { %4986 = vst [vmem:[%s8807_s15 + $0xa0] sm:$0xff] %v4954_v32  ;;  %v4855_v56 = vmul.f32 %v8784_v11, %v4819_v1  ;;  %v4070_v32 = vadd.f32 %v4069_v27, %v3957_v8  ;;  %v9502_v1 = vld [vmem:[#allocation22_spill] sm:$0xff]  ;;  %v4557_v17 = vpop.f32.mrf.mxu3 }
 0x58d   : > { %v4671_v5 = vadd.f32 %v4670_v41, %v4557_v17 }
 0x58e   : > { %v4891_v25 = vadd.f32 %v8791_v50, %v4855_v56 }
 0x58f   : > { %v4768_v15 = vpop.f32.mrf.mxu1 }
 0x590   : > { %v4923_v29 = vadd.f32 %v4891_v25, %v9495_v10  ;;  %v4769_v53 = vadd.f32 %v4768_v15, %v4656_v30  ;;  %v4075_v25 = vpop.f32.mrf.mxu2  ;;  %v4668_v15 = vadd.f32 %v4667_v38, %v4554_v14 }
 0x592   : > { %v4955_v35 = vmax.f32 %v4923_v29, 0.0  ;;  %v4820_v42 = vadd.f32 %v4769_v53, %v4061_v47  ;;  %v4073_v29 = vadd.f32 %v4072_v40, %v3960_v36  ;;  %v9504_v53 = vld [vmem:[#allocation23_spill] sm:$0xff]  ;;  %v4673_v19 = vpop.f32.mrf.mxu0 }
 0x594   : > { %4987 = vst [vmem:[%s8807_s15 + $0xa8] sm:$0xff] %v4955_v35  ;;  %v4856_v31 = vmul.f32 %v8784_v11, %v4820_v42  ;;  %v4560_v0 = vpop.f32.mrf.mxu3 }
 0x596   : > { %v4892_v62 = vadd.f32 %v8791_v50, %v4856_v31 }
 0x597   : > { %v4771_v48 = vpop.f32.mrf.mxu1 }
 0x598   : > { %v4924_v20 = vadd.f32 %v4892_v62, %v9497_v22  ;;  %v4772_v18 = vadd.f32 %v4771_v48, %v4659_v7  ;;  %v9505_v62 = vld [vmem:[#allocation68_spill] sm:$0xff] }
 0x599   : > { %v3963_v44 = vadd.f32 %v8746_v63, %v9505_v62 }
 0x59a   : > { %v4956_v55 = vmax.f32 %v4924_v20, 0.0  ;;  %v4821_v54 = vadd.f32 %v4772_v18, %v4064_v60  ;;  %v4078_v60 = vpop.f32.mrf.mxu2  ;;  %v9506_v18 = vld [vmem:[#allocation26_spill] sm:$0xff] }
 0x59b   : > { %v4076_v20 = vadd.f32 %v4075_v25, %v3963_v44  ;;  %v4079_v14 = vadd.f32 %v4078_v60, %v3966_v52  ;;  %v9511_v25 = vld [vmem:[#allocation79_spill] sm:$0xff] }
 0x59c   : > { %4988 = vst [vmem:[%s8807_s15 + $0xb0] sm:$0xff] %v4956_v55  ;;  %v4857_v24 = vmul.f32 %v8784_v11, %v4821_v54  ;;  %v4563_v63 = vpop.f32.mrf.mxu3 }
 0x59e   : > { %v4893_v21 = vadd.f32 %v8791_v50, %v4857_v24 }
 0x59f   : > { %v4774_v9 = vpop.f32.mrf.mxu1 }
 0x5a0   : > { %v4925_v6 = vadd.f32 %v4893_v21, %v9500_v39  ;;  %v4775_v12 = vadd.f32 %v4774_v9, %v4662_v23  ;;  %v4674_v23 = vadd.f32 %v4673_v19, %v4560_v0  ;;  %v4676_v9 = vpop.f32.mrf.mxu0  ;;  %v9508_v39 = vld [vmem:[#allocation27_spill] sm:$0xff] }
 0x5a1   : > { %v4677_v61 = vadd.f32 %v4676_v9, %v4563_v63 }
 0x5a2   : > { %v4957_v34 = vmax.f32 %v4925_v6, 0.0  ;;  %v4822_v58 = vadd.f32 %v4775_v12, %v4067_v46  ;;  %v4081_v38 = vpop.f32.mrf.mxu2 }
 0x5a4   : > { %4989 = vst [vmem:[%s8807_s15 + $0xb8] sm:$0xff] %v4957_v34  ;;  %v4858_v4 = vmul.f32 %v8784_v11, %v4822_v58 }
 0x5a6   : > { %v4894_v51 = vadd.f32 %v8791_v50, %v4858_v4  ;;  %v9509_v4 = vld [vmem:[#allocation75_spill] sm:$0xff] }
 0x5a7   : > { %v4777_v59 = vpop.f32.mrf.mxu1  ;;  %v3969_v49 = vadd.f32 %v8764_v3, %v9509_v4  ;;  %v3972_v3 = vadd.f32 %v8769_v2, %v9511_v25  ;;  %v9513_v2 = vld [vmem:[#allocation81_spill] sm:$0xff] }
 0x5a8   : > { %v4926_v33 = vadd.f32 %v4894_v51, %v9502_v1  ;;  %v4778_v56 = vadd.f32 %v4777_v59, %v4665_v16  ;;  %v4566_v16 = vpop.f32.mrf.mxu3  ;;  %v4679_v59 = vpop.f32.mrf.mxu0  ;;  %v9510_v1 = vld [vmem:[#allocation30_spill] sm:$0xff]  ;;  %v3975_v19 = vadd.f32 %v8773_v13, %v9513_v2 }
 0x5aa   : > { %v4958_v26 = vmax.f32 %v4926_v33, 0.0  ;;  %v4823_v45 = vadd.f32 %v4778_v56, %v4070_v32  ;;  %v4082_v32 = vadd.f32 %v4081_v38, %v3969_v49 }
 0x5ac   : > { %4990 = vst [vmem:[%s8807_s15 + $0xc0] sm:$0xff] %v4958_v26  ;;  %v4859_v30 = vmul.f32 %v8784_v11, %v4823_v45  ;;  %v4084_v45 = vpop.f32.mrf.mxu2 }
 0x5ae   : > { %v4895_v47 = vadd.f32 %v8791_v50, %v4859_v30  ;;  %v4680_v30 = vadd.f32 %v4679_v59, %v4566_v16 }
 0x5af   : > { %v4780_v10 = vpop.f32.mrf.mxu1 }
 0x5b0   : > { %v4927_v35 = vadd.f32 %v4895_v47, %v9504_v53  ;;  %v4781_v42 = vadd.f32 %v4780_v10, %v4668_v15  ;;  %v4085_v15 = vadd.f32 %v4084_v45, %v3972_v3  ;;  %v9512_v47 = vld [vmem:[#allocation31_spill] sm:$0xff]  ;;  %v4569_v53 = vpop.f32.mrf.mxu3 }
 0x5b2   : > { %v4959_v31 = vmax.f32 %v4927_v35, 0.0  ;;  %v4824_v57 = vadd.f32 %v4781_v42, %v4073_v29  ;;  %v4682_v35 = vpop.f32.mrf.mxu0 }
 0x5b3   : > { %v4683_v0 = vadd.f32 %v4682_v35, %v4569_v53 }
 0x5b4   : > { %4991 = vst [vmem:[%s8807_s15 + $0xc8] sm:$0xff] %v4959_v31  ;;  %v4860_v7 = vmul.f32 %v8784_v11, %v4824_v57 }
 0x5b6   : > { %v4896_v48 = vadd.f32 %v8791_v50, %v4860_v7  ;;  %v4087_v7 = vpop.f32.mrf.mxu2 }
 0x5b7   : > { %v4783_v22 = vpop.f32.mrf.mxu1 }
 0x5b8   : > { %v4928_v27 = vadd.f32 %v4896_v48, %v9506_v18  ;;  %v4784_v55 = vadd.f32 %v4783_v22, %v4671_v5  ;;  %v4088_v5 = vadd.f32 %v4087_v7, %v3975_v19  ;;  %v9514_v48 = vld [vmem:[#allocation34_spill] sm:$0xff] }
 0x5ba   : > { %v4960_v54 = vmax.f32 %v4928_v27, 0.0  ;;  %v4825_v24 = vadd.f32 %v4784_v55, %v4076_v20  ;;  %v9515_v55 = vld [vmem:[#allocation35_spill] sm:$0xff] }
 0x5bc   : > { %4992 = vst [vmem:[%s8807_s15 + $0xd0] sm:$0xff] %v4960_v54  ;;  %v4861_v28 = vmul.f32 %v8784_v11, %v4825_v24 }
 0x5be   : > { %v4897_v21 = vadd.f32 %v8791_v50, %v4861_v28 }
 0x5bf   : > { %v4786_v46 = vpop.f32.mrf.mxu1 }
 0x5c0   : > { %v4929_v6 = vadd.f32 %v4897_v21, %v9508_v39  ;;  %v4787_v12 = vadd.f32 %v4786_v46, %v4674_v23 }
 0x5c2   : > { %v4961_v34 = vmax.f32 %v4929_v6, 0.0  ;;  %v4826_v58 = vadd.f32 %v4787_v12, %v4079_v14 }
 0x5c4   : > { %4993 = vst [vmem:[%s8807_s15 + $0xd8] sm:$0xff] %v4961_v34  ;;  %v4862_v40 = vmul.f32 %v8784_v11, %v4826_v58 }
 0x5c6   : > { %v4898_v8 = vadd.f32 %v8791_v50, %v4862_v40 }
 0x5c7   : > { %v4789_v51 = vpop.f32.mrf.mxu1 }
 0x5c8   : > { %v4930_v33 = vadd.f32 %v4898_v8, %v9510_v1  ;;  %v4790_v56 = vadd.f32 %v4789_v51, %v4677_v61 }
 0x5ca   : > { %v4962_v17 = vmax.f32 %v4930_v33, 0.0  ;;  %v4827_v26 = vadd.f32 %v4790_v56, %v4082_v32 }
 0x5cc   : > { %4994 = vst [vmem:[%s8807_s15 + $0xe0] sm:$0xff] %v4962_v17  ;;  %v4863_v41 = vmul.f32 %v8784_v11, %v4827_v26 }
 0x5ce   : > { %v4899_v43 = vadd.f32 %v8791_v50, %v4863_v41 }
 0x5cf   : > { %v4792_v36 = vpop.f32.mrf.mxu1 }
 0x5d0   : > { %v4931_v10 = vadd.f32 %v4899_v43, %v9512_v47  ;;  %v4793_v29 = vadd.f32 %v4792_v36, %v4680_v30 }
 0x5d2   : > { %v4963_v42 = vmax.f32 %v4931_v10, 0.0  ;;  %v4828_v31 = vadd.f32 %v4793_v29, %v4085_v15 }
 0x5d4   : > { %4995 = vst [vmem:[%s8807_s15 + $0xe8] sm:$0xff] %v4963_v42  ;;  %v4864_v57 = vmul.f32 %v8784_v11, %v4828_v31 }
 0x5d6   : > { %v4900_v62 = vadd.f32 %v8791_v50, %v4864_v57 }
 0x5d7   : > { %v4795_v44 = vpop.f32.mrf.mxu1 }
 0x5d8   : > { %v4932_v60 = vadd.f32 %v4900_v62, %v9514_v48  ;;  %v4796_v22 = vadd.f32 %v4795_v44, %v4683_v0 }
 0x5da   : > { %v4964_v20 = vmax.f32 %v4932_v60, 0.0  ;;  %v4829_v18 = vadd.f32 %v4796_v22, %v4088_v5 }
 0x5dc   : > { %4996 = vst [vmem:[%s8807_s15 + $0xf0] sm:$0xff] %v4964_v20  ;;  %v4865_v13 = vmul.f32 %v8784_v11, %v4829_v18 }
 0x5de   : > { %v4901_v27 = vadd.f32 %v8791_v50, %v4865_v13 }
 0x5e0   : > { %v4933_v54 = vadd.f32 %v4901_v27, %v9515_v55 }
 0x5e2   : > { %v4965_v24 = vmax.f32 %v4933_v54, 0.0 }
 0x5e4   : > { %4997 = vst [vmem:[%s8807_s15 + $0xf8] sm:$0xff] %v4965_v24 }
 0x5e5   : > { %5431 = shalt.err (!%p5428_p3)
}
 0x5e6   : > { %s5469_s9 = smov 128   ;;  %s5470_s15 = smov 8  }
 0x5e7   : > { %5314 = dma.vmem_to_hbm [thread:$0]  (%p5549_p5), %s5012_s20, 4096, %s5014_s21, %s4999_s28, %s5469_s9, %s5469_s9, %s5470_s15  }
 0x5e8 PF: > { %p5320_p4 = scmp.ge.s32.totalorder %s5466_s27, 2  ;;  %s5028_s17 = sand.u32 1, %s5454_s24  }
 0x5e9   : > { %s5029_s18 = scalar_lea.sflag [#allocation4], %s5028_s17 }
 0x5ea   : > { %p5317_p7 = pnand %p5320_p4, %p5553_p6 }
 0x5ec   : > { %p5318_p8 = pneg %p5317_p7 }
 0x5ee   : > { %5449 = dma.done.wait (%p5318_p8), %s5029_s18, 4096  }
 0x5ef   : > { %5451 = vsyncadd (%p5318_p8), %s5029_s18, 4294963200  ;;  %p17_p9 = scmp.ge.s32.totalorder %s5536_s30, 4   ;;  %s9516_s24 = smov %s5458_s25 }
 0x5f0   : > { %s9517_s25 = smov %s5462_s26  ;;  %s9518_s26 = smov %s5547_s10 }
 0x5f1   : > { %s9519_s27 = smov %s5536_s30  ;;  %19 = sbr.rel (!%p17_p9) target bundleno = 3 (0x3), region = 90 }
 0x5f6   :  { %5035 = vsyncpa [#allocation4], 1 }
 0x5f7   :  { %5037 = vsyncpa [#allocation4 + $0x1], 1 }

</bundles_post_ra>
